<compile_context>
chip_gen: v7x
topology: tpu7x:2x2x1
jax: 0.10.0
libtpu: 0.0.40
codegen_flags: <defaults>
</compile_context>

<pallas_src>
import functools

import jax
import jax.numpy as jnp
from jax.experimental import pallas as pl
from jax.experimental.pallas import tpu as pltpu

STATE_SIZE = 272
STATE_PAD = 384      # 272 rounded up to a multiple of 128 (clean MXU K-dim tiles)
HIDDEN = 1024
ACTION_SIZE = 8
OUT_PAD = 128        # final layer width padded to one full lane tile
MAX_TM = 256         # max batch rows per grid step (safe on v5e/v6e/v7x)


def _round_up(x, m):
    return (x + m - 1) // m * m


def _qnet_kernel(x_ref,
                 w1_ref, b1_ref,
                 w2_ref, b2_ref,
                 w3_ref, b3_ref,
                 w4_ref, b4_ref,
                 w5_ref, b5_ref,
                 o_ref):
    """Fused forward: 4x (Linear + ReLU) + final Linear.

    x and weights are bf16 and the weights are VMEM-resident (single-buffered)
    across the batch grid; every matmul accumulates in f32 on the MXU. Biases
    are f32 and added post-accumulation.
    """
    h = x_ref[...]  # bf16 already

    h = jnp.dot(h, w1_ref[...], preferred_element_type=jnp.float32) + b1_ref[...]
    h = jnp.maximum(h, 0.0).astype(jnp.bfloat16)

    h = jnp.dot(h, w2_ref[...], preferred_element_type=jnp.float32) + b2_ref[...]
    h = jnp.maximum(h, 0.0).astype(jnp.bfloat16)

    h = jnp.dot(h, w3_ref[...], preferred_element_type=jnp.float32) + b3_ref[...]
    h = jnp.maximum(h, 0.0).astype(jnp.bfloat16)

    h = jnp.dot(h, w4_ref[...], preferred_element_type=jnp.float32) + b4_ref[...]
    h = jnp.maximum(h, 0.0).astype(jnp.bfloat16)

    q = jnp.dot(h, w5_ref[...], preferred_element_type=jnp.float32) + b5_ref[...]
    o_ref[...] = q.astype(o_ref.dtype)


def prepare_params(params, action_size=ACTION_SIZE):
    """Convert f32 PyTorch-layout params to kernel params (do this once).

    * weights cast to bf16 (kernel is HBM-bandwidth bound on weight traffic)
    * w1 zero-padded 272 -> 384 on the contraction dim
    * w5/b5 zero-padded action_size -> 128 on the output dim
    * biases kept f32
    """
    kp = {}
    kp["w1"] = jnp.pad(params["w1"].astype(jnp.bfloat16),
                       ((0, STATE_PAD - STATE_SIZE), (0, 0)))
    kp["b1"] = params["b1"].astype(jnp.float32)
    for li in (2, 3, 4):
        kp[f"w{li}"] = params[f"w{li}"].astype(jnp.bfloat16)
        kp[f"b{li}"] = params[f"b{li}"].astype(jnp.float32)
    kp["w5"] = jnp.pad(params["w5"].astype(jnp.bfloat16),
                       ((0, 0), (0, OUT_PAD - action_size)))
    kp["b5"] = jnp.pad(params["b5"].astype(jnp.float32),
                       ((0, 0), (0, OUT_PAD - action_size)))
    return kp


def _compute_tiling(batch):
    """Pick (tm, b_pad, n_tiles) so padding is minimal and v7x gets >=2 tiles
    whenever the batch spans more than one tile."""
    n_tiles = -(-batch // MAX_TM)            # cdiv
    if n_tiles > 1 and n_tiles % 2 == 1:     # feed both v7x TensorCores
        n_tiles += 1
    tm = _round_up(-(-batch // n_tiles), 16)  # multiple of 16 (bf16 sublanes)
    b_pad = n_tiles * tm
    return tm, b_pad, n_tiles


@functools.partial(jax.jit, static_argnames=("action_size",))
def qnetwork_forward(state, kparams, action_size=ACTION_SIZE):
    """state: (B, 272) float32 (or bf16).  kparams: output of prepare_params."""
    B = state.shape[0]
    tm, b_pad, n_tiles = _compute_tiling(B)

    # Cast + pad fused into one cheap wrapper op; kernel consumes bf16 directly.
    x = jnp.pad(state, ((0, b_pad - B), (0, STATE_PAD - STATE_SIZE))
                ).astype(jnp.bfloat16)

    # Constant block index + single buffer => fetched once, reused every tile.
    def resident(shape):
        return pl.BlockSpec(shape, lambda i: (0, 0),
                            pipeline_mode=pl.Buffered(1))

    in_specs = [pl.BlockSpec((tm, STATE_PAD), lambda i: (i, 0))]
    args = [x]
    layer_dims = [(STATE_PAD, HIDDEN), (HIDDEN, HIDDEN), (HIDDEN, HIDDEN),
                  (HIDDEN, HIDDEN), (HIDDEN, OUT_PAD)]
    for li, (din, dout) in enumerate(layer_dims, start=1):
        in_specs.append(resident((din, dout)))
        in_specs.append(resident((1, dout)))
        args.append(kparams[f"w{li}"])
        args.append(kparams[f"b{li}"])

    weight_bytes = sum(int(kparams[f"w{l}"].size) * 2 for l in range(1, 6))
    bias_bytes = sum(int(kparams[f"b{l}"].size) * 4 for l in range(1, 6))
    flops = 2 * b_pad * sum(din * dout for din, dout in layer_dims)
    bytes_accessed = (weight_bytes + bias_bytes
                      + b_pad * STATE_PAD * 2     # bf16 x in
                      + b_pad * OUT_PAD * 4)      # f32 q out

    out = pl.pallas_call(
        _qnet_kernel,
        out_shape=jax.ShapeDtypeStruct((b_pad, OUT_PAD), jnp.float32),
        grid=(n_tiles,),
        in_specs=in_specs,
        out_specs=pl.BlockSpec((tm, OUT_PAD), lambda i: (i, 0)),
        compiler_params=pltpu.CompilerParams(
            dimension_semantics=("parallel",),
            vmem_limit_bytes=28 * 1024 * 1024),
        cost_estimate=pl.CostEstimate(
            flops=flops, transcendentals=0, bytes_accessed=bytes_accessed),
    )(*args)

    return out[:B, :action_size]


def init_params(key, action_size=ACTION_SIZE):
    """Deterministic PyTorch-style (uniform 1/sqrt(fan_in)) init, stored as (in, out), f32."""
    dims = [STATE_SIZE, HIDDEN, HIDDEN, HIDDEN, HIDDEN, action_size]
    params = {}
    for li in range(1, 6):
        din, dout = dims[li - 1], dims[li]
        key, kw, kb = jax.random.split(key, 3)
        bound = 1.0 / jnp.sqrt(din)
        params[f"w{li}"] = jax.random.uniform(
            kw, (din, dout), jnp.float32, minval=-bound, maxval=bound)
        params[f"b{li}"] = jax.random.uniform(
            kb, (1, dout), jnp.float32, minval=-bound, maxval=bound)
    return params


def reference_forward_bf16(state, params):
    """Plain-JAX reference emulating the kernel's bf16-weight / f32-accumulate math."""
    h = state
    for li in range(1, 5):
        h = jnp.dot(h.astype(jnp.bfloat16), params[f"w{li}"].astype(jnp.bfloat16),
                    preferred_element_type=jnp.float32) + params[f"b{li}"]
        h = jnp.maximum(h, 0.0)
    return jnp.dot(h.astype(jnp.bfloat16), params["w5"].astype(jnp.bfloat16),
                   preferred_element_type=jnp.float32) + params["b5"]


# TODO(synk): for the repeated tiny-batch RL acting loop, the call is bound by
# streaming ~7 MiB of bf16 weights per invocation; a cross-pallas_call weight
# prefetch (DMA-semaphore future) would hide that but is out of scope here.


if __name__ == "__main__":
    key = jax.random.PRNGKey(0)
    kparam_key, kx = jax.random.split(key)

    params = init_params(kparam_key, ACTION_SIZE)
    kparams = prepare_params(params, ACTION_SIZE)

    batch = 8
    state = jax.random.normal(kx, (batch, STATE_SIZE), jnp.float32)

    q = qnetwork_forward(state, kparams, action_size=ACTION_SIZE)
    q = jax.block_until_ready(q)

    q_ref = reference_forward_bf16(state, params)
    assert q.shape == (batch, ACTION_SIZE), q.shape
    max_err = float(jnp.max(jnp.abs(q - q_ref)))
    assert jnp.allclose(q, q_ref, atol=1e-2, rtol=1e-2), max_err

    print("KERNEL_OK")
</pallas_src>

<mosaic_0001>
module attributes {stable_mosaic.version = 11 : i64} {
  func.func @_qnet_kernel(%arg0: i32, %arg1: memref<16x384xbf16, #tpu.memory_space<vmem>>, %arg2: memref<384x1024xbf16, #tpu.memory_space<vmem>>, %arg3: memref<1x1024xf32, #tpu.memory_space<vmem>>, %arg4: memref<1024x1024xbf16, #tpu.memory_space<vmem>>, %arg5: memref<1x1024xf32, #tpu.memory_space<vmem>>, %arg6: memref<1024x1024xbf16, #tpu.memory_space<vmem>>, %arg7: memref<1x1024xf32, #tpu.memory_space<vmem>>, %arg8: memref<1024x1024xbf16, #tpu.memory_space<vmem>>, %arg9: memref<1x1024xf32, #tpu.memory_space<vmem>>, %arg10: memref<1024x128xbf16, #tpu.memory_space<vmem>>, %arg11: memref<1x128xf32, #tpu.memory_space<vmem>>, %arg12: memref<16x128xf32, #tpu.memory_space<vmem>>) attributes {dimension_semantics = [#tpu.dimension_semantics<parallel>], iteration_bounds = array<i64: 1>, scalar_prefetch = 0 : i64, scratch_operands = 0 : i64, tpu.core_type = #tpu.core_type<tc>, window_params = [{transform_indices = @transform_0, window_bounds = array<i64: 16, 384>}, {pipeline_mode = #tpu.pipeline_mode<synchronous>, transform_indices = @transform_1, window_bounds = array<i64: 384, 1024>}, {pipeline_mode = #tpu.pipeline_mode<synchronous>, transform_indices = @transform_2, window_bounds = array<i64: 1, 1024>}, {pipeline_mode = #tpu.pipeline_mode<synchronous>, transform_indices = @transform_3, window_bounds = array<i64: 1024, 1024>}, {pipeline_mode = #tpu.pipeline_mode<synchronous>, transform_indices = @transform_4, window_bounds = array<i64: 1, 1024>}, {pipeline_mode = #tpu.pipeline_mode<synchronous>, transform_indices = @transform_5, window_bounds = array<i64: 1024, 1024>}, {pipeline_mode = #tpu.pipeline_mode<synchronous>, transform_indices = @transform_6, window_bounds = array<i64: 1, 1024>}, {pipeline_mode = #tpu.pipeline_mode<synchronous>, transform_indices = @transform_7, window_bounds = array<i64: 1024, 1024>}, {pipeline_mode = #tpu.pipeline_mode<synchronous>, transform_indices = @transform_8, window_bounds = array<i64: 1, 1024>}, {pipeline_mode = #tpu.pipeline_mode<synchronous>, transform_indices = @transform_9, window_bounds = array<i64: 1024, 128>}, {pipeline_mode = #tpu.pipeline_mode<synchronous>, transform_indices = @transform_10, window_bounds = array<i64: 1, 128>}, {transform_indices = @transform_11, window_bounds = array<i64: 16, 128>}]} {
    %c0 = arith.constant 0 : index
    %c0_0 = arith.constant 0 : index
    %0 = vector.load %arg1[%c0, %c0_0] : memref<16x384xbf16, #tpu.memory_space<vmem>>, vector<16x384xbf16>
    %c0_1 = arith.constant 0 : index
    %c0_2 = arith.constant 0 : index
    %1 = vector.load %arg2[%c0_1, %c0_2] : memref<384x1024xbf16, #tpu.memory_space<vmem>>, vector<384x1024xbf16>
    %cst = arith.constant dense<0.000000e+00> : vector<16x1024xf32>
    %2 = tpu.matmul %0, %1, %cst {dimension_numbers = #tpu.dot_dimension_numbers<[1], [0], [0], [1], [0, 0, 1, 1], [], []>} : vector<16x384xbf16>, vector<384x1024xbf16>, vector<16x1024xf32> -> vector<16x1024xf32>
    %c0_3 = arith.constant 0 : index
    %c0_4 = arith.constant 0 : index
    %3 = vector.load %arg3[%c0_3, %c0_4] : memref<1x1024xf32, #tpu.memory_space<vmem>>, vector<1x1024xf32>
    %4 = vector.broadcast %3 : vector<1x1024xf32> to vector<16x1024xf32>
    %5 = arith.addf %2, %4 : vector<16x1024xf32>
    %cst_5 = arith.constant 0.000000e+00 : f32
    %6 = vector.broadcast %cst_5 : f32 to vector<16x1024xf32>
    %7 = arith.maximumf %5, %6 : vector<16x1024xf32>
    %8 = arith.truncf %7 : vector<16x1024xf32> to vector<16x1024xbf16>
    %c0_6 = arith.constant 0 : index
    %c0_7 = arith.constant 0 : index
    %9 = vector.load %arg4[%c0_6, %c0_7] : memref<1024x1024xbf16, #tpu.memory_space<vmem>>, vector<1024x1024xbf16>
    %cst_8 = arith.constant dense<0.000000e+00> : vector<16x1024xf32>
    %10 = tpu.matmul %8, %9, %cst_8 {dimension_numbers = #tpu.dot_dimension_numbers<[1], [0], [0], [1], [0, 0, 1, 1], [], []>} : vector<16x1024xbf16>, vector<1024x1024xbf16>, vector<16x1024xf32> -> vector<16x1024xf32>
    %c0_9 = arith.constant 0 : index
    %c0_10 = arith.constant 0 : index
    %11 = vector.load %arg5[%c0_9, %c0_10] : memref<1x1024xf32, #tpu.memory_space<vmem>>, vector<1x1024xf32>
    %12 = vector.broadcast %11 : vector<1x1024xf32> to vector<16x1024xf32>
    %13 = arith.addf %10, %12 : vector<16x1024xf32>
    %cst_11 = arith.constant 0.000000e+00 : f32
    %14 = vector.broadcast %cst_11 : f32 to vector<16x1024xf32>
    %15 = arith.maximumf %13, %14 : vector<16x1024xf32>
    %16 = arith.truncf %15 : vector<16x1024xf32> to vector<16x1024xbf16>
    %c0_12 = arith.constant 0 : index
    %c0_13 = arith.constant 0 : index
    %17 = vector.load %arg6[%c0_12, %c0_13] : memref<1024x1024xbf16, #tpu.memory_space<vmem>>, vector<1024x1024xbf16>
    %cst_14 = arith.constant dense<0.000000e+00> : vector<16x1024xf32>
    %18 = tpu.matmul %16, %17, %cst_14 {dimension_numbers = #tpu.dot_dimension_numbers<[1], [0], [0], [1], [0, 0, 1, 1], [], []>} : vector<16x1024xbf16>, vector<1024x1024xbf16>, vector<16x1024xf32> -> vector<16x1024xf32>
    %c0_15 = arith.constant 0 : index
    %c0_16 = arith.constant 0 : index
    %19 = vector.load %arg7[%c0_15, %c0_16] : memref<1x1024xf32, #tpu.memory_space<vmem>>, vector<1x1024xf32>
    %20 = vector.broadcast %19 : vector<1x1024xf32> to vector<16x1024xf32>
    %21 = arith.addf %18, %20 : vector<16x1024xf32>
    %cst_17 = arith.constant 0.000000e+00 : f32
    %22 = vector.broadcast %cst_17 : f32 to vector<16x1024xf32>
    %23 = arith.maximumf %21, %22 : vector<16x1024xf32>
    %24 = arith.truncf %23 : vector<16x1024xf32> to vector<16x1024xbf16>
    %c0_18 = arith.constant 0 : index
    %c0_19 = arith.constant 0 : index
    %25 = vector.load %arg8[%c0_18, %c0_19] : memref<1024x1024xbf16, #tpu.memory_space<vmem>>, vector<1024x1024xbf16>
    %cst_20 = arith.constant dense<0.000000e+00> : vector<16x1024xf32>
    %26 = tpu.matmul %24, %25, %cst_20 {dimension_numbers = #tpu.dot_dimension_numbers<[1], [0], [0], [1], [0, 0, 1, 1], [], []>} : vector<16x1024xbf16>, vector<1024x1024xbf16>, vector<16x1024xf32> -> vector<16x1024xf32>
    %c0_21 = arith.constant 0 : index
    %c0_22 = arith.constant 0 : index
    %27 = vector.load %arg9[%c0_21, %c0_22] : memref<1x1024xf32, #tpu.memory_space<vmem>>, vector<1x1024xf32>
    %28 = vector.broadcast %27 : vector<1x1024xf32> to vector<16x1024xf32>
    %29 = arith.addf %26, %28 : vector<16x1024xf32>
    %cst_23 = arith.constant 0.000000e+00 : f32
    %30 = vector.broadcast %cst_23 : f32 to vector<16x1024xf32>
    %31 = arith.maximumf %29, %30 : vector<16x1024xf32>
    %32 = arith.truncf %31 : vector<16x1024xf32> to vector<16x1024xbf16>
    %c0_24 = arith.constant 0 : index
    %c0_25 = arith.constant 0 : index
    %33 = vector.load %arg10[%c0_24, %c0_25] : memref<1024x128xbf16, #tpu.memory_space<vmem>>, vector<1024x128xbf16>
    %cst_26 = arith.constant dense<0.000000e+00> : vector<16x128xf32>
    %34 = tpu.matmul %32, %33, %cst_26 {dimension_numbers = #tpu.dot_dimension_numbers<[1], [0], [0], [1], [0, 0, 1, 1], [], []>} : vector<16x1024xbf16>, vector<1024x128xbf16>, vector<16x128xf32> -> vector<16x128xf32>
    %c0_27 = arith.constant 0 : index
    %c0_28 = arith.constant 0 : index
    %35 = vector.load %arg11[%c0_27, %c0_28] : memref<1x128xf32, #tpu.memory_space<vmem>>, vector<1x128xf32>
    %36 = vector.broadcast %35 : vector<1x128xf32> to vector<16x128xf32>
    %37 = arith.addf %34, %36 : vector<16x128xf32>
    %c0_29 = arith.constant 0 : index
    %c0_30 = arith.constant 0 : index
    %38 = vector.load %arg12[%c0_29, %c0_30] : memref<16x128xf32, #tpu.memory_space<vmem>>, vector<16x128xf32>
    tpu.vector_store %arg12[%c0_29, %c0_30], %37 {strides = array<i32>} : memref<16x128xf32, #tpu.memory_space<vmem>>, vector<16x128xf32>,
    return
  }
  func.func @transform_0(%arg0: i32) -> (i32, i32) {
    %c0_i32 = arith.constant 0 : i32
    %c0_i32_0 = arith.constant 0 : i32
    return %arg0, %c0_i32 : i32, i32
  }
  func.func @transform_1(%arg0: i32) -> (i32, i32) {
    %c0_i32 = arith.constant 0 : i32
    %c0_i32_0 = arith.constant 0 : i32
    %c0_i32_1 = arith.constant 0 : i32
    return %c0_i32, %c0_i32_0 : i32, i32
  }
  func.func @transform_2(%arg0: i32) -> (i32, i32) {
    %c0_i32 = arith.constant 0 : i32
    %c0_i32_0 = arith.constant 0 : i32
    %c0_i32_1 = arith.constant 0 : i32
    return %c0_i32, %c0_i32_0 : i32, i32
  }
  func.func @transform_3(%arg0: i32) -> (i32, i32) {
    %c0_i32 = arith.constant 0 : i32
    %c0_i32_0 = arith.constant 0 : i32
    %c0_i32_1 = arith.constant 0 : i32
    return %c0_i32, %c0_i32_0 : i32, i32
  }
  func.func @transform_4(%arg0: i32) -> (i32, i32) {
    %c0_i32 = arith.constant 0 : i32
    %c0_i32_0 = arith.constant 0 : i32
    %c0_i32_1 = arith.constant 0 : i32
    return %c0_i32, %c0_i32_0 : i32, i32
  }
  func.func @transform_5(%arg0: i32) -> (i32, i32) {
    %c0_i32 = arith.constant 0 : i32
    %c0_i32_0 = arith.constant 0 : i32
    %c0_i32_1 = arith.constant 0 : i32
    return %c0_i32, %c0_i32_0 : i32, i32
  }
  func.func @transform_6(%arg0: i32) -> (i32, i32) {
    %c0_i32 = arith.constant 0 : i32
    %c0_i32_0 = arith.constant 0 : i32
    %c0_i32_1 = arith.constant 0 : i32
    return %c0_i32, %c0_i32_0 : i32, i32
  }
  func.func @transform_7(%arg0: i32) -> (i32, i32) {
    %c0_i32 = arith.constant 0 : i32
    %c0_i32_0 = arith.constant 0 : i32
    %c0_i32_1 = arith.constant 0 : i32
    return %c0_i32, %c0_i32_0 : i32, i32
  }
  func.func @transform_8(%arg0: i32) -> (i32, i32) {
    %c0_i32 = arith.constant 0 : i32
    %c0_i32_0 = arith.constant 0 : i32
    %c0_i32_1 = arith.constant 0 : i32
    return %c0_i32, %c0_i32_0 : i32, i32
  }
  func.func @transform_9(%arg0: i32) -> (i32, i32) {
    %c0_i32 = arith.constant 0 : i32
    %c0_i32_0 = arith.constant 0 : i32
    %c0_i32_1 = arith.constant 0 : i32
    return %c0_i32, %c0_i32_0 : i32, i32
  }
  func.func @transform_10(%arg0: i32) -> (i32, i32) {
    %c0_i32 = arith.constant 0 : i32
    %c0_i32_0 = arith.constant 0 : i32
    %c0_i32_1 = arith.constant 0 : i32
    return %c0_i32, %c0_i32_0 : i32, i32
  }
  func.func @transform_11(%arg0: i32) -> (i32, i32) {
    %c0_i32 = arith.constant 0 : i32
    %c0_i32_0 = arith.constant 0 : i32
    return %arg0, %c0_i32 : i32, i32
  }
}

</mosaic_0001>

<bundles_post_ra>
// kernel: qnetwork_forward.1
= control target key start
LH: loop header
LB: loop body
LE: loop exit
PB: predicated region body
PF: predicated region fallthrough
CT: control target
= control target key end

     0   :  { %16 = vsyncpa [#allocation3], 0  ;;  %s16870_s0 = inlined_call_operand.vmem [shape: bf16[16,384], index: 0, kind: input, shape index: {}]   ;;  %s16871_s1 = inlined_call_operand.hbm [shape: bf16[384,1024], index: 1, kind: input, shape index: {}]   ;;  %s16872_s2 = inlined_call_operand.hbm [shape: f32[1,1024], index: 2, kind: input, shape index: {}]   ;;  %s16873_s3 = inlined_call_operand.hbm [shape: bf16[1024,1024], index: 3, kind: input, shape index: {}]   ;;  %s16874_s4 = inlined_call_operand.hbm [shape: f32[1,1024], index: 4, kind: input, shape index: {}]   ;;  %s16875_s5 = inlined_call_operand.hbm [shape: bf16[1024,1024], index: 5, kind: input, shape index: {}]   ;;  %s16876_s6 = inlined_call_operand.hbm [shape: f32[1,1024], index: 6, kind: input, shape index: {}]   ;;  %s16877_s7 = inlined_call_operand.hbm [shape: bf16[1024,1024], index: 7, kind: input, shape index: {}]   ;;  %s16878_s8 = inlined_call_operand.hbm [shape: f32[1,1024], index: 8, kind: input, shape index: {}]   ;;  %s16879_s9 = inlined_call_operand.hbm [shape: bf16[1024,128], index: 9, kind: input, shape index: {}]   ;;  %s16880_s10 = inlined_call_operand.hbm [shape: f32[1,128], index: 10, kind: input, shape index: {}]   ;;  %s16881_s11 = inlined_call_operand.vmem [shape: f32[16,128], index: 11, kind: output, shape index: {}]  }
   0x1   :  { %17 = vsyncpa [#allocation5], 0 }
   0x2   :  { %18 = vsyncpa [#allocation8], 0 }
   0x3   :  { %19 = vsyncpa [#allocation11], 0 }
   0x4   :  { %20 = vsyncpa [#allocation14], 0 }
   0x5   :  { %21 = vsyncpa [#allocation17], 0  ;;  %s16345_s17 = smov [#allocation4]   ;;  %s16346_s19 = smov [#allocation7]  }
   0x6   :  { %s42_s18 = sshll.u32 %s16345_s17, 4  ;;  %s64_s20 = sshll.u32 %s16346_s19, 4  ;;  %s43_s18 = int_to_ptr.vmem [resolvable:$true] %s42_s18  ;;  %s65_s20 = int_to_ptr.vmem [resolvable:$true] %s64_s20 }
   0x7   :  { %s16113_s23 = scalar_lea.hbm %s16872_s2, 128 }
   0x8   :  { %p16114_p0 = scmp.ne.s32.totalorder %s16872_s2, %s16113_s23  ;;  %p16117_p1 = scmp.lt.u32.totalorder %s16113_s23, %s16872_s2 }
   0xa   :  { %p16119_p2 = pnand %p16117_p1, %p16114_p0 }
   0xc   :  { %16122 = shalt.err (!%p16119_p2)
}
   0xd   :  { %s16123_s28 = scalar_lea.vmem %s43_s18, 128  ;;  %p16128_p4 = scmp.lt.s32.totalorder %s43_s18, %s43_s18 }
   0xe   :  { %p16124_p3 = scmp.ne.s32.totalorder %s43_s18, %s16123_s28  ;;  %p16129_p5 = scmp.lt.s32.totalorder %s16123_s28, %s16123_s28 }
  0x10   :  { %p16130_p6 = por %p16129_p5, %p16128_p4 }
  0x12   :  { %p16131_p7 = pnand %p16130_p6, %p16124_p3 }
  0x14   :  { %16134 = shalt.err (!%p16131_p7)
}
  0x15   :  { %45 = dma.hbm_to_vmem [thread:$0]  %s16872_s2, 128, %s43_s18, [#allocation5]  }
  0x16   :  { %s16135_s14 = scalar_lea.hbm %s16874_s4, 128 }
  0x17   :  { %p16136_p8 = scmp.ne.s32.totalorder %s16874_s4, %s16135_s14  ;;  %p16139_p9 = scmp.lt.u32.totalorder %s16135_s14, %s16874_s4 }
  0x19   :  { %p16141_p10 = pnand %p16139_p9, %p16136_p8 }
  0x1b   :  { %16144 = shalt.err (!%p16141_p10)
}
  0x1c   :  { %s16145_s21 = scalar_lea.vmem %s65_s20, 128  ;;  %p16150_p12 = scmp.lt.s32.totalorder %s65_s20, %s65_s20 }
  0x1d   :  { %p16146_p11 = scmp.ne.s32.totalorder %s65_s20, %s16145_s21  ;;  %p16151_p13 = scmp.lt.s32.totalorder %s16145_s21, %s16145_s21 }
  0x1f   :  { %p16152_p0 = por %p16151_p13, %p16150_p12 }
  0x21   :  { %p16153_p1 = pnand %p16152_p0, %p16146_p11 }
  0x23   :  { %16156 = shalt.err (!%p16153_p1)
}
  0x24   :  { %67 = dma.hbm_to_vmem [thread:$0]  %s16874_s4, 128, %s65_s20, [#allocation8]  }
  0x25   :  { %s16347_s22 = smov [#allocation10]   ;;  %s16348_s24 = smov [#allocation13]  }
  0x26   :  { %s86_s23 = sshll.u32 %s16347_s22, 4  ;;  %s108_s25 = sshll.u32 %s16348_s24, 4  ;;  %s87_s23 = int_to_ptr.vmem [resolvable:$true] %s86_s23  ;;  %s109_s25 = int_to_ptr.vmem [resolvable:$true] %s108_s25 }
  0x27   :  { %s16157_s28 = scalar_lea.hbm %s16876_s6, 128 }
  0x28   :  { %p16158_p2 = scmp.ne.s32.totalorder %s16876_s6, %s16157_s28  ;;  %p16161_p3 = scmp.lt.u32.totalorder %s16157_s28, %s16876_s6 }
  0x2a   :  { %p16163_p4 = pnand %p16161_p3, %p16158_p2 }
  0x2c   :  { %16166 = shalt.err (!%p16163_p4)
}
  0x2d   :  { %s16167_s4 = scalar_lea.vmem %s87_s23, 128  ;;  %p16172_p6 = scmp.lt.s32.totalorder %s87_s23, %s87_s23 }
  0x2e   :  { %p16168_p5 = scmp.ne.s32.totalorder %s87_s23, %s16167_s4  ;;  %p16173_p7 = scmp.lt.s32.totalorder %s16167_s4, %s16167_s4 }
  0x30   :  { %p16174_p8 = por %p16173_p7, %p16172_p6 }
  0x32   :  { %p16175_p9 = pnand %p16174_p8, %p16168_p5 }
  0x34   :  { %16178 = shalt.err (!%p16175_p9)
}
  0x35   :  { %89 = dma.hbm_to_vmem [thread:$0]  %s16876_s6, 128, %s87_s23, [#allocation11]  }
  0x36   :  { %s16179_s17 = scalar_lea.hbm %s16878_s8, 128 }
  0x37   :  { %p16180_p10 = scmp.ne.s32.totalorder %s16878_s8, %s16179_s17  ;;  %p16183_p11 = scmp.lt.u32.totalorder %s16179_s17, %s16878_s8 }
  0x39   :  { %p16185_p12 = pnand %p16183_p11, %p16180_p10 }
  0x3b   :  { %16188 = shalt.err (!%p16185_p12)
}
  0x3c   :  { %s16189_s22 = scalar_lea.vmem %s109_s25, 128  ;;  %p16194_p0 = scmp.lt.s32.totalorder %s109_s25, %s109_s25 }
  0x3d   :  { %p16190_p13 = scmp.ne.s32.totalorder %s109_s25, %s16189_s22  ;;  %p16195_p1 = scmp.lt.s32.totalorder %s16189_s22, %s16189_s22 }
  0x3f   :  { %p16196_p2 = por %p16195_p1, %p16194_p0 }
  0x41   :  { %p16197_p3 = pnand %p16196_p2, %p16190_p13 }
  0x43   :  { %16200 = shalt.err (!%p16197_p3)
}
  0x44   :  { %111 = dma.hbm_to_vmem [thread:$0]  %s16878_s8, 128, %s109_s25, [#allocation14]  }
  0x45   :  { %s16349_s24 = smov [#allocation2]   ;;  %s16201_s29 = scalar_lea.hbm %s16871_s1, 24576 }
  0x46   :  { %s29_s26 = sshll.u32 %s16349_s24, 4  ;;  %p16202_p4 = scmp.ne.s32.totalorder %s16871_s1, %s16201_s29  ;;  %s30_s26 = int_to_ptr.vmem [resolvable:$true] %s29_s26 }
  0x47   :  { %p16205_p5 = scmp.lt.u32.totalorder %s16201_s29, %s16871_s1 }
  0x49   :  { %p16207_p6 = pnand %p16205_p5, %p16202_p4 }
  0x4b   :  { %16210 = shalt.err (!%p16207_p6)
}
  0x4c   :  { %s16211_s20 = scalar_lea.vmem %s30_s26, 24576  ;;  %p16216_p8 = scmp.lt.s32.totalorder %s30_s26, %s30_s26 }
  0x4d   :  { %p16212_p7 = scmp.ne.s32.totalorder %s30_s26, %s16211_s20  ;;  %p16217_p9 = scmp.lt.s32.totalorder %s16211_s20, %s16211_s20 }
  0x4f   :  { %p16218_p10 = por %p16217_p9, %p16216_p8 }
  0x51   :  { %p16219_p11 = pnand %p16218_p10, %p16212_p7 }
  0x53   :  { %16222 = shalt.err (!%p16219_p11)
}
  0x54   :  { %s16350_s8 = smov 512   ;;  %s16351_s25 = smov 32  }
  0x55   :  { %35 = dma.hbm_to_vmem [thread:$0]  %s16871_s1, 24576, %s30_s26, [#allocation3], %s16350_s8, %s16350_s8, %s16351_s25  }
  0x56   :  { %s16352_s16 = smov [#allocation6]   ;;  %s16353_s19 = smov [#allocation9]  }
  0x57   :  { %s51_s17 = sshll.u32 %s16352_s16, 4  ;;  %s73_s21 = sshll.u32 %s16353_s19, 4  ;;  %s52_s17 = int_to_ptr.vmem [resolvable:$true] %s51_s17  ;;  %s74_s21 = int_to_ptr.vmem [resolvable:$true] %s73_s21 }
  0x58   :  { %s16223_s22 = scalar_lea.hbm %s16873_s3, 65536 }
  0x59   :  { %p16224_p12 = scmp.ne.s32.totalorder %s16873_s3, %s16223_s22  ;;  %p16227_p13 = scmp.lt.u32.totalorder %s16223_s22, %s16873_s3 }
  0x5b   :  { %p16229_p0 = pnand %p16227_p13, %p16224_p12 }
  0x5d   :  { %16232 = shalt.err (!%p16229_p0)
}
  0x5e   :  { %s16233_s1 = scalar_lea.vmem %s52_s17, 65536  ;;  %p16238_p2 = scmp.lt.s32.totalorder %s52_s17, %s52_s17 }
  0x5f   :  { %p16234_p1 = scmp.ne.s32.totalorder %s52_s17, %s16233_s1  ;;  %p16239_p3 = scmp.lt.s32.totalorder %s16233_s1, %s16233_s1 }
  0x61   :  { %p16240_p4 = por %p16239_p3, %p16238_p2 }
  0x63   :  { %p16241_p5 = pnand %p16240_p4, %p16234_p1 }
  0x65   :  { %16244 = shalt.err (!%p16241_p5)
}
  0x66   :  { %57 = dma.hbm_to_vmem [thread:$0]  %s16873_s3, 65536, %s52_s17, [#allocation5], %s16350_s8, %s16350_s8, %s16351_s25  }
  0x67   :  { %s16245_s12 = scalar_lea.hbm %s16875_s5, 65536 }
  0x68   :  { %p16246_p6 = scmp.ne.s32.totalorder %s16875_s5, %s16245_s12  ;;  %p16249_p7 = scmp.lt.u32.totalorder %s16245_s12, %s16875_s5 }
  0x6a   :  { %p16251_p8 = pnand %p16249_p7, %p16246_p6 }
  0x6c   :  { %16254 = shalt.err (!%p16251_p8)
}
  0x6d   :  { %s16255_s15 = scalar_lea.vmem %s74_s21, 65536  ;;  %p16260_p10 = scmp.lt.s32.totalorder %s74_s21, %s74_s21 }
  0x6e   :  { %p16256_p9 = scmp.ne.s32.totalorder %s74_s21, %s16255_s15  ;;  %p16261_p11 = scmp.lt.s32.totalorder %s16255_s15, %s16255_s15 }
  0x70   :  { %p16262_p12 = por %p16261_p11, %p16260_p10 }
  0x72   :  { %p16263_p13 = pnand %p16262_p12, %p16256_p9 }
  0x74   :  { %16266 = shalt.err (!%p16263_p13)
}
  0x75   :  { %79 = dma.hbm_to_vmem [thread:$0]  %s16875_s5, 65536, %s74_s21, [#allocation8], %s16350_s8, %s16350_s8, %s16351_s25  }
  0x76   :  { %s16354_s17 = smov [#allocation12]   ;;  %s16355_s2 = smov [#allocation15]  }
  0x77   :  { %s95_s19 = sshll.u32 %s16354_s17, 4  ;;  %s117_s18 = sshll.u32 %s16355_s2, 4  ;;  %s96_s19 = int_to_ptr.vmem [resolvable:$true] %s95_s19  ;;  %s118_s18 = int_to_ptr.vmem [resolvable:$true] %s117_s18 }
  0x78   :  { %s16267_s23 = scalar_lea.hbm %s16877_s7, 65536 }
  0x79   :  { %p16268_p0 = scmp.ne.s32.totalorder %s16877_s7, %s16267_s23  ;;  %p16271_p1 = scmp.lt.u32.totalorder %s16267_s23, %s16877_s7 }
  0x7b   :  { %p16273_p2 = pnand %p16271_p1, %p16268_p0 }
  0x7d   :  { %16276 = shalt.err (!%p16273_p2)
}
  0x7e   :  { %s16277_s5 = scalar_lea.vmem %s96_s19, 65536  ;;  %p16282_p4 = scmp.lt.s32.totalorder %s96_s19, %s96_s19 }
  0x7f   :  { %p16278_p3 = scmp.ne.s32.totalorder %s96_s19, %s16277_s5  ;;  %p16283_p5 = scmp.lt.s32.totalorder %s16277_s5, %s16277_s5 }
  0x81   :  { %p16284_p6 = por %p16283_p5, %p16282_p4 }
  0x83   :  { %p16285_p7 = pnand %p16284_p6, %p16278_p3 }
  0x85   :  { %16288 = shalt.err (!%p16285_p7)
}
  0x86   :  { %101 = dma.hbm_to_vmem [thread:$0]  %s16877_s7, 65536, %s96_s19, [#allocation11], %s16350_s8, %s16350_s8, %s16351_s25  }
  0x87   :  { %s16289_s12 = scalar_lea.hbm %s16879_s9, 8192 }
  0x88   :  { %p16290_p8 = scmp.ne.s32.totalorder %s16879_s9, %s16289_s12  ;;  %p16293_p9 = scmp.lt.u32.totalorder %s16289_s12, %s16879_s9 }
  0x8a   :  { %p16295_p10 = pnand %p16293_p9, %p16290_p8 }
  0x8c   :  { %16298 = shalt.err (!%p16295_p10)
}
  0x8d   :  { %s16299_s15 = scalar_lea.vmem %s118_s18, 8192  ;;  %p16304_p12 = scmp.lt.s32.totalorder %s118_s18, %s118_s18 }
  0x8e   :  { %p16300_p11 = scmp.ne.s32.totalorder %s118_s18, %s16299_s15  ;;  %p16305_p13 = scmp.lt.s32.totalorder %s16299_s15, %s16299_s15 }
  0x90   :  { %p16306_p0 = por %p16305_p13, %p16304_p12 }
  0x92   :  { %p16307_p1 = pnand %p16306_p0, %p16300_p11 }
  0x94   :  { %16310 = shalt.err (!%p16307_p1)
}
  0x95   :  { %s16356_s7 = smov 64   ;;  %s16357_s8 = smov 4  }
  0x96   :  { %123 = dma.hbm_to_vmem [thread:$0]  %s16879_s9, 8192, %s118_s18, [#allocation14], %s16356_s7, %s16356_s7, %s16357_s8  }
  0x97   :  { %s16358_s16 = smov [#allocation16]   ;;  %s16311_s22 = scalar_lea.hbm %s16880_s10, 16 }
  0x98   :  { %s130_s17 = sshll.u32 %s16358_s16, 4  ;;  %p16312_p2 = scmp.ne.s32.totalorder %s16880_s10, %s16311_s22  ;;  %s131_s17 = int_to_ptr.vmem [resolvable:$true] %s130_s17 }
  0x99   :  { %p16315_p3 = scmp.lt.u32.totalorder %s16311_s22, %s16880_s10 }
  0x9b   :  { %p16317_p4 = pnand %p16315_p3, %p16312_p2 }
  0x9d   :  { %16320 = shalt.err (!%p16317_p4)
}
  0x9e   :  { %s16321_s1 = scalar_lea.vmem %s131_s17, 16  ;;  %s16325_s9 = scalar_lea.vmem %s131_s17, 32 }
  0x9f   :  { %p16322_p5 = scmp.ne.s32.totalorder %s131_s17, %s16321_s1  ;;  %p16326_p6 = scmp.lt.s32.totalorder %s131_s17, %s131_s17 }
  0xa0   :  { %p16327_p7 = scmp.lt.s32.totalorder %s16325_s9, %s16321_s1 }
  0xa2   :  { %p16328_p8 = por %p16327_p7, %p16326_p6 }
  0xa4   :  { %p16329_p9 = pnand %p16328_p8, %p16322_p5 }
  0xa6   :  { %16332 = shalt.err (!%p16329_p9)
}
  0xa7   :  { %133 = dma.hbm_to_vmem [thread:$0]  %s16880_s10, 16, %s131_s17, [#allocation17]  }
  0xa8   :  { %16333 = dma.done.wait [#allocation3], 24576  }
  0xa9   :  { %16334 = vsyncadd [#allocation3], 4294942720 }
  0xaa   :  { %16335 = dma.done.wait [#allocation5], 65664  }
  0xab   :  { %16336 = vsyncadd [#allocation5], 4294901632 }
  0xac   :  { %16337 = dma.done.wait [#allocation8], 65664  }
  0xad   :  { %16338 = vsyncadd [#allocation8], 4294901632 }
  0xae   :  { %16339 = dma.done.wait [#allocation11], 65664  }
  0xaf   :  { %16340 = vsyncadd [#allocation11], 4294901632 }
  0xb0   :  { %16341 = dma.done.wait [#allocation14], 8320  }
  0xb1   :  { %16342 = vsyncadd [#allocation14], 4294958976 }
  0xb2   :  { %16343 = dma.done.wait [#allocation17], 16  }
  0xb3   :  { %16344 = vsyncadd [#allocation17], 4294967280  ;;  %v169_v0 = vld [vmem:[#allocation2] sm:$0xff]  ;;  %v170_v11 = vld [vmem:[#allocation2 + $0x8] sm:$0xff] }
  0xb4   :  { %v173_v1 = vld [vmem:[#allocation2 + $0x20] sm:$0xff]  ;;  %v174_v12 = vld [vmem:[#allocation2 + $0x28] sm:$0xff] }
  0xb5   :  { %v177_v2 = vld [vmem:[#allocation2 + $0x40] sm:$0xff]  ;;  %v13924_v3 = vcombine.high %v169_v0, %v173_v1  ;;  %v13923_v4 = vcombine.low %v169_v0, %v173_v1  ;;  %v13926_v15 = vcombine.high %v170_v11, %v174_v12  ;;  %v13925_v16 = vcombine.low %v170_v11, %v174_v12  ;;  %v178_v17 = vld [vmem:[#allocation2 + $0x48] sm:$0xff] }
  0xb6   :  { %v181_v5 = vld [vmem:[#allocation2 + $0x60] sm:$0xff]  ;;  %v182_v18 = vld [vmem:[#allocation2 + $0x68] sm:$0xff] }
  0xb7   :  { %v13932_v6 = vcombine.high %v177_v2, %v181_v5  ;;  %v185_v7 = vld [vmem:[#allocation2 + $0x80] sm:$0xff]  ;;  %1379 = vmatprep.subr.bf16.mxu0 %v13924_v3  ;;  %v13931_v9 = vcombine.low %v177_v2, %v181_v5  ;;  %1465 = vmatprep.subr.bf16.mxu1 %v13926_v15  ;;  %v13934_v20 = vcombine.high %v178_v17, %v182_v18  ;;  %v186_v21 = vld [vmem:[#allocation2 + $0x88] sm:$0xff] }
  0xb8   :  { %v189_v8 = vld [vmem:[#allocation2 + $0xa0] sm:$0xff]  ;;  %1380 = vmatpush1.bf16.msra.mxu0 %v13923_v4  ;;  %v190_v22 = vld [vmem:[#allocation2 + $0xa8] sm:$0xff]  ;;  %1466 = vmatpush1.bf16.msra.mxu1 %v13925_v16  ;;  %v13933_v24 = vcombine.low %v178_v17, %v182_v18 }
  0xb9   :  { %1381 = vmatprep.subr.bf16.mxu0 %v13932_v6  ;;  %v13940_v10 = vcombine.high %v185_v7, %v189_v8  ;;  %v193_v13 = vld [vmem:[#allocation2 + $0xc0] sm:$0xff]  ;;  %v13939_v19 = vcombine.low %v185_v7, %v189_v8  ;;  %1467 = vmatprep.subr.bf16.mxu1 %v13934_v20  ;;  %v13942_v27 = vcombine.high %v186_v21, %v190_v22  ;;  %v194_v28 = vld [vmem:[#allocation2 + $0xc8] sm:$0xff] }
  0xba   :  { %v197_v14 = vld [vmem:[#allocation2 + $0xe0] sm:$0xff]  ;;  %v198_v29 = vld [vmem:[#allocation2 + $0xe8] sm:$0xff]  ;;  %v13941_v32 = vcombine.low %v186_v21, %v190_v22 }
  0xbb   :  { %v13948_v23 = vcombine.high %v193_v13, %v197_v14  ;;  %v201_v25 = vld [vmem:[#allocation2 + $0x100] sm:$0xff]  ;;  %v13947_v30 = vcombine.low %v193_v13, %v197_v14  ;;  %v13950_v35 = vcombine.high %v194_v28, %v198_v29  ;;  %v202_v36 = vld [vmem:[#allocation2 + $0x108] sm:$0xff]  ;;  %v13949_v40 = vcombine.low %v194_v28, %v198_v29 }
  0xbc   :  { %1382 = vmatpush1.bf16.msra.mxu0 %v13931_v9  ;;  %v205_v26 = vld [vmem:[#allocation2 + $0x120] sm:$0xff]  ;;  %1468 = vmatpush1.bf16.msra.mxu1 %v13933_v24  ;;  %v206_v37 = vld [vmem:[#allocation2 + $0x128] sm:$0xff] }
  0xbd   :  { %1383 = vmatprep.subr.bf16.mxu0 %v13940_v10  ;;  %v13956_v31 = vcombine.high %v201_v25, %v205_v26  ;;  %v209_v33 = vld [vmem:[#allocation2 + $0x140] sm:$0xff]  ;;  %1469 = vmatprep.subr.bf16.mxu1 %v13942_v27  ;;  %v13955_v38 = vcombine.low %v201_v25, %v205_v26  ;;  %v13958_v44 = vcombine.high %v202_v36, %v206_v37  ;;  %v210_v45 = vld [vmem:[#allocation2 + $0x148] sm:$0xff] }
  0xbe   :  { %v213_v34 = vld [vmem:[#allocation2 + $0x160] sm:$0xff]  ;;  %v214_v46 = vld [vmem:[#allocation2 + $0x168] sm:$0xff]  ;;  %v13957_v49 = vcombine.low %v202_v36, %v206_v37 }
  0xbf   :  { %v13964_v39 = vcombine.high %v209_v33, %v213_v34  ;;  %v16555_v41 = vld [vmem:[%s16870_s0 + $0x4] ss:$12 sps:$4 sm:$0xff]   ;;  %v13963_v47 = vcombine.low %v209_v33, %v213_v34  ;;  %v13966_v52 = vcombine.high %v210_v45, %v214_v46  ;;  %v218_v53 = vld [vmem:[#allocation2 + $0x188] sm:$0xff]  ;;  %v13965_v57 = vcombine.low %v210_v45, %v214_v46 }
  0xc0   :  { %1384 = vmatpush1.bf16.msra.mxu0 %v13939_v19  ;;  %1470 = vmatpush1.bf16.msra.mxu1 %v13941_v32  ;;  %v217_v42 = vld [vmem:[#allocation2 + $0x180] sm:$0xff]  ;;  %v222_v54 = vld [vmem:[#allocation2 + $0x1a8] sm:$0xff] }
  0xc1   :  { %1385 = vmatprep.subr.bf16.mxu0 %v13948_v23  ;;  %v221_v43 = vld [vmem:[#allocation2 + $0x1a0] sm:$0xff]  ;;  %1471 = vmatprep.subr.bf16.mxu1 %v13950_v35  ;;  %v13974_v60 = vcombine.high %v218_v53, %v222_v54  ;;  %v226_v61 = vld [vmem:[#allocation2 + $0x1c8] sm:$0xff]  ;;  %v13973_v1 = vcombine.low %v218_v53, %v222_v54 }
  0xc2   :  { %1411 = vmatprep.mubr.bf16.mxu0 %v16555_v41  ;;  %1497 = vmatprep.mubr.bf16.mxu1 %v16555_v41  ;;  %v13972_v48 = vcombine.high %v217_v42, %v221_v43  ;;  %v225_v50 = vld [vmem:[#allocation2 + $0x1c0] sm:$0xff]  ;;  %v13971_v55 = vcombine.low %v217_v42, %v221_v43  ;;  %v230_v62 = vld [vmem:[#allocation2 + $0x1e8] sm:$0xff] }
  0xc3   :  { %v229_v51 = vld [vmem:[#allocation2 + $0x1e0] sm:$0xff]  ;;  %v13982_v4 = vcombine.high %v226_v61, %v230_v62  ;;  %v234_v5 = vld [vmem:[#allocation2 + $0x208] sm:$0xff]  ;;  %v13981_v9 = vcombine.low %v226_v61, %v230_v62 }
  0xc4   :  { %1386 = vmatpush1.bf16.msra.mxu0 %v13947_v30  ;;  %1472 = vmatpush1.bf16.msra.mxu1 %v13949_v40  ;;  %v13980_v56 = vcombine.high %v225_v50, %v229_v51  ;;  %v233_v58 = vld [vmem:[#allocation2 + $0x200] sm:$0xff]  ;;  %v13979_v63 = vcombine.low %v225_v50, %v229_v51  ;;  %v238_v6 = vld [vmem:[#allocation2 + $0x228] sm:$0xff] }
  0xc5   :  { %1387 = vmatprep.subr.bf16.mxu0 %v13956_v31  ;;  %1473 = vmatprep.subr.bf16.mxu1 %v13958_v44  ;;  %v237_v59 = vld [vmem:[#allocation2 + $0x220] sm:$0xff]  ;;  %v13990_v12 = vcombine.high %v234_v5, %v238_v6  ;;  %v242_v13 = vld [vmem:[#allocation2 + $0x248] sm:$0xff]  ;;  %v13989_v17 = vcombine.low %v234_v5, %v238_v6 }
  0xc6   :  { %v13988_v0 = vcombine.high %v233_v58, %v237_v59  ;;  %v241_v2 = vld [vmem:[#allocation2 + $0x240] sm:$0xff]  ;;  %v13987_v7 = vcombine.low %v233_v58, %v237_v59  ;;  %v246_v14 = vld [vmem:[#allocation2 + $0x268] sm:$0xff] }
  0xc7   :  { %v245_v3 = vld [vmem:[#allocation2 + $0x260] sm:$0xff]  ;;  %v13998_v20 = vcombine.high %v242_v13, %v246_v14  ;;  %v250_v21 = vld [vmem:[#allocation2 + $0x288] sm:$0xff]  ;;  %v13997_v25 = vcombine.low %v242_v13, %v246_v14 }
  0xc8   :  { %1388 = vmatpush1.bf16.msra.mxu0 %v13955_v38  ;;  %1474 = vmatpush1.bf16.msra.mxu1 %v13957_v49  ;;  %v13996_v8 = vcombine.high %v241_v2, %v245_v3  ;;  %v249_v10 = vld [vmem:[#allocation2 + $0x280] sm:$0xff]  ;;  %v13995_v15 = vcombine.low %v241_v2, %v245_v3  ;;  %v254_v22 = vld [vmem:[#allocation2 + $0x2a8] sm:$0xff] }
  0xc9   :  { %1389 = vmatprep.subr.bf16.mxu0 %v13964_v39  ;;  %1475 = vmatprep.subr.bf16.mxu1 %v13966_v52  ;;  %v253_v11 = vld [vmem:[#allocation2 + $0x2a0] sm:$0xff]  ;;  %v14006_v28 = vcombine.high %v250_v21, %v254_v22  ;;  %v258_v29 = vld [vmem:[#allocation2 + $0x2c8] sm:$0xff]  ;;  %v14005_v33 = vcombine.low %v250_v21, %v254_v22 }
  0xca   :  { %v14004_v16 = vcombine.high %v249_v10, %v253_v11  ;;  %v257_v18 = vld [vmem:[#allocation2 + $0x2c0] sm:$0xff]  ;;  %v14003_v23 = vcombine.low %v249_v10, %v253_v11  ;;  %v262_v30 = vld [vmem:[#allocation2 + $0x2e8] sm:$0xff] }
  0xcb   :  { %v261_v19 = vld [vmem:[#allocation2 + $0x2e0] sm:$0xff]  ;;  %v14014_v36 = vcombine.high %v258_v29, %v262_v30  ;;  %v266_v37 = vld [vmem:[#allocation2 + $0x308] sm:$0xff]  ;;  %v14013_v42 = vcombine.low %v258_v29, %v262_v30 }
  0xcc   :  { %1390 = vmatpush1.bf16.msra.mxu0 %v13963_v47  ;;  %1476 = vmatpush1.bf16.msra.mxu1 %v13965_v57  ;;  %v14012_v24 = vcombine.high %v257_v18, %v261_v19  ;;  %v265_v26 = vld [vmem:[#allocation2 + $0x300] sm:$0xff]  ;;  %v14011_v31 = vcombine.low %v257_v18, %v261_v19  ;;  %v270_v38 = vld [vmem:[#allocation2 + $0x328] sm:$0xff]  ;;  %v16359_v18 = vmov 0  }
  0xcd   :  { %1391 = vmatprep.subr.bf16.mxu0 %v13972_v48  ;;  %1477 = vmatprep.subr.bf16.mxu1 %v13974_v60  ;;  %v269_v27 = vld [vmem:[#allocation2 + $0x320] sm:$0xff]  ;;  %v14022_v45 = vcombine.high %v266_v37, %v270_v38  ;;  %v274_v46 = vld [vmem:[#allocation2 + $0x348] sm:$0xff]  ;;  %v14021_v52 = vcombine.low %v266_v37, %v270_v38 }
  0xce   :  { %v14020_v32 = vcombine.high %v265_v26, %v269_v27  ;;  %v273_v34 = vld [vmem:[#allocation2 + $0x340] sm:$0xff]  ;;  %v14019_v39 = vcombine.low %v265_v26, %v269_v27  ;;  %v278_v47 = vld [vmem:[#allocation2 + $0x368] sm:$0xff] }
  0xcf   :  { %v277_v35 = vld [vmem:[#allocation2 + $0x360] sm:$0xff]  ;;  %v282_v53 = vld [vmem:[#allocation2 + $0x388] sm:$0xff]  ;;  %v14029_v60 = vcombine.low %v274_v46, %v278_v47 }
  0xd0   :  { %1392 = vmatpush1.bf16.msra.mxu0 %v13971_v55  ;;  %1478 = vmatpush1.bf16.msra.mxu1 %v13973_v1  ;;  %v14028_v40 = vcombine.high %v273_v34, %v277_v35  ;;  %v281_v43 = vld [vmem:[#allocation2 + $0x380] sm:$0xff]  ;;  %v14027_v48 = vcombine.low %v273_v34, %v277_v35  ;;  %v286_v54 = vld [vmem:[#allocation2 + $0x3a8] sm:$0xff]  ;;  %v14030_v55 = vcombine.high %v274_v46, %v278_v47 }
  0xd1   :  { %1393 = vmatprep.subr.bf16.mxu0 %v13980_v56  ;;  %1479 = vmatprep.subr.bf16.mxu1 %v13982_v4  ;;  %v285_v44 = vld [vmem:[#allocation2 + $0x3a0] sm:$0xff]  ;;  %v290_v61 = vld [vmem:[#allocation2 + $0x3c8] sm:$0xff]  ;;  %v14037_v5 = vcombine.low %v282_v53, %v286_v54 }
  0xd2   :  { %v289_v49 = vld [vmem:[#allocation2 + $0x3c0] sm:$0xff]  ;;  %v14036_v51 = vcombine.high %v281_v43, %v285_v44  ;;  %v14035_v56 = vcombine.low %v281_v43, %v285_v44  ;;  %v294_v62 = vld [vmem:[#allocation2 + $0x3e8] sm:$0xff] }
  0xd3   :  { %v293_v50 = vld [vmem:[#allocation2 + $0x3e0] sm:$0xff]  ;;  %v298_v6 = vld [vmem:[#allocation2 + $0x408] sm:$0xff]  ;;  %v14045_v13 = vcombine.low %v290_v61, %v294_v62 }
  0xd4   :  { %1394 = vmatpush1.bf16.msra.mxu0 %v13979_v63  ;;  %1480 = vmatpush1.bf16.msra.mxu1 %v13981_v9  ;;  %v297_v57 = vld [vmem:[#allocation2 + $0x400] sm:$0xff]  ;;  %v14044_v59 = vcombine.high %v289_v49, %v293_v50  ;;  %v14038_v63 = vcombine.high %v282_v53, %v286_v54 }
  0xd5   :  { %1395 = vmatprep.subr.bf16.mxu0 %v13988_v0  ;;  %1481 = vmatprep.subr.bf16.mxu1 %v13990_v12  ;;  %v301_v58 = vld [vmem:[#allocation2 + $0x420] sm:$0xff]  ;;  %v14043_v0 = vcombine.low %v289_v49, %v293_v50  ;;  %v342_v50 = vld [vmem:[#allocation2 + $0x568] sm:$0xff] }
  0xd6   :  { %v305_v1 = vld [vmem:[#allocation2 + $0x440] sm:$0xff]  ;;  %v14052_v3 = vcombine.high %v297_v57, %v301_v58  ;;  %v14051_v9 = vcombine.low %v297_v57, %v301_v58  ;;  %v350_v58 = vld [vmem:[#allocation2 + $0x5a8] sm:$0xff] }
  0xd7   :  { %v309_v2 = vld [vmem:[#allocation2 + $0x460] sm:$0xff] }
  0xd8   :  { %1396 = vmatpush1.bf16.msra.mxu0 %v13987_v7  ;;  %1482 = vmatpush1.bf16.msra.mxu1 %v13989_v17  ;;  %v16562_v4 = vld [vmem:[%s16870_s0] ss:$12 sps:$4 sm:$0xff]   ;;  %v14060_v10 = vcombine.high %v305_v1, %v309_v2  ;;  %v14059_v17 = vcombine.low %v305_v1, %v309_v2 }
  0xd9   :  { %1397 = vmatprep.subr.bf16.mxu0 %v13996_v8  ;;  %1483 = vmatprep.subr.bf16.mxu1 %v13998_v20  ;;  %v302_v7 = vld [vmem:[#allocation2 + $0x428] sm:$0xff]  ;;  %v14046_v8 = vcombine.high %v290_v61, %v294_v62  ;;  %v313_v11 = vld [vmem:[#allocation2 + $0x480] sm:$0xff]  ;;  %v171_v61 = vld [vmem:[#allocation2 + $0x10] sm:$0xff] }
  0xda   :  { %v317_v12 = vld [vmem:[#allocation2 + $0x4a0] sm:$0xff]  ;;  %v14054_v14 = vcombine.high %v298_v6, %v302_v7  ;;  %v14053_v20 = vcombine.low %v298_v6, %v302_v7  ;;  %v175_v62 = vld [vmem:[#allocation2 + $0x30] sm:$0xff]  ;;  %v358_v2 = vld [vmem:[#allocation2 + $0x5e8] sm:$0xff] }
  0xdb   :  { %v14068_v19 = vcombine.high %v313_v11, %v317_v12  ;;  %v321_v21 = vld [vmem:[#allocation2 + $0x4c0] sm:$0xff]  ;;  %v14067_v26 = vcombine.low %v313_v11, %v317_v12  ;;  %v13928_v6 = vcombine.high %v171_v61, %v175_v62  ;;  %v179_v7 = vld [vmem:[#allocation2 + $0x50] sm:$0xff]  ;;  %v176_v12 = vld [vmem:[#allocation2 + $0x38] sm:$0xff] }
  0xdc   :  { %1398 = vmatpush1.bf16.msra.mxu0 %v13995_v15  ;;  %1484 = vmatpush1.bf16.msra.mxu1 %v13997_v25  ;;  %v306_v15 = vld [vmem:[#allocation2 + $0x448] sm:$0xff]  ;;  %v325_v22 = vld [vmem:[#allocation2 + $0x4e0] sm:$0xff] }
  0xdd   :  { %1399 = vmatprep.subr.bf16.mxu0 %v14004_v16  ;;  %1485 = vmatprep.subr.bf16.mxu1 %v14006_v28  ;;  %v310_v16 = vld [vmem:[#allocation2 + $0x468] sm:$0xff]  ;;  %v14076_v27 = vcombine.high %v321_v21, %v325_v22  ;;  %v329_v29 = vld [vmem:[#allocation2 + $0x500] sm:$0xff]  ;;  %v14075_v34 = vcombine.low %v321_v21, %v325_v22  ;;  %v184_v21 = vld [vmem:[#allocation2 + $0x78] sm:$0xff] }
  0xde   :  { %v318_v25 = vld [vmem:[#allocation2 + $0x4a8] sm:$0xff]  ;;  %v14061_v28 = vcombine.low %v306_v15, %v310_v16  ;;  %v333_v30 = vld [vmem:[#allocation2 + $0x520] sm:$0xff] }
  0xdf   :  { %v14084_v35 = vcombine.high %v329_v29, %v333_v30  ;;  %v337_v37 = vld [vmem:[#allocation2 + $0x540] sm:$0xff]  ;;  %v14083_v43 = vcombine.low %v329_v29, %v333_v30  ;;  %v192_v29 = vld [vmem:[#allocation2 + $0xb8] sm:$0xff] }
  0xe0   :  { %1400 = vmatpush1.bf16.msra.mxu0 %v14003_v23  ;;  %1486 = vmatpush1.bf16.msra.mxu1 %v14005_v33  ;;  %v14062_v23 = vcombine.high %v306_v15, %v310_v16  ;;  %v326_v33 = vld [vmem:[#allocation2 + $0x4e8] sm:$0xff]  ;;  %v341_v38 = vld [vmem:[#allocation2 + $0x560] sm:$0xff]  ;;  %v187_v15 = vld [vmem:[#allocation2 + $0x90] sm:$0xff] }
  0xe1   :  { %1401 = vmatprep.subr.bf16.mxu0 %v14012_v24  ;;  %1487 = vmatprep.subr.bf16.mxu1 %v14014_v36  ;;  %v314_v24 = vld [vmem:[#allocation2 + $0x488] sm:$0xff]  ;;  %v14092_v44 = vcombine.high %v337_v37, %v341_v38  ;;  %v349_v46 = vld [vmem:[#allocation2 + $0x5a0] sm:$0xff]  ;;  %v191_v16 = vld [vmem:[#allocation2 + $0xb0] sm:$0xff] }
  0xe2   :  { %v14069_v36 = vcombine.low %v314_v24, %v318_v25  ;;  %v353_v53 = vld [vmem:[#allocation2 + $0x5c0] sm:$0xff]  ;;  %v13943_v30 = vcombine.low %v187_v15, %v191_v16 }
  0xe3   :  { %v357_v54 = vld [vmem:[#allocation2 + $0x5e0] sm:$0xff] }
  0xe4   :  { %1402 = vmatpush1.bf16.msra.mxu0 %v14011_v31  ;;  %1488 = vmatpush1.bf16.msra.mxu1 %v14013_v42  ;;  %v14070_v31 = vcombine.high %v314_v24, %v318_v25  ;;  %v334_v42 = vld [vmem:[#allocation2 + $0x528] sm:$0xff]  ;;  %v195_v24 = vld [vmem:[#allocation2 + $0xd0] sm:$0xff] }
  0xe5   :  { %1403 = vmatprep.subr.bf16.mxu0 %v14020_v32  ;;  %1489 = vmatprep.subr.bf16.mxu1 %v14022_v45  ;;  %v322_v32 = vld [vmem:[#allocation2 + $0x4c8] sm:$0xff]  ;;  %v345_v45 = vld [vmem:[#allocation2 + $0x580] sm:$0xff]  ;;  %v199_v25 = vld [vmem:[#allocation2 + $0xf0] sm:$0xff] }
  0xe6   :  { %v14077_v47 = vcombine.low %v322_v32, %v326_v33 }
  0xe8   :  { %1404 = vmatpush1.bf16.msra.mxu0 %v14019_v39  ;;  %1490 = vmatpush1.bf16.msra.mxu1 %v14021_v52  ;;  %v14078_v39 = vcombine.high %v322_v32, %v326_v33  ;;  %v14100_v52 = vcombine.high %v345_v45, %v349_v46  ;;  %v203_v32 = vld [vmem:[#allocation2 + $0x110] sm:$0xff] }
  0xe9   :  { %1405 = vmatprep.subr.bf16.mxu0 %v14028_v40  ;;  %1491 = vmatprep.subr.bf16.mxu1 %v14030_v55  ;;  %v330_v40 = vld [vmem:[#allocation2 + $0x508] sm:$0xff]  ;;  %v207_v33 = vld [vmem:[#allocation2 + $0x130] sm:$0xff] }
  0xea   :  { %v14086_v49 = vcombine.high %v330_v40, %v334_v42  ;;  %v14085_v55 = vcombine.low %v330_v40, %v334_v42  ;;  %v211_v40 = vld [vmem:[#allocation2 + $0x150] sm:$0xff] }
  0xeb   :  { %v215_v42 = vld [vmem:[#allocation2 + $0x170] sm:$0xff] }
  0xec   :  { %1406 = vmatpush1.bf16.msra.mxu0 %v14027_v48  ;;  %1492 = vmatpush1.bf16.msra.mxu1 %v14029_v60  ;;  %v338_v48 = vld [vmem:[#allocation2 + $0x548] sm:$0xff]  ;;  %v14108_v60 = vcombine.high %v353_v53, %v357_v54 }
  0xed   :  { %1407 = vmatprep.subr.bf16.mxu0 %v14036_v51  ;;  %1493 = vmatprep.subr.bf16.mxu1 %v14038_v63  ;;  %v14091_v51 = vcombine.low %v337_v37, %v341_v38  ;;  %v14094_v57 = vcombine.high %v338_v48, %v342_v50  ;;  %v14093_v63 = vcombine.low %v338_v48, %v342_v50  ;;  %v200_v37 = vld [vmem:[#allocation2 + $0xf8] sm:$0xff]  ;;  %v223_v50 = vld [vmem:[#allocation2 + $0x1b0] sm:$0xff] }
  0xee   :  { %v13951_v38 = vcombine.low %v195_v24, %v199_v25  ;;  %v13968_v48 = vcombine.high %v211_v40, %v215_v42 }
  0xf0   :  { %1408 = vmatpush1.bf16.msra.mxu0 %v14035_v56  ;;  %1494 = vmatpush1.bf16.msra.mxu1 %v14037_v5  ;;  %v346_v56 = vld [vmem:[#allocation2 + $0x588] sm:$0xff] }
  0xf1   :  { %1409 = vmatprep.subr.bf16.mxu0 %v14044_v59  ;;  %1495 = vmatprep.subr.bf16.mxu1 %v14046_v8  ;;  %v14099_v59 = vcombine.low %v345_v45, %v349_v46  ;;  %v14102_v1 = vcombine.high %v346_v56, %v350_v58  ;;  %v16571_v5 = vld [vmem:[%s16870_s0 + $0x8] ss:$12 sps:$4 sm:$0xff]   ;;  %v208_v46 = vld [vmem:[#allocation2 + $0x138] sm:$0xff] }
  0xf2   :  { %v183_v8 = vld [vmem:[#allocation2 + $0x70] sm:$0xff] }
  0xf3   :  { %v13935_v22 = vcombine.low %v179_v7, %v183_v8 }
  0xf4   :  { %1410 = vmatpush1.bf16.msra.mxu0 %v14043_v0  ;;  %1496 = vmatpush1.bf16.msra.mxu1 %v14045_v13  ;;  %v354_v0 = vld [vmem:[#allocation2 + $0x5c8] sm:$0xff]  ;;  %v13927_v13 = vcombine.low %v171_v61, %v175_v62  ;;  %v224_v61 = vld [vmem:[#allocation2 + $0x1b8] sm:$0xff] }
  0xf5   :  { %1422 = vmatprep.subr.bf16.mxu0 %v14052_v3  ;;  %1508 = vmatprep.subr.bf16.mxu1 %v14054_v14  ;;  %v14107_v3 = vcombine.low %v353_v53, %v357_v54  ;;  %v14110_v11 = vcombine.high %v354_v0, %v358_v2  ;;  %v13936_v14 = vcombine.high %v179_v7, %v183_v8  ;;  %v216_v53 = vld [vmem:[#allocation2 + $0x178] sm:$0xff] }
  0xf6   :  { %v13967_v54 = vcombine.low %v211_v40, %v215_v42  ;;  %v232_v7 = vld [vmem:[#allocation2 + $0x1f8] sm:$0xff] }
  0xf7   :  { %1412 = vmatmul.mubr.bf16.vlgmr.msra.gmra.mrb[0].mxu0 %v16562_v4  ;;  %1498 = vmatmul.mubr.bf16.vlgmr.msra.gmra.mrb[0].mxu1 %v16562_v4  ;;  %v264_v40 = vld [vmem:[#allocation2 + $0x2f8] sm:$0xff] }
  0xf8   :  { %1423 = vmatpush1.bf16.msra.mxu0 %v14051_v9  ;;  %1454 = vmatprep.mubr.bf16.mxu0 %v16359_v18  ;;  %v14101_v9 = vcombine.low %v346_v56, %v350_v58  ;;  %v227_v56 = vld [vmem:[#allocation2 + $0x1d0] sm:$0xff] }
  0xf9   :  { %1424 = vmatprep.subr.bf16.mxu0 %v14060_v10  ;;  %1509 = vmatpush1.bf16.msra.mxu1 %v14053_v20  ;;  %v172_v10 = vld [vmem:[#allocation2 + $0x18] sm:$0xff] }
  0xfa   :  { %1510 = vmatprep.subr.bf16.mxu1 %v14062_v23  ;;  %1540 = vmatprep.mubr.bf16.mxu1 %v16359_v18  ;;  %v13930_v20 = vcombine.high %v172_v10, %v176_v12  ;;  %v13944_v23 = vcombine.high %v187_v15, %v191_v16  ;;  %v240_v15 = vld [vmem:[#allocation2 + $0x238] sm:$0xff] }
  0xfc   :  { %1425 = vmatpush1.bf16.msra.mxu0 %v14059_v17  ;;  %v14109_v17 = vcombine.low %v354_v0, %v358_v2  ;;  %v235_v0 = vld [vmem:[#allocation2 + $0x210] sm:$0xff] }
  0xfd   :  { %1426 = vmatprep.subr.bf16.mxu0 %v14068_v19  ;;  %1511 = vmatpush1.bf16.msra.mxu1 %v14061_v28  ;;  %v180_v19 = vld [vmem:[#allocation2 + $0x58] sm:$0xff] }
  0xfe   :  { %1512 = vmatprep.subr.bf16.mxu1 %v14070_v31  ;;  %v13938_v28 = vcombine.high %v180_v19, %v184_v21  ;;  %v13952_v31 = vcombine.high %v195_v24, %v199_v25  ;;  %v248_v24 = vld [vmem:[#allocation2 + $0x278] sm:$0xff] }
 0x100   :  { %1427 = vmatpush1.bf16.msra.mxu0 %v14067_v26  ;;  %v13929_v26 = vcombine.low %v172_v10, %v176_v12  ;;  %v247_v10 = vld [vmem:[#allocation2 + $0x270] sm:$0xff] }
 0x101   :  { %1428 = vmatprep.subr.bf16.mxu0 %v14076_v27  ;;  %1513 = vmatpush1.bf16.msra.mxu1 %v14069_v36  ;;  %v188_v27 = vld [vmem:[#allocation2 + $0x98] sm:$0xff] }
 0x102   :  { %1514 = vmatprep.subr.bf16.mxu1 %v14078_v39  ;;  %v13946_v36 = vcombine.high %v188_v27, %v192_v29  ;;  %v13960_v39 = vcombine.high %v203_v32, %v207_v33 }
 0x104   :  { %1429 = vmatpush1.bf16.msra.mxu0 %v14075_v34  ;;  %v13937_v34 = vcombine.low %v180_v19, %v184_v21  ;;  %v255_v21 = vld [vmem:[#allocation2 + $0x2b0] sm:$0xff] }
 0x105   :  { %1430 = vmatprep.subr.bf16.mxu0 %v14084_v35  ;;  %1515 = vmatpush1.bf16.msra.mxu1 %v14077_v47  ;;  %v196_v35 = vld [vmem:[#allocation2 + $0xd8] sm:$0xff]  ;;  %v13959_v47 = vcombine.low %v203_v32, %v207_v33 }
 0x106   :  { %1516 = vmatprep.subr.bf16.mxu1 %v14086_v49  ;;  %v13954_v45 = vcombine.high %v196_v35, %v200_v37  ;;  %v219_v49 = vld [vmem:[#allocation2 + $0x190] sm:$0xff]  ;;  %v256_v32 = vld [vmem:[#allocation2 + $0x2b8] sm:$0xff] }
 0x107   :  { %v13975_v62 = vcombine.low %v219_v49, %v223_v50 }
 0x108   :  { %1431 = vmatpush1.bf16.msra.mxu0 %v14083_v43  ;;  %v13945_v43 = vcombine.low %v188_v27, %v192_v29  ;;  %v263_v29 = vld [vmem:[#allocation2 + $0x2f0] sm:$0xff] }
 0x109   :  { %1432 = vmatprep.subr.bf16.mxu0 %v14092_v44  ;;  %1517 = vmatpush1.bf16.msra.mxu1 %v14085_v55  ;;  %v204_v44 = vld [vmem:[#allocation2 + $0x118] sm:$0xff]  ;;  %v13976_v55 = vcombine.high %v219_v49, %v223_v50 }
 0x10a   :  { %1518 = vmatprep.subr.bf16.mxu1 %v14094_v57  ;;  %v231_v57 = vld [vmem:[#allocation2 + $0x1f0] sm:$0xff]  ;;  %v13961_v58 = vcombine.low %v204_v44, %v208_v46  ;;  %v272_v49 = vld [vmem:[#allocation2 + $0x338] sm:$0xff] }
 0x10b   :  { %v13983_v8 = vcombine.low %v227_v56, %v231_v57 }
 0x10c   :  { %1433 = vmatpush1.bf16.msra.mxu0 %v14091_v51  ;;  %v212_v51 = vld [vmem:[#allocation2 + $0x158] sm:$0xff] }
 0x10d   :  { %1434 = vmatprep.subr.bf16.mxu0 %v14100_v52  ;;  %1519 = vmatpush1.bf16.msra.mxu1 %v14093_v63  ;;  %v13962_v52 = vcombine.high %v204_v44, %v208_v46  ;;  %v13984_v63 = vcombine.high %v227_v56, %v231_v57  ;;  %v13969_v2 = vcombine.low %v212_v51, %v216_v53  ;;  %v279_v46 = vld [vmem:[#allocation2 + $0x370] sm:$0xff]  ;;  %v280_v56 = vld [vmem:[#allocation2 + $0x378] sm:$0xff] }
 0x10e   :  { %1520 = vmatprep.subr.bf16.mxu1 %v14102_v1  ;;  %v239_v1 = vld [vmem:[#allocation2 + $0x230] sm:$0xff] }
 0x10f   :  { %v13991_v16 = vcombine.low %v235_v0, %v239_v1 }
 0x110   :  { %1435 = vmatpush1.bf16.msra.mxu0 %v14099_v59  ;;  %v220_v59 = vld [vmem:[#allocation2 + $0x198] sm:$0xff] }
 0x111   :  { %1436 = vmatprep.subr.bf16.mxu0 %v14108_v60  ;;  %1521 = vmatpush1.bf16.msra.mxu1 %v14101_v9  ;;  %v13970_v60 = vcombine.high %v212_v51, %v216_v53  ;;  %v243_v9 = vld [vmem:[#allocation2 + $0x250] sm:$0xff]  ;;  %v13977_v12 = vcombine.low %v220_v59, %v224_v61 }
 0x112   :  { %1522 = vmatprep.subr.bf16.mxu1 %v14110_v11  ;;  %v13992_v11 = vcombine.high %v235_v0, %v239_v1  ;;  %v13999_v25 = vcombine.low %v243_v9, %v247_v10  ;;  %v287_v53 = vld [vmem:[#allocation2 + $0x3b0] sm:$0xff]  ;;  %v288_v0 = vld [vmem:[#allocation2 + $0x3b8] sm:$0xff] }
 0x114   :  { %1437 = vmatpush1.bf16.msra.mxu0 %v14107_v3  ;;  %v228_v3 = vld [vmem:[#allocation2 + $0x1d8] sm:$0xff] }
 0x115   :  { %1551 = vmatprep.subr.bf16.mxu0 %v13928_v6  ;;  %1523 = vmatpush1.bf16.msra.mxu1 %v14109_v17  ;;  %v13978_v6 = vcombine.high %v220_v59, %v224_v61  ;;  %v14000_v17 = vcombine.high %v243_v9, %v247_v10  ;;  %v13985_v19 = vcombine.low %v228_v3, %v232_v7  ;;  %v295_v61 = vld [vmem:[#allocation2 + $0x3f0] sm:$0xff]  ;;  %v292_v9 = vld [vmem:[#allocation2 + $0x3d8] sm:$0xff] }
 0x116   :  { %1637 = vmatprep.subr.bf16.mxu1 %v13930_v20  ;;  %v251_v20 = vld [vmem:[#allocation2 + $0x290] sm:$0xff]  ;;  %v296_v10 = vld [vmem:[#allocation2 + $0x3f8] sm:$0xff] }
 0x117   :  { %1455 = vmatmul.mubr.bf16.vlgmr.msra.gmra.mrb[0].mxu0 %v16571_v5  ;;  %v14007_v33 = vcombine.low %v251_v20, %v255_v21 }
 0x118   :  { %1552 = vmatpush1.bf16.msra.mxu0 %v13927_v13  ;;  %1583 = vmatprep.mubr.bf16.mxu0 %v16555_v41  ;;  %v236_v13 = vld [vmem:[#allocation2 + $0x218] sm:$0xff] }
 0x119   :  { %1553 = vmatprep.subr.bf16.mxu0 %v13936_v14  ;;  %1541 = vmatmul.mubr.bf16.vlgmr.msra.gmra.mrb[0].mxu1 %v16571_v5  ;;  %v13986_v14 = vcombine.high %v228_v3, %v232_v7  ;;  %v13993_v27 = vcombine.low %v236_v13, %v240_v15  ;;  %v303_v7 = vld [vmem:[#allocation2 + $0x430] sm:$0xff] }
 0x11a   :  { %1638 = vmatpush1.bf16.msra.mxu1 %v13929_v26  ;;  %1669 = vmatprep.mubr.bf16.mxu1 %v16555_v41  ;;  %v13953_v41 = vcombine.low %v196_v35, %v200_v37  ;;  %v14008_v26 = vcombine.high %v251_v20, %v255_v21  ;;  %v271_v37 = vld [vmem:[#allocation2 + $0x330] sm:$0xff] }
 0x11b   :  { %1639 = vmatprep.subr.bf16.mxu1 %v13938_v28  ;;  %v259_v28 = vld [vmem:[#allocation2 + $0x2d0] sm:$0xff] }
 0x11c   :  { %1554 = vmatpush1.bf16.msra.mxu0 %v13935_v22  ;;  %v13994_v22 = vcombine.high %v236_v13, %v240_v15  ;;  %v14015_v42 = vcombine.low %v259_v28, %v263_v29  ;;  %v311_v15 = vld [vmem:[#allocation2 + $0x470] sm:$0xff] }
 0x11d   :  { %1555 = vmatprep.subr.bf16.mxu0 %v13944_v23  ;;  %v244_v23 = vld [vmem:[#allocation2 + $0x258] sm:$0xff] }
 0x11e   :  { %1640 = vmatpush1.bf16.msra.mxu1 %v13937_v34  ;;  %v14016_v34 = vcombine.high %v259_v28, %v263_v29  ;;  %v14001_v35 = vcombine.low %v244_v23, %v248_v24 }
 0x11f   :  { %1641 = vmatprep.subr.bf16.mxu1 %v13946_v36  ;;  %v267_v36 = vld [vmem:[#allocation2 + $0x310] sm:$0xff] }
 0x120   :  { %1556 = vmatpush1.bf16.msra.mxu0 %v13943_v30  ;;  %v14002_v30 = vcombine.high %v244_v23, %v248_v24  ;;  %v14023_v50 = vcombine.low %v267_v36, %v271_v37  ;;  %v315_v23 = vld [vmem:[#allocation2 + $0x490] sm:$0xff] }
 0x121   :  { %1557 = vmatprep.subr.bf16.mxu0 %v13952_v31  ;;  %v252_v31 = vld [vmem:[#allocation2 + $0x298] sm:$0xff]  ;;  %v319_v24 = vld [vmem:[#allocation2 + $0x4b0] sm:$0xff] }
 0x122   :  { %1642 = vmatpush1.bf16.msra.mxu1 %v13945_v43  ;;  %v14024_v43 = vcombine.high %v267_v36, %v271_v37  ;;  %v14009_v44 = vcombine.low %v252_v31, %v256_v32  ;;  %v14072_v29 = vcombine.high %v315_v23, %v319_v24  ;;  %v14071_v36 = vcombine.low %v315_v23, %v319_v24 }
 0x123   :  { %1643 = vmatprep.subr.bf16.mxu1 %v13954_v45  ;;  %v275_v45 = vld [vmem:[#allocation2 + $0x350] sm:$0xff] }
 0x124   :  { %1558 = vmatpush1.bf16.msra.mxu0 %v13951_v38  ;;  %v14010_v38 = vcombine.high %v252_v31, %v256_v32  ;;  %v14031_v57 = vcombine.low %v275_v45, %v279_v46  ;;  %v323_v31 = vld [vmem:[#allocation2 + $0x4d0] sm:$0xff] }
 0x125   :  { %1559 = vmatprep.subr.bf16.mxu0 %v13960_v39  ;;  %v260_v39 = vld [vmem:[#allocation2 + $0x2d8] sm:$0xff]  ;;  %v327_v32 = vld [vmem:[#allocation2 + $0x4f0] sm:$0xff] }
 0x126   :  { %1644 = vmatpush1.bf16.msra.mxu1 %v13953_v41  ;;  %v14032_v41 = vcombine.high %v275_v45, %v279_v46  ;;  %v14017_v51 = vcombine.low %v260_v39, %v264_v40  ;;  %v14080_v37 = vcombine.high %v323_v31, %v327_v32  ;;  %v14079_v45 = vcombine.low %v323_v31, %v327_v32  ;;  %v1760_v31 = vld [vmem:[#allocation6 + $0x68] sm:$0xff] }
 0x127   :  { %1645 = vmatprep.subr.bf16.mxu1 %v13962_v52  ;;  %v283_v52 = vld [vmem:[#allocation2 + $0x390] sm:$0xff] }
 0x128   :  { %1560 = vmatpush1.bf16.msra.mxu0 %v13959_v47  ;;  %v14018_v47 = vcombine.high %v260_v39, %v264_v40  ;;  %v14039_v1 = vcombine.low %v283_v52, %v287_v53  ;;  %v331_v39 = vld [vmem:[#allocation2 + $0x510] sm:$0xff] }
 0x129   :  { %1561 = vmatprep.subr.bf16.mxu0 %v13968_v48  ;;  %v268_v48 = vld [vmem:[#allocation2 + $0x318] sm:$0xff]  ;;  %v335_v40 = vld [vmem:[#allocation2 + $0x530] sm:$0xff] }
 0x12a   :  { %1646 = vmatpush1.bf16.msra.mxu1 %v13961_v58  ;;  %v14040_v58 = vcombine.high %v283_v52, %v287_v53  ;;  %v14025_v59 = vcombine.low %v268_v48, %v272_v49  ;;  %v14088_v46 = vcombine.high %v331_v39, %v335_v40  ;;  %v347_v53 = vld [vmem:[#allocation2 + $0x590] sm:$0xff] }
 0x12b   :  { %1647 = vmatprep.subr.bf16.mxu1 %v13970_v60  ;;  %v291_v60 = vld [vmem:[#allocation2 + $0x3d0] sm:$0xff] }
 0x12c   :  { %1562 = vmatpush1.bf16.msra.mxu0 %v13967_v54  ;;  %v14026_v54 = vcombine.high %v268_v48, %v272_v49  ;;  %v339_v48 = vld [vmem:[#allocation2 + $0x550] sm:$0xff] }
 0x12d   :  { %1563 = vmatprep.subr.bf16.mxu0 %v13976_v55  ;;  %v276_v55 = vld [vmem:[#allocation2 + $0x358] sm:$0xff] }
 0x12e   :  { %1648 = vmatpush1.bf16.msra.mxu1 %v13969_v2  ;;  %v14048_v2 = vcombine.high %v291_v60, %v295_v61  ;;  %v14033_v3 = vcombine.low %v276_v55, %v280_v56 }
 0x12f   :  { %1649 = vmatprep.subr.bf16.mxu1 %v13978_v6  ;;  %v299_v6 = vld [vmem:[#allocation2 + $0x410] sm:$0xff] }
 0x130   :  { %1564 = vmatpush1.bf16.msra.mxu0 %v13975_v62  ;;  %v14034_v62 = vcombine.high %v276_v55, %v280_v56  ;;  %v14055_v20 = vcombine.low %v299_v6, %v303_v7  ;;  %v340_v56 = vld [vmem:[#allocation2 + $0x558] sm:$0xff] }
 0x131   :  { %1565 = vmatprep.subr.bf16.mxu0 %v13984_v63  ;;  %v284_v63 = vld [vmem:[#allocation2 + $0x398] sm:$0xff] }
 0x132   :  { %1650 = vmatpush1.bf16.msra.mxu1 %v13977_v12  ;;  %v14056_v12 = vcombine.high %v299_v6, %v303_v7  ;;  %v14041_v13 = vcombine.low %v284_v63, %v288_v0 }
 0x133   :  { %1651 = vmatprep.subr.bf16.mxu1 %v13986_v14  ;;  %v307_v14 = vld [vmem:[#allocation2 + $0x450] sm:$0xff] }
 0x134   :  { %1566 = vmatpush1.bf16.msra.mxu0 %v13983_v8  ;;  %v14042_v8 = vcombine.high %v284_v63, %v288_v0  ;;  %v14064_v21 = vcombine.high %v307_v14, %v311_v15  ;;  %v14063_v28 = vcombine.low %v307_v14, %v311_v15  ;;  %v348_v0 = vld [vmem:[#allocation2 + $0x598] sm:$0xff]  ;;  %v16581_v15 = vld [vmem:[#allocation6 + $0x400] sm:$0xff] }
 0x135   :  { %1567 = vmatprep.subr.bf16.mxu0 %v13992_v11  ;;  %v14047_v11 = vcombine.low %v291_v60, %v295_v61  ;;  %v355_v61 = vld [vmem:[#allocation2 + $0x5d0] sm:$0xff] }
 0x136   :  { %1652 = vmatpush1.bf16.msra.mxu1 %v13985_v19  ;;  %v304_v19 = vld [vmem:[#allocation2 + $0x438] sm:$0xff] }
 0x137   :  { %1653 = vmatprep.subr.bf16.mxu1 %v13994_v22  ;;  %v14049_v22 = vcombine.low %v292_v9, %v296_v10 }
 0x138   :  { %1568 = vmatpush1.bf16.msra.mxu0 %v13991_v16  ;;  %v14050_v16 = vcombine.high %v292_v9, %v296_v10  ;;  %v1751_v9 = vld [vmem:[#allocation6 + $0x20] sm:$0xff]  ;;  %v356_v10 = vld [vmem:[#allocation2 + $0x5d8] sm:$0xff] }
 0x139   :  { %1569 = vmatprep.subr.bf16.mxu0 %v14000_v17  ;;  %v300_v17 = vld [vmem:[#allocation2 + $0x418] sm:$0xff] }
 0x13a   :  { %1654 = vmatpush1.bf16.msra.mxu1 %v13993_v27  ;;  %v312_v27 = vld [vmem:[#allocation2 + $0x478] sm:$0xff] }
 0x13b   :  { %1655 = vmatprep.subr.bf16.mxu1 %v14002_v30  ;;  %v14057_v30 = vcombine.low %v300_v17, %v304_v19 }
 0x13c   :  { %1570 = vmatpush1.bf16.msra.mxu0 %v13999_v25  ;;  %v14058_v25 = vcombine.high %v300_v17, %v304_v19  ;;  %v1755_v19 = vld [vmem:[#allocation6 + $0x40] sm:$0xff] }
 0x13d   :  { %1571 = vmatprep.subr.bf16.mxu0 %v14008_v26  ;;  %v308_v26 = vld [vmem:[#allocation2 + $0x458] sm:$0xff] }
 0x13e   :  { %1656 = vmatpush1.bf16.msra.mxu1 %v14001_v35  ;;  %v320_v35 = vld [vmem:[#allocation2 + $0x4b8] sm:$0xff] }
 0x13f   :  { %1657 = vmatprep.subr.bf16.mxu1 %v14010_v38  ;;  %v14065_v38 = vcombine.low %v308_v26, %v312_v27 }
 0x140   :  { %1572 = vmatpush1.bf16.msra.mxu0 %v14007_v33  ;;  %v14066_v33 = vcombine.high %v308_v26, %v312_v27 }
 0x141   :  { %1573 = vmatprep.subr.bf16.mxu0 %v14016_v34  ;;  %v316_v34 = vld [vmem:[#allocation2 + $0x498] sm:$0xff] }
 0x142   :  { %1658 = vmatpush1.bf16.msra.mxu1 %v14009_v44  ;;  %v328_v44 = vld [vmem:[#allocation2 + $0x4f8] sm:$0xff] }
 0x143   :  { %1659 = vmatprep.subr.bf16.mxu1 %v14018_v47  ;;  %v14073_v47 = vcombine.low %v316_v34, %v320_v35 }
 0x144   :  { %1574 = vmatpush1.bf16.msra.mxu0 %v14015_v42  ;;  %v14074_v42 = vcombine.high %v316_v34, %v320_v35 }
 0x145   :  { %1575 = vmatprep.subr.bf16.mxu0 %v14024_v43  ;;  %v324_v43 = vld [vmem:[#allocation2 + $0x4d8] sm:$0xff] }
 0x146   :  { %1660 = vmatpush1.bf16.msra.mxu1 %v14017_v51  ;;  %v14082_v49 = vcombine.high %v324_v43, %v328_v44  ;;  %v14087_v51 = vcombine.low %v331_v39, %v335_v40  ;;  %v1768_v39 = vld [vmem:[#allocation6 + $0xa8] sm:$0xff] }
 0x147   :  { %1661 = vmatprep.subr.bf16.mxu1 %v14026_v54  ;;  %v351_v54 = vld [vmem:[#allocation2 + $0x5b0] sm:$0xff] }
 0x148   :  { %1576 = vmatpush1.bf16.msra.mxu0 %v14023_v50  ;;  %v332_v50 = vld [vmem:[#allocation2 + $0x518] sm:$0xff] }
 0x149   :  { %1577 = vmatprep.subr.bf16.mxu0 %v14032_v41  ;;  %v336_v41 = vld [vmem:[#allocation2 + $0x538] sm:$0xff] }
 0x14a   :  { %1662 = vmatpush1.bf16.msra.mxu1 %v14025_v59  ;;  %v14090_v55 = vcombine.high %v332_v50, %v336_v41  ;;  %v14104_v59 = vcombine.high %v347_v53, %v351_v54  ;;  %v14089_v60 = vcombine.low %v332_v50, %v336_v41  ;;  %v1787_v41 = vld [vmem:[#allocation6 + $0x140] sm:$0xff] }
 0x14b   :  { %1663 = vmatprep.subr.bf16.mxu1 %v14034_v62  ;;  %v359_v62 = vld [vmem:[#allocation2 + $0x5f0] sm:$0xff] }
 0x14c   :  { %1578 = vmatpush1.bf16.msra.mxu0 %v14031_v57  ;;  %v344_v57 = vld [vmem:[#allocation2 + $0x578] sm:$0xff] }
 0x14d   :  { %1579 = vmatprep.subr.bf16.mxu0 %v14040_v58  ;;  %v14098_v63 = vcombine.high %v340_v56, %v344_v57  ;;  %v14097_v6 = vcombine.low %v340_v56, %v344_v57  ;;  %v1795_v57 = vld [vmem:[#allocation6 + $0x180] sm:$0xff] }
 0x14e   :  { %1664 = vmatpush1.bf16.msra.mxu1 %v14033_v3  ;;  %v14112_v3 = vcombine.high %v355_v61, %v359_v62 }
 0x14f   :  { %1665 = vmatprep.subr.bf16.mxu1 %v14042_v8  ;;  %v1747_v8 = vld [vmem:[#allocation6] sm:$0xff] }
 0x150   :  { %1580 = vmatpush1.bf16.msra.mxu0 %v14039_v1  ;;  %v352_v1 = vld [vmem:[#allocation2 + $0x5b8] sm:$0xff]  ;;  %v14116_v14 = vcombine.high %v1747_v8, %v1751_v9  ;;  %v14115_v24 = vcombine.low %v1747_v8, %v1751_v9 }
 0x151   :  { %1581 = vmatprep.subr.bf16.mxu0 %v14048_v2  ;;  %v14103_v2 = vcombine.low %v347_v53, %v351_v54  ;;  %v14106_v7 = vcombine.high %v348_v0, %v352_v1 }
 0x152   :  { %1666 = vmatpush1.bf16.msra.mxu1 %v14041_v13  ;;  %v14105_v13 = vcombine.low %v348_v0, %v352_v1  ;;  %v1803_v1 = vld [vmem:[#allocation6 + $0x1c0] sm:$0xff] }
 0x153   :  { %1667 = vmatprep.subr.bf16.mxu1 %v14050_v16  ;;  %v16583_v16 = vld [vmem:[#allocation6 + $0x420] sm:$0xff] }
 0x154   :  { %1582 = vmatpush1.bf16.msra.mxu0 %v14047_v11  ;;  %v360_v11 = vld [vmem:[#allocation2 + $0x5f8] sm:$0xff]  ;;  %v14243_v23 = vcombine.low %v16581_v15, %v16583_v16 }
 0x155   :  { %1594 = vmatprep.subr.bf16.mxu0 %v14056_v12  ;;  %v14111_v12 = vcombine.low %v355_v61, %v359_v62  ;;  %v14114_v17 = vcombine.high %v356_v10, %v360_v11 }
 0x156   :  { %1668 = vmatpush1.bf16.msra.mxu1 %v14049_v22  ;;  %v1752_v22 = vld [vmem:[#allocation6 + $0x28] sm:$0xff] }
 0x157   :  { %1584 = vmatmul.mubr.bf16.vlgmr.msra.gmra.mrb[4].mxu0 %v16562_v4  ;;  %1680 = vmatprep.subr.bf16.mxu1 %v14058_v25  ;;  %v14113_v25 = vcombine.low %v356_v10, %v360_v11  ;;  %v1811_v11 = vld [vmem:[#allocation6 + $0x200] sm:$0xff] }
 0x158   :  { %1595 = vmatpush1.bf16.msra.mxu0 %v14055_v20  ;;  %1626 = vmatprep.mubr.bf16.mxu0 %v16359_v18  ;;  %v1759_v20 = vld [vmem:[#allocation6 + $0x60] sm:$0xff] }
 0x159   :  { %1596 = vmatprep.subr.bf16.mxu0 %v14064_v21  ;;  %1670 = vmatmul.mubr.bf16.vlgmr.msra.gmra.mrb[4].mxu1 %v16562_v4  ;;  %v343_v4 = vld [vmem:[#allocation2 + $0x570] sm:$0xff]  ;;  %v14124_v26 = vcombine.high %v1755_v19, %v1759_v20  ;;  %v14123_v32 = vcombine.low %v1755_v19, %v1759_v20 }
 0x15a   :  { %1681 = vmatpush1.bf16.msra.mxu1 %v14057_v30  ;;  %1712 = vmatprep.mubr.bf16.mxu1 %v16359_v18  ;;  %v14096_v52 = vcombine.high %v339_v48, %v343_v4  ;;  %v14081_v18 = vcombine.low %v324_v43, %v328_v44  ;;  %v14095_v58 = vcombine.low %v339_v48, %v343_v4  ;;  %v1748_v21 = vld [vmem:[#allocation6 + $0x8] sm:$0xff] }
 0x15b   :  { %1682 = vmatprep.subr.bf16.mxu1 %v14066_v33  ;;  %v14118_v27 = vcombine.high %v1748_v21, %v1752_v22  ;;  %v1756_v30 = vld [vmem:[#allocation6 + $0x48] sm:$0xff]  ;;  %v14117_v33 = vcombine.low %v1748_v21, %v1752_v22  ;;  %v1819_v22 = vld [vmem:[#allocation6 + $0x240] sm:$0xff] }
 0x15c   :  { %1597 = vmatpush1.bf16.msra.mxu0 %v14063_v28  ;;  %v1763_v28 = vld [vmem:[#allocation6 + $0x80] sm:$0xff]  ;;  %v14126_v35 = vcombine.high %v1756_v30, %v1760_v31  ;;  %v1776_v48 = vld [vmem:[#allocation6 + $0xe8] sm:$0xff] }
 0x15d   :  { %1598 = vmatprep.subr.bf16.mxu0 %v14072_v29  ;;  %v1767_v29 = vld [vmem:[#allocation6 + $0xa0] sm:$0xff] }
 0x15e   :  { %1683 = vmatpush1.bf16.msra.mxu1 %v14065_v38  ;;  %v14132_v34 = vcombine.high %v1763_v28, %v1767_v29  ;;  %v1764_v38 = vld [vmem:[#allocation6 + $0x88] sm:$0xff]  ;;  %v14131_v40 = vcombine.low %v1763_v28, %v1767_v29 }
 0x15f   :  { %1684 = vmatprep.subr.bf16.mxu1 %v14074_v42  ;;  %v14125_v42 = vcombine.low %v1756_v30, %v1760_v31  ;;  %v14134_v44 = vcombine.high %v1764_v38, %v1768_v39  ;;  %v1827_v31 = vld [vmem:[#allocation6 + $0x280] sm:$0xff] }
 0x160   :  { %1599 = vmatpush1.bf16.msra.mxu0 %v14071_v36  ;;  %v1771_v36 = vld [vmem:[#allocation6 + $0xc0] sm:$0xff] }
 0x161   :  { %1600 = vmatprep.subr.bf16.mxu0 %v14080_v37  ;;  %v1775_v37 = vld [vmem:[#allocation6 + $0xe0] sm:$0xff] }
 0x162   :  { %1685 = vmatpush1.bf16.msra.mxu1 %v14073_v47  ;;  %v14140_v43 = vcombine.high %v1771_v36, %v1775_v37  ;;  %v1772_v47 = vld [vmem:[#allocation6 + $0xc8] sm:$0xff]  ;;  %v14139_v4 = vcombine.low %v1771_v36, %v1775_v37 }
 0x163   :  { %1686 = vmatprep.subr.bf16.mxu1 %v14082_v49  ;;  %v14133_v49 = vcombine.low %v1764_v38, %v1768_v39  ;;  %v14141_v54 = vcombine.low %v1772_v47, %v1776_v48  ;;  %v1835_v39 = vld [vmem:[#allocation6 + $0x2c0] sm:$0xff] }
 0x164   :  { %1601 = vmatpush1.bf16.msra.mxu0 %v14079_v45  ;;  %v1779_v45 = vld [vmem:[#allocation6 + $0x100] sm:$0xff] }
 0x165   :  { %1602 = vmatprep.subr.bf16.mxu0 %v14088_v46  ;;  %v1783_v46 = vld [vmem:[#allocation6 + $0x120] sm:$0xff] }
 0x166   :  { %1687 = vmatpush1.bf16.msra.mxu1 %v14081_v18  ;;  %v14148_v50 = vcombine.high %v1779_v45, %v1783_v46  ;;  %v1784_v18 = vld [vmem:[#allocation6 + $0x128] sm:$0xff]  ;;  %v14147_v53 = vcombine.low %v1779_v45, %v1783_v46 }
 0x167   :  { %1688 = vmatprep.subr.bf16.mxu1 %v14090_v55 }
 0x168   :  { %1603 = vmatpush1.bf16.msra.mxu0 %v14087_v51  ;;  %v1791_v51 = vld [vmem:[#allocation6 + $0x160] sm:$0xff] }
 0x169   :  { %1604 = vmatprep.subr.bf16.mxu0 %v14096_v52  ;;  %v1780_v52 = vld [vmem:[#allocation6 + $0x108] sm:$0xff]  ;;  %v14156_v55 = vcombine.high %v1787_v41, %v1791_v51  ;;  %v14155_v61 = vcombine.low %v1787_v41, %v1791_v51 }
 0x16a   :  { %1689 = vmatpush1.bf16.msra.mxu1 %v14089_v60  ;;  %v14150_v56 = vcombine.high %v1780_v52, %v1784_v18  ;;  %v1792_v60 = vld [vmem:[#allocation6 + $0x168] sm:$0xff]  ;;  %v14149_v62 = vcombine.low %v1780_v52, %v1784_v18  ;;  %v1851_v18 = vld [vmem:[#allocation6 + $0x340] sm:$0xff] }
 0x16b   :  { %1690 = vmatprep.subr.bf16.mxu1 %v14098_v63 }
 0x16c   :  { %1605 = vmatpush1.bf16.msra.mxu0 %v14095_v58  ;;  %v1799_v58 = vld [vmem:[#allocation6 + $0x1a0] sm:$0xff] }
 0x16d   :  { %1606 = vmatprep.subr.bf16.mxu0 %v14104_v59  ;;  %v1788_v59 = vld [vmem:[#allocation6 + $0x148] sm:$0xff]  ;;  %v14164_v63 = vcombine.high %v1795_v57, %v1799_v58 }
 0x16e   :  { %1691 = vmatpush1.bf16.msra.mxu1 %v14097_v6  ;;  %v14158_v0 = vcombine.high %v1788_v59, %v1792_v60  ;;  %v1800_v6 = vld [vmem:[#allocation6 + $0x1a8] sm:$0xff]  ;;  %v14157_v8 = vcombine.low %v1788_v59, %v1792_v60  ;;  %v1859_v60 = vld [vmem:[#allocation6 + $0x380] sm:$0xff] }
 0x16f   :  { %1692 = vmatprep.subr.bf16.mxu1 %v14106_v7  ;;  %v14163_v7 = vcombine.low %v1795_v57, %v1799_v58 }
 0x170   :  { %1607 = vmatpush1.bf16.msra.mxu0 %v14103_v2  ;;  %v1807_v2 = vld [vmem:[#allocation6 + $0x1e0] sm:$0xff] }
 0x171   :  { %1608 = vmatprep.subr.bf16.mxu0 %v14112_v3  ;;  %v1796_v3 = vld [vmem:[#allocation6 + $0x188] sm:$0xff]  ;;  %v14172_v9 = vcombine.high %v1803_v1, %v1807_v2 }
 0x172   :  { %1693 = vmatpush1.bf16.msra.mxu1 %v14105_v13  ;;  %v14166_v10 = vcombine.high %v1796_v3, %v1800_v6  ;;  %v1804_v13 = vld [vmem:[#allocation6 + $0x1c8] sm:$0xff]  ;;  %v14165_v19 = vcombine.low %v1796_v3, %v1800_v6  ;;  %v1867_v6 = vld [vmem:[#allocation6 + $0x3c0] sm:$0xff] }
 0x173   :  { %1694 = vmatprep.subr.bf16.mxu1 %v14114_v17  ;;  %v14171_v17 = vcombine.low %v1803_v1, %v1807_v2 }
 0x174   :  { %1609 = vmatpush1.bf16.msra.mxu0 %v14111_v12  ;;  %v1815_v12 = vld [vmem:[#allocation6 + $0x220] sm:$0xff] }
 0x175   :  { %4861 = vmatprep.subr.bf16.mxu0 %v14116_v14  ;;  %v1808_v14 = vld [vmem:[#allocation6 + $0x1e8] sm:$0xff]  ;;  %v14180_v20 = vcombine.high %v1811_v11, %v1815_v12 }
 0x176   :  { %1695 = vmatpush1.bf16.msra.mxu1 %v14113_v25  ;;  %v14174_v21 = vcombine.high %v1804_v13, %v1808_v14  ;;  %v1812_v25 = vld [vmem:[#allocation6 + $0x208] sm:$0xff]  ;;  %v14173_v28 = vcombine.low %v1804_v13, %v1808_v14 }
 0x177   :  { %1627 = vmatmul.mubr.bf16.vlgmr.msra.gmra.mrb[4].mxu0 %v16571_v5  ;;  %5033 = vmatprep.subr.bf16.mxu1 %v14118_v27  ;;  %v14179_v27 = vcombine.low %v1811_v11, %v1815_v12  ;;  %v1868_v14 = vld [vmem:[#allocation6 + $0x3c8] sm:$0xff] }
 0x178   :  { %4862 = vmatpush1.bf16.msra.mxu0 %v14115_v24  ;;  %v1823_v24 = vld [vmem:[#allocation6 + $0x260] sm:$0xff] }
 0x179   :  { %4863 = vmatprep.subr.bf16.mxu0 %v14124_v26  ;;  %1713 = vmatmul.mubr.bf16.vlgmr.msra.gmra.mrb[4].mxu1 %v16571_v5  ;;  %v14142_v5 = vcombine.high %v1772_v47, %v1776_v48  ;;  %v1816_v26 = vld [vmem:[#allocation6 + $0x228] sm:$0xff]  ;;  %v14188_v29 = vcombine.high %v1819_v22, %v1823_v24  ;;  %v1843_v48 = vld [vmem:[#allocation6 + $0x300] sm:$0xff] }
 0x17a   :  { %5034 = vmatpush1.bf16.msra.mxu1 %v14117_v33  ;;  %v14182_v30 = vcombine.high %v1812_v25, %v1816_v26  ;;  %v1820_v33 = vld [vmem:[#allocation6 + $0x248] sm:$0xff]  ;;  %v14181_v36 = vcombine.low %v1812_v25, %v1816_v26 }
 0x17b   :  { %5035 = vmatprep.subr.bf16.mxu1 %v14126_v35  ;;  %v14187_v35 = vcombine.low %v1819_v22, %v1823_v24  ;;  %v16591_v24 = vld [vmem:[#allocation6 + $0x408] sm:$0xff] }
 0x17c   :  { %4864 = vmatpush1.bf16.msra.mxu0 %v14123_v32  ;;  %v1831_v32 = vld [vmem:[#allocation6 + $0x2a0] sm:$0xff]  ;;  %v1880_v25 = vld [vmem:[#allocation6 + $0x428] sm:$0xff] }
 0x17d   :  { %4865 = vmatprep.subr.bf16.mxu0 %v14132_v34  ;;  %v1824_v34 = vld [vmem:[#allocation6 + $0x268] sm:$0xff]  ;;  %v14196_v37 = vcombine.high %v1827_v31, %v1831_v32 }
 0x17e   :  { %5036 = vmatpush1.bf16.msra.mxu1 %v14125_v42  ;;  %v14190_v38 = vcombine.high %v1820_v33, %v1824_v34  ;;  %v1828_v42 = vld [vmem:[#allocation6 + $0x288] sm:$0xff]  ;;  %v14189_v45 = vcombine.low %v1820_v33, %v1824_v34 }
 0x17f   :  { %5037 = vmatprep.subr.bf16.mxu1 %v14134_v44  ;;  %v14195_v44 = vcombine.low %v1827_v31, %v1831_v32  ;;  %v16599_v31 = vld [vmem:[#allocation4] sm:$0xff] }
 0x180   :  { %4866 = vmatpush1.bf16.msra.mxu0 %v14131_v40  ;;  %v1839_v40 = vld [vmem:[#allocation6 + $0x2e0] sm:$0xff] }
 0x181   :  { %4867 = vmatprep.subr.bf16.mxu0 %v14140_v43  ;;  %v1832_v43 = vld [vmem:[#allocation6 + $0x2a8] sm:$0xff]  ;;  %v14204_v46 = vcombine.high %v1835_v39, %v1839_v40 }
 0x182   :  { %5038 = vmatpush1.bf16.msra.mxu1 %v14133_v49  ;;  %v14198_v47 = vcombine.high %v1828_v42, %v1832_v43  ;;  %v1836_v49 = vld [vmem:[#allocation6 + $0x2c8] sm:$0xff]  ;;  %v14197_v41 = vcombine.low %v1828_v42, %v1832_v43 }
 0x183   :  { %5039 = vmatprep.subr.bf16.mxu1 %v14142_v5  ;;  %v14203_v5 = vcombine.low %v1835_v39, %v1839_v40 }
 0x184   :  { %4868 = vmatpush1.bf16.msra.mxu0 %v14139_v4  ;;  %v1847_v4 = vld [vmem:[#allocation6 + $0x320] sm:$0xff] }
 0x185   :  { %4869 = vmatprep.subr.bf16.mxu0 %v14148_v50  ;;  %v1840_v50 = vld [vmem:[#allocation6 + $0x2e8] sm:$0xff]  ;;  %v14212_v51 = vcombine.high %v1843_v48, %v1847_v4 }
 0x186   :  { %5040 = vmatpush1.bf16.msra.mxu1 %v14141_v54  ;;  %v14206_v52 = vcombine.high %v1836_v49, %v1840_v50  ;;  %v1844_v54 = vld [vmem:[#allocation6 + $0x308] sm:$0xff]  ;;  %v14205_v57 = vcombine.low %v1836_v49, %v1840_v50  ;;  %v1883_v49 = vld [vmem:[#allocation6 + $0x440] sm:$0xff] }
 0x187   :  { %5041 = vmatprep.subr.bf16.mxu1 %v14150_v56  ;;  %v14211_v56 = vcombine.low %v1843_v48, %v1847_v4 }
 0x188   :  { %4870 = vmatpush1.bf16.msra.mxu0 %v14147_v53  ;;  %v1855_v53 = vld [vmem:[#allocation6 + $0x360] sm:$0xff] }
 0x189   :  { %4871 = vmatprep.subr.bf16.mxu0 %v14156_v55  ;;  %v1848_v55 = vld [vmem:[#allocation6 + $0x328] sm:$0xff]  ;;  %v14220_v58 = vcombine.high %v1851_v18, %v1855_v53 }
 0x18a   :  { %5042 = vmatpush1.bf16.msra.mxu1 %v14149_v62  ;;  %v14214_v59 = vcombine.high %v1844_v54, %v1848_v55  ;;  %v1852_v62 = vld [vmem:[#allocation6 + $0x348] sm:$0xff]  ;;  %v14213_v1 = vcombine.low %v1844_v54, %v1848_v55 }
 0x18b   :  { %5043 = vmatprep.subr.bf16.mxu1 %v14158_v0  ;;  %v14219_v0 = vcombine.low %v1851_v18, %v1855_v53  ;;  %v1888_v18 = vld [vmem:[#allocation6 + $0x468] sm:$0xff] }
 0x18c   :  { %4872 = vmatpush1.bf16.msra.mxu0 %v14155_v61  ;;  %v1863_v61 = vld [vmem:[#allocation6 + $0x3a0] sm:$0xff] }
 0x18d   :  { %4873 = vmatprep.subr.bf16.mxu0 %v14164_v63  ;;  %v1856_v63 = vld [vmem:[#allocation6 + $0x368] sm:$0xff]  ;;  %v14228_v2 = vcombine.high %v1859_v60, %v1863_v61 }
 0x18e   :  { %5044 = vmatpush1.bf16.msra.mxu1 %v14157_v8  ;;  %v14222_v3 = vcombine.high %v1852_v62, %v1856_v63  ;;  %v1860_v8 = vld [vmem:[#allocation6 + $0x388] sm:$0xff]  ;;  %v14221_v11 = vcombine.low %v1852_v62, %v1856_v63 }
 0x18f   :  { %5045 = vmatprep.subr.bf16.mxu1 %v14166_v10  ;;  %v14227_v10 = vcombine.low %v1859_v60, %v1863_v61 }
 0x190   :  { %4874 = vmatpush1.bf16.msra.mxu0 %v14163_v7  ;;  %v1871_v7 = vld [vmem:[#allocation6 + $0x3e0] sm:$0xff] }
 0x191   :  { %4875 = vmatprep.subr.bf16.mxu0 %v14172_v9  ;;  %v1864_v9 = vld [vmem:[#allocation6 + $0x3a8] sm:$0xff]  ;;  %v14236_v12 = vcombine.high %v1867_v6, %v1871_v7 }
 0x192   :  { %5046 = vmatpush1.bf16.msra.mxu1 %v14165_v19  ;;  %v14230_v13 = vcombine.high %v1860_v8, %v1864_v9  ;;  %v14235_v19 = vcombine.low %v1867_v6, %v1871_v7  ;;  %v1895_v6 = vld [vmem:[#allocation6 + $0x4a0] sm:$0xff]  ;;  %v1892_v7 = vld [vmem:[#allocation6 + $0x488] sm:$0xff] }
 0x193   :  { %5047 = vmatprep.subr.bf16.mxu1 %v14174_v21  ;;  %v14244_v21 = vcombine.high %v16581_v15, %v16583_v16 }
 0x194   :  { %4876 = vmatpush1.bf16.msra.mxu0 %v14171_v17  ;;  %v1872_v17 = vld [vmem:[#allocation6 + $0x3e8] sm:$0xff] }
 0x195   :  { %4877 = vmatprep.subr.bf16.mxu0 %v14180_v20  ;;  %v14229_v20 = vcombine.low %v1860_v8, %v1864_v9  ;;  %v14238_v22 = vcombine.high %v1868_v14, %v1872_v17  ;;  %v14237_v26 = vcombine.low %v1868_v14, %v1872_v17  ;;  %v1896_v8 = vld [vmem:[#allocation6 + $0x4a8] sm:$0xff] }
 0x196   :  { %5048 = vmatpush1.bf16.msra.mxu1 %v14173_v28  ;;  %v363_v28 = vlaneseq  ;;  %v14262_v17 = vcombine.high %v1892_v7, %v1896_v8  ;;  %v14261_v16 = vcombine.low %v1892_v7, %v1896_v8 }
 0x197   :  { %5049 = vmatprep.subr.bf16.mxu1 %v14182_v30 }
 0x198   :  { %4878 = vmatpush1.bf16.msra.mxu0 %v14179_v27  ;;  %v14246_v27 = vcombine.high %v16591_v24, %v1880_v25 }
 0x199   :  { %4879 = vmatprep.subr.bf16.mxu0 %v14188_v29  ;;  %v16594_v29 = vshrl.u32 %v363_v28, 7  ;;  %v1908_v28 = vld [vmem:[#allocation6 + $0x508] sm:$0xff] }
 0x19a   :  { %5050 = vmatpush1.bf16.msra.mxu1 %v14181_v36 }
 0x19b   :  { %5051 = vmatprep.subr.bf16.mxu1 %v14190_v38  ;;  %v16597_v30 = vsub.s32 0, %v16594_v29  ;;  %v16602_v32 = vsub.s32 1, %v16594_v29  ;;  %v16612_v36 = vsub.s32 3, %v16594_v29 }
 0x19c   :  { %4880 = vmatpush1.bf16.msra.mxu0 %v14187_v35  ;;  %v16609_v35 = vsub.s32 2, %v16594_v29 }
 0x19d   :  { %4881 = vmatprep.subr.bf16.mxu0 %v14196_v37  ;;  %v366_v33 = vrot.slane %v16599_v31, %v16597_v30  ;;  %v370_v34 = vrot.slane %v16599_v31, %v16602_v32 }
 0x19e   :  { %5052 = vmatpush1.bf16.msra.mxu1 %v14189_v45  ;;  %v374_v43 = vrot.slane %v16599_v31, %v16609_v35 }
 0x19f   :  { %5053 = vmatprep.subr.bf16.mxu1 %v14198_v47 }
 0x1a0   :  { %4882 = vmatpush1.bf16.msra.mxu0 %v14195_v44 }
 0x1a1   :  { %4883 = vmatprep.subr.bf16.mxu0 %v14204_v46  ;;  %v378_v46 = vrot.slane %v16599_v31, %v16612_v36 }
 0x1a2   :  { %5054 = vmatpush1.bf16.msra.mxu1 %v14197_v41 }
 0x1a3   :  { %5055 = vmatprep.subr.bf16.mxu1 %v14206_v52  ;;  %v1884_v52 = vld [vmem:[#allocation6 + $0x448] sm:$0xff] }
 0x1a4   :  { %4884 = vmatpush1.bf16.msra.mxu0 %v14203_v5 }
 0x1a5   :  { %4885 = vmatprep.subr.bf16.mxu0 %v14212_v51  ;;  %v1887_v51 = vld [vmem:[#allocation6 + $0x460] sm:$0xff] }
 0x1a6   :  { %5056 = vmatpush1.bf16.msra.mxu1 %v14205_v57  ;;  %v14252_v63 = vcombine.high %v1883_v49, %v1887_v51 }
 0x1a7   :  { %5057 = vmatprep.subr.bf16.mxu1 %v14214_v59  ;;  %v14245_v59 = vcombine.low %v16591_v24, %v1880_v25  ;;  %v1904_v24 = vld [vmem:[#allocation6 + $0x4e8] sm:$0xff] }
 0x1a8   :  { %4886 = vmatpush1.bf16.msra.mxu0 %v14211_v56 }
 0x1a9   :  { %4887 = vmatprep.subr.bf16.mxu0 %v14220_v58 }
 0x1aa   :  { %5058 = vmatpush1.bf16.msra.mxu1 %v14213_v1  ;;  %v1891_v1 = vld [vmem:[#allocation6 + $0x480] sm:$0xff] }
 0x1ab   :  { %5059 = vmatprep.subr.bf16.mxu1 %v14222_v3  ;;  %v14260_v14 = vcombine.high %v1891_v1, %v1895_v6  ;;  %v14259_v15 = vcombine.low %v1891_v1, %v1895_v6  ;;  %v1940_v1 = vld [vmem:[#allocation6 + $0x608] sm:$0xff] }
 0x1ac   :  { %4888 = vmatpush1.bf16.msra.mxu0 %v14219_v0  ;;  %v14254_v0 = vcombine.high %v1884_v52, %v1888_v18 }
 0x1ad   :  { %4889 = vmatprep.subr.bf16.mxu0 %v14228_v2 }
 0x1ae   :  { %5060 = vmatpush1.bf16.msra.mxu1 %v14221_v11  ;;  %v14251_v11 = vcombine.low %v1883_v49, %v1887_v51  ;;  %v1927_v49 = vld [vmem:[#allocation6 + $0x5a0] sm:$0xff] }
 0x1af   :  { %5061 = vmatprep.subr.bf16.mxu1 %v14230_v13 }
 0x1b0   :  { %4890 = vmatpush1.bf16.msra.mxu0 %v14227_v10 }
 0x1b1   :  { %4891 = vmatprep.subr.bf16.mxu0 %v14236_v12  ;;  %v14253_v12 = vcombine.low %v1884_v52, %v1888_v18 }
 0x1b2   :  { %5062 = vmatpush1.bf16.msra.mxu1 %v14229_v20 }
 0x1b3   :  { %5063 = vmatprep.subr.bf16.mxu1 %v14238_v22  ;;  %v1900_v22 = vld [vmem:[#allocation6 + $0x4c8] sm:$0xff] }
 0x1b4   :  { %4892 = vmatpush1.bf16.msra.mxu0 %v14235_v19  ;;  %v1899_v19 = vld [vmem:[#allocation6 + $0x4c0] sm:$0xff]  ;;  %v14270_v25 = vcombine.high %v1900_v22, %v1904_v24 }
 0x1b5   :  { %4904 = vmatprep.subr.bf16.mxu0 %v14244_v21  ;;  %v1903_v21 = vld [vmem:[#allocation6 + $0x4e0] sm:$0xff] }
 0x1b6   :  { %5064 = vmatpush1.bf16.msra.mxu1 %v14237_v26  ;;  %v1907_v26 = vld [vmem:[#allocation6 + $0x500] sm:$0xff] }
 0x1b7   :  { %5076 = vmatprep.subr.bf16.mxu1 %v14246_v27  ;;  %v1911_v27 = vld [vmem:[#allocation6 + $0x520] sm:$0xff] }
 0x1ea   :  { %v1456_v37 = vpop.f32.mrb[0].mxu0 }
 0x1eb   :  { %v15804_v38 = vadd.f32 %v1456_v37, %v366_v33  ;;  %v1458_v39 = vpop.f32.mrb[1].mxu0  ;;  %v14269_v37 = vcombine.low %v1900_v22, %v1904_v24  ;;  %v1955_v22 = vld [vmem:[#allocation6 + $0x680] sm:$0xff] }
 0x1ec   :  { %v15805_v40 = vadd.f32 %v1458_v39, %v370_v34  ;;  %v1460_v42 = vpop.f32.mrb[2].mxu0  ;;  %v1542_v50 = vpop.f32.mrb[0].mxu1  ;;  %v1959_v24 = vld [vmem:[#allocation6 + $0x6a0] sm:$0xff] }
 0x1ed   :  { %v15806_v44 = vadd.f32 %v1460_v42, %v366_v33  ;;  %v1462_v45 = vpop.f32.mrb[3].mxu0  ;;  %v1723_v48 = vmax.f32 %v15804_v38, 0.0  ;;  %v15808_v53 = vadd.f32 %v1542_v50, %v374_v43  ;;  %v1544_v54 = vpop.f32.mrb[1].mxu1  ;;  %v1912_v33 = vld [vmem:[#allocation6 + $0x528] sm:$0xff]  ;;  %v14276_v38 = vcombine.high %v1907_v26, %v1911_v27  ;;  %v1919_v42 = vld [vmem:[#allocation6 + $0x560] sm:$0xff] }
 0x1ee   :  { %v15807_v47 = vadd.f32 %v1462_v45, %v370_v34  ;;  %v1724_v5 = vmax.f32 %v15805_v40, 0.0  ;;  %v15809_v56 = vadd.f32 %v1544_v54, %v378_v46  ;;  %v1546_v57 = vpop.f32.mrb[2].mxu1  ;;  %v14267_v34 = vcombine.low %v1899_v19, %v1903_v21  ;;  %v1915_v40 = vld [vmem:[#allocation6 + $0x540] sm:$0xff]  ;;  %v1924_v50 = vld [vmem:[#allocation6 + $0x588] sm:$0xff] }
 0x1ef   :  { %v1731_v4 = vmax.f32 %v15806_v44, 0.0  ;;  %v1725_v60 = vmax.f32 %v15808_v53, 0.0  ;;  %v15810_v61 = vadd.f32 %v1546_v57, %v374_v43  ;;  %v1548_v62 = vpop.f32.mrb[3].mxu1  ;;  %v14278_v39 = vcombine.high %v1908_v28, %v1912_v33  ;;  %v1916_v43 = vld [vmem:[#allocation6 + $0x548] sm:$0xff]  ;;  %v1931_v53 = vld [vmem:[#allocation6 + $0x5c0] sm:$0xff] }
 0x1f0   :  { %v1732_v41 = vmax.f32 %v15807_v47, 0.0  ;;  %v1726_v2 = vmax.f32 %v15809_v56, 0.0  ;;  %v15811_v3 = vadd.f32 %v1548_v62, %v378_v46  ;;  %v1920_v44 = vld [vmem:[#allocation6 + $0x568] sm:$0xff]  ;;  %v14275_v45 = vcombine.low %v1907_v26, %v1911_v27  ;;  %v1935_v54 = vld [vmem:[#allocation6 + $0x5e0] sm:$0xff] }
 0x1f1   :  { %v16618_v55 = vpack.c.bf16 %v1731_v4, %v1723_v48  ;;  %v1733_v9 = vmax.f32 %v15810_v61, 0.0  ;;  %v14277_v46 = vcombine.low %v1908_v28, %v1912_v33  ;;  %v14284_v47 = vcombine.high %v1915_v40, %v1919_v42  ;;  %v1923_v4 = vld [vmem:[#allocation6 + $0x580] sm:$0xff]  ;;  %v1932_v56 = vld [vmem:[#allocation6 + $0x5c8] sm:$0xff] }
 0x1f2   :  { %v16620_v58 = vpack.c.bf16 %v1732_v41, %v1724_v5  ;;  %v1734_v10 = vmax.f32 %v15811_v3, 0.0  ;;  %v14286_v48 = vcombine.high %v1916_v43, %v1920_v44  ;;  %v1928_v5 = vld [vmem:[#allocation6 + $0x5a8] sm:$0xff]  ;;  %v14283_v41 = vcombine.low %v1915_v40, %v1919_v42  ;;  %v1963_v28 = vld [vmem:[#allocation6 + $0x6c0] sm:$0xff] }
 0x1f3   :  { %v16630_v13 = vpack.c.bf16 %v1733_v9, %v1725_v60  ;;  %v14285_v51 = vcombine.low %v1916_v43, %v1920_v44  ;;  %v14292_v52 = vcombine.high %v1923_v4, %v1927_v49  ;;  %v14294_v18 = vcombine.high %v1924_v50, %v1928_v5  ;;  %v1936_v57 = vld [vmem:[#allocation6 + $0x5e8] sm:$0xff]  ;;  %v1947_v9 = vld [vmem:[#allocation6 + $0x640] sm:$0xff] }
 0x1f4   :  { %4893 = vmatprep.mubr.bf16.mxu0 %v16620_v58  ;;  %5065 = vmatprep.mubr.bf16.mxu1 %v16620_v58  ;;  %v16632_v20 = vpack.c.bf16 %v1734_v10, %v1726_v2  ;;  %v14293_v60 = vcombine.low %v1924_v50, %v1928_v5  ;;  %v14300_v61 = vcombine.high %v1931_v53, %v1935_v54  ;;  %v1944_v2 = vld [vmem:[#allocation6 + $0x628] sm:$0xff]  ;;  %v1951_v10 = vld [vmem:[#allocation6 + $0x660] sm:$0xff] }
 0x1f5   :  { %4894 = vmatmul.mubr.bf16.vlgmr.msra.gmra.mrb[8].mxu0 %v16618_v55  ;;  %5066 = vmatmul.mubr.bf16.vlgmr.msra.gmra.mrb[8].mxu1 %v16618_v55  ;;  %v14302_v62 = vcombine.high %v1932_v56, %v1936_v57  ;;  %v14299_v3 = vcombine.low %v1931_v53, %v1935_v54  ;;  %v14301_v6 = vcombine.low %v1932_v56, %v1936_v57  ;;  %v1967_v33 = vld [vmem:[#allocation6 + $0x6e0] sm:$0xff] }
 0x1f6   :  { %4905 = vmatpush1.bf16.msra.mxu0 %v14243_v23  ;;  %5077 = vmatpush1.bf16.msra.mxu1 %v14245_v59  ;;  %v14268_v23 = vcombine.high %v1899_v19, %v1903_v21  ;;  %v14291_v59 = vcombine.low %v1923_v4, %v1927_v49  ;;  %v14310_v8 = vcombine.high %v1940_v1, %v1944_v2  ;;  %v1971_v43 = vld [vmem:[#allocation6 + $0x700] sm:$0xff] }
 0x1f7   :  { %4906 = vmatprep.subr.bf16.mxu0 %v14252_v63  ;;  %5078 = vmatprep.subr.bf16.mxu1 %v14254_v0  ;;  %v1939_v63 = vld [vmem:[#allocation6 + $0x600] sm:$0xff]  ;;  %v14316_v19 = vcombine.high %v1947_v9, %v1951_v10  ;;  %v14324_v26 = vcombine.high %v1955_v22, %v1959_v24  ;;  %v14332_v40 = vcombine.high %v1963_v28, %v1967_v33 }
 0x1f8   :  { %4936 = vmatprep.mubr.bf16.mxu0 %v16632_v20  ;;  %5108 = vmatprep.mubr.bf16.mxu1 %v16632_v20  ;;  %v1943_v0 = vld [vmem:[#allocation6 + $0x620] sm:$0xff] }
 0x1f9   :  { %v14308_v7 = vcombine.high %v1939_v63, %v1943_v0  ;;  %v1975_v44 = vld [vmem:[#allocation6 + $0x720] sm:$0xff] }
 0x1fa   :  { %4907 = vmatpush1.bf16.msra.mxu0 %v14251_v11  ;;  %5079 = vmatpush1.bf16.msra.mxu1 %v14253_v12  ;;  %v1948_v11 = vld [vmem:[#allocation6 + $0x648] sm:$0xff]  ;;  %v14340_v4 = vcombine.high %v1971_v43, %v1975_v44  ;;  %v1979_v50 = vld [vmem:[#allocation6 + $0x740] sm:$0xff] }
 0x1fb   :  { %4908 = vmatprep.subr.bf16.mxu0 %v14260_v14  ;;  %5080 = vmatprep.subr.bf16.mxu1 %v14262_v17  ;;  %v1952_v12 = vld [vmem:[#allocation6 + $0x668] sm:$0xff]  ;;  %v14307_v14 = vcombine.low %v1939_v63, %v1943_v0  ;;  %v14309_v17 = vcombine.low %v1940_v1, %v1944_v2  ;;  %v1983_v5 = vld [vmem:[#allocation6 + $0x760] sm:$0xff] }
 0x1fc   :  { %v14318_v21 = vcombine.high %v1948_v11, %v1952_v12  ;;  %v14348_v53 = vcombine.high %v1979_v50, %v1983_v5  ;;  %v1987_v56 = vld [vmem:[#allocation6 + $0x780] sm:$0xff] }
 0x1fd   :  { %v1991_v57 = vld [vmem:[#allocation6 + $0x7a0] sm:$0xff] }
 0x1fe   :  { %4909 = vmatpush1.bf16.msra.mxu0 %v14259_v15  ;;  %5081 = vmatpush1.bf16.msra.mxu1 %v14261_v16  ;;  %v1956_v15 = vld [vmem:[#allocation6 + $0x688] sm:$0xff]  ;;  %v14356_v63 = vcombine.high %v1987_v56, %v1991_v57  ;;  %v1995_v1 = vld [vmem:[#allocation6 + $0x7c0] sm:$0xff] }
 0x1ff   :  { %4910 = vmatprep.subr.bf16.mxu0 %v14268_v23  ;;  %5082 = vmatprep.subr.bf16.mxu1 %v14270_v25  ;;  %v1960_v16 = vld [vmem:[#allocation6 + $0x6a8] sm:$0xff]  ;;  %v14315_v23 = vcombine.low %v1947_v9, %v1951_v10  ;;  %v14317_v25 = vcombine.low %v1948_v11, %v1952_v12  ;;  %v1999_v2 = vld [vmem:[#allocation6 + $0x7e0] sm:$0xff] }
 0x200   :  { %v14326_v27 = vcombine.high %v1956_v15, %v1960_v16  ;;  %v14364_v9 = vcombine.high %v1995_v1, %v1999_v2  ;;  %v2003_v11 = vld [vmem:[#allocation6 + $0x800] sm:$0xff] }
 0x201   :  { %v2007_v12 = vld [vmem:[#allocation6 + $0x820] sm:$0xff] }
 0x202   :  { %4911 = vmatpush1.bf16.msra.mxu0 %v14267_v34  ;;  %5083 = vmatpush1.bf16.msra.mxu1 %v14269_v37  ;;  %v1964_v34 = vld [vmem:[#allocation6 + $0x6c8] sm:$0xff] }
 0x203   :  { %4912 = vmatprep.subr.bf16.mxu0 %v14276_v38  ;;  %5084 = vmatprep.subr.bf16.mxu1 %v14278_v39  ;;  %v1968_v37 = vld [vmem:[#allocation6 + $0x6e8] sm:$0xff]  ;;  %v14323_v38 = vcombine.low %v1955_v22, %v1959_v24  ;;  %v14325_v39 = vcombine.low %v1956_v15, %v1960_v16  ;;  %v14372_v22 = vcombine.high %v2003_v11, %v2007_v12  ;;  %v2011_v15 = vld [vmem:[#allocation6 + $0x840] sm:$0xff] }
 0x204   :  { %v14334_v42 = vcombine.high %v1964_v34, %v1968_v37  ;;  %v2015_v16 = vld [vmem:[#allocation6 + $0x860] sm:$0xff] }
 0x206   :  { %4913 = vmatpush1.bf16.msra.mxu0 %v14275_v45  ;;  %5085 = vmatpush1.bf16.msra.mxu1 %v14277_v46  ;;  %v1972_v45 = vld [vmem:[#allocation6 + $0x708] sm:$0xff] }
 0x207   :  { %4914 = vmatprep.subr.bf16.mxu0 %v14284_v47  ;;  %5086 = vmatprep.subr.bf16.mxu1 %v14286_v48  ;;  %v1976_v46 = vld [vmem:[#allocation6 + $0x728] sm:$0xff]  ;;  %v14331_v47 = vcombine.low %v1963_v28, %v1967_v33  ;;  %v14333_v48 = vcombine.low %v1964_v34, %v1968_v37  ;;  %v14380_v28 = vcombine.high %v2011_v15, %v2015_v16  ;;  %v2019_v34 = vld [vmem:[#allocation6 + $0x880] sm:$0xff] }
 0x208   :  { %v14342_v49 = vcombine.high %v1972_v45, %v1976_v46  ;;  %v2023_v37 = vld [vmem:[#allocation6 + $0x8a0] sm:$0xff] }
 0x20a   :  { %4915 = vmatpush1.bf16.msra.mxu0 %v14283_v41  ;;  %5087 = vmatpush1.bf16.msra.mxu1 %v14285_v51  ;;  %v1980_v41 = vld [vmem:[#allocation6 + $0x748] sm:$0xff] }
 0x20b   :  { %4916 = vmatprep.subr.bf16.mxu0 %v14292_v52  ;;  %5088 = vmatprep.subr.bf16.mxu1 %v14294_v18  ;;  %v1984_v51 = vld [vmem:[#allocation6 + $0x768] sm:$0xff]  ;;  %v14339_v52 = vcombine.low %v1971_v43, %v1975_v44  ;;  %v14341_v18 = vcombine.low %v1972_v45, %v1976_v46  ;;  %v14388_v43 = vcombine.high %v2019_v34, %v2023_v37  ;;  %v2027_v45 = vld [vmem:[#allocation6 + $0x8c0] sm:$0xff] }
 0x20c   :  { %v14350_v54 = vcombine.high %v1980_v41, %v1984_v51  ;;  %v2031_v46 = vld [vmem:[#allocation6 + $0x8e0] sm:$0xff] }
 0x20e   :  { %4917 = vmatpush1.bf16.msra.mxu0 %v14291_v59  ;;  %5089 = vmatpush1.bf16.msra.mxu1 %v14293_v60  ;;  %v1988_v59 = vld [vmem:[#allocation6 + $0x788] sm:$0xff] }
 0x20f   :  { %4918 = vmatprep.subr.bf16.mxu0 %v14300_v61  ;;  %5090 = vmatprep.subr.bf16.mxu1 %v14302_v62  ;;  %v1992_v60 = vld [vmem:[#allocation6 + $0x7a8] sm:$0xff]  ;;  %v14347_v61 = vcombine.low %v1979_v50, %v1983_v5  ;;  %v14349_v62 = vcombine.low %v1980_v41, %v1984_v51  ;;  %v14396_v50 = vcombine.high %v2027_v45, %v2031_v46  ;;  %v2035_v41 = vld [vmem:[#allocation6 + $0x900] sm:$0xff] }
 0x210   :  { %v14358_v0 = vcombine.high %v1988_v59, %v1992_v60  ;;  %v2039_v51 = vld [vmem:[#allocation6 + $0x920] sm:$0xff] }
 0x212   :  { %4919 = vmatpush1.bf16.msra.mxu0 %v14299_v3  ;;  %5091 = vmatpush1.bf16.msra.mxu1 %v14301_v6  ;;  %v1996_v3 = vld [vmem:[#allocation6 + $0x7c8] sm:$0xff] }
 0x213   :  { %4920 = vmatprep.subr.bf16.mxu0 %v14308_v7  ;;  %5092 = vmatprep.subr.bf16.mxu1 %v14310_v8  ;;  %v2000_v6 = vld [vmem:[#allocation6 + $0x7e8] sm:$0xff]  ;;  %v14355_v7 = vcombine.low %v1987_v56, %v1991_v57  ;;  %v14357_v8 = vcombine.low %v1988_v59, %v1992_v60  ;;  %v14404_v56 = vcombine.high %v2035_v41, %v2039_v51  ;;  %v2043_v59 = vld [vmem:[#allocation6 + $0x940] sm:$0xff] }
 0x214   :  { %v14366_v10 = vcombine.high %v1996_v3, %v2000_v6  ;;  %v2047_v60 = vld [vmem:[#allocation6 + $0x960] sm:$0xff] }
 0x216   :  { %4921 = vmatpush1.bf16.msra.mxu0 %v14307_v14  ;;  %5093 = vmatpush1.bf16.msra.mxu1 %v14309_v17  ;;  %v2004_v14 = vld [vmem:[#allocation6 + $0x808] sm:$0xff] }
 0x217   :  { %4922 = vmatprep.subr.bf16.mxu0 %v14316_v19  ;;  %5094 = vmatprep.subr.bf16.mxu1 %v14318_v21  ;;  %v2008_v17 = vld [vmem:[#allocation6 + $0x828] sm:$0xff]  ;;  %v14363_v19 = vcombine.low %v1995_v1, %v1999_v2  ;;  %v14365_v21 = vcombine.low %v1996_v3, %v2000_v6  ;;  %v14412_v1 = vcombine.high %v2043_v59, %v2047_v60  ;;  %v16639_v3 = vsub.s32 4, %v16594_v29  ;;  %v2051_v6 = vld [vmem:[#allocation6 + $0x980] sm:$0xff] }
 0x218   :  { %v14374_v24 = vcombine.high %v2004_v14, %v2008_v17 }
 0x21a   :  { %4923 = vmatpush1.bf16.msra.mxu0 %v14315_v23  ;;  %5095 = vmatpush1.bf16.msra.mxu1 %v14317_v25  ;;  %v2012_v23 = vld [vmem:[#allocation6 + $0x848] sm:$0xff] }
 0x21b   :  { %4924 = vmatprep.subr.bf16.mxu0 %v14324_v26  ;;  %5096 = vmatprep.subr.bf16.mxu1 %v14326_v27  ;;  %v2016_v25 = vld [vmem:[#allocation6 + $0x868] sm:$0xff]  ;;  %v14371_v26 = vcombine.low %v2003_v11, %v2007_v12  ;;  %v14373_v27 = vcombine.low %v2004_v14, %v2008_v17  ;;  %v14411_v11 = vcombine.low %v2043_v59, %v2047_v60 }
 0x21c   :  { %v14382_v33 = vcombine.high %v2012_v23, %v2016_v25  ;;  %v382_v14 = vrot.slane %v16599_v31, %v16639_v3  ;;  %v2076_v59 = vld [vmem:[#allocation6 + $0xa48] sm:$0xff] }
 0x21d   :  { %v2080_v60 = vld [vmem:[#allocation6 + $0xa68] sm:$0xff] }
 0x21e   :  { %4925 = vmatpush1.bf16.msra.mxu0 %v14323_v38  ;;  %5097 = vmatpush1.bf16.msra.mxu1 %v14325_v39  ;;  %v2020_v38 = vld [vmem:[#allocation6 + $0x888] sm:$0xff] }
 0x21f   :  { %4926 = vmatprep.subr.bf16.mxu0 %v14332_v40  ;;  %5098 = vmatprep.subr.bf16.mxu1 %v14334_v42  ;;  %v2024_v39 = vld [vmem:[#allocation6 + $0x8a8] sm:$0xff]  ;;  %v14379_v40 = vcombine.low %v2011_v15, %v2015_v16  ;;  %v14381_v42 = vcombine.low %v2012_v23, %v2016_v25  ;;  %v16649_v23 = vsub.s32 6, %v16594_v29  ;;  %v16652_v25 = vsub.s32 7, %v16594_v29 }
 0x220   :  { %v14390_v44 = vcombine.high %v2020_v38, %v2024_v39  ;;  %v2060_v15 = vld [vmem:[#allocation6 + $0x9c8] sm:$0xff] }
 0x221   :  { %v2064_v16 = vld [vmem:[#allocation6 + $0x9e8] sm:$0xff] }
 0x222   :  { %4927 = vmatpush1.bf16.msra.mxu0 %v14331_v47  ;;  %5099 = vmatpush1.bf16.msra.mxu1 %v14333_v48  ;;  %v2028_v47 = vld [vmem:[#allocation6 + $0x8c8] sm:$0xff] }
 0x223   :  { %4928 = vmatprep.subr.bf16.mxu0 %v14340_v4  ;;  %5100 = vmatprep.subr.bf16.mxu1 %v14342_v49  ;;  %v2032_v48 = vld [vmem:[#allocation6 + $0x8e8] sm:$0xff]  ;;  %v14387_v4 = vcombine.low %v2019_v34, %v2023_v37  ;;  %v14389_v49 = vcombine.low %v2020_v38, %v2024_v39  ;;  %v14430_v38 = vcombine.high %v2060_v15, %v2064_v16  ;;  %v2067_v39 = vld [vmem:[#allocation6 + $0xa00] sm:$0xff] }
 0x224   :  { %v14398_v5 = vcombine.high %v2028_v47, %v2032_v48 }
 0x226   :  { %4929 = vmatpush1.bf16.msra.mxu0 %v14339_v52  ;;  %5101 = vmatpush1.bf16.msra.mxu1 %v14341_v18  ;;  %v2036_v52 = vld [vmem:[#allocation6 + $0x908] sm:$0xff] }
 0x227   :  { %4930 = vmatprep.subr.bf16.mxu0 %v14348_v53  ;;  %5102 = vmatprep.subr.bf16.mxu1 %v14350_v54  ;;  %v2040_v18 = vld [vmem:[#allocation6 + $0x928] sm:$0xff]  ;;  %v14395_v53 = vcombine.low %v2027_v45, %v2031_v46  ;;  %v14397_v54 = vcombine.low %v2028_v47, %v2032_v48 }
 0x228   :  { %v14406_v57 = vcombine.high %v2036_v52, %v2040_v18  ;;  %v2072_v45 = vld [vmem:[#allocation6 + $0xa28] sm:$0xff] }
 0x22a   :  { %4931 = vmatpush1.bf16.msra.mxu0 %v14347_v61  ;;  %5103 = vmatpush1.bf16.msra.mxu1 %v14349_v62  ;;  %v2044_v61 = vld [vmem:[#allocation6 + $0x948] sm:$0xff] }
 0x22b   :  { %4932 = vmatprep.subr.bf16.mxu0 %v14356_v63  ;;  %5104 = vmatprep.subr.bf16.mxu1 %v14358_v0  ;;  %v2048_v62 = vld [vmem:[#allocation6 + $0x968] sm:$0xff]  ;;  %v14403_v63 = vcombine.low %v2035_v41, %v2039_v51  ;;  %v14405_v0 = vcombine.low %v2036_v52, %v2040_v18  ;;  %v2075_v18 = vld [vmem:[#allocation6 + $0xa40] sm:$0xff] }
 0x22c   :  { %v14414_v2 = vcombine.high %v2044_v61, %v2048_v62  ;;  %v14413_v12 = vcombine.low %v2044_v61, %v2048_v62 }
 0x22e   :  { %4933 = vmatpush1.bf16.msra.mxu0 %v14355_v7  ;;  %5105 = vmatpush1.bf16.msra.mxu1 %v14357_v8  ;;  %v16642_v7 = vsub.s32 5, %v16594_v29  ;;  %v2055_v8 = vld [vmem:[#allocation6 + $0x9a0] sm:$0xff]  ;;  %v390_v29 = vrot.slane %v16599_v31, %v16649_v23 }
 0x22f   :  { %4934 = vmatprep.subr.bf16.mxu0 %v14364_v9  ;;  %5106 = vmatprep.subr.bf16.mxu1 %v14366_v10  ;;  %v2052_v9 = vld [vmem:[#allocation6 + $0x988] sm:$0xff]  ;;  %v14420_v17 = vcombine.high %v2051_v6, %v2055_v8 }
 0x230   :  { %v2056_v10 = vld [vmem:[#allocation6 + $0x9a8] sm:$0xff] }
 0x232   :  { %4935 = vmatpush1.bf16.msra.mxu0 %v14363_v19  ;;  %5107 = vmatpush1.bf16.msra.mxu1 %v14365_v21  ;;  %v14422_v19 = vcombine.high %v2052_v9, %v2056_v10  ;;  %v2059_v21 = vld [vmem:[#allocation6 + $0x9c0] sm:$0xff] }
 0x233   :  { %4947 = vmatprep.subr.bf16.mxu0 %v14372_v22  ;;  %5119 = vmatprep.subr.bf16.mxu1 %v14374_v24  ;;  %v386_v22 = vrot.slane %v16599_v31, %v16642_v7  ;;  %v2063_v24 = vld [vmem:[#allocation6 + $0x9e0] sm:$0xff] }
 0x234   :  { %v14428_v37 = vcombine.high %v2059_v21, %v2063_v24 }
 0x235   :  { %4937 = vmatmul.mubr.bf16.vlgmr.msra.gmra.mrb[8].mxu0 %v16630_v13  ;;  %5109 = vmatmul.mubr.bf16.vlgmr.msra.gmra.mrb[8].mxu1 %v16630_v13 }
 0x236   :  { %4948 = vmatpush1.bf16.msra.mxu0 %v14371_v26  ;;  %5120 = vmatpush1.bf16.msra.mxu1 %v14373_v27  ;;  %v14419_v27 = vcombine.low %v2051_v6, %v2055_v8 }
 0x237   :  { %4949 = vmatprep.subr.bf16.mxu0 %v14380_v28  ;;  %5121 = vmatprep.subr.bf16.mxu1 %v14382_v33  ;;  %v14421_v28 = vcombine.low %v2052_v9, %v2056_v10 }
 0x23a   :  { %4950 = vmatpush1.bf16.msra.mxu0 %v14379_v40  ;;  %5122 = vmatpush1.bf16.msra.mxu1 %v14381_v42 }
 0x23b   :  { %4951 = vmatprep.subr.bf16.mxu0 %v14388_v43  ;;  %5123 = vmatprep.subr.bf16.mxu1 %v14390_v44  ;;  %v2071_v43 = vld [vmem:[#allocation6 + $0xa20] sm:$0xff]  ;;  %v2068_v44 = vld [vmem:[#allocation6 + $0xa08] sm:$0xff] }
 0x23c   :  { %v14436_v51 = vcombine.high %v2067_v39, %v2071_v43  ;;  %v14438_v52 = vcombine.high %v2068_v44, %v2072_v45  ;;  %v14437_v6 = vcombine.low %v2068_v44, %v2072_v45 }
 0x23e   :  { %4952 = vmatpush1.bf16.msra.mxu0 %v14387_v4  ;;  %5124 = vmatpush1.bf16.msra.mxu1 %v14389_v49  ;;  %v394_v4 = vrot.slane %v16599_v31, %v16652_v25 }
 0x23f   :  { %4953 = vmatprep.subr.bf16.mxu0 %v14396_v50  ;;  %5125 = vmatprep.subr.bf16.mxu1 %v14398_v5  ;;  %v14427_v50 = vcombine.low %v2059_v21, %v2063_v24  ;;  %v14429_v5 = vcombine.low %v2060_v15, %v2064_v16  ;;  %v2087_v21 = vld [vmem:[#allocation6 + $0xaa0] sm:$0xff]  ;;  %v2088_v24 = vld [vmem:[#allocation6 + $0xaa8] sm:$0xff] }
 0x242   :  { %4954 = vmatpush1.bf16.msra.mxu0 %v14395_v53  ;;  %5126 = vmatpush1.bf16.msra.mxu1 %v14397_v54 }
 0x243   :  { %4955 = vmatprep.subr.bf16.mxu0 %v14404_v56  ;;  %5127 = vmatprep.subr.bf16.mxu1 %v14406_v57  ;;  %v2079_v57 = vld [vmem:[#allocation6 + $0xa60] sm:$0xff] }
 0x246   :  { %4956 = vmatpush1.bf16.msra.mxu0 %v14403_v63  ;;  %5128 = vmatpush1.bf16.msra.mxu1 %v14405_v0  ;;  %v14435_v63 = vcombine.low %v2067_v39, %v2071_v43  ;;  %v2095_v39 = vld [vmem:[#allocation6 + $0xae0] sm:$0xff] }
 0x247   :  { %4957 = vmatprep.subr.bf16.mxu0 %v14412_v1  ;;  %5129 = vmatprep.subr.bf16.mxu1 %v14414_v2 }
 0x24a   :  { %4958 = vmatpush1.bf16.msra.mxu0 %v14411_v11  ;;  %5130 = vmatpush1.bf16.msra.mxu1 %v14413_v12  ;;  %v1628_v26 = vpop.f32.mrb[4].mxu0  ;;  %v14444_v11 = vcombine.high %v2075_v18, %v2079_v57  ;;  %v14446_v12 = vcombine.high %v2076_v59, %v2080_v60 }
 0x24b   :  { %v15812_v33 = vadd.f32 %v1628_v26, %v382_v14  ;;  %v1630_v34 = vpop.f32.mrb[5].mxu0  ;;  %4959 = vmatprep.subr.bf16.mxu0 %v14420_v17  ;;  %5131 = vmatprep.subr.bf16.mxu1 %v14422_v19  ;;  %v14443_v26 = vcombine.low %v2075_v18, %v2079_v57  ;;  %v2108_v18 = vld [vmem:[#allocation6 + $0xb48] sm:$0xff] }
 0x24c   :  { %v15813_v40 = vadd.f32 %v1630_v34, %v386_v22  ;;  %v1632_v42 = vpop.f32.mrb[6].mxu0  ;;  %v1714_v53 = vpop.f32.mrb[4].mxu1 }
 0x24d   :  { %v1727_v46 = vmax.f32 %v15812_v33, 0.0  ;;  %v15814_v47 = vadd.f32 %v1632_v42, %v382_v14  ;;  %v1634_v48 = vpop.f32.mrb[7].mxu0  ;;  %v15816_v61 = vadd.f32 %v1714_v53, %v390_v29  ;;  %v1716_v62 = vpop.f32.mrb[5].mxu1  ;;  %v2083_v14 = vld [vmem:[#allocation6 + $0xa80] sm:$0xff]  ;;  %v2096_v42 = vld [vmem:[#allocation6 + $0xae8] sm:$0xff] }
 0x24e   :  { %v15815_v49 = vadd.f32 %v1634_v48, %v386_v22  ;;  %4960 = vmatpush1.bf16.msra.mxu0 %v14419_v27  ;;  %5132 = vmatpush1.bf16.msra.mxu1 %v14421_v28  ;;  %v1728_v54 = vmax.f32 %v15813_v40, 0.0  ;;  %v15817_v0 = vadd.f32 %v1716_v62, %v394_v4  ;;  %v1718_v1 = vpop.f32.mrb[6].mxu1  ;;  %v2084_v22 = vld [vmem:[#allocation6 + $0xa88] sm:$0xff]  ;;  %v14445_v27 = vcombine.low %v2076_v59, %v2080_v60  ;;  %v2115_v60 = vld [vmem:[#allocation6 + $0xb80] sm:$0xff] }
 0x24f   :  { %v1735_v41 = vmax.f32 %v15814_v47, 0.0  ;;  %4961 = vmatprep.subr.bf16.mxu0 %v14428_v37  ;;  %5133 = vmatprep.subr.bf16.mxu1 %v14430_v38  ;;  %v1729_v8 = vmax.f32 %v15816_v61, 0.0  ;;  %v15818_v9 = vadd.f32 %v1718_v1, %v390_v29  ;;  %v1720_v10 = vpop.f32.mrb[7].mxu1  ;;  %v14452_v33 = vcombine.high %v2083_v14, %v2087_v21  ;;  %v2091_v37 = vld [vmem:[#allocation6 + $0xac0] sm:$0xff]  ;;  %v2092_v40 = vld [vmem:[#allocation6 + $0xac8] sm:$0xff] }
 0x250   :  { %v1736_v56 = vmax.f32 %v15815_v49, 0.0  ;;  %v1730_v17 = vmax.f32 %v15817_v0, 0.0  ;;  %v15819_v19 = vadd.f32 %v1720_v10, %v394_v4  ;;  %v14454_v34 = vcombine.high %v2084_v22, %v2088_v24  ;;  %v2103_v47 = vld [vmem:[#allocation6 + $0xb20] sm:$0xff]  ;;  %v2100_v48 = vld [vmem:[#allocation6 + $0xb08] sm:$0xff] }
 0x251   :  { %v16658_v31 = vpack.c.bf16 %v1735_v41, %v1727_v46  ;;  %v1737_v15 = vmax.f32 %v15818_v9, 0.0  ;;  %v14451_v43 = vcombine.low %v2083_v14, %v2087_v21  ;;  %v14453_v44 = vcombine.low %v2084_v22, %v2088_v24  ;;  %v2099_v46 = vld [vmem:[#allocation6 + $0xb00] sm:$0xff]  ;;  %v2104_v4 = vld [vmem:[#allocation6 + $0xb28] sm:$0xff] }
 0x252   :  { %v16660_v2 = vpack.c.bf16 %v1736_v56, %v1728_v54  ;;  %4962 = vmatpush1.bf16.msra.mxu0 %v14427_v50  ;;  %5134 = vmatpush1.bf16.msra.mxu1 %v14429_v5  ;;  %v1738_v16 = vmax.f32 %v15819_v19, 0.0  ;;  %v14460_v45 = vcombine.high %v2091_v37, %v2095_v39  ;;  %v14462_v29 = vcombine.high %v2092_v40, %v2096_v42  ;;  %v2112_v53 = vld [vmem:[#allocation6 + $0xb68] sm:$0xff]  ;;  %v2119_v61 = vld [vmem:[#allocation6 + $0xba0] sm:$0xff] }
 0x253   :  { %4963 = vmatprep.subr.bf16.mxu0 %v14436_v51  ;;  %5135 = vmatprep.subr.bf16.mxu1 %v14438_v52  ;;  %v16664_v28 = vpack.c.bf16 %v1737_v15, %v1729_v8  ;;  %v14459_v49 = vcombine.low %v2091_v37, %v2095_v39  ;;  %v14461_v50 = vcombine.low %v2092_v40, %v2096_v42  ;;  %v2107_v51 = vld [vmem:[#allocation6 + $0xb40] sm:$0xff]  ;;  %v2116_v62 = vld [vmem:[#allocation6 + $0xb88] sm:$0xff] }
 0x254   :  { %4979 = vmatprep.mubr.bf16.mxu0 %v16660_v2  ;;  %5151 = vmatprep.mubr.bf16.mxu1 %v16660_v2  ;;  %v16666_v38 = vpack.c.bf16 %v1738_v16, %v1730_v17  ;;  %v14468_v5 = vcombine.high %v2099_v46, %v2103_v47  ;;  %v14470_v41 = vcombine.high %v2100_v48, %v2104_v4  ;;  %v2111_v52 = vld [vmem:[#allocation6 + $0xb60] sm:$0xff]  ;;  %v2132_v15 = vld [vmem:[#allocation6 + $0xc08] sm:$0xff] }
 0x255   :  { %v14467_v54 = vcombine.low %v2099_v46, %v2103_v47  ;;  %v14469_v56 = vcombine.low %v2100_v48, %v2104_v4  ;;  %v14476_v57 = vcombine.high %v2107_v51, %v2111_v52  ;;  %v14478_v59 = vcombine.high %v2108_v18, %v2112_v53  ;;  %v2123_v9 = vld [vmem:[#allocation6 + $0xbc0] sm:$0xff]  ;;  %v2136_v16 = vld [vmem:[#allocation6 + $0xc28] sm:$0xff] }
 0x256   :  { %4964 = vmatpush1.bf16.msra.mxu0 %v14435_v63  ;;  %5136 = vmatpush1.bf16.msra.mxu1 %v14437_v6  ;;  %v2120_v63 = vld [vmem:[#allocation6 + $0xba8] sm:$0xff]  ;;  %v14475_v0 = vcombine.low %v2107_v51, %v2111_v52  ;;  %v14477_v1 = vcombine.low %v2108_v18, %v2112_v53  ;;  %v14484_v6 = vcombine.high %v2115_v60, %v2119_v61  ;;  %v2127_v10 = vld [vmem:[#allocation6 + $0xbe0] sm:$0xff] }
 0x257   :  { %4965 = vmatprep.subr.bf16.mxu0 %v14444_v11  ;;  %5137 = vmatprep.subr.bf16.mxu1 %v14446_v12  ;;  %v14486_v8 = vcombine.high %v2116_v62, %v2120_v63  ;;  %v2124_v11 = vld [vmem:[#allocation6 + $0xbc8] sm:$0xff]  ;;  %v14483_v14 = vcombine.low %v2115_v60, %v2119_v61  ;;  %v14485_v17 = vcombine.low %v2116_v62, %v2120_v63  ;;  %v2131_v22 = vld [vmem:[#allocation6 + $0xc00] sm:$0xff] }
 0x258   :  { %v2128_v12 = vld [vmem:[#allocation6 + $0xbe8] sm:$0xff]  ;;  %v14492_v19 = vcombine.high %v2123_v9, %v2127_v10  ;;  %v2135_v24 = vld [vmem:[#allocation6 + $0xc20] sm:$0xff] }
 0x259   :  { %v14494_v21 = vcombine.high %v2124_v11, %v2128_v12  ;;  %v2139_v37 = vld [vmem:[#allocation6 + $0xc40] sm:$0xff]  ;;  %v2140_v40 = vld [vmem:[#allocation6 + $0xc48] sm:$0xff] }
 0x25a   :  { %4966 = vmatpush1.bf16.msra.mxu0 %v14443_v26  ;;  %5138 = vmatpush1.bf16.msra.mxu1 %v14445_v27  ;;  %v14491_v26 = vcombine.low %v2123_v9, %v2127_v10  ;;  %v14493_v27 = vcombine.low %v2124_v11, %v2128_v12  ;;  %v2143_v39 = vld [vmem:[#allocation6 + $0xc60] sm:$0xff]  ;;  %v2144_v42 = vld [vmem:[#allocation6 + $0xc68] sm:$0xff] }
 0x25b   :  { %4967 = vmatprep.subr.bf16.mxu0 %v14452_v33  ;;  %5139 = vmatprep.subr.bf16.mxu1 %v14454_v34  ;;  %v14500_v33 = vcombine.high %v2131_v22, %v2135_v24  ;;  %v14502_v34 = vcombine.high %v2132_v15, %v2136_v16  ;;  %v2147_v46 = vld [vmem:[#allocation6 + $0xc80] sm:$0xff]  ;;  %v2148_v48 = vld [vmem:[#allocation6 + $0xc88] sm:$0xff] }
 0x25c   :  { %v2151_v47 = vld [vmem:[#allocation6 + $0xca0] sm:$0xff]  ;;  %v2152_v4 = vld [vmem:[#allocation6 + $0xca8] sm:$0xff] }
 0x25d   :  { %v2155_v51 = vld [vmem:[#allocation6 + $0xcc0] sm:$0xff]  ;;  %v2156_v18 = vld [vmem:[#allocation6 + $0xcc8] sm:$0xff] }
 0x25e   :  { %4968 = vmatpush1.bf16.msra.mxu0 %v14451_v43  ;;  %5140 = vmatpush1.bf16.msra.mxu1 %v14453_v44  ;;  %v14499_v43 = vcombine.low %v2131_v22, %v2135_v24  ;;  %v14501_v44 = vcombine.low %v2132_v15, %v2136_v16  ;;  %v2159_v52 = vld [vmem:[#allocation6 + $0xce0] sm:$0xff]  ;;  %v2160_v53 = vld [vmem:[#allocation6 + $0xce8] sm:$0xff] }
 0x25f   :  { %4969 = vmatprep.subr.bf16.mxu0 %v14460_v45  ;;  %5141 = vmatprep.subr.bf16.mxu1 %v14462_v29  ;;  %v14508_v45 = vcombine.high %v2139_v37, %v2143_v39  ;;  %v14510_v29 = vcombine.high %v2140_v40, %v2144_v42  ;;  %v2163_v60 = vld [vmem:[#allocation6 + $0xd00] sm:$0xff]  ;;  %v2164_v62 = vld [vmem:[#allocation6 + $0xd08] sm:$0xff] }
 0x260   :  { %v2167_v61 = vld [vmem:[#allocation6 + $0xd20] sm:$0xff]  ;;  %v2168_v63 = vld [vmem:[#allocation6 + $0xd28] sm:$0xff] }
 0x261   :  { %v2171_v9 = vld [vmem:[#allocation6 + $0xd40] sm:$0xff]  ;;  %v2172_v11 = vld [vmem:[#allocation6 + $0xd48] sm:$0xff] }
 0x262   :  { %4970 = vmatpush1.bf16.msra.mxu0 %v14459_v49  ;;  %5142 = vmatpush1.bf16.msra.mxu1 %v14461_v50  ;;  %v14507_v49 = vcombine.low %v2139_v37, %v2143_v39  ;;  %v14509_v50 = vcombine.low %v2140_v40, %v2144_v42  ;;  %v2175_v10 = vld [vmem:[#allocation6 + $0xd60] sm:$0xff]  ;;  %v2176_v12 = vld [vmem:[#allocation6 + $0xd68] sm:$0xff] }
 0x263   :  { %4971 = vmatprep.subr.bf16.mxu0 %v14468_v5  ;;  %5143 = vmatprep.subr.bf16.mxu1 %v14470_v41  ;;  %v14516_v5 = vcombine.high %v2147_v46, %v2151_v47  ;;  %v14518_v41 = vcombine.high %v2148_v48, %v2152_v4  ;;  %v2179_v22 = vld [vmem:[#allocation6 + $0xd80] sm:$0xff]  ;;  %v2180_v15 = vld [vmem:[#allocation6 + $0xd88] sm:$0xff] }
 0x264   :  { %v2183_v24 = vld [vmem:[#allocation6 + $0xda0] sm:$0xff]  ;;  %v2184_v16 = vld [vmem:[#allocation6 + $0xda8] sm:$0xff] }
 0x265   :  { %v2187_v37 = vld [vmem:[#allocation6 + $0xdc0] sm:$0xff]  ;;  %v2188_v40 = vld [vmem:[#allocation6 + $0xdc8] sm:$0xff] }
 0x266   :  { %4972 = vmatpush1.bf16.msra.mxu0 %v14467_v54  ;;  %5144 = vmatpush1.bf16.msra.mxu1 %v14469_v56  ;;  %v14515_v54 = vcombine.low %v2147_v46, %v2151_v47  ;;  %v14517_v56 = vcombine.low %v2148_v48, %v2152_v4  ;;  %v2191_v39 = vld [vmem:[#allocation6 + $0xde0] sm:$0xff]  ;;  %v2192_v42 = vld [vmem:[#allocation6 + $0xde8] sm:$0xff] }
 0x267   :  { %4973 = vmatprep.subr.bf16.mxu0 %v14476_v57  ;;  %5145 = vmatprep.subr.bf16.mxu1 %v14478_v59  ;;  %v14524_v57 = vcombine.high %v2155_v51, %v2159_v52  ;;  %v14526_v59 = vcombine.high %v2156_v18, %v2160_v53  ;;  %v2195_v46 = vld [vmem:[#allocation6 + $0xe00] sm:$0xff]  ;;  %v2196_v48 = vld [vmem:[#allocation6 + $0xe08] sm:$0xff] }
 0x268   :  { %v2199_v47 = vld [vmem:[#allocation6 + $0xe20] sm:$0xff]  ;;  %v2200_v4 = vld [vmem:[#allocation6 + $0xe28] sm:$0xff] }
 0x26a   :  { %4974 = vmatpush1.bf16.msra.mxu0 %v14475_v0  ;;  %5146 = vmatpush1.bf16.msra.mxu1 %v14477_v1  ;;  %v14523_v0 = vcombine.low %v2155_v51, %v2159_v52  ;;  %v14525_v1 = vcombine.low %v2156_v18, %v2160_v53  ;;  %v2203_v51 = vld [vmem:[#allocation6 + $0xe40] sm:$0xff]  ;;  %v2204_v18 = vld [vmem:[#allocation6 + $0xe48] sm:$0xff] }
 0x26b   :  { %4975 = vmatprep.subr.bf16.mxu0 %v14484_v6  ;;  %5147 = vmatprep.subr.bf16.mxu1 %v14486_v8  ;;  %v14532_v6 = vcombine.high %v2163_v60, %v2167_v61  ;;  %v14534_v8 = vcombine.high %v2164_v62, %v2168_v63  ;;  %v2207_v52 = vld [vmem:[#allocation6 + $0xe60] sm:$0xff]  ;;  %v2208_v53 = vld [vmem:[#allocation6 + $0xe68] sm:$0xff] }
 0x26e   :  { %4976 = vmatpush1.bf16.msra.mxu0 %v14483_v14  ;;  %5148 = vmatpush1.bf16.msra.mxu1 %v14485_v17  ;;  %v14531_v14 = vcombine.low %v2163_v60, %v2167_v61  ;;  %v14533_v17 = vcombine.low %v2164_v62, %v2168_v63  ;;  %v2211_v60 = vld [vmem:[#allocation6 + $0xe80] sm:$0xff]  ;;  %v2212_v62 = vld [vmem:[#allocation6 + $0xe88] sm:$0xff] }
 0x26f   :  { %4977 = vmatprep.subr.bf16.mxu0 %v14492_v19  ;;  %5149 = vmatprep.subr.bf16.mxu1 %v14494_v21  ;;  %v14540_v19 = vcombine.high %v2171_v9, %v2175_v10  ;;  %v14542_v21 = vcombine.high %v2172_v11, %v2176_v12  ;;  %v2215_v61 = vld [vmem:[#allocation6 + $0xea0] sm:$0xff]  ;;  %v2216_v63 = vld [vmem:[#allocation6 + $0xea8] sm:$0xff] }
 0x272   :  { %4978 = vmatpush1.bf16.msra.mxu0 %v14491_v26  ;;  %5150 = vmatpush1.bf16.msra.mxu1 %v14493_v27  ;;  %v14539_v26 = vcombine.low %v2171_v9, %v2175_v10  ;;  %v14541_v27 = vcombine.low %v2172_v11, %v2176_v12  ;;  %v2219_v9 = vld [vmem:[#allocation6 + $0xec0] sm:$0xff]  ;;  %v2220_v11 = vld [vmem:[#allocation6 + $0xec8] sm:$0xff] }
 0x273   :  { %4990 = vmatprep.subr.bf16.mxu0 %v14500_v33  ;;  %5162 = vmatprep.subr.bf16.mxu1 %v14502_v34  ;;  %v14548_v33 = vcombine.high %v2179_v22, %v2183_v24  ;;  %v14550_v34 = vcombine.high %v2180_v15, %v2184_v16  ;;  %v2223_v10 = vld [vmem:[#allocation6 + $0xee0] sm:$0xff]  ;;  %v2224_v12 = vld [vmem:[#allocation6 + $0xee8] sm:$0xff] }
 0x275   :  { %4980 = vmatmul.mubr.bf16.vlgmr.msra.gmra.mrb[8].mxu0 %v16658_v31  ;;  %5152 = vmatmul.mubr.bf16.vlgmr.msra.gmra.mrb[8].mxu1 %v16658_v31 }
 0x276   :  { %4991 = vmatpush1.bf16.msra.mxu0 %v14499_v43  ;;  %5163 = vmatpush1.bf16.msra.mxu1 %v14501_v44  ;;  %v14547_v43 = vcombine.low %v2179_v22, %v2183_v24  ;;  %v14549_v44 = vcombine.low %v2180_v15, %v2184_v16  ;;  %v2227_v22 = vld [vmem:[#allocation6 + $0xf00] sm:$0xff]  ;;  %v2228_v15 = vld [vmem:[#allocation6 + $0xf08] sm:$0xff] }
 0x277   :  { %4992 = vmatprep.subr.bf16.mxu0 %v14508_v45  ;;  %5164 = vmatprep.subr.bf16.mxu1 %v14510_v29  ;;  %v14556_v45 = vcombine.high %v2187_v37, %v2191_v39  ;;  %v14558_v29 = vcombine.high %v2188_v40, %v2192_v42  ;;  %v2231_v24 = vld [vmem:[#allocation6 + $0xf20] sm:$0xff]  ;;  %v2232_v16 = vld [vmem:[#allocation6 + $0xf28] sm:$0xff] }
 0x278   :  { %5022 = vmatprep.mubr.bf16.mxu0 %v16666_v38  ;;  %5194 = vmatprep.mubr.bf16.mxu1 %v16666_v38 }
 0x27a   :  { %4993 = vmatpush1.bf16.msra.mxu0 %v14507_v49  ;;  %5165 = vmatpush1.bf16.msra.mxu1 %v14509_v50  ;;  %v14555_v49 = vcombine.low %v2187_v37, %v2191_v39  ;;  %v14557_v50 = vcombine.low %v2188_v40, %v2192_v42  ;;  %v2235_v37 = vld [vmem:[#allocation6 + $0xf40] sm:$0xff]  ;;  %v2236_v40 = vld [vmem:[#allocation6 + $0xf48] sm:$0xff] }
 0x27b   :  { %4994 = vmatprep.subr.bf16.mxu0 %v14516_v5  ;;  %5166 = vmatprep.subr.bf16.mxu1 %v14518_v41  ;;  %v14564_v5 = vcombine.high %v2195_v46, %v2199_v47  ;;  %v14566_v41 = vcombine.high %v2196_v48, %v2200_v4  ;;  %v2239_v39 = vld [vmem:[#allocation6 + $0xf60] sm:$0xff]  ;;  %v2240_v42 = vld [vmem:[#allocation6 + $0xf68] sm:$0xff] }
 0x27e   :  { %4995 = vmatpush1.bf16.msra.mxu0 %v14515_v54  ;;  %5167 = vmatpush1.bf16.msra.mxu1 %v14517_v56  ;;  %v14563_v54 = vcombine.low %v2195_v46, %v2199_v47  ;;  %v14565_v56 = vcombine.low %v2196_v48, %v2200_v4  ;;  %v2243_v46 = vld [vmem:[#allocation6 + $0xf80] sm:$0xff]  ;;  %v2244_v48 = vld [vmem:[#allocation6 + $0xf88] sm:$0xff] }
 0x27f   :  { %4996 = vmatprep.subr.bf16.mxu0 %v14524_v57  ;;  %5168 = vmatprep.subr.bf16.mxu1 %v14526_v59  ;;  %v14572_v57 = vcombine.high %v2203_v51, %v2207_v52  ;;  %v14574_v59 = vcombine.high %v2204_v18, %v2208_v53  ;;  %v2247_v47 = vld [vmem:[#allocation6 + $0xfa0] sm:$0xff]  ;;  %v2248_v4 = vld [vmem:[#allocation6 + $0xfa8] sm:$0xff] }
 0x282   :  { %4997 = vmatpush1.bf16.msra.mxu0 %v14523_v0  ;;  %5169 = vmatpush1.bf16.msra.mxu1 %v14525_v1  ;;  %v14571_v0 = vcombine.low %v2203_v51, %v2207_v52  ;;  %v14573_v1 = vcombine.low %v2204_v18, %v2208_v53  ;;  %v2251_v51 = vld [vmem:[#allocation6 + $0xfc0] sm:$0xff]  ;;  %v2252_v18 = vld [vmem:[#allocation6 + $0xfc8] sm:$0xff] }
 0x283   :  { %4998 = vmatprep.subr.bf16.mxu0 %v14532_v6  ;;  %5170 = vmatprep.subr.bf16.mxu1 %v14534_v8  ;;  %v14580_v6 = vcombine.high %v2211_v60, %v2215_v61  ;;  %v14582_v8 = vcombine.high %v2212_v62, %v2216_v63  ;;  %v2255_v52 = vld [vmem:[#allocation6 + $0xfe0] sm:$0xff]  ;;  %v2256_v53 = vld [vmem:[#allocation6 + $0xfe8] sm:$0xff] }
 0x286   :  { %4999 = vmatpush1.bf16.msra.mxu0 %v14531_v14  ;;  %5171 = vmatpush1.bf16.msra.mxu1 %v14533_v17  ;;  %v14579_v14 = vcombine.low %v2211_v60, %v2215_v61  ;;  %v14581_v17 = vcombine.low %v2212_v62, %v2216_v63  ;;  %v1749_v60 = vld [vmem:[#allocation6 + $0x10] sm:$0xff]  ;;  %v1750_v62 = vld [vmem:[#allocation6 + $0x18] sm:$0xff] }
 0x287   :  { %5000 = vmatprep.subr.bf16.mxu0 %v14540_v19  ;;  %5172 = vmatprep.subr.bf16.mxu1 %v14542_v21  ;;  %v14588_v19 = vcombine.high %v2219_v9, %v2223_v10  ;;  %v14590_v21 = vcombine.high %v2220_v11, %v2224_v12  ;;  %v1753_v61 = vld [vmem:[#allocation6 + $0x30] sm:$0xff]  ;;  %v1754_v63 = vld [vmem:[#allocation6 + $0x38] sm:$0xff] }
 0x28a   :  { %5001 = vmatpush1.bf16.msra.mxu0 %v14539_v26  ;;  %5173 = vmatpush1.bf16.msra.mxu1 %v14541_v27  ;;  %v14587_v26 = vcombine.low %v2219_v9, %v2223_v10  ;;  %v14589_v27 = vcombine.low %v2220_v11, %v2224_v12  ;;  %v1757_v9 = vld [vmem:[#allocation6 + $0x50] sm:$0xff]  ;;  %v1758_v11 = vld [vmem:[#allocation6 + $0x58] sm:$0xff] }
 0x28b   :  { %5002 = vmatprep.subr.bf16.mxu0 %v14548_v33  ;;  %5174 = vmatprep.subr.bf16.mxu1 %v14550_v34  ;;  %v14596_v33 = vcombine.high %v2227_v22, %v2231_v24  ;;  %v14598_v34 = vcombine.high %v2228_v15, %v2232_v16  ;;  %v1761_v10 = vld [vmem:[#allocation6 + $0x70] sm:$0xff]  ;;  %v1762_v12 = vld [vmem:[#allocation6 + $0x78] sm:$0xff] }
 0x28e   :  { %5003 = vmatpush1.bf16.msra.mxu0 %v14547_v43  ;;  %5175 = vmatpush1.bf16.msra.mxu1 %v14549_v44  ;;  %v14595_v43 = vcombine.low %v2227_v22, %v2231_v24  ;;  %v14597_v44 = vcombine.low %v2228_v15, %v2232_v16  ;;  %v1765_v22 = vld [vmem:[#allocation6 + $0x90] sm:$0xff]  ;;  %v1766_v15 = vld [vmem:[#allocation6 + $0x98] sm:$0xff] }
 0x28f   :  { %5004 = vmatprep.subr.bf16.mxu0 %v14556_v45  ;;  %5176 = vmatprep.subr.bf16.mxu1 %v14558_v29  ;;  %v14604_v45 = vcombine.high %v2235_v37, %v2239_v39  ;;  %v14606_v29 = vcombine.high %v2236_v40, %v2240_v42  ;;  %v1769_v24 = vld [vmem:[#allocation6 + $0xb0] sm:$0xff]  ;;  %v1770_v16 = vld [vmem:[#allocation6 + $0xb8] sm:$0xff] }
 0x292   :  { %5005 = vmatpush1.bf16.msra.mxu0 %v14555_v49  ;;  %5177 = vmatpush1.bf16.msra.mxu1 %v14557_v50  ;;  %v14603_v49 = vcombine.low %v2235_v37, %v2239_v39  ;;  %v14605_v50 = vcombine.low %v2236_v40, %v2240_v42  ;;  %v1773_v37 = vld [vmem:[#allocation6 + $0xd0] sm:$0xff]  ;;  %v1774_v40 = vld [vmem:[#allocation6 + $0xd8] sm:$0xff] }
 0x293   :  { %5006 = vmatprep.subr.bf16.mxu0 %v14564_v5  ;;  %5178 = vmatprep.subr.bf16.mxu1 %v14566_v41  ;;  %v14612_v5 = vcombine.high %v2243_v46, %v2247_v47  ;;  %v14614_v41 = vcombine.high %v2244_v48, %v2248_v4  ;;  %v1777_v39 = vld [vmem:[#allocation6 + $0xf0] sm:$0xff]  ;;  %v1778_v42 = vld [vmem:[#allocation6 + $0xf8] sm:$0xff] }
 0x296   :  { %5007 = vmatpush1.bf16.msra.mxu0 %v14563_v54  ;;  %5179 = vmatpush1.bf16.msra.mxu1 %v14565_v56  ;;  %v14611_v54 = vcombine.low %v2243_v46, %v2247_v47  ;;  %v14613_v56 = vcombine.low %v2244_v48, %v2248_v4  ;;  %v1781_v46 = vld [vmem:[#allocation6 + $0x110] sm:$0xff]  ;;  %v1786_v48 = vld [vmem:[#allocation6 + $0x138] sm:$0xff]  ;;  %v14143_v4 = vcombine.low %v1773_v37, %v1777_v39 }
 0x297   :  { %5008 = vmatprep.subr.bf16.mxu0 %v14572_v57  ;;  %5180 = vmatprep.subr.bf16.mxu1 %v14574_v59  ;;  %v14620_v57 = vcombine.high %v2251_v51, %v2255_v52  ;;  %v14622_v59 = vcombine.high %v2252_v18, %v2256_v53  ;;  %v1785_v47 = vld [vmem:[#allocation6 + $0x130] sm:$0xff] }
 0x29a   :  { %5009 = vmatpush1.bf16.msra.mxu0 %v14571_v0  ;;  %5181 = vmatpush1.bf16.msra.mxu1 %v14573_v1  ;;  %v14619_v0 = vcombine.low %v2251_v51, %v2255_v52  ;;  %v14621_v1 = vcombine.low %v2252_v18, %v2256_v53  ;;  %v1793_v51 = vld [vmem:[#allocation6 + $0x170] sm:$0xff]  ;;  %v1790_v52 = vld [vmem:[#allocation6 + $0x158] sm:$0xff]  ;;  %v14151_v53 = vcombine.low %v1781_v46, %v1785_v47 }
 0x29b   :  { %5010 = vmatprep.subr.bf16.mxu0 %v14580_v6  ;;  %5182 = vmatprep.subr.bf16.mxu1 %v14582_v8  ;;  %v14120_v6 = vcombine.high %v1749_v60, %v1753_v61  ;;  %v14122_v8 = vcombine.high %v1750_v62, %v1754_v63  ;;  %v1794_v18 = vld [vmem:[#allocation6 + $0x178] sm:$0xff] }
 0x29e   :  { %5011 = vmatpush1.bf16.msra.mxu0 %v14579_v14  ;;  %5183 = vmatpush1.bf16.msra.mxu1 %v14581_v17  ;;  %v14119_v14 = vcombine.low %v1749_v60, %v1753_v61  ;;  %v14121_v17 = vcombine.low %v1750_v62, %v1754_v63  ;;  %v1801_v60 = vld [vmem:[#allocation6 + $0x1b0] sm:$0xff]  ;;  %v1798_v61 = vld [vmem:[#allocation6 + $0x198] sm:$0xff] }
 0x29f   :  { %5012 = vmatprep.subr.bf16.mxu0 %v14588_v19  ;;  %5184 = vmatprep.subr.bf16.mxu1 %v14590_v21  ;;  %v14128_v19 = vcombine.high %v1757_v9, %v1761_v10  ;;  %v14130_v21 = vcombine.high %v1758_v11, %v1762_v12  ;;  %v1802_v62 = vld [vmem:[#allocation6 + $0x1b8] sm:$0xff] }
 0x2a2   :  { %5013 = vmatpush1.bf16.msra.mxu0 %v14587_v26  ;;  %5185 = vmatpush1.bf16.msra.mxu1 %v14589_v27  ;;  %v14127_v26 = vcombine.low %v1757_v9, %v1761_v10  ;;  %v14129_v27 = vcombine.low %v1758_v11, %v1762_v12  ;;  %v1809_v9 = vld [vmem:[#allocation6 + $0x1f0] sm:$0xff]  ;;  %v1806_v10 = vld [vmem:[#allocation6 + $0x1d8] sm:$0xff] }
 0x2a3   :  { %5014 = vmatprep.subr.bf16.mxu0 %v14596_v33  ;;  %5186 = vmatprep.subr.bf16.mxu1 %v14598_v34  ;;  %v14136_v33 = vcombine.high %v1765_v22, %v1769_v24  ;;  %v14138_v34 = vcombine.high %v1766_v15, %v1770_v16  ;;  %v1810_v11 = vld [vmem:[#allocation6 + $0x1f8] sm:$0xff] }
 0x2a6   :  { %5015 = vmatpush1.bf16.msra.mxu0 %v14595_v43  ;;  %5187 = vmatpush1.bf16.msra.mxu1 %v14597_v44  ;;  %v14135_v43 = vcombine.low %v1765_v22, %v1769_v24  ;;  %v14137_v44 = vcombine.low %v1766_v15, %v1770_v16  ;;  %v1817_v22 = vld [vmem:[#allocation6 + $0x230] sm:$0xff]  ;;  %v1814_v24 = vld [vmem:[#allocation6 + $0x218] sm:$0xff] }
 0x2a7   :  { %5016 = vmatprep.subr.bf16.mxu0 %v14604_v45  ;;  %5188 = vmatprep.subr.bf16.mxu1 %v14606_v29  ;;  %v14144_v45 = vcombine.high %v1773_v37, %v1777_v39  ;;  %v14146_v29 = vcombine.high %v1774_v40, %v1778_v42  ;;  %v1818_v15 = vld [vmem:[#allocation6 + $0x238] sm:$0xff]  ;;  %v1825_v37 = vld [vmem:[#allocation6 + $0x270] sm:$0xff] }
 0x2a8   :  { %v1822_v39 = vld [vmem:[#allocation6 + $0x258] sm:$0xff] }
 0x2aa   :  { %5017 = vmatpush1.bf16.msra.mxu0 %v14603_v49  ;;  %5189 = vmatpush1.bf16.msra.mxu1 %v14605_v50  ;;  %v14145_v49 = vcombine.low %v1774_v40, %v1778_v42  ;;  %v14152_v50 = vcombine.high %v1781_v46, %v1785_v47  ;;  %v1826_v40 = vld [vmem:[#allocation6 + $0x278] sm:$0xff]  ;;  %v1833_v46 = vld [vmem:[#allocation6 + $0x2b0] sm:$0xff] }
 0x2ab   :  { %5018 = vmatprep.subr.bf16.mxu0 %v14612_v5  ;;  %5190 = vmatprep.subr.bf16.mxu1 %v14614_v41  ;;  %v1789_v41 = vld [vmem:[#allocation6 + $0x150] sm:$0xff]  ;;  %v1830_v47 = vld [vmem:[#allocation6 + $0x298] sm:$0xff] }
 0x2ac   :  { %v14159_v63 = vcombine.low %v1789_v41, %v1793_v51 }
 0x2ae   :  { %5019 = vmatpush1.bf16.msra.mxu0 %v14611_v54  ;;  %5191 = vmatpush1.bf16.msra.mxu1 %v14613_v56  ;;  %v14160_v56 = vcombine.high %v1789_v41, %v1793_v51  ;;  %v1841_v41 = vld [vmem:[#allocation6 + $0x2f0] sm:$0xff]  ;;  %v1838_v51 = vld [vmem:[#allocation6 + $0x2d8] sm:$0xff] }
 0x2af   :  { %5020 = vmatprep.subr.bf16.mxu0 %v14620_v57  ;;  %5192 = vmatprep.subr.bf16.mxu1 %v14622_v59  ;;  %v14162_v57 = vcombine.high %v1790_v52, %v1794_v18  ;;  %v1797_v59 = vld [vmem:[#allocation6 + $0x190] sm:$0xff] }
 0x2b0   :  { %v14167_v12 = vcombine.low %v1797_v59, %v1801_v60 }
 0x2b2   :  { %5021 = vmatpush1.bf16.msra.mxu0 %v14619_v0  ;;  %5193 = vmatpush1.bf16.msra.mxu1 %v14621_v1  ;;  %v14161_v0 = vcombine.low %v1790_v52, %v1794_v18  ;;  %v14168_v1 = vcombine.high %v1797_v59, %v1801_v60  ;;  %v1842_v52 = vld [vmem:[#allocation6 + $0x2f8] sm:$0xff]  ;;  %v1849_v59 = vld [vmem:[#allocation6 + $0x330] sm:$0xff] }
 0x2b3   :  { %5205 = vmatprep.subr.bf16.mxu0 %v14120_v6  ;;  %5377 = vmatprep.subr.bf16.mxu1 %v14122_v8  ;;  %v14170_v6 = vcombine.high %v1798_v61, %v1802_v62  ;;  %v1805_v8 = vld [vmem:[#allocation6 + $0x1d0] sm:$0xff]  ;;  %v1846_v60 = vld [vmem:[#allocation6 + $0x318] sm:$0xff] }
 0x2b4   :  { %v14175_v16 = vcombine.low %v1805_v8, %v1809_v9 }
 0x2b5   :  { %5023 = vmatmul.mubr.bf16.vlgmr.msra.gmra.mrb[8].mxu0 %v16664_v28  ;;  %5195 = vmatmul.mubr.bf16.vlgmr.msra.gmra.mrb[8].mxu1 %v16664_v28 }
 0x2b6   :  { %5206 = vmatpush1.bf16.msra.mxu0 %v14119_v14  ;;  %5237 = vmatprep.mubr.bf16.mxu0 %v16620_v58  ;;  %v14169_v14 = vcombine.low %v1798_v61, %v1802_v62  ;;  %v1850_v61 = vld [vmem:[#allocation6 + $0x338] sm:$0xff] }
 0x2b7   :  { %5378 = vmatpush1.bf16.msra.mxu1 %v14121_v17  ;;  %5409 = vmatprep.mubr.bf16.mxu1 %v16620_v58  ;;  %v1782_v58 = vld [vmem:[#allocation6 + $0x118] sm:$0xff]  ;;  %v14176_v17 = vcombine.high %v1805_v8, %v1809_v9  ;;  %v1857_v8 = vld [vmem:[#allocation6 + $0x370] sm:$0xff] }
 0x2b8   :  { %5207 = vmatprep.subr.bf16.mxu0 %v14128_v19  ;;  %5379 = vmatprep.subr.bf16.mxu1 %v14130_v21  ;;  %v14154_v5 = vcombine.high %v1782_v58, %v1786_v48  ;;  %v14153_v54 = vcombine.low %v1782_v58, %v1786_v48  ;;  %v14178_v19 = vcombine.high %v1806_v10, %v1810_v11  ;;  %v1813_v21 = vld [vmem:[#allocation6 + $0x210] sm:$0xff]  ;;  %v1834_v58 = vld [vmem:[#allocation6 + $0x2b8] sm:$0xff] }
 0x2b9   :  { %v14183_v42 = vcombine.low %v1813_v21, %v1817_v22  ;;  %v1854_v9 = vld [vmem:[#allocation6 + $0x358] sm:$0xff] }
 0x2ba   :  { %5208 = vmatpush1.bf16.msra.mxu0 %v14127_v26  ;;  %v14177_v26 = vcombine.low %v1806_v10, %v1810_v11  ;;  %v1858_v10 = vld [vmem:[#allocation6 + $0x378] sm:$0xff] }
 0x2bb   :  { %5380 = vmatpush1.bf16.msra.mxu1 %v14129_v27  ;;  %5209 = vmatprep.subr.bf16.mxu0 %v14136_v33  ;;  %v14184_v27 = vcombine.high %v1813_v21, %v1817_v22  ;;  %v14186_v33 = vcombine.high %v1814_v24, %v1818_v15  ;;  %v1865_v21 = vld [vmem:[#allocation6 + $0x3b0] sm:$0xff]  ;;  %v1862_v22 = vld [vmem:[#allocation6 + $0x398] sm:$0xff] }
 0x2bc   :  { %5381 = vmatprep.subr.bf16.mxu1 %v14138_v34  ;;  %v1821_v34 = vld [vmem:[#allocation6 + $0x250] sm:$0xff] }
 0x2bd   :  { %v14191_v48 = vcombine.low %v1821_v34, %v1825_v37 }
 0x2be   :  { %5210 = vmatpush1.bf16.msra.mxu0 %v14135_v43  ;;  %v14185_v43 = vcombine.low %v1814_v24, %v1818_v15  ;;  %v1866_v24 = vld [vmem:[#allocation6 + $0x3b8] sm:$0xff] }
 0x2bf   :  { %5382 = vmatpush1.bf16.msra.mxu1 %v14137_v44  ;;  %5211 = vmatprep.subr.bf16.mxu0 %v14144_v45  ;;  %v14192_v44 = vcombine.high %v1821_v34, %v1825_v37  ;;  %v14194_v45 = vcombine.high %v1822_v39, %v1826_v40  ;;  %v1873_v34 = vld [vmem:[#allocation6 + $0x3f0] sm:$0xff]  ;;  %v1870_v37 = vld [vmem:[#allocation6 + $0x3d8] sm:$0xff] }
 0x2c0   :  { %5383 = vmatprep.subr.bf16.mxu1 %v14146_v29  ;;  %v1829_v29 = vld [vmem:[#allocation6 + $0x290] sm:$0xff] }
 0x2c1   :  { %v14199_v18 = vcombine.low %v1829_v29, %v1833_v46 }
 0x2c2   :  { %5212 = vmatpush1.bf16.msra.mxu0 %v14143_v4  ;;  %v14193_v4 = vcombine.low %v1822_v39, %v1826_v40  ;;  %v1874_v39 = vld [vmem:[#allocation6 + $0x3f8] sm:$0xff] }
 0x2c3   :  { %5384 = vmatpush1.bf16.msra.mxu1 %v14145_v49  ;;  %5213 = vmatprep.subr.bf16.mxu0 %v14152_v50  ;;  %v14200_v49 = vcombine.high %v1829_v29, %v1833_v46  ;;  %v14202_v50 = vcombine.high %v1830_v47, %v1834_v58  ;;  %v1881_v29 = vld [vmem:[#allocation6 + $0x430] sm:$0xff]  ;;  %v1878_v46 = vld [vmem:[#allocation6 + $0x418] sm:$0xff] }
 0x2c4   :  { %5385 = vmatprep.subr.bf16.mxu1 %v14154_v5  ;;  %v1837_v5 = vld [vmem:[#allocation6 + $0x2d0] sm:$0xff] }
 0x2c5   :  { %v14207_v62 = vcombine.low %v1837_v5, %v1841_v41 }
 0x2c6   :  { %5214 = vmatpush1.bf16.msra.mxu0 %v14151_v53  ;;  %v14201_v53 = vcombine.low %v1830_v47, %v1834_v58  ;;  %v1882_v47 = vld [vmem:[#allocation6 + $0x438] sm:$0xff] }
 0x2c7   :  { %5386 = vmatpush1.bf16.msra.mxu1 %v14153_v54  ;;  %5215 = vmatprep.subr.bf16.mxu0 %v14160_v56  ;;  %v14208_v54 = vcombine.high %v1837_v5, %v1841_v41  ;;  %v14210_v56 = vcombine.high %v1838_v51, %v1842_v52  ;;  %v1889_v5 = vld [vmem:[#allocation6 + $0x470] sm:$0xff] }
 0x2c8   :  { %5387 = vmatprep.subr.bf16.mxu1 %v14162_v57  ;;  %v1845_v57 = vld [vmem:[#allocation6 + $0x310] sm:$0xff] }
 0x2c9   :  { %v14215_v11 = vcombine.low %v1845_v57, %v1849_v59 }
 0x2ca   :  { %5216 = vmatpush1.bf16.msra.mxu0 %v14159_v63  ;;  %v14209_v63 = vcombine.low %v1838_v51, %v1842_v52  ;;  %v1886_v51 = vld [vmem:[#allocation6 + $0x458] sm:$0xff] }
 0x2cb   :  { %5388 = vmatpush1.bf16.msra.mxu1 %v14161_v0  ;;  %5217 = vmatprep.subr.bf16.mxu0 %v14168_v1  ;;  %v14216_v0 = vcombine.high %v1845_v57, %v1849_v59  ;;  %v14218_v1 = vcombine.high %v1846_v60, %v1850_v61  ;;  %v1890_v52 = vld [vmem:[#allocation6 + $0x478] sm:$0xff] }
 0x2cc   :  { %5389 = vmatprep.subr.bf16.mxu1 %v14170_v6  ;;  %v1853_v6 = vld [vmem:[#allocation6 + $0x350] sm:$0xff]  ;;  %v14258_v57 = vcombine.high %v1886_v51, %v1890_v52  ;;  %v1894_v59 = vld [vmem:[#allocation6 + $0x498] sm:$0xff] }
 0x2cd   :  { %v14223_v15 = vcombine.low %v1853_v6, %v1857_v8 }
 0x2ce   :  { %5218 = vmatpush1.bf16.msra.mxu0 %v14167_v12  ;;  %v14217_v12 = vcombine.low %v1846_v60, %v1850_v61  ;;  %v1898_v60 = vld [vmem:[#allocation6 + $0x4b8] sm:$0xff] }
 0x2cf   :  { %5390 = vmatpush1.bf16.msra.mxu1 %v14169_v14  ;;  %5219 = vmatprep.subr.bf16.mxu0 %v14176_v17  ;;  %v14224_v14 = vcombine.high %v1853_v6, %v1857_v8  ;;  %v14226_v17 = vcombine.high %v1854_v9, %v1858_v10  ;;  %v1905_v6 = vld [vmem:[#allocation6 + $0x4f0] sm:$0xff]  ;;  %v1902_v8 = vld [vmem:[#allocation6 + $0x4d8] sm:$0xff] }
 0x2d0   :  { %5391 = vmatprep.subr.bf16.mxu1 %v14178_v19  ;;  %v1861_v19 = vld [vmem:[#allocation6 + $0x390] sm:$0xff] }
 0x2d1   :  { %v14231_v40 = vcombine.low %v1861_v19, %v1865_v21 }
 0x2d2   :  { %5220 = vmatpush1.bf16.msra.mxu0 %v14175_v16  ;;  %v14225_v16 = vcombine.low %v1854_v9, %v1858_v10  ;;  %v1906_v9 = vld [vmem:[#allocation6 + $0x4f8] sm:$0xff] }
 0x2d3   :  { %5392 = vmatpush1.bf16.msra.mxu1 %v14177_v26  ;;  %5221 = vmatprep.subr.bf16.mxu0 %v14184_v27  ;;  %v14232_v26 = vcombine.high %v1861_v19, %v1865_v21  ;;  %v14234_v27 = vcombine.high %v1862_v22, %v1866_v24  ;;  %v1910_v19 = vld [vmem:[#allocation6 + $0x518] sm:$0xff] }
 0x2d4   :  { %5393 = vmatprep.subr.bf16.mxu1 %v14186_v33  ;;  %v1869_v33 = vld [vmem:[#allocation6 + $0x3d0] sm:$0xff]  ;;  %v1914_v21 = vld [vmem:[#allocation6 + $0x538] sm:$0xff] }
 0x2d5   :  { %v14239_v58 = vcombine.low %v1869_v33, %v1873_v34 }
 0x2d6   :  { %5222 = vmatpush1.bf16.msra.mxu0 %v14183_v42  ;;  %v14233_v42 = vcombine.low %v1862_v22, %v1866_v24  ;;  %v14273_v22 = vcombine.low %v1902_v8, %v1906_v9 }
 0x2d7   :  { %5394 = vmatpush1.bf16.msra.mxu1 %v14185_v43  ;;  %5223 = vmatprep.subr.bf16.mxu0 %v14192_v44  ;;  %v14240_v43 = vcombine.high %v1869_v33, %v1873_v34  ;;  %v14242_v44 = vcombine.high %v1870_v37, %v1874_v39  ;;  %v1922_v33 = vld [vmem:[#allocation6 + $0x578] sm:$0xff] }
 0x2d8   :  { %5395 = vmatprep.subr.bf16.mxu1 %v14194_v45  ;;  %v1877_v45 = vld [vmem:[#allocation6 + $0x410] sm:$0xff] }
 0x2d9   :  { %v14247_v41 = vcombine.low %v1877_v45, %v1881_v29 }
 0x2da   :  { %5224 = vmatpush1.bf16.msra.mxu0 %v14191_v48  ;;  %v14241_v48 = vcombine.low %v1870_v37, %v1874_v39  ;;  %v14281_v37 = vcombine.low %v1910_v19, %v1914_v21 }
 0x2db   :  { %5396 = vmatpush1.bf16.msra.mxu1 %v14193_v4  ;;  %5225 = vmatprep.subr.bf16.mxu0 %v14200_v49  ;;  %v14248_v4 = vcombine.high %v1877_v45, %v1881_v29  ;;  %v14250_v49 = vcombine.high %v1878_v46, %v1882_v47  ;;  %v1930_v45 = vld [vmem:[#allocation6 + $0x5b8] sm:$0xff] }
 0x2dc   :  { %5397 = vmatprep.subr.bf16.mxu1 %v14202_v50  ;;  %v1885_v50 = vld [vmem:[#allocation6 + $0x450] sm:$0xff] }
 0x2dd   :  { %v14255_v61 = vcombine.low %v1885_v50, %v1889_v5 }
 0x2de   :  { %5226 = vmatpush1.bf16.msra.mxu0 %v14199_v18  ;;  %v14249_v18 = vcombine.low %v1878_v46, %v1882_v47 }
 0x2df   :  { %5398 = vmatpush1.bf16.msra.mxu1 %v14201_v53  ;;  %5227 = vmatprep.subr.bf16.mxu0 %v14208_v54  ;;  %v14256_v53 = vcombine.high %v1885_v50, %v1889_v5  ;;  %v1893_v54 = vld [vmem:[#allocation6 + $0x490] sm:$0xff]  ;;  %v1938_v50 = vld [vmem:[#allocation6 + $0x5f8] sm:$0xff] }
 0x2e0   :  { %5399 = vmatprep.subr.bf16.mxu1 %v14210_v56  ;;  %v1897_v56 = vld [vmem:[#allocation6 + $0x4b0] sm:$0xff] }
 0x2e1   :  { %v14263_v10 = vcombine.low %v1893_v54, %v1897_v56 }
 0x2e2   :  { %5228 = vmatpush1.bf16.msra.mxu0 %v14207_v62  ;;  %v14257_v62 = vcombine.low %v1886_v51, %v1890_v52 }
 0x2e3   :  { %5400 = vmatpush1.bf16.msra.mxu1 %v14209_v63  ;;  %5229 = vmatprep.subr.bf16.mxu0 %v14216_v0  ;;  %v14264_v63 = vcombine.high %v1893_v54, %v1897_v56  ;;  %v14266_v0 = vcombine.high %v1894_v59, %v1898_v60  ;;  %v1942_v54 = vld [vmem:[#allocation6 + $0x618] sm:$0xff] }
 0x2e4   :  { %5401 = vmatprep.subr.bf16.mxu1 %v14218_v1  ;;  %v1901_v1 = vld [vmem:[#allocation6 + $0x4d0] sm:$0xff]  ;;  %v1946_v56 = vld [vmem:[#allocation6 + $0x638] sm:$0xff] }
 0x2e6   :  { %5230 = vmatpush1.bf16.msra.mxu0 %v14215_v11  ;;  %v14272_v11 = vcombine.high %v1901_v1, %v1905_v6 }
 0x2e7   :  { %5402 = vmatpush1.bf16.msra.mxu1 %v14217_v12  ;;  %5231 = vmatprep.subr.bf16.mxu0 %v14224_v14  ;;  %v14274_v12 = vcombine.high %v1902_v8, %v1906_v9  ;;  %v1909_v14 = vld [vmem:[#allocation6 + $0x510] sm:$0xff]  ;;  %v14313_v8 = vcombine.low %v1942_v54, %v1946_v56 }
 0x2e8   :  { %5403 = vmatprep.subr.bf16.mxu1 %v14226_v17  ;;  %v1913_v17 = vld [vmem:[#allocation6 + $0x530] sm:$0xff] }
 0x2e9   :  { %v14280_v24 = vcombine.high %v1909_v14, %v1913_v17  ;;  %v14279_v34 = vcombine.low %v1909_v14, %v1913_v17  ;;  %v1962_v14 = vld [vmem:[#allocation6 + $0x6b8] sm:$0xff] }
 0x2ea   :  { %5232 = vmatpush1.bf16.msra.mxu0 %v14223_v15  ;;  %v14282_v15 = vcombine.high %v1910_v19, %v1914_v21 }
 0x2eb   :  { %5404 = vmatpush1.bf16.msra.mxu1 %v14225_v16  ;;  %5233 = vmatprep.subr.bf16.mxu0 %v14232_v26  ;;  %v1917_v16 = vld [vmem:[#allocation6 + $0x550] sm:$0xff] }
 0x2ec   :  { %5405 = vmatprep.subr.bf16.mxu1 %v14234_v27  ;;  %v1921_v26 = vld [vmem:[#allocation6 + $0x570] sm:$0xff]  ;;  %v1918_v27 = vld [vmem:[#allocation6 + $0x558] sm:$0xff] }
 0x2ed   :  { %v14288_v39 = vcombine.high %v1917_v16, %v1921_v26  ;;  %v14287_v29 = vcombine.low %v1917_v16, %v1921_v26  ;;  %v14289_v46 = vcombine.low %v1918_v27, %v1922_v33  ;;  %v1970_v16 = vld [vmem:[#allocation6 + $0x6f8] sm:$0xff] }
 0x2ee   :  { %5234 = vmatpush1.bf16.msra.mxu0 %v14231_v40  ;;  %v14290_v40 = vcombine.high %v1918_v27, %v1922_v33 }
 0x2ef   :  { %5406 = vmatpush1.bf16.msra.mxu1 %v14233_v42  ;;  %5235 = vmatprep.subr.bf16.mxu0 %v14240_v43  ;;  %v1925_v42 = vld [vmem:[#allocation6 + $0x590] sm:$0xff] }
 0x2f0   :  { %5407 = vmatprep.subr.bf16.mxu1 %v14242_v44  ;;  %v1929_v43 = vld [vmem:[#allocation6 + $0x5b0] sm:$0xff]  ;;  %v1926_v44 = vld [vmem:[#allocation6 + $0x598] sm:$0xff] }
 0x2f1   :  { %v14296_v47 = vcombine.high %v1925_v42, %v1929_v43  ;;  %v14295_v5 = vcombine.low %v1925_v42, %v1929_v43  ;;  %v1978_v42 = vld [vmem:[#allocation6 + $0x738] sm:$0xff] }
 0x2f2   :  { %5236 = vmatpush1.bf16.msra.mxu0 %v14239_v58  ;;  %v14298_v58 = vcombine.high %v1926_v44, %v1930_v45 }
 0x2f3   :  { %5408 = vmatpush1.bf16.msra.mxu1 %v14241_v48  ;;  %5248 = vmatprep.subr.bf16.mxu0 %v14248_v4  ;;  %v1933_v48 = vld [vmem:[#allocation6 + $0x5d0] sm:$0xff] }
 0x2f4   :  { %5420 = vmatprep.subr.bf16.mxu1 %v14250_v49  ;;  %v1937_v4 = vld [vmem:[#allocation6 + $0x5f0] sm:$0xff]  ;;  %v1934_v49 = vld [vmem:[#allocation6 + $0x5d8] sm:$0xff] }
 0x2f5   :  { %5238 = vmatmul.mubr.bf16.vlgmr.msra.gmra.mrb[12].mxu0 %v16618_v55  ;;  %v14304_v51 = vcombine.high %v1933_v48, %v1937_v4  ;;  %v14306_v52 = vcombine.high %v1934_v49, %v1938_v50 }
 0x2f6   :  { %5410 = vmatmul.mubr.bf16.vlgmr.msra.gmra.mrb[12].mxu1 %v16618_v55  ;;  %5249 = vmatpush1.bf16.msra.mxu0 %v14247_v41  ;;  %v14265_v55 = vcombine.low %v1894_v59, %v1898_v60  ;;  %v14297_v41 = vcombine.low %v1926_v44, %v1930_v45  ;;  %v14305_v59 = vcombine.low %v1934_v49, %v1938_v50 }
 0x2f7   :  { %5280 = vmatprep.mubr.bf16.mxu0 %v16632_v20  ;;  %5421 = vmatpush1.bf16.msra.mxu1 %v14249_v18  ;;  %v1941_v18 = vld [vmem:[#allocation6 + $0x610] sm:$0xff] }
 0x2f8   :  { %5452 = vmatprep.mubr.bf16.mxu1 %v16632_v20  ;;  %5250 = vmatprep.subr.bf16.mxu0 %v14256_v53  ;;  %v14271_v20 = vcombine.low %v1901_v1, %v1905_v6  ;;  %v1945_v53 = vld [vmem:[#allocation6 + $0x630] sm:$0xff]  ;;  %v1954_v1 = vld [vmem:[#allocation6 + $0x678] sm:$0xff] }
 0x2f9   :  { %5422 = vmatprep.subr.bf16.mxu1 %v14258_v57  ;;  %v14303_v57 = vcombine.low %v1933_v48, %v1937_v4  ;;  %v14312_v60 = vcombine.high %v1941_v18, %v1945_v53  ;;  %v14311_v6 = vcombine.low %v1941_v18, %v1945_v53  ;;  %v1986_v48 = vld [vmem:[#allocation6 + $0x778] sm:$0xff] }
 0x2fa   :  { %5251 = vmatpush1.bf16.msra.mxu0 %v14255_v61  ;;  %v14314_v61 = vcombine.high %v1942_v54, %v1946_v56  ;;  %v1994_v18 = vld [vmem:[#allocation6 + $0x7b8] sm:$0xff] }
 0x2fb   :  { %5423 = vmatpush1.bf16.msra.mxu1 %v14257_v62  ;;  %5252 = vmatprep.subr.bf16.mxu0 %v14264_v63  ;;  %v1949_v62 = vld [vmem:[#allocation6 + $0x650] sm:$0xff] }
 0x2fc   :  { %5424 = vmatprep.subr.bf16.mxu1 %v14266_v0  ;;  %v1953_v63 = vld [vmem:[#allocation6 + $0x670] sm:$0xff]  ;;  %v1950_v0 = vld [vmem:[#allocation6 + $0x658] sm:$0xff] }
 0x2fd   :  { %v14320_v9 = vcombine.high %v1949_v62, %v1953_v63  ;;  %v14319_v17 = vcombine.low %v1949_v62, %v1953_v63  ;;  %v14321_v19 = vcombine.low %v1950_v0, %v1954_v1  ;;  %v2002_v62 = vld [vmem:[#allocation6 + $0x7f8] sm:$0xff] }
 0x2fe   :  { %5253 = vmatpush1.bf16.msra.mxu0 %v14263_v10  ;;  %v14322_v10 = vcombine.high %v1950_v0, %v1954_v1 }
 0x2ff   :  { %5425 = vmatpush1.bf16.msra.mxu1 %v14265_v55  ;;  %5254 = vmatprep.subr.bf16.mxu0 %v14272_v11  ;;  %v1957_v55 = vld [vmem:[#allocation6 + $0x690] sm:$0xff] }
 0x300   :  { %5426 = vmatprep.subr.bf16.mxu1 %v14274_v12  ;;  %v1961_v11 = vld [vmem:[#allocation6 + $0x6b0] sm:$0xff]  ;;  %v1958_v12 = vld [vmem:[#allocation6 + $0x698] sm:$0xff] }
 0x301   :  { %v14328_v21 = vcombine.high %v1957_v55, %v1961_v11  ;;  %v14327_v26 = vcombine.low %v1957_v55, %v1961_v11  ;;  %v14329_v27 = vcombine.low %v1958_v12, %v1962_v14  ;;  %v2010_v55 = vld [vmem:[#allocation6 + $0x838] sm:$0xff] }
 0x302   :  { %5255 = vmatpush1.bf16.msra.mxu0 %v14271_v20  ;;  %v14330_v20 = vcombine.high %v1958_v12, %v1962_v14 }
 0x303   :  { %5427 = vmatpush1.bf16.msra.mxu1 %v14273_v22  ;;  %5256 = vmatprep.subr.bf16.mxu0 %v14280_v24  ;;  %v1965_v22 = vld [vmem:[#allocation6 + $0x6d0] sm:$0xff] }
 0x304   :  { %5428 = vmatprep.subr.bf16.mxu1 %v14282_v15  ;;  %v1969_v24 = vld [vmem:[#allocation6 + $0x6f0] sm:$0xff]  ;;  %v1966_v15 = vld [vmem:[#allocation6 + $0x6d8] sm:$0xff] }
 0x305   :  { %v14336_v33 = vcombine.high %v1965_v22, %v1969_v24  ;;  %v14335_v43 = vcombine.low %v1965_v22, %v1969_v24  ;;  %v14337_v44 = vcombine.low %v1966_v15, %v1970_v16  ;;  %v2014_v22 = vld [vmem:[#allocation6 + $0x858] sm:$0xff] }
 0x306   :  { %5257 = vmatpush1.bf16.msra.mxu0 %v14279_v34  ;;  %v14338_v34 = vcombine.high %v1966_v15, %v1970_v16  ;;  %v2018_v24 = vld [vmem:[#allocation6 + $0x878] sm:$0xff] }
 0x307   :  { %5429 = vmatpush1.bf16.msra.mxu1 %v14281_v37  ;;  %5258 = vmatprep.subr.bf16.mxu0 %v14288_v39  ;;  %v1973_v37 = vld [vmem:[#allocation6 + $0x710] sm:$0xff] }
 0x308   :  { %5430 = vmatprep.subr.bf16.mxu1 %v14290_v40  ;;  %v1977_v39 = vld [vmem:[#allocation6 + $0x730] sm:$0xff]  ;;  %v1974_v40 = vld [vmem:[#allocation6 + $0x718] sm:$0xff] }
 0x309   :  { %v14344_v45 = vcombine.high %v1973_v37, %v1977_v39  ;;  %v14343_v4 = vcombine.low %v1973_v37, %v1977_v39  ;;  %v14345_v49 = vcombine.low %v1974_v40, %v1978_v42  ;;  %v2026_v37 = vld [vmem:[#allocation6 + $0x8b8] sm:$0xff] }
 0x30a   :  { %5259 = vmatpush1.bf16.msra.mxu0 %v14287_v29  ;;  %v14346_v29 = vcombine.high %v1974_v40, %v1978_v42  ;;  %v14385_v40 = vcombine.low %v2014_v22, %v2018_v24 }
 0x30b   :  { %5431 = vmatpush1.bf16.msra.mxu1 %v14289_v46  ;;  %5260 = vmatprep.subr.bf16.mxu0 %v14296_v47  ;;  %v1981_v46 = vld [vmem:[#allocation6 + $0x750] sm:$0xff] }
 0x30c   :  { %5432 = vmatprep.subr.bf16.mxu1 %v14298_v58  ;;  %v1985_v47 = vld [vmem:[#allocation6 + $0x770] sm:$0xff]  ;;  %v1982_v58 = vld [vmem:[#allocation6 + $0x758] sm:$0xff] }
 0x30d   :  { %v14352_v50 = vcombine.high %v1981_v46, %v1985_v47  ;;  %v14351_v53 = vcombine.low %v1981_v46, %v1985_v47  ;;  %v14353_v54 = vcombine.low %v1982_v58, %v1986_v48  ;;  %v2034_v46 = vld [vmem:[#allocation6 + $0x8f8] sm:$0xff] }
 0x30e   :  { %5261 = vmatpush1.bf16.msra.mxu0 %v14295_v5  ;;  %v14354_v5 = vcombine.high %v1982_v58, %v1986_v48 }
 0x30f   :  { %5433 = vmatpush1.bf16.msra.mxu1 %v14297_v41  ;;  %5262 = vmatprep.subr.bf16.mxu0 %v14304_v51  ;;  %v1989_v41 = vld [vmem:[#allocation6 + $0x790] sm:$0xff] }
 0x310   :  { %5434 = vmatprep.subr.bf16.mxu1 %v14306_v52  ;;  %v1993_v51 = vld [vmem:[#allocation6 + $0x7b0] sm:$0xff]  ;;  %v1990_v52 = vld [vmem:[#allocation6 + $0x798] sm:$0xff] }
 0x311   :  { %v14360_v56 = vcombine.high %v1989_v41, %v1993_v51  ;;  %v14359_v63 = vcombine.low %v1989_v41, %v1993_v51  ;;  %v14361_v0 = vcombine.low %v1990_v52, %v1994_v18 }
 0x312   :  { %5263 = vmatpush1.bf16.msra.mxu0 %v14303_v57  ;;  %v14362_v57 = vcombine.high %v1990_v52, %v1994_v18  ;;  %v2045_v18 = vld [vmem:[#allocation6 + $0x950] sm:$0xff] }
 0x313   :  { %5435 = vmatpush1.bf16.msra.mxu1 %v14305_v59  ;;  %5264 = vmatprep.subr.bf16.mxu0 %v14312_v60  ;;  %v1997_v59 = vld [vmem:[#allocation6 + $0x7d0] sm:$0xff] }
 0x314   :  { %5436 = vmatprep.subr.bf16.mxu1 %v14314_v61  ;;  %v2001_v60 = vld [vmem:[#allocation6 + $0x7f0] sm:$0xff]  ;;  %v1998_v61 = vld [vmem:[#allocation6 + $0x7d8] sm:$0xff] }
 0x315   :  { %v14368_v1 = vcombine.high %v1997_v59, %v2001_v60  ;;  %v14367_v11 = vcombine.low %v1997_v59, %v2001_v60  ;;  %v14369_v12 = vcombine.low %v1998_v61, %v2002_v62 }
 0x316   :  { %5265 = vmatpush1.bf16.msra.mxu0 %v14311_v6  ;;  %v14370_v6 = vcombine.high %v1998_v61, %v2002_v62  ;;  %v2053_v62 = vld [vmem:[#allocation6 + $0x990] sm:$0xff] }
 0x317   :  { %5437 = vmatpush1.bf16.msra.mxu1 %v14313_v8  ;;  %5266 = vmatprep.subr.bf16.mxu0 %v14320_v9  ;;  %v2005_v8 = vld [vmem:[#allocation6 + $0x810] sm:$0xff] }
 0x318   :  { %5438 = vmatprep.subr.bf16.mxu1 %v14322_v10  ;;  %v2009_v9 = vld [vmem:[#allocation6 + $0x830] sm:$0xff]  ;;  %v2006_v10 = vld [vmem:[#allocation6 + $0x818] sm:$0xff] }
 0x319   :  { %v14376_v14 = vcombine.high %v2005_v8, %v2009_v9  ;;  %v14377_v15 = vcombine.low %v2006_v10, %v2010_v55 }
 0x31a   :  { %5267 = vmatpush1.bf16.msra.mxu0 %v14319_v17  ;;  %v14378_v17 = vcombine.high %v2006_v10, %v2010_v55  ;;  %v2061_v55 = vld [vmem:[#allocation6 + $0x9d0] sm:$0xff] }
 0x31b   :  { %5439 = vmatpush1.bf16.msra.mxu1 %v14321_v19  ;;  %5268 = vmatprep.subr.bf16.mxu0 %v14328_v21  ;;  %v2013_v19 = vld [vmem:[#allocation6 + $0x850] sm:$0xff] }
 0x31c   :  { %5440 = vmatprep.subr.bf16.mxu1 %v14330_v20  ;;  %v2017_v21 = vld [vmem:[#allocation6 + $0x870] sm:$0xff]  ;;  %v14375_v20 = vcombine.low %v2005_v8, %v2009_v9 }
 0x31d   :  { %v14384_v16 = vcombine.high %v2013_v19, %v2017_v21  ;;  %v14383_v39 = vcombine.low %v2013_v19, %v2017_v21 }
 0x31e   :  { %5269 = vmatpush1.bf16.msra.mxu0 %v14327_v26  ;;  %v2021_v26 = vld [vmem:[#allocation6 + $0x890] sm:$0xff] }
 0x31f   :  { %5441 = vmatpush1.bf16.msra.mxu1 %v14329_v27  ;;  %5270 = vmatprep.subr.bf16.mxu0 %v14336_v33  ;;  %v2025_v27 = vld [vmem:[#allocation6 + $0x8b0] sm:$0xff]  ;;  %v14386_v33 = vcombine.high %v2014_v22, %v2018_v24 }
 0x320   :  { %5442 = vmatprep.subr.bf16.mxu1 %v14338_v34  ;;  %v2022_v34 = vld [vmem:[#allocation6 + $0x898] sm:$0xff]  ;;  %v14392_v42 = vcombine.high %v2021_v26, %v2025_v27  ;;  %v14391_v47 = vcombine.low %v2021_v26, %v2025_v27  ;;  %v2069_v22 = vld [vmem:[#allocation6 + $0xa10] sm:$0xff] }
 0x321   :  { %v2073_v24 = vld [vmem:[#allocation6 + $0xa30] sm:$0xff] }
 0x322   :  { %5271 = vmatpush1.bf16.msra.mxu0 %v14335_v43  ;;  %v14394_v43 = vcombine.high %v2022_v34, %v2026_v37 }
 0x323   :  { %5443 = vmatpush1.bf16.msra.mxu1 %v14337_v44  ;;  %5272 = vmatprep.subr.bf16.mxu0 %v14344_v45  ;;  %v2029_v44 = vld [vmem:[#allocation6 + $0x8d0] sm:$0xff] }
 0x324   :  { %5444 = vmatprep.subr.bf16.mxu1 %v14346_v29  ;;  %v2033_v45 = vld [vmem:[#allocation6 + $0x8f0] sm:$0xff]  ;;  %v2030_v29 = vld [vmem:[#allocation6 + $0x8d8] sm:$0xff] }
 0x325   :  { %v14400_v58 = vcombine.high %v2029_v44, %v2033_v45  ;;  %v14402_v48 = vcombine.high %v2030_v29, %v2034_v46  ;;  %v14401_v41 = vcombine.low %v2030_v29, %v2034_v46  ;;  %v2085_v46 = vld [vmem:[#allocation6 + $0xa90] sm:$0xff] }
 0x326   :  { %5273 = vmatpush1.bf16.msra.mxu0 %v14343_v4  ;;  %v2037_v4 = vld [vmem:[#allocation6 + $0x910] sm:$0xff] }
 0x327   :  { %5445 = vmatpush1.bf16.msra.mxu1 %v14345_v49  ;;  %5274 = vmatprep.subr.bf16.mxu0 %v14352_v50  ;;  %v2041_v49 = vld [vmem:[#allocation6 + $0x930] sm:$0xff]  ;;  %v2038_v50 = vld [vmem:[#allocation6 + $0x918] sm:$0xff] }
 0x328   :  { %5446 = vmatprep.subr.bf16.mxu1 %v14354_v5  ;;  %v2042_v5 = vld [vmem:[#allocation6 + $0x938] sm:$0xff]  ;;  %v14408_v51 = vcombine.high %v2037_v4, %v2041_v49 }
 0x329   :  { %v14410_v52 = vcombine.high %v2038_v50, %v2042_v5  ;;  %v14409_v59 = vcombine.low %v2038_v50, %v2042_v5  ;;  %v2093_v5 = vld [vmem:[#allocation6 + $0xad0] sm:$0xff] }
 0x32a   :  { %5275 = vmatpush1.bf16.msra.mxu0 %v14351_v53  ;;  %v2049_v53 = vld [vmem:[#allocation6 + $0x970] sm:$0xff] }
 0x32b   :  { %5447 = vmatpush1.bf16.msra.mxu1 %v14353_v54  ;;  %5276 = vmatprep.subr.bf16.mxu0 %v14360_v56  ;;  %v2046_v54 = vld [vmem:[#allocation6 + $0x958] sm:$0xff]  ;;  %v14416_v60 = vcombine.high %v2045_v18, %v2049_v53 }
 0x32c   :  { %5448 = vmatprep.subr.bf16.mxu1 %v14362_v57  ;;  %v2050_v56 = vld [vmem:[#allocation6 + $0x978] sm:$0xff]  ;;  %v14407_v57 = vcombine.low %v2037_v4, %v2041_v49 }
 0x32d   :  { %v14418_v61 = vcombine.high %v2046_v54, %v2050_v56  ;;  %v14417_v8 = vcombine.low %v2046_v54, %v2050_v56  ;;  %v2101_v56 = vld [vmem:[#allocation6 + $0xb10] sm:$0xff] }
 0x32e   :  { %5277 = vmatpush1.bf16.msra.mxu0 %v14359_v63  ;;  %v2057_v63 = vld [vmem:[#allocation6 + $0x9b0] sm:$0xff] }
 0x32f   :  { %5449 = vmatpush1.bf16.msra.mxu1 %v14361_v0  ;;  %5278 = vmatprep.subr.bf16.mxu0 %v14368_v1  ;;  %v2054_v0 = vld [vmem:[#allocation6 + $0x998] sm:$0xff]  ;;  %v14424_v9 = vcombine.high %v2053_v62, %v2057_v63 }
 0x330   :  { %5450 = vmatprep.subr.bf16.mxu1 %v14370_v6  ;;  %v2058_v1 = vld [vmem:[#allocation6 + $0x9b8] sm:$0xff]  ;;  %v14415_v6 = vcombine.low %v2045_v18, %v2049_v53 }
 0x331   :  { %v14426_v10 = vcombine.high %v2054_v0, %v2058_v1  ;;  %v14425_v19 = vcombine.low %v2054_v0, %v2058_v1  ;;  %v2109_v1 = vld [vmem:[#allocation6 + $0xb50] sm:$0xff] }
 0x332   :  { %5279 = vmatpush1.bf16.msra.mxu0 %v14367_v11  ;;  %v2065_v11 = vld [vmem:[#allocation6 + $0x9f0] sm:$0xff] }
 0x333   :  { %5451 = vmatpush1.bf16.msra.mxu1 %v14369_v12  ;;  %5291 = vmatprep.subr.bf16.mxu0 %v14376_v14  ;;  %v2062_v12 = vld [vmem:[#allocation6 + $0x9d8] sm:$0xff]  ;;  %v14432_v21 = vcombine.high %v2061_v55, %v2065_v11  ;;  %v14431_v26 = vcombine.low %v2061_v55, %v2065_v11 }
 0x334   :  { %5463 = vmatprep.subr.bf16.mxu1 %v14378_v17  ;;  %v2066_v14 = vld [vmem:[#allocation6 + $0x9f8] sm:$0xff]  ;;  %v14423_v17 = vcombine.low %v2053_v62, %v2057_v63 }
 0x335   :  { %5281 = vmatmul.mubr.bf16.vlgmr.msra.gmra.mrb[12].mxu0 %v16630_v13  ;;  %v14433_v27 = vcombine.low %v2062_v12, %v2066_v14 }
 0x336   :  { %5453 = vmatmul.mubr.bf16.vlgmr.msra.gmra.mrb[12].mxu1 %v16630_v13  ;;  %5292 = vmatpush1.bf16.msra.mxu0 %v14375_v20  ;;  %v14393_v13 = vcombine.low %v2022_v34, %v2026_v37  ;;  %v14434_v20 = vcombine.high %v2062_v12, %v2066_v14  ;;  %v2077_v37 = vld [vmem:[#allocation6 + $0xa50] sm:$0xff] }
 0x337   :  { %5323 = vmatprep.mubr.bf16.mxu0 %v16660_v2  ;;  %5464 = vmatpush1.bf16.msra.mxu1 %v14377_v15  ;;  %v2070_v15 = vld [vmem:[#allocation6 + $0xa18] sm:$0xff]  ;;  %v2117_v14 = vld [vmem:[#allocation6 + $0xb90] sm:$0xff] }
 0x338   :  { %5495 = vmatprep.mubr.bf16.mxu1 %v16660_v2  ;;  %5293 = vmatprep.subr.bf16.mxu0 %v14384_v16  ;;  %v14399_v2 = vcombine.low %v2029_v44, %v2033_v45  ;;  %v2074_v16 = vld [vmem:[#allocation6 + $0xa38] sm:$0xff] }
 0x339   :  { %5465 = vmatprep.subr.bf16.mxu1 %v14386_v33  ;;  %v14440_v33 = vcombine.high %v2069_v22, %v2073_v24  ;;  %v14442_v34 = vcombine.high %v2070_v15, %v2074_v16  ;;  %v14441_v44 = vcombine.low %v2070_v15, %v2074_v16  ;;  %v2125_v16 = vld [vmem:[#allocation6 + $0xbd0] sm:$0xff] }
 0x33a   :  { %5294 = vmatpush1.bf16.msra.mxu0 %v14383_v39  ;;  %v2081_v39 = vld [vmem:[#allocation6 + $0xa70] sm:$0xff] }
 0x33b   :  { %5466 = vmatpush1.bf16.msra.mxu1 %v14385_v40  ;;  %5295 = vmatprep.subr.bf16.mxu0 %v14392_v42  ;;  %v2078_v40 = vld [vmem:[#allocation6 + $0xa58] sm:$0xff]  ;;  %v14448_v45 = vcombine.high %v2077_v37, %v2081_v39 }
 0x33c   :  { %5467 = vmatprep.subr.bf16.mxu1 %v14394_v43  ;;  %v2082_v42 = vld [vmem:[#allocation6 + $0xa78] sm:$0xff]  ;;  %v14439_v43 = vcombine.low %v2069_v22, %v2073_v24 }
 0x33d   :  { %v14450_v29 = vcombine.high %v2078_v40, %v2082_v42  ;;  %v14449_v4 = vcombine.low %v2078_v40, %v2082_v42  ;;  %v2133_v42 = vld [vmem:[#allocation6 + $0xc10] sm:$0xff] }
 0x33e   :  { %5296 = vmatpush1.bf16.msra.mxu0 %v14391_v47  ;;  %v2089_v47 = vld [vmem:[#allocation6 + $0xab0] sm:$0xff] }
 0x33f   :  { %5468 = vmatpush1.bf16.msra.mxu1 %v14393_v13  ;;  %5297 = vmatprep.subr.bf16.mxu0 %v14400_v58  ;;  %v2086_v13 = vld [vmem:[#allocation6 + $0xa98] sm:$0xff]  ;;  %v14456_v49 = vcombine.high %v2085_v46, %v2089_v47 }
 0x340   :  { %5469 = vmatprep.subr.bf16.mxu1 %v14402_v48  ;;  %v2090_v58 = vld [vmem:[#allocation6 + $0xab8] sm:$0xff]  ;;  %v14447_v48 = vcombine.low %v2077_v37, %v2081_v39 }
 0x341   :  { %v14458_v50 = vcombine.high %v2086_v13, %v2090_v58  ;;  %v14457_v18 = vcombine.low %v2086_v13, %v2090_v58  ;;  %v2141_v58 = vld [vmem:[#allocation6 + $0xc50] sm:$0xff] }
 0x342   :  { %5298 = vmatpush1.bf16.msra.mxu0 %v14399_v2  ;;  %v2097_v2 = vld [vmem:[#allocation6 + $0xaf0] sm:$0xff] }
 0x343   :  { %5470 = vmatpush1.bf16.msra.mxu1 %v14401_v41  ;;  %5299 = vmatprep.subr.bf16.mxu0 %v14408_v51  ;;  %v2094_v41 = vld [vmem:[#allocation6 + $0xad8] sm:$0xff]  ;;  %v14464_v53 = vcombine.high %v2093_v5, %v2097_v2 }
 0x344   :  { %5471 = vmatprep.subr.bf16.mxu1 %v14410_v52  ;;  %v2098_v51 = vld [vmem:[#allocation6 + $0xaf8] sm:$0xff]  ;;  %v14455_v52 = vcombine.low %v2085_v46, %v2089_v47 }
 0x345   :  { %v14466_v54 = vcombine.high %v2094_v41, %v2098_v51  ;;  %v14465_v62 = vcombine.low %v2094_v41, %v2098_v51  ;;  %v2149_v41 = vld [vmem:[#allocation6 + $0xc90] sm:$0xff] }
 0x346   :  { %5300 = vmatpush1.bf16.msra.mxu0 %v14407_v57  ;;  %v2105_v57 = vld [vmem:[#allocation6 + $0xb30] sm:$0xff] }
 0x347   :  { %5472 = vmatpush1.bf16.msra.mxu1 %v14409_v59  ;;  %5301 = vmatprep.subr.bf16.mxu0 %v14416_v60  ;;  %v2102_v59 = vld [vmem:[#allocation6 + $0xb18] sm:$0xff]  ;;  %v14472_v63 = vcombine.high %v2101_v56, %v2105_v57  ;;  %v2153_v51 = vld [vmem:[#allocation6 + $0xcb0] sm:$0xff] }
 0x348   :  { %5473 = vmatprep.subr.bf16.mxu1 %v14418_v61  ;;  %v2106_v60 = vld [vmem:[#allocation6 + $0xb38] sm:$0xff]  ;;  %v14463_v61 = vcombine.low %v2093_v5, %v2097_v2 }
 0x349   :  { %v14474_v0 = vcombine.high %v2102_v59, %v2106_v60  ;;  %v14473_v55 = vcombine.low %v2102_v59, %v2106_v60  ;;  %v2157_v60 = vld [vmem:[#allocation6 + $0xcd0] sm:$0xff] }
 0x34a   :  { %5302 = vmatpush1.bf16.msra.mxu0 %v14415_v6  ;;  %v2113_v6 = vld [vmem:[#allocation6 + $0xb70] sm:$0xff] }
 0x34b   :  { %5474 = vmatpush1.bf16.msra.mxu1 %v14417_v8  ;;  %5303 = vmatprep.subr.bf16.mxu0 %v14424_v9  ;;  %v2110_v8 = vld [vmem:[#allocation6 + $0xb58] sm:$0xff]  ;;  %v14480_v11 = vcombine.high %v2109_v1, %v2113_v6 }
 0x34c   :  { %5475 = vmatprep.subr.bf16.mxu1 %v14426_v10  ;;  %v2114_v9 = vld [vmem:[#allocation6 + $0xb78] sm:$0xff]  ;;  %v14471_v10 = vcombine.low %v2101_v56, %v2105_v57  ;;  %v14520_v57 = vcombine.high %v2149_v41, %v2153_v51 }
 0x34d   :  { %v14482_v12 = vcombine.high %v2110_v8, %v2114_v9  ;;  %v14481_v22 = vcombine.low %v2110_v8, %v2114_v9  ;;  %v2165_v8 = vld [vmem:[#allocation6 + $0xd10] sm:$0xff] }
 0x34e   :  { %5304 = vmatpush1.bf16.msra.mxu0 %v14423_v17  ;;  %v2121_v17 = vld [vmem:[#allocation6 + $0xbb0] sm:$0xff] }
 0x34f   :  { %5476 = vmatpush1.bf16.msra.mxu1 %v14425_v19  ;;  %5305 = vmatprep.subr.bf16.mxu0 %v14432_v21  ;;  %v2118_v19 = vld [vmem:[#allocation6 + $0xb98] sm:$0xff]  ;;  %v14488_v24 = vcombine.high %v2117_v14, %v2121_v17  ;;  %v2169_v9 = vld [vmem:[#allocation6 + $0xd30] sm:$0xff] }
 0x350   :  { %5477 = vmatprep.subr.bf16.mxu1 %v14434_v20  ;;  %v2122_v21 = vld [vmem:[#allocation6 + $0xbb8] sm:$0xff]  ;;  %v14479_v20 = vcombine.low %v2109_v1, %v2113_v6 }
 0x351   :  { %v14490_v15 = vcombine.high %v2118_v19, %v2122_v21  ;;  %v14489_v37 = vcombine.low %v2118_v19, %v2122_v21  ;;  %v2177_v19 = vld [vmem:[#allocation6 + $0xd70] sm:$0xff]  ;;  %v2174_v21 = vld [vmem:[#allocation6 + $0xd58] sm:$0xff] }
 0x352   :  { %5306 = vmatpush1.bf16.msra.mxu0 %v14431_v26  ;;  %v2129_v26 = vld [vmem:[#allocation6 + $0xbf0] sm:$0xff] }
 0x353   :  { %5478 = vmatpush1.bf16.msra.mxu1 %v14433_v27  ;;  %5307 = vmatprep.subr.bf16.mxu0 %v14440_v33  ;;  %v2126_v27 = vld [vmem:[#allocation6 + $0xbd8] sm:$0xff]  ;;  %v14496_v39 = vcombine.high %v2125_v16, %v2129_v26 }
 0x354   :  { %5479 = vmatprep.subr.bf16.mxu1 %v14442_v34  ;;  %v2130_v33 = vld [vmem:[#allocation6 + $0xbf8] sm:$0xff]  ;;  %v14487_v34 = vcombine.low %v2117_v14, %v2121_v17  ;;  %v2173_v17 = vld [vmem:[#allocation6 + $0xd50] sm:$0xff] }
 0x355   :  { %v14498_v40 = vcombine.high %v2126_v27, %v2130_v33  ;;  %v14497_v46 = vcombine.low %v2126_v27, %v2130_v33  ;;  %v2181_v27 = vld [vmem:[#allocation6 + $0xd90] sm:$0xff] }
 0x356   :  { %5308 = vmatpush1.bf16.msra.mxu0 %v14439_v43  ;;  %v2137_v43 = vld [vmem:[#allocation6 + $0xc30] sm:$0xff] }
 0x357   :  { %5480 = vmatpush1.bf16.msra.mxu1 %v14441_v44  ;;  %5309 = vmatprep.subr.bf16.mxu0 %v14448_v45  ;;  %v2134_v44 = vld [vmem:[#allocation6 + $0xc18] sm:$0xff]  ;;  %v14504_v47 = vcombine.high %v2133_v42, %v2137_v43  ;;  %v2185_v33 = vld [vmem:[#allocation6 + $0xdb0] sm:$0xff] }
 0x358   :  { %5481 = vmatprep.subr.bf16.mxu1 %v14450_v29  ;;  %v2138_v45 = vld [vmem:[#allocation6 + $0xc38] sm:$0xff]  ;;  %v14495_v29 = vcombine.low %v2125_v16, %v2129_v26  ;;  %v14544_v16 = vcombine.high %v2173_v17, %v2177_v19 }
 0x359   :  { %v14506_v13 = vcombine.high %v2134_v44, %v2138_v45  ;;  %v14505_v5 = vcombine.low %v2134_v44, %v2138_v45  ;;  %v14543_v44 = vcombine.low %v2173_v17, %v2177_v19 }
 0x35a   :  { %5310 = vmatpush1.bf16.msra.mxu0 %v14447_v48  ;;  %v2145_v48 = vld [vmem:[#allocation6 + $0xc70] sm:$0xff] }
 0x35b   :  { %5482 = vmatpush1.bf16.msra.mxu1 %v14449_v4  ;;  %5311 = vmatprep.subr.bf16.mxu0 %v14456_v49  ;;  %v14503_v4 = vcombine.low %v2133_v42, %v2137_v43  ;;  %v2142_v49 = vld [vmem:[#allocation6 + $0xc58] sm:$0xff]  ;;  %v14512_v2 = vcombine.high %v2141_v58, %v2145_v48 }
 0x35c   :  { %5483 = vmatprep.subr.bf16.mxu1 %v14458_v50  ;;  %v2146_v50 = vld [vmem:[#allocation6 + $0xc78] sm:$0xff] }
 0x35d   :  { %v14513_v56 = vcombine.low %v2142_v49, %v2146_v50 }
 0x35e   :  { %5312 = vmatpush1.bf16.msra.mxu0 %v14455_v52  ;;  %v14514_v52 = vcombine.high %v2142_v49, %v2146_v50 }
 0x35f   :  { %5484 = vmatpush1.bf16.msra.mxu1 %v14457_v18  ;;  %5313 = vmatprep.subr.bf16.mxu0 %v14464_v53  ;;  %v2150_v18 = vld [vmem:[#allocation6 + $0xc98] sm:$0xff] }
 0x360   :  { %5485 = vmatprep.subr.bf16.mxu1 %v14466_v54  ;;  %v2154_v53 = vld [vmem:[#allocation6 + $0xcb8] sm:$0xff]  ;;  %v14511_v54 = vcombine.low %v2141_v58, %v2145_v48 }
 0x361   :  { %v14522_v59 = vcombine.high %v2150_v18, %v2154_v53 }
 0x362   :  { %5314 = vmatpush1.bf16.msra.mxu0 %v14463_v61  ;;  %v2161_v61 = vld [vmem:[#allocation6 + $0xcf0] sm:$0xff] }
 0x363   :  { %5486 = vmatpush1.bf16.msra.mxu1 %v14465_v62  ;;  %5315 = vmatprep.subr.bf16.mxu0 %v14472_v63  ;;  %v2158_v62 = vld [vmem:[#allocation6 + $0xcd8] sm:$0xff]  ;;  %v14528_v1 = vcombine.high %v2157_v60, %v2161_v61 }
 0x364   :  { %5487 = vmatprep.subr.bf16.mxu1 %v14474_v0  ;;  %v2162_v63 = vld [vmem:[#allocation6 + $0xcf8] sm:$0xff]  ;;  %v14519_v0 = vcombine.low %v2149_v41, %v2153_v51 }
 0x365   :  { %v14530_v6 = vcombine.high %v2158_v62, %v2162_v63  ;;  %v2190_v41 = vld [vmem:[#allocation6 + $0xdd8] sm:$0xff] }
 0x366   :  { %5316 = vmatpush1.bf16.msra.mxu0 %v14471_v10  ;;  %v2166_v10 = vld [vmem:[#allocation6 + $0xd18] sm:$0xff] }
 0x367   :  { %5488 = vmatpush1.bf16.msra.mxu1 %v14473_v55  ;;  %5317 = vmatprep.subr.bf16.mxu0 %v14480_v11  ;;  %v2170_v55 = vld [vmem:[#allocation6 + $0xd38] sm:$0xff]  ;;  %v14529_v11 = vcombine.low %v2158_v62, %v2162_v63 }
 0x368   :  { %5489 = vmatprep.subr.bf16.mxu1 %v14482_v12  ;;  %v14536_v12 = vcombine.high %v2165_v8, %v2169_v9  ;;  %v14538_v14 = vcombine.high %v2166_v10, %v2170_v55  ;;  %v2194_v51 = vld [vmem:[#allocation6 + $0xdf8] sm:$0xff] }
 0x36a   :  { %5318 = vmatpush1.bf16.msra.mxu0 %v14479_v20  ;;  %v2178_v20 = vld [vmem:[#allocation6 + $0xd78] sm:$0xff] }
 0x36b   :  { %5490 = vmatpush1.bf16.msra.mxu1 %v14481_v22  ;;  %5319 = vmatprep.subr.bf16.mxu0 %v14488_v24  ;;  %v14535_v22 = vcombine.low %v2165_v8, %v2169_v9  ;;  %v2259_v24 = vld [vmem:[#allocation7] sm:$0xff]  ;;  %v14546_v26 = vcombine.high %v2174_v21, %v2178_v20  ;;  %v14545_v45 = vcombine.low %v2174_v21, %v2178_v20  ;;  %v2197_v8 = vld [vmem:[#allocation6 + $0xe10] sm:$0xff] }
 0x36c   :  { %5491 = vmatprep.subr.bf16.mxu1 %v14490_v15  ;;  %v14537_v15 = vcombine.low %v2166_v10, %v2170_v55  ;;  %v2268_v42 = vrot.slane %v2259_v24, %v16602_v32  ;;  %v2276_v43 = vrot.slane %v2259_v24, %v16612_v36  ;;  %v2201_v9 = vld [vmem:[#allocation6 + $0xe30] sm:$0xff] }
 0x36e   :  { %5320 = vmatpush1.bf16.msra.mxu0 %v14487_v34  ;;  %v2264_v34 = vrot.slane %v2259_v24, %v16597_v30 }
 0x36f   :  { %5492 = vmatpush1.bf16.msra.mxu1 %v14489_v37  ;;  %5321 = vmatprep.subr.bf16.mxu0 %v14496_v39  ;;  %v2272_v37 = vrot.slane %v2259_v24, %v16609_v35  ;;  %v2182_v39 = vld [vmem:[#allocation6 + $0xd98] sm:$0xff] }
 0x370   :  { %5493 = vmatprep.subr.bf16.mxu1 %v14498_v40  ;;  %v2186_v40 = vld [vmem:[#allocation6 + $0xdb8] sm:$0xff] }
 0x371   :  { %v14554_v48 = vcombine.high %v2182_v39, %v2186_v40 }
 0x372   :  { %5322 = vmatpush1.bf16.msra.mxu0 %v14495_v29  ;;  %v14552_v29 = vcombine.high %v2181_v27, %v2185_v33 }
 0x373   :  { %5494 = vmatpush1.bf16.msra.mxu1 %v14497_v46  ;;  %5334 = vmatprep.subr.bf16.mxu0 %v14504_v47  ;;  %v2189_v46 = vld [vmem:[#allocation6 + $0xdd0] sm:$0xff] }
 0x374   :  { %5506 = vmatprep.subr.bf16.mxu1 %v14506_v13  ;;  %v2193_v47 = vld [vmem:[#allocation6 + $0xdf0] sm:$0xff] }
 0x375   :  { %5324 = vmatmul.mubr.bf16.vlgmr.msra.gmra.mrb[12].mxu0 %v16658_v31  ;;  %v14560_v63 = vcombine.high %v2189_v46, %v2193_v47 }
 0x376   :  { %5496 = vmatmul.mubr.bf16.vlgmr.msra.gmra.mrb[12].mxu1 %v16658_v31  ;;  %5335 = vmatpush1.bf16.msra.mxu0 %v14503_v4  ;;  %v14521_v31 = vcombine.low %v2150_v18, %v2154_v53 }
 0x377   :  { %5366 = vmatprep.mubr.bf16.mxu0 %v16666_v38  ;;  %5507 = vmatpush1.bf16.msra.mxu1 %v14505_v5 }
 0x378   :  { %5538 = vmatprep.mubr.bf16.mxu1 %v16666_v38  ;;  %5336 = vmatprep.subr.bf16.mxu0 %v14512_v2  ;;  %v14527_v38 = vcombine.low %v2157_v60, %v2161_v61  ;;  %v14551_v2 = vcombine.low %v2181_v27, %v2185_v33  ;;  %v2205_v33 = vld [vmem:[#allocation6 + $0xe50] sm:$0xff] }
 0x379   :  { %5508 = vmatprep.subr.bf16.mxu1 %v14514_v52 }
 0x37a   :  { %5337 = vmatpush1.bf16.msra.mxu0 %v14511_v54 }
 0x37b   :  { %5509 = vmatpush1.bf16.msra.mxu1 %v14513_v56  ;;  %5338 = vmatprep.subr.bf16.mxu0 %v14520_v57  ;;  %v14553_v56 = vcombine.low %v2182_v39, %v2186_v40  ;;  %v14559_v57 = vcombine.low %v2189_v46, %v2193_v47  ;;  %v2210_v39 = vld [vmem:[#allocation6 + $0xe78] sm:$0xff]  ;;  %v14567_v40 = vcombine.low %v2197_v8, %v2201_v9 }
 0x37c   :  { %5510 = vmatprep.subr.bf16.mxu1 %v14522_v59  ;;  %v2214_v46 = vld [vmem:[#allocation6 + $0xe98] sm:$0xff] }
 0x37d   :  { %v2218_v47 = vld [vmem:[#allocation6 + $0xeb8] sm:$0xff] }
 0x37e   :  { %5339 = vmatpush1.bf16.msra.mxu0 %v14519_v0 }
 0x37f   :  { %5511 = vmatpush1.bf16.msra.mxu1 %v14521_v31  ;;  %5340 = vmatprep.subr.bf16.mxu0 %v14528_v1  ;;  %v14561_v1 = vcombine.low %v2190_v41, %v2194_v51 }
 0x380   :  { %5512 = vmatprep.subr.bf16.mxu1 %v14530_v6  ;;  %v14562_v6 = vcombine.high %v2190_v41, %v2194_v51  ;;  %v14585_v51 = vcombine.low %v2214_v46, %v2218_v47 }
 0x382   :  { %5341 = vmatpush1.bf16.msra.mxu0 %v14527_v38 }
 0x383   :  { %5513 = vmatpush1.bf16.msra.mxu1 %v14529_v11  ;;  %5342 = vmatprep.subr.bf16.mxu0 %v14536_v12  ;;  %v2198_v12 = vld [vmem:[#allocation6 + $0xe18] sm:$0xff] }
 0x384   :  { %5514 = vmatprep.subr.bf16.mxu1 %v14538_v14  ;;  %v2202_v14 = vld [vmem:[#allocation6 + $0xe38] sm:$0xff] }
 0x385   :  { %v14570_v27 = vcombine.high %v2198_v12, %v2202_v14 }
 0x386   :  { %5343 = vmatpush1.bf16.msra.mxu0 %v14535_v22 }
 0x387   :  { %5515 = vmatpush1.bf16.msra.mxu1 %v14537_v15  ;;  %5344 = vmatprep.subr.bf16.mxu0 %v14544_v16  ;;  %v14568_v15 = vcombine.high %v2197_v8, %v2201_v9 }
 0x388   :  { %v5024_v13 = vpop.f32.mrb[8].mxu0  ;;  %v5196_v58 = vpop.f32.mrb[8].mxu1  ;;  %5516 = vmatprep.subr.bf16.mxu1 %v14546_v26 }
 0x389   :  { %v15820_v4 = vadd.f32 %v5024_v13, %v2264_v34  ;;  %v15824_v49 = vadd.f32 %v5196_v58, %v2272_v37  ;;  %v5026_v50 = vpop.f32.mrb[9].mxu0  ;;  %v5198_v5 = vpop.f32.mrb[9].mxu1 }
 0x38a   :  { %v15821_v52 = vadd.f32 %v5026_v50, %v2268_v42  ;;  %v15825_v18 = vadd.f32 %v5198_v5, %v2276_v43  ;;  %v5028_v53 = vpop.f32.mrb[10].mxu0  ;;  %v5200_v54 = vpop.f32.mrb[10].mxu1  ;;  %5345 = vmatpush1.bf16.msra.mxu0 %v14543_v44  ;;  %v2225_v50 = vld [vmem:[#allocation6 + $0xef0] sm:$0xff]  ;;  %v2222_v5 = vld [vmem:[#allocation6 + $0xed8] sm:$0xff] }
 0x38b   :  { %v15822_v59 = vadd.f32 %v5028_v53, %v2264_v34  ;;  %v15826_v60 = vadd.f32 %v5200_v54, %v2272_v37  ;;  %5517 = vmatpush1.bf16.msra.mxu1 %v14545_v45  ;;  %v5030_v61 = vpop.f32.mrb[11].mxu0  ;;  %v5202_v62 = vpop.f32.mrb[11].mxu1  ;;  %5346 = vmatprep.subr.bf16.mxu0 %v14552_v29  ;;  %v5549_v10 = vmax.f32 %v15820_v4, 0.0  ;;  %v5551_v55 = vmax.f32 %v15824_v49, 0.0  ;;  %v2209_v34 = vld [vmem:[#allocation6 + $0xe70] sm:$0xff]  ;;  %v2206_v37 = vld [vmem:[#allocation6 + $0xe58] sm:$0xff] }
 0x38c   :  { %v15823_v0 = vadd.f32 %v5030_v61, %v2268_v42  ;;  %v15827_v31 = vadd.f32 %v5202_v62, %v2276_v43  ;;  %5518 = vmatprep.subr.bf16.mxu1 %v14554_v48  ;;  %v5550_v17 = vmax.f32 %v15821_v52, 0.0  ;;  %v5552_v19 = vmax.f32 %v15825_v18, 0.0  ;;  %v2213_v45 = vld [vmem:[#allocation6 + $0xe90] sm:$0xff] }
 0x38d   :  { %v5557_v38 = vmax.f32 %v15822_v59, 0.0  ;;  %v5559_v11 = vmax.f32 %v15826_v60, 0.0  ;;  %v14569_v42 = vcombine.low %v2198_v12, %v2202_v14  ;;  %v14576_v43 = vcombine.high %v2205_v33, %v2209_v34  ;;  %v2217_v29 = vld [vmem:[#allocation6 + $0xeb0] sm:$0xff]  ;;  %v2250_v12 = vld [vmem:[#allocation6 + $0xfb8] sm:$0xff] }
 0x38e   :  { %v5558_v21 = vmax.f32 %v15823_v0, 0.0  ;;  %v5560_v20 = vmax.f32 %v15827_v31, 0.0  ;;  %5347 = vmatpush1.bf16.msra.mxu0 %v14551_v2  ;;  %v14578_v44 = vcombine.high %v2206_v37, %v2210_v39  ;;  %v14575_v13 = vcombine.low %v2205_v33, %v2209_v34  ;;  %v2221_v49 = vld [vmem:[#allocation6 + $0xed0] sm:$0xff]  ;;  %v2226_v2 = vld [vmem:[#allocation6 + $0xef8] sm:$0xff] }
 0x38f   :  { %v16692_v22 = vpack.c.bf16 %v5557_v38, %v5549_v10  ;;  %v16694_v24 = vpack.c.bf16 %v5559_v11, %v5551_v55  ;;  %5519 = vmatpush1.bf16.msra.mxu1 %v14553_v56  ;;  %5348 = vmatprep.subr.bf16.mxu0 %v14560_v63  ;;  %v14577_v58 = vcombine.low %v2206_v37, %v2210_v39  ;;  %v2229_v53 = vld [vmem:[#allocation6 + $0xf10] sm:$0xff]  ;;  %v2230_v56 = vld [vmem:[#allocation6 + $0xf18] sm:$0xff] }
 0x390   :  { %v16696_v16 = vpack.c.bf16 %v5558_v21, %v5550_v17  ;;  %v16698_v26 = vpack.c.bf16 %v5560_v20, %v5552_v19  ;;  %5520 = vmatprep.subr.bf16.mxu1 %v14562_v6  ;;  %v14584_v48 = vcombine.high %v2213_v45, %v2217_v29  ;;  %v14586_v4 = vcombine.high %v2214_v46, %v2218_v47  ;;  %v2233_v54 = vld [vmem:[#allocation6 + $0xf30] sm:$0xff]  ;;  %v2238_v31 = vld [vmem:[#allocation6 + $0xf58] sm:$0xff] }
 0x391   :  { %v14583_v41 = vcombine.low %v2213_v45, %v2217_v29  ;;  %v14592_v52 = vcombine.high %v2221_v49, %v2225_v50  ;;  %v14594_v18 = vcombine.high %v2222_v5, %v2226_v2  ;;  %v14591_v59 = vcombine.low %v2221_v49, %v2225_v50  ;;  %v2237_v63 = vld [vmem:[#allocation6 + $0xf50] sm:$0xff]  ;;  %v2246_v11 = vld [vmem:[#allocation6 + $0xf98] sm:$0xff] }
 0x392   :  { %5349 = vmatpush1.bf16.msra.mxu0 %v14559_v57  ;;  %v2234_v57 = vld [vmem:[#allocation6 + $0xf38] sm:$0xff]  ;;  %v14593_v60 = vcombine.low %v2222_v5, %v2226_v2  ;;  %v14600_v61 = vcombine.high %v2229_v53, %v2233_v54  ;;  %v2241_v0 = vld [vmem:[#allocation6 + $0xf70] sm:$0xff]  ;;  %v14599_v6 = vcombine.low %v2229_v53, %v2233_v54  ;;  %v14618_v21 = vcombine.high %v2246_v11, %v2250_v12 }
 0x393   :  { %5521 = vmatpush1.bf16.msra.mxu1 %v14561_v1  ;;  %5350 = vmatprep.subr.bf16.mxu0 %v14568_v15  ;;  %v14602_v62 = vcombine.high %v2230_v56, %v2234_v57  ;;  %v2242_v1 = vld [vmem:[#allocation6 + $0xf78] sm:$0xff]  ;;  %v14601_v8 = vcombine.low %v2230_v56, %v2234_v57  ;;  %v14608_v9 = vcombine.high %v2237_v63, %v2241_v0  ;;  %v2245_v55 = vld [vmem:[#allocation6 + $0xf90] sm:$0xff] }
 0x394   :  { %5522 = vmatprep.subr.bf16.mxu1 %v14570_v27  ;;  %v14610_v10 = vcombine.high %v2238_v31, %v2242_v1  ;;  %v2249_v38 = vld [vmem:[#allocation6 + $0xfb0] sm:$0xff]  ;;  %v14607_v14 = vcombine.low %v2237_v63, %v2241_v0  ;;  %v14609_v17 = vcombine.low %v2238_v31, %v2242_v1  ;;  %v2254_v27 = vld [vmem:[#allocation6 + $0xfd8] sm:$0xff]  ;;  %v14617_v37 = vcombine.low %v2246_v11, %v2250_v12 }
 0x395   :  { %v14616_v19 = vcombine.high %v2245_v55, %v2249_v38  ;;  %v2253_v20 = vld [vmem:[#allocation6 + $0xfd0] sm:$0xff]  ;;  %v2258_v33 = vld [vmem:[#allocation6 + $0xff8] sm:$0xff]  ;;  %v14615_v34 = vcombine.low %v2245_v55, %v2249_v38 }
 0x396   :  { %5351 = vmatpush1.bf16.msra.mxu0 %v14567_v40  ;;  %v2257_v15 = vld [vmem:[#allocation6 + $0xff0] sm:$0xff]  ;;  %v14626_v40 = vcombine.high %v2254_v27, %v2258_v33  ;;  %v14625_v46 = vcombine.low %v2254_v27, %v2258_v33 }
 0x397   :  { %5523 = vmatpush1.bf16.msra.mxu1 %v14569_v42  ;;  %5352 = vmatprep.subr.bf16.mxu0 %v14576_v43  ;;  %v14624_v39 = vcombine.high %v2253_v20, %v2257_v15  ;;  %v5573_v42 = vld [vmem:[#allocation9] sm:$0xff]  ;;  %v5578_v45 = vld [vmem:[#allocation9 + $0x28] sm:$0xff]  ;;  %v14623_v29 = vcombine.low %v2253_v20, %v2257_v15 }
 0x398   :  { %5524 = vmatprep.subr.bf16.mxu1 %v14578_v44  ;;  %v5577_v43 = vld [vmem:[#allocation9 + $0x20] sm:$0xff]  ;;  %v5574_v44 = vld [vmem:[#allocation9 + $0x8] sm:$0xff] }
 0x399   :  { %v14628_v47 = vcombine.high %v5573_v42, %v5577_v43  ;;  %v5582_v49 = vld [vmem:[#allocation9 + $0x48] sm:$0xff]  ;;  %v14629_v5 = vcombine.low %v5574_v44, %v5578_v45 }
 0x39a   :  { %5353 = vmatpush1.bf16.msra.mxu0 %v14575_v13  ;;  %v14630_v13 = vcombine.high %v5574_v44, %v5578_v45  ;;  %v5586_v50 = vld [vmem:[#allocation9 + $0x68] sm:$0xff] }
 0x39b   :  { %5525 = vmatpush1.bf16.msra.mxu1 %v14577_v58  ;;  %5354 = vmatprep.subr.bf16.mxu0 %v14584_v48  ;;  %v5581_v58 = vld [vmem:[#allocation9 + $0x40] sm:$0xff]  ;;  %v5594_v53 = vld [vmem:[#allocation9 + $0xa8] sm:$0xff]  ;;  %v14637_v56 = vcombine.low %v5582_v49, %v5586_v50 }
 0x39c   :  { %5526 = vmatprep.subr.bf16.mxu1 %v14586_v4  ;;  %v5585_v48 = vld [vmem:[#allocation9 + $0x60] sm:$0xff]  ;;  %v14627_v4 = vcombine.low %v5573_v42, %v5577_v43  ;;  %v5602_v63 = vld [vmem:[#allocation9 + $0xe8] sm:$0xff] }
 0x39d   :  { %v14636_v2 = vcombine.high %v5581_v58, %v5585_v48  ;;  %v14635_v54 = vcombine.low %v5581_v58, %v5585_v48 }
 0x39e   :  { %5355 = vmatpush1.bf16.msra.mxu0 %v14583_v41  ;;  %v5589_v41 = vld [vmem:[#allocation9 + $0x80] sm:$0xff] }
 0x39f   :  { %5527 = vmatpush1.bf16.msra.mxu1 %v14585_v51  ;;  %5356 = vmatprep.subr.bf16.mxu0 %v14592_v52  ;;  %v5593_v51 = vld [vmem:[#allocation9 + $0xa0] sm:$0xff]  ;;  %v14638_v52 = vcombine.high %v5582_v49, %v5586_v50 }
 0x3a0   :  { %5528 = vmatprep.subr.bf16.mxu1 %v14594_v18  ;;  %v5590_v18 = vld [vmem:[#allocation9 + $0x88] sm:$0xff]  ;;  %v14644_v57 = vcombine.high %v5589_v41, %v5593_v51  ;;  %v14643_v0 = vcombine.low %v5589_v41, %v5593_v51  ;;  %v5637_v50 = vld [vmem:[#allocation9 + $0x200] sm:$0xff] }
 0x3a1   :  { %v5642_v41 = vld [vmem:[#allocation9 + $0x228] sm:$0xff] }
 0x3a2   :  { %5357 = vmatpush1.bf16.msra.mxu0 %v14591_v59  ;;  %v14646_v59 = vcombine.high %v5590_v18, %v5594_v53 }
 0x3a3   :  { %5529 = vmatpush1.bf16.msra.mxu1 %v14593_v60  ;;  %5358 = vmatprep.subr.bf16.mxu0 %v14600_v61  ;;  %v5597_v60 = vld [vmem:[#allocation9 + $0xc0] sm:$0xff] }
 0x3a4   :  { %5530 = vmatprep.subr.bf16.mxu1 %v14602_v62  ;;  %v5601_v61 = vld [vmem:[#allocation9 + $0xe0] sm:$0xff]  ;;  %v5598_v62 = vld [vmem:[#allocation9 + $0xc8] sm:$0xff] }
 0x3a5   :  { %v14652_v31 = vcombine.high %v5597_v60, %v5601_v61  ;;  %v14654_v1 = vcombine.high %v5598_v62, %v5602_v63  ;;  %v14651_v55 = vcombine.low %v5597_v60, %v5601_v61  ;;  %v14653_v38 = vcombine.low %v5598_v62, %v5602_v63 }
 0x3a6   :  { %5359 = vmatpush1.bf16.msra.mxu0 %v14599_v6  ;;  %v5605_v6 = vld [vmem:[#allocation9 + $0x100] sm:$0xff] }
 0x3a7   :  { %5531 = vmatpush1.bf16.msra.mxu1 %v14601_v8  ;;  %5360 = vmatprep.subr.bf16.mxu0 %v14608_v9  ;;  %v5609_v8 = vld [vmem:[#allocation9 + $0x120] sm:$0xff]  ;;  %v5606_v9 = vld [vmem:[#allocation9 + $0x108] sm:$0xff] }
 0x3a8   :  { %5532 = vmatprep.subr.bf16.mxu1 %v14610_v10  ;;  %v5610_v10 = vld [vmem:[#allocation9 + $0x128] sm:$0xff]  ;;  %v14660_v11 = vcombine.high %v5605_v6, %v5609_v8  ;;  %v14659_v20 = vcombine.low %v5605_v6, %v5609_v8 }
 0x3a9   :  { %v14662_v12 = vcombine.high %v5606_v9, %v5610_v10  ;;  %v14661_v15 = vcombine.low %v5606_v9, %v5610_v10 }
 0x3aa   :  { %5361 = vmatpush1.bf16.msra.mxu0 %v14607_v14  ;;  %v5613_v14 = vld [vmem:[#allocation9 + $0x140] sm:$0xff] }
 0x3ab   :  { %5533 = vmatpush1.bf16.msra.mxu1 %v14609_v17  ;;  %5362 = vmatprep.subr.bf16.mxu0 %v14616_v19  ;;  %v5617_v17 = vld [vmem:[#allocation9 + $0x160] sm:$0xff]  ;;  %v5614_v19 = vld [vmem:[#allocation9 + $0x148] sm:$0xff] }
 0x3ac   :  { %5534 = vmatprep.subr.bf16.mxu1 %v14618_v21  ;;  %v5618_v21 = vld [vmem:[#allocation9 + $0x168] sm:$0xff]  ;;  %v14668_v27 = vcombine.high %v5613_v14, %v5617_v17  ;;  %v14667_v42 = vcombine.low %v5613_v14, %v5617_v17 }
 0x3ad   :  { %v14670_v33 = vcombine.high %v5614_v19, %v5618_v21  ;;  %v14669_v43 = vcombine.low %v5614_v19, %v5618_v21 }
 0x3ae   :  { %5363 = vmatpush1.bf16.msra.mxu0 %v14615_v34  ;;  %v5621_v34 = vld [vmem:[#allocation9 + $0x180] sm:$0xff] }
 0x3af   :  { %5535 = vmatpush1.bf16.msra.mxu1 %v14617_v37  ;;  %5364 = vmatprep.subr.bf16.mxu0 %v14624_v39  ;;  %v5625_v37 = vld [vmem:[#allocation9 + $0x1a0] sm:$0xff]  ;;  %v5622_v39 = vld [vmem:[#allocation9 + $0x188] sm:$0xff] }
 0x3b0   :  { %5536 = vmatprep.subr.bf16.mxu1 %v14626_v40  ;;  %v5626_v40 = vld [vmem:[#allocation9 + $0x1a8] sm:$0xff]  ;;  %v14676_v44 = vcombine.high %v5621_v34, %v5625_v37  ;;  %v14675_v58 = vcombine.low %v5621_v34, %v5625_v37 }
 0x3b1   :  { %v14678_v45 = vcombine.high %v5622_v39, %v5626_v40  ;;  %v14677_v48 = vcombine.low %v5622_v39, %v5626_v40 }
 0x3b2   :  { %5365 = vmatpush1.bf16.msra.mxu0 %v14623_v29  ;;  %v5629_v29 = vld [vmem:[#allocation9 + $0x1c0] sm:$0xff] }
 0x3b3   :  { %5537 = vmatpush1.bf16.msra.mxu1 %v14625_v46  ;;  %8687 = vmatprep.subr.bf16.mxu0 %v14628_v47  ;;  %v5633_v46 = vld [vmem:[#allocation9 + $0x1e0] sm:$0xff]  ;;  %v5630_v47 = vld [vmem:[#allocation9 + $0x1c8] sm:$0xff] }
 0x3b4   :  { %8859 = vmatprep.subr.bf16.mxu1 %v14630_v13  ;;  %v5634_v13 = vld [vmem:[#allocation9 + $0x1e8] sm:$0xff]  ;;  %v14683_v51 = vcombine.low %v5629_v29, %v5633_v46 }
 0x3b5   :  { %5367 = vmatmul.mubr.bf16.vlgmr.msra.gmra.mrb[12].mxu0 %v16664_v28  ;;  %v14686_v49 = vcombine.high %v5630_v47, %v5634_v13 }
 0x3b6   :  { %5539 = vmatmul.mubr.bf16.vlgmr.msra.gmra.mrb[12].mxu1 %v16664_v28  ;;  %8688 = vmatpush1.bf16.msra.mxu0 %v14627_v4  ;;  %v14645_v28 = vcombine.low %v5590_v18, %v5594_v53  ;;  %v14684_v4 = vcombine.high %v5629_v29, %v5633_v46 }
 0x3b7   :  { %8719 = vmatprep.mubr.bf16.mxu0 %v16696_v16  ;;  %8860 = vmatpush1.bf16.msra.mxu1 %v14629_v5  ;;  %v5641_v5 = vld [vmem:[#allocation9 + $0x220] sm:$0xff] }
 0x3b8   :  { %8891 = vmatprep.mubr.bf16.mxu1 %v16696_v16  ;;  %8689 = vmatprep.subr.bf16.mxu0 %v14636_v2  ;;  %v5638_v2 = vld [vmem:[#allocation9 + $0x208] sm:$0xff]  ;;  %v14692_v18 = vcombine.high %v5637_v50, %v5641_v5  ;;  %v14691_v60 = vcombine.low %v5637_v50, %v5641_v5 }
 0x3b9   :  { %8861 = vmatprep.subr.bf16.mxu1 %v14638_v52  ;;  %v14685_v52 = vcombine.low %v5630_v47, %v5634_v13  ;;  %v14694_v53 = vcombine.high %v5638_v2, %v5642_v41  ;;  %v14693_v61 = vcombine.low %v5638_v2, %v5642_v41 }
 0x3ba   :  { %8690 = vmatpush1.bf16.msra.mxu0 %v14635_v54  ;;  %v5645_v54 = vld [vmem:[#allocation9 + $0x240] sm:$0xff] }
 0x3bb   :  { %8862 = vmatpush1.bf16.msra.mxu1 %v14637_v56  ;;  %8691 = vmatprep.subr.bf16.mxu0 %v14644_v57  ;;  %v5649_v56 = vld [vmem:[#allocation9 + $0x260] sm:$0xff]  ;;  %v5646_v57 = vld [vmem:[#allocation9 + $0x248] sm:$0xff] }
 0x3bc   :  { %8863 = vmatprep.subr.bf16.mxu1 %v14646_v59  ;;  %v5650_v59 = vld [vmem:[#allocation9 + $0x268] sm:$0xff]  ;;  %v14700_v62 = vcombine.high %v5645_v54, %v5649_v56  ;;  %v14699_v6 = vcombine.low %v5645_v54, %v5649_v56 }
 0x3bd   :  { %v14702_v63 = vcombine.high %v5646_v57, %v5650_v59  ;;  %v14701_v8 = vcombine.low %v5646_v57, %v5650_v59 }
 0x3be   :  { %8692 = vmatpush1.bf16.msra.mxu0 %v14643_v0  ;;  %v5653_v0 = vld [vmem:[#allocation9 + $0x280] sm:$0xff] }
 0x3bf   :  { %8864 = vmatpush1.bf16.msra.mxu1 %v14645_v28  ;;  %8693 = vmatprep.subr.bf16.mxu0 %v14652_v31  ;;  %v5657_v28 = vld [vmem:[#allocation9 + $0x2a0] sm:$0xff]  ;;  %v5654_v31 = vld [vmem:[#allocation9 + $0x288] sm:$0xff] }
 0x3c0   :  { %8865 = vmatprep.subr.bf16.mxu1 %v14654_v1  ;;  %v5658_v1 = vld [vmem:[#allocation9 + $0x2a8] sm:$0xff]  ;;  %v14708_v9 = vcombine.high %v5653_v0, %v5657_v28  ;;  %v14707_v14 = vcombine.low %v5653_v0, %v5657_v28 }
 0x3c1   :  { %v14710_v10 = vcombine.high %v5654_v31, %v5658_v1  ;;  %v14709_v17 = vcombine.low %v5654_v31, %v5658_v1 }
 0x3c2   :  { %8694 = vmatpush1.bf16.msra.mxu0 %v14651_v55  ;;  %v5661_v55 = vld [vmem:[#allocation9 + $0x2c0] sm:$0xff] }
 0x3c3   :  { %8866 = vmatpush1.bf16.msra.mxu1 %v14653_v38  ;;  %8695 = vmatprep.subr.bf16.mxu0 %v14660_v11  ;;  %v5665_v38 = vld [vmem:[#allocation9 + $0x2e0] sm:$0xff]  ;;  %v5662_v11 = vld [vmem:[#allocation9 + $0x2c8] sm:$0xff] }
 0x3c4   :  { %8867 = vmatprep.subr.bf16.mxu1 %v14662_v12  ;;  %v5666_v12 = vld [vmem:[#allocation9 + $0x2e8] sm:$0xff]  ;;  %v14716_v19 = vcombine.high %v5661_v55, %v5665_v38  ;;  %v14715_v34 = vcombine.low %v5661_v55, %v5665_v38 }
 0x3c5   :  { %v14718_v21 = vcombine.high %v5662_v11, %v5666_v12  ;;  %v14717_v37 = vcombine.low %v5662_v11, %v5666_v12  ;;  %v5714_v55 = vld [vmem:[#allocation9 + $0x468] sm:$0xff]  ;;  %v5717_v12 = vld [vmem:[#allocation9 + $0x480] sm:$0xff] }
 0x3c6   :  { %8696 = vmatpush1.bf16.msra.mxu0 %v14659_v20  ;;  %v5669_v20 = vld [vmem:[#allocation9 + $0x300] sm:$0xff] }
 0x3c7   :  { %8868 = vmatpush1.bf16.msra.mxu1 %v14661_v15  ;;  %8697 = vmatprep.subr.bf16.mxu0 %v14668_v27  ;;  %v5673_v15 = vld [vmem:[#allocation9 + $0x320] sm:$0xff]  ;;  %v5670_v27 = vld [vmem:[#allocation9 + $0x308] sm:$0xff] }
 0x3c8   :  { %8869 = vmatprep.subr.bf16.mxu1 %v14670_v33  ;;  %v5674_v33 = vld [vmem:[#allocation9 + $0x328] sm:$0xff]  ;;  %v14724_v39 = vcombine.high %v5669_v20, %v5673_v15  ;;  %v14723_v29 = vcombine.low %v5669_v20, %v5673_v15 }
 0x3c9   :  { %v14726_v40 = vcombine.high %v5670_v27, %v5674_v33  ;;  %v14725_v46 = vcombine.low %v5670_v27, %v5674_v33 }
 0x3ca   :  { %8698 = vmatpush1.bf16.msra.mxu0 %v14667_v42  ;;  %v5677_v42 = vld [vmem:[#allocation9 + $0x340] sm:$0xff] }
 0x3cb   :  { %8870 = vmatpush1.bf16.msra.mxu1 %v14669_v43  ;;  %8699 = vmatprep.subr.bf16.mxu0 %v14676_v44  ;;  %v5681_v43 = vld [vmem:[#allocation9 + $0x360] sm:$0xff]  ;;  %v5678_v44 = vld [vmem:[#allocation9 + $0x348] sm:$0xff] }
 0x3cc   :  { %8871 = vmatprep.subr.bf16.mxu1 %v14678_v45  ;;  %v5682_v45 = vld [vmem:[#allocation9 + $0x368] sm:$0xff]  ;;  %v14732_v47 = vcombine.high %v5677_v42, %v5681_v43  ;;  %v14731_v50 = vcombine.low %v5677_v42, %v5681_v43 }
 0x3cd   :  { %v14734_v13 = vcombine.high %v5678_v44, %v5682_v45  ;;  %v14733_v5 = vcombine.low %v5678_v44, %v5682_v45 }
 0x3ce   :  { %8700 = vmatpush1.bf16.msra.mxu0 %v14675_v58  ;;  %v5685_v58 = vld [vmem:[#allocation9 + $0x380] sm:$0xff] }
 0x3cf   :  { %8872 = vmatpush1.bf16.msra.mxu1 %v14677_v48  ;;  %8701 = vmatprep.subr.bf16.mxu0 %v14684_v4  ;;  %v5689_v48 = vld [vmem:[#allocation9 + $0x3a0] sm:$0xff]  ;;  %v5686_v4 = vld [vmem:[#allocation9 + $0x388] sm:$0xff] }
 0x3d0   :  { %8873 = vmatprep.subr.bf16.mxu1 %v14686_v49  ;;  %v5690_v49 = vld [vmem:[#allocation9 + $0x3a8] sm:$0xff]  ;;  %v14740_v2 = vcombine.high %v5685_v58, %v5689_v48  ;;  %v14739_v54 = vcombine.low %v5685_v58, %v5689_v48 }
 0x3d1   :  { %v14742_v41 = vcombine.high %v5686_v4, %v5690_v49  ;;  %v14741_v56 = vcombine.low %v5686_v4, %v5690_v49 }
 0x3d2   :  { %8702 = vmatpush1.bf16.msra.mxu0 %v14683_v51  ;;  %v5693_v51 = vld [vmem:[#allocation9 + $0x3c0] sm:$0xff] }
 0x3d3   :  { %8874 = vmatpush1.bf16.msra.mxu1 %v14685_v52  ;;  %8703 = vmatprep.subr.bf16.mxu0 %v14692_v18  ;;  %v5697_v52 = vld [vmem:[#allocation9 + $0x3e0] sm:$0xff]  ;;  %v5694_v18 = vld [vmem:[#allocation9 + $0x3c8] sm:$0xff] }
 0x3d4   :  { %8875 = vmatprep.subr.bf16.mxu1 %v14694_v53  ;;  %v5698_v53 = vld [vmem:[#allocation9 + $0x3e8] sm:$0xff]  ;;  %v14748_v57 = vcombine.high %v5693_v51, %v5697_v52  ;;  %v14747_v0 = vcombine.low %v5693_v51, %v5697_v52 }
 0x3d5   :  { %v14750_v59 = vcombine.high %v5694_v18, %v5698_v53  ;;  %v14749_v28 = vcombine.low %v5694_v18, %v5698_v53 }
 0x3d6   :  { %8704 = vmatpush1.bf16.msra.mxu0 %v14691_v60  ;;  %v5701_v60 = vld [vmem:[#allocation9 + $0x400] sm:$0xff] }
 0x3d7   :  { %8876 = vmatpush1.bf16.msra.mxu1 %v14693_v61  ;;  %8705 = vmatprep.subr.bf16.mxu0 %v14700_v62  ;;  %v5705_v61 = vld [vmem:[#allocation9 + $0x420] sm:$0xff]  ;;  %v5702_v62 = vld [vmem:[#allocation9 + $0x408] sm:$0xff] }
 0x3d8   :  { %8877 = vmatprep.subr.bf16.mxu1 %v14702_v63  ;;  %v5706_v63 = vld [vmem:[#allocation9 + $0x428] sm:$0xff]  ;;  %v14756_v31 = vcombine.high %v5701_v60, %v5705_v61 }
 0x3d9   :  { %v14758_v1 = vcombine.high %v5702_v62, %v5706_v63  ;;  %v14757_v38 = vcombine.low %v5702_v62, %v5706_v63 }
 0x3da   :  { %8706 = vmatpush1.bf16.msra.mxu0 %v14699_v6  ;;  %v5709_v6 = vld [vmem:[#allocation9 + $0x440] sm:$0xff] }
 0x3db   :  { %8878 = vmatpush1.bf16.msra.mxu1 %v14701_v8  ;;  %8707 = vmatprep.subr.bf16.mxu0 %v14708_v9  ;;  %v5713_v8 = vld [vmem:[#allocation9 + $0x460] sm:$0xff]  ;;  %v14755_v9 = vcombine.low %v5701_v60, %v5705_v61 }
 0x3dc   :  { %8879 = vmatprep.subr.bf16.mxu1 %v14710_v10  ;;  %v5710_v10 = vld [vmem:[#allocation9 + $0x448] sm:$0xff]  ;;  %v14764_v11 = vcombine.high %v5709_v6, %v5713_v8  ;;  %v14763_v20 = vcombine.low %v5709_v6, %v5713_v8 }
 0x3dd   :  { %v14765_v15 = vcombine.low %v5710_v10, %v5714_v55 }
 0x3de   :  { %8708 = vmatpush1.bf16.msra.mxu0 %v14707_v14  ;;  %v5721_v14 = vld [vmem:[#allocation9 + $0x4a0] sm:$0xff] }
 0x3df   :  { %8880 = vmatpush1.bf16.msra.mxu1 %v14709_v17  ;;  %8709 = vmatprep.subr.bf16.mxu0 %v14716_v19  ;;  %v14766_v17 = vcombine.high %v5710_v10, %v5714_v55  ;;  %v5718_v19 = vld [vmem:[#allocation9 + $0x488] sm:$0xff]  ;;  %v14772_v27 = vcombine.high %v5717_v12, %v5721_v14  ;;  %v14771_v42 = vcombine.low %v5717_v12, %v5721_v14  ;;  %v5765_v55 = vld [vmem:[#allocation9 + $0x600] sm:$0xff] }
 0x3e0   :  { %8881 = vmatprep.subr.bf16.mxu1 %v14718_v21  ;;  %v5722_v21 = vld [vmem:[#allocation9 + $0x4a8] sm:$0xff] }
 0x3e1   :  { %v14774_v33 = vcombine.high %v5718_v19, %v5722_v21  ;;  %v14773_v43 = vcombine.low %v5718_v19, %v5722_v21  ;;  %v5770_v12 = vld [vmem:[#allocation9 + $0x628] sm:$0xff] }
 0x3e2   :  { %8710 = vmatpush1.bf16.msra.mxu0 %v14715_v34  ;;  %v5725_v34 = vld [vmem:[#allocation9 + $0x4c0] sm:$0xff] }
 0x3e3   :  { %8882 = vmatpush1.bf16.msra.mxu1 %v14717_v37  ;;  %8711 = vmatprep.subr.bf16.mxu0 %v14724_v39  ;;  %v5729_v37 = vld [vmem:[#allocation9 + $0x4e0] sm:$0xff]  ;;  %v5726_v39 = vld [vmem:[#allocation9 + $0x4c8] sm:$0xff] }
 0x3e4   :  { %8883 = vmatprep.subr.bf16.mxu1 %v14726_v40  ;;  %v5730_v40 = vld [vmem:[#allocation9 + $0x4e8] sm:$0xff]  ;;  %v14780_v44 = vcombine.high %v5725_v34, %v5729_v37  ;;  %v14779_v58 = vcombine.low %v5725_v34, %v5729_v37 }
 0x3e5   :  { %v14782_v45 = vcombine.high %v5726_v39, %v5730_v40  ;;  %v14781_v48 = vcombine.low %v5726_v39, %v5730_v40 }
 0x3e6   :  { %8712 = vmatpush1.bf16.msra.mxu0 %v14723_v29  ;;  %v5733_v29 = vld [vmem:[#allocation9 + $0x500] sm:$0xff] }
 0x3e7   :  { %8884 = vmatpush1.bf16.msra.mxu1 %v14725_v46  ;;  %8713 = vmatprep.subr.bf16.mxu0 %v14732_v47  ;;  %v5737_v46 = vld [vmem:[#allocation9 + $0x520] sm:$0xff]  ;;  %v5734_v47 = vld [vmem:[#allocation9 + $0x508] sm:$0xff] }
 0x3e8   :  { %8885 = vmatprep.subr.bf16.mxu1 %v14734_v13  ;;  %v5738_v13 = vld [vmem:[#allocation9 + $0x528] sm:$0xff]  ;;  %v14788_v4 = vcombine.high %v5733_v29, %v5737_v46  ;;  %v14787_v51 = vcombine.low %v5733_v29, %v5737_v46 }
 0x3e9   :  { %v14790_v49 = vcombine.high %v5734_v47, %v5738_v13  ;;  %v14789_v52 = vcombine.low %v5734_v47, %v5738_v13 }
 0x3ea   :  { %8714 = vmatpush1.bf16.msra.mxu0 %v14731_v50  ;;  %v5741_v50 = vld [vmem:[#allocation9 + $0x540] sm:$0xff] }
 0x3eb   :  { %8886 = vmatpush1.bf16.msra.mxu1 %v14733_v5  ;;  %8715 = vmatprep.subr.bf16.mxu0 %v14740_v2  ;;  %v5745_v5 = vld [vmem:[#allocation9 + $0x560] sm:$0xff]  ;;  %v5742_v2 = vld [vmem:[#allocation9 + $0x548] sm:$0xff] }
 0x3ec   :  { %8887 = vmatprep.subr.bf16.mxu1 %v14742_v41  ;;  %v5746_v41 = vld [vmem:[#allocation9 + $0x568] sm:$0xff]  ;;  %v14796_v18 = vcombine.high %v5741_v50, %v5745_v5  ;;  %v14795_v60 = vcombine.low %v5741_v50, %v5745_v5 }
 0x3ed   :  { %v14798_v53 = vcombine.high %v5742_v2, %v5746_v41  ;;  %v14797_v61 = vcombine.low %v5742_v2, %v5746_v41 }
 0x3ee   :  { %8716 = vmatpush1.bf16.msra.mxu0 %v14739_v54  ;;  %v5749_v54 = vld [vmem:[#allocation9 + $0x580] sm:$0xff] }
 0x3ef   :  { %8888 = vmatpush1.bf16.msra.mxu1 %v14741_v56  ;;  %8717 = vmatprep.subr.bf16.mxu0 %v14748_v57  ;;  %v5753_v56 = vld [vmem:[#allocation9 + $0x5a0] sm:$0xff]  ;;  %v5750_v57 = vld [vmem:[#allocation9 + $0x588] sm:$0xff] }
 0x3f0   :  { %8889 = vmatprep.subr.bf16.mxu1 %v14750_v59  ;;  %v5754_v59 = vld [vmem:[#allocation9 + $0x5a8] sm:$0xff]  ;;  %v14804_v62 = vcombine.high %v5749_v54, %v5753_v56  ;;  %v14803_v6 = vcombine.low %v5749_v54, %v5753_v56 }
 0x3f1   :  { %v14806_v63 = vcombine.high %v5750_v57, %v5754_v59  ;;  %v14805_v8 = vcombine.low %v5750_v57, %v5754_v59 }
 0x3f2   :  { %8718 = vmatpush1.bf16.msra.mxu0 %v14747_v0  ;;  %v5757_v0 = vld [vmem:[#allocation9 + $0x5c0] sm:$0xff] }
 0x3f3   :  { %8890 = vmatpush1.bf16.msra.mxu1 %v14749_v28  ;;  %8730 = vmatprep.subr.bf16.mxu0 %v14756_v31  ;;  %v5761_v28 = vld [vmem:[#allocation9 + $0x5e0] sm:$0xff]  ;;  %v5758_v31 = vld [vmem:[#allocation9 + $0x5c8] sm:$0xff] }
 0x3f4   :  { %8902 = vmatprep.subr.bf16.mxu1 %v14758_v1  ;;  %v5762_v1 = vld [vmem:[#allocation9 + $0x5e8] sm:$0xff]  ;;  %v14811_v14 = vcombine.low %v5757_v0, %v5761_v28 }
 0x3f5   :  { %8720 = vmatmul.mubr.bf16.vlgmr.msra.gmra.mrb[16].mxu0 %v16692_v22  ;;  %v14814_v10 = vcombine.high %v5758_v31, %v5762_v1 }
 0x3f6   :  { %8892 = vmatmul.mubr.bf16.vlgmr.msra.gmra.mrb[16].mxu1 %v16692_v22  ;;  %8731 = vmatpush1.bf16.msra.mxu0 %v14755_v9  ;;  %v14812_v9 = vcombine.high %v5757_v0, %v5761_v28 }
 0x3f7   :  { %8762 = vmatprep.mubr.bf16.mxu0 %v16698_v26  ;;  %8903 = vmatpush1.bf16.msra.mxu1 %v14757_v38  ;;  %v5769_v38 = vld [vmem:[#allocation9 + $0x620] sm:$0xff] }
 0x3f8   :  { %8934 = vmatprep.mubr.bf16.mxu1 %v16698_v26  ;;  %8732 = vmatprep.subr.bf16.mxu0 %v14764_v11  ;;  %v5766_v11 = vld [vmem:[#allocation9 + $0x608] sm:$0xff]  ;;  %v14820_v19 = vcombine.high %v5765_v55, %v5769_v38  ;;  %v14819_v34 = vcombine.low %v5765_v55, %v5769_v38 }
 0x3f9   :  { %8904 = vmatprep.subr.bf16.mxu1 %v14766_v17  ;;  %v14813_v17 = vcombine.low %v5758_v31, %v5762_v1  ;;  %v14822_v21 = vcombine.high %v5766_v11, %v5770_v12  ;;  %v14821_v37 = vcombine.low %v5766_v11, %v5770_v12 }
 0x3fa   :  { %8733 = vmatpush1.bf16.msra.mxu0 %v14763_v20  ;;  %v5773_v20 = vld [vmem:[#allocation9 + $0x640] sm:$0xff] }
 0x3fb   :  { %8905 = vmatpush1.bf16.msra.mxu1 %v14765_v15  ;;  %8734 = vmatprep.subr.bf16.mxu0 %v14772_v27  ;;  %v5777_v15 = vld [vmem:[#allocation9 + $0x660] sm:$0xff]  ;;  %v5774_v27 = vld [vmem:[#allocation9 + $0x648] sm:$0xff] }
 0x3fc   :  { %8906 = vmatprep.subr.bf16.mxu1 %v14774_v33  ;;  %v5778_v33 = vld [vmem:[#allocation9 + $0x668] sm:$0xff]  ;;  %v14828_v39 = vcombine.high %v5773_v20, %v5777_v15  ;;  %v14827_v29 = vcombine.low %v5773_v20, %v5777_v15 }
 0x3fd   :  { %v14830_v40 = vcombine.high %v5774_v27, %v5778_v33  ;;  %v14829_v46 = vcombine.low %v5774_v27, %v5778_v33 }
 0x3fe   :  { %8735 = vmatpush1.bf16.msra.mxu0 %v14771_v42  ;;  %v5781_v42 = vld [vmem:[#allocation9 + $0x680] sm:$0xff] }
 0x3ff   :  { %8907 = vmatpush1.bf16.msra.mxu1 %v14773_v43  ;;  %8736 = vmatprep.subr.bf16.mxu0 %v14780_v44  ;;  %v5785_v43 = vld [vmem:[#allocation9 + $0x6a0] sm:$0xff]  ;;  %v5782_v44 = vld [vmem:[#allocation9 + $0x688] sm:$0xff] }
 0x400   :  { %8908 = vmatprep.subr.bf16.mxu1 %v14782_v45  ;;  %v5786_v45 = vld [vmem:[#allocation9 + $0x6a8] sm:$0xff]  ;;  %v14836_v47 = vcombine.high %v5781_v42, %v5785_v43  ;;  %v14835_v50 = vcombine.low %v5781_v42, %v5785_v43 }
 0x401   :  { %v14838_v13 = vcombine.high %v5782_v44, %v5786_v45  ;;  %v14837_v5 = vcombine.low %v5782_v44, %v5786_v45 }
 0x402   :  { %8737 = vmatpush1.bf16.msra.mxu0 %v14779_v58  ;;  %v5789_v58 = vld [vmem:[#allocation9 + $0x6c0] sm:$0xff] }
 0x403   :  { %8909 = vmatpush1.bf16.msra.mxu1 %v14781_v48  ;;  %8738 = vmatprep.subr.bf16.mxu0 %v14788_v4  ;;  %v5793_v48 = vld [vmem:[#allocation9 + $0x6e0] sm:$0xff]  ;;  %v5790_v4 = vld [vmem:[#allocation9 + $0x6c8] sm:$0xff] }
 0x404   :  { %8910 = vmatprep.subr.bf16.mxu1 %v14790_v49  ;;  %v5794_v49 = vld [vmem:[#allocation9 + $0x6e8] sm:$0xff]  ;;  %v14844_v2 = vcombine.high %v5789_v58, %v5793_v48  ;;  %v14843_v54 = vcombine.low %v5789_v58, %v5793_v48 }
 0x405   :  { %v14846_v41 = vcombine.high %v5790_v4, %v5794_v49  ;;  %v14845_v56 = vcombine.low %v5790_v4, %v5794_v49 }
 0x406   :  { %8739 = vmatpush1.bf16.msra.mxu0 %v14787_v51  ;;  %v5797_v51 = vld [vmem:[#allocation9 + $0x700] sm:$0xff] }
 0x407   :  { %8911 = vmatpush1.bf16.msra.mxu1 %v14789_v52  ;;  %8740 = vmatprep.subr.bf16.mxu0 %v14796_v18  ;;  %v5801_v52 = vld [vmem:[#allocation9 + $0x720] sm:$0xff]  ;;  %v5798_v18 = vld [vmem:[#allocation9 + $0x708] sm:$0xff] }
 0x408   :  { %8912 = vmatprep.subr.bf16.mxu1 %v14798_v53  ;;  %v5802_v53 = vld [vmem:[#allocation9 + $0x728] sm:$0xff]  ;;  %v14852_v57 = vcombine.high %v5797_v51, %v5801_v52  ;;  %v14851_v0 = vcombine.low %v5797_v51, %v5801_v52 }
 0x409   :  { %v14854_v59 = vcombine.high %v5798_v18, %v5802_v53  ;;  %v14853_v28 = vcombine.low %v5798_v18, %v5802_v53 }
 0x40a   :  { %8741 = vmatpush1.bf16.msra.mxu0 %v14795_v60  ;;  %v5805_v60 = vld [vmem:[#allocation9 + $0x740] sm:$0xff] }
 0x40b   :  { %8913 = vmatpush1.bf16.msra.mxu1 %v14797_v61  ;;  %8742 = vmatprep.subr.bf16.mxu0 %v14804_v62  ;;  %v5809_v61 = vld [vmem:[#allocation9 + $0x760] sm:$0xff]  ;;  %v5806_v62 = vld [vmem:[#allocation9 + $0x748] sm:$0xff] }
 0x40c   :  { %8914 = vmatprep.subr.bf16.mxu1 %v14806_v63  ;;  %v5810_v63 = vld [vmem:[#allocation9 + $0x768] sm:$0xff]  ;;  %v14860_v31 = vcombine.high %v5805_v60, %v5809_v61  ;;  %v14859_v55 = vcombine.low %v5805_v60, %v5809_v61 }
 0x40d   :  { %v14862_v1 = vcombine.high %v5806_v62, %v5810_v63  ;;  %v14861_v38 = vcombine.low %v5806_v62, %v5810_v63 }
 0x40e   :  { %8743 = vmatpush1.bf16.msra.mxu0 %v14803_v6  ;;  %v5813_v6 = vld [vmem:[#allocation9 + $0x780] sm:$0xff] }
 0x40f   :  { %8915 = vmatpush1.bf16.msra.mxu1 %v14805_v8  ;;  %8744 = vmatprep.subr.bf16.mxu0 %v14812_v9  ;;  %v5817_v8 = vld [vmem:[#allocation9 + $0x7a0] sm:$0xff]  ;;  %v5814_v9 = vld [vmem:[#allocation9 + $0x788] sm:$0xff] }
 0x410   :  { %8916 = vmatprep.subr.bf16.mxu1 %v14814_v10  ;;  %v5818_v10 = vld [vmem:[#allocation9 + $0x7a8] sm:$0xff]  ;;  %v14868_v11 = vcombine.high %v5813_v6, %v5817_v8  ;;  %v14867_v20 = vcombine.low %v5813_v6, %v5817_v8 }
 0x411   :  { %v14870_v12 = vcombine.high %v5814_v9, %v5818_v10  ;;  %v14869_v15 = vcombine.low %v5814_v9, %v5818_v10 }
 0x412   :  { %8745 = vmatpush1.bf16.msra.mxu0 %v14811_v14  ;;  %v5821_v14 = vld [vmem:[#allocation9 + $0x7c0] sm:$0xff] }
 0x413   :  { %8917 = vmatpush1.bf16.msra.mxu1 %v14813_v17  ;;  %8746 = vmatprep.subr.bf16.mxu0 %v14820_v19  ;;  %v5825_v17 = vld [vmem:[#allocation9 + $0x7e0] sm:$0xff]  ;;  %v5822_v19 = vld [vmem:[#allocation9 + $0x7c8] sm:$0xff] }
 0x414   :  { %8918 = vmatprep.subr.bf16.mxu1 %v14822_v21  ;;  %v5826_v21 = vld [vmem:[#allocation9 + $0x7e8] sm:$0xff]  ;;  %v14876_v27 = vcombine.high %v5821_v14, %v5825_v17  ;;  %v14875_v42 = vcombine.low %v5821_v14, %v5825_v17 }
 0x415   :  { %v14878_v33 = vcombine.high %v5822_v19, %v5826_v21  ;;  %v14877_v43 = vcombine.low %v5822_v19, %v5826_v21 }
 0x416   :  { %8747 = vmatpush1.bf16.msra.mxu0 %v14819_v34  ;;  %v5829_v34 = vld [vmem:[#allocation9 + $0x800] sm:$0xff] }
 0x417   :  { %8919 = vmatpush1.bf16.msra.mxu1 %v14821_v37  ;;  %8748 = vmatprep.subr.bf16.mxu0 %v14828_v39  ;;  %v5833_v37 = vld [vmem:[#allocation9 + $0x820] sm:$0xff]  ;;  %v5830_v39 = vld [vmem:[#allocation9 + $0x808] sm:$0xff] }
 0x418   :  { %8920 = vmatprep.subr.bf16.mxu1 %v14830_v40  ;;  %v5834_v40 = vld [vmem:[#allocation9 + $0x828] sm:$0xff]  ;;  %v14884_v44 = vcombine.high %v5829_v34, %v5833_v37  ;;  %v14883_v58 = vcombine.low %v5829_v34, %v5833_v37 }
 0x419   :  { %v14886_v45 = vcombine.high %v5830_v39, %v5834_v40  ;;  %v14885_v48 = vcombine.low %v5830_v39, %v5834_v40 }
 0x41a   :  { %8749 = vmatpush1.bf16.msra.mxu0 %v14827_v29  ;;  %v5837_v29 = vld [vmem:[#allocation9 + $0x840] sm:$0xff] }
 0x41b   :  { %8921 = vmatpush1.bf16.msra.mxu1 %v14829_v46  ;;  %8750 = vmatprep.subr.bf16.mxu0 %v14836_v47  ;;  %v5841_v46 = vld [vmem:[#allocation9 + $0x860] sm:$0xff]  ;;  %v5838_v47 = vld [vmem:[#allocation9 + $0x848] sm:$0xff] }
 0x41c   :  { %8922 = vmatprep.subr.bf16.mxu1 %v14838_v13  ;;  %v5842_v13 = vld [vmem:[#allocation9 + $0x868] sm:$0xff]  ;;  %v14892_v4 = vcombine.high %v5837_v29, %v5841_v46  ;;  %v14891_v51 = vcombine.low %v5837_v29, %v5841_v46 }
 0x41d   :  { %v14894_v49 = vcombine.high %v5838_v47, %v5842_v13  ;;  %v14893_v52 = vcombine.low %v5838_v47, %v5842_v13 }
 0x41e   :  { %8751 = vmatpush1.bf16.msra.mxu0 %v14835_v50  ;;  %v5845_v50 = vld [vmem:[#allocation9 + $0x880] sm:$0xff] }
 0x41f   :  { %8923 = vmatpush1.bf16.msra.mxu1 %v14837_v5  ;;  %8752 = vmatprep.subr.bf16.mxu0 %v14844_v2  ;;  %v5849_v5 = vld [vmem:[#allocation9 + $0x8a0] sm:$0xff]  ;;  %v5846_v2 = vld [vmem:[#allocation9 + $0x888] sm:$0xff] }
 0x420   :  { %8924 = vmatprep.subr.bf16.mxu1 %v14846_v41  ;;  %v5850_v41 = vld [vmem:[#allocation9 + $0x8a8] sm:$0xff]  ;;  %v14900_v18 = vcombine.high %v5845_v50, %v5849_v5  ;;  %v14899_v60 = vcombine.low %v5845_v50, %v5849_v5 }
 0x421   :  { %v14902_v53 = vcombine.high %v5846_v2, %v5850_v41  ;;  %v14901_v61 = vcombine.low %v5846_v2, %v5850_v41 }
 0x422   :  { %8753 = vmatpush1.bf16.msra.mxu0 %v14843_v54  ;;  %v5853_v54 = vld [vmem:[#allocation9 + $0x8c0] sm:$0xff] }
 0x423   :  { %8925 = vmatpush1.bf16.msra.mxu1 %v14845_v56  ;;  %8754 = vmatprep.subr.bf16.mxu0 %v14852_v57  ;;  %v5857_v56 = vld [vmem:[#allocation9 + $0x8e0] sm:$0xff]  ;;  %v5854_v57 = vld [vmem:[#allocation9 + $0x8c8] sm:$0xff] }
 0x424   :  { %8926 = vmatprep.subr.bf16.mxu1 %v14854_v59  ;;  %v5858_v59 = vld [vmem:[#allocation9 + $0x8e8] sm:$0xff]  ;;  %v14908_v62 = vcombine.high %v5853_v54, %v5857_v56  ;;  %v14907_v6 = vcombine.low %v5853_v54, %v5857_v56 }
 0x425   :  { %v14910_v63 = vcombine.high %v5854_v57, %v5858_v59  ;;  %v14909_v8 = vcombine.low %v5854_v57, %v5858_v59 }
 0x426   :  { %8755 = vmatpush1.bf16.msra.mxu0 %v14851_v0  ;;  %v5861_v0 = vld [vmem:[#allocation9 + $0x900] sm:$0xff] }
 0x427   :  { %8927 = vmatpush1.bf16.msra.mxu1 %v14853_v28  ;;  %8756 = vmatprep.subr.bf16.mxu0 %v14860_v31  ;;  %v5865_v28 = vld [vmem:[#allocation9 + $0x920] sm:$0xff]  ;;  %v5862_v31 = vld [vmem:[#allocation9 + $0x908] sm:$0xff] }
 0x428   :  { %8928 = vmatprep.subr.bf16.mxu1 %v14862_v1  ;;  %v5866_v1 = vld [vmem:[#allocation9 + $0x928] sm:$0xff]  ;;  %v14916_v9 = vcombine.high %v5861_v0, %v5865_v28  ;;  %v14915_v14 = vcombine.low %v5861_v0, %v5865_v28 }
 0x429   :  { %v14918_v10 = vcombine.high %v5862_v31, %v5866_v1  ;;  %v14917_v17 = vcombine.low %v5862_v31, %v5866_v1 }
 0x42a   :  { %8757 = vmatpush1.bf16.msra.mxu0 %v14859_v55  ;;  %v5869_v55 = vld [vmem:[#allocation9 + $0x940] sm:$0xff] }
 0x42b   :  { %8929 = vmatpush1.bf16.msra.mxu1 %v14861_v38  ;;  %8758 = vmatprep.subr.bf16.mxu0 %v14868_v11  ;;  %v5873_v38 = vld [vmem:[#allocation9 + $0x960] sm:$0xff]  ;;  %v5870_v11 = vld [vmem:[#allocation9 + $0x948] sm:$0xff] }
 0x42c   :  { %8930 = vmatprep.subr.bf16.mxu1 %v14870_v12  ;;  %v5874_v12 = vld [vmem:[#allocation9 + $0x968] sm:$0xff]  ;;  %v14924_v19 = vcombine.high %v5869_v55, %v5873_v38  ;;  %v14923_v34 = vcombine.low %v5869_v55, %v5873_v38 }
 0x42d   :  { %v14926_v21 = vcombine.high %v5870_v11, %v5874_v12  ;;  %v14925_v37 = vcombine.low %v5870_v11, %v5874_v12 }
 0x42e   :  { %8759 = vmatpush1.bf16.msra.mxu0 %v14867_v20  ;;  %v5877_v20 = vld [vmem:[#allocation9 + $0x980] sm:$0xff] }
 0x42f   :  { %8931 = vmatpush1.bf16.msra.mxu1 %v14869_v15  ;;  %8760 = vmatprep.subr.bf16.mxu0 %v14876_v27  ;;  %v5881_v15 = vld [vmem:[#allocation9 + $0x9a0] sm:$0xff]  ;;  %v5878_v27 = vld [vmem:[#allocation9 + $0x988] sm:$0xff] }
 0x430   :  { %8932 = vmatprep.subr.bf16.mxu1 %v14878_v33  ;;  %v5882_v33 = vld [vmem:[#allocation9 + $0x9a8] sm:$0xff]  ;;  %v14932_v39 = vcombine.high %v5877_v20, %v5881_v15  ;;  %v14931_v29 = vcombine.low %v5877_v20, %v5881_v15 }
 0x431   :  { %v14934_v40 = vcombine.high %v5878_v27, %v5882_v33  ;;  %v14933_v46 = vcombine.low %v5878_v27, %v5882_v33 }
 0x432   :  { %8761 = vmatpush1.bf16.msra.mxu0 %v14875_v42  ;;  %v5885_v42 = vld [vmem:[#allocation9 + $0x9c0] sm:$0xff] }
 0x433   :  { %8933 = vmatpush1.bf16.msra.mxu1 %v14877_v43  ;;  %8773 = vmatprep.subr.bf16.mxu0 %v14884_v44  ;;  %v5889_v43 = vld [vmem:[#allocation9 + $0x9e0] sm:$0xff]  ;;  %v5886_v44 = vld [vmem:[#allocation9 + $0x9c8] sm:$0xff] }
 0x434   :  { %8945 = vmatprep.subr.bf16.mxu1 %v14886_v45  ;;  %v5890_v45 = vld [vmem:[#allocation9 + $0x9e8] sm:$0xff]  ;;  %v14940_v47 = vcombine.high %v5885_v42, %v5889_v43  ;;  %v14939_v50 = vcombine.low %v5885_v42, %v5889_v43 }
 0x435   :  { %8763 = vmatmul.mubr.bf16.vlgmr.msra.gmra.mrb[16].mxu0 %v16694_v24  ;;  %v14942_v13 = vcombine.high %v5886_v44, %v5890_v45  ;;  %v14941_v5 = vcombine.low %v5886_v44, %v5890_v45 }
 0x436   :  { %8935 = vmatmul.mubr.bf16.vlgmr.msra.gmra.mrb[16].mxu1 %v16694_v24  ;;  %8774 = vmatpush1.bf16.msra.mxu0 %v14883_v58  ;;  %v5893_v58 = vld [vmem:[#allocation9 + $0xa00] sm:$0xff] }
 0x437   :  { %8946 = vmatpush1.bf16.msra.mxu1 %v14885_v48  ;;  %8775 = vmatprep.subr.bf16.mxu0 %v14892_v4  ;;  %v5897_v48 = vld [vmem:[#allocation9 + $0xa20] sm:$0xff]  ;;  %v5894_v4 = vld [vmem:[#allocation9 + $0xa08] sm:$0xff] }
 0x438   :  { %8947 = vmatprep.subr.bf16.mxu1 %v14894_v49  ;;  %v5898_v49 = vld [vmem:[#allocation9 + $0xa28] sm:$0xff]  ;;  %v14948_v2 = vcombine.high %v5893_v58, %v5897_v48  ;;  %v14947_v54 = vcombine.low %v5893_v58, %v5897_v48 }
 0x439   :  { %v14950_v41 = vcombine.high %v5894_v4, %v5898_v49  ;;  %v14949_v56 = vcombine.low %v5894_v4, %v5898_v49 }
 0x43a   :  { %8776 = vmatpush1.bf16.msra.mxu0 %v14891_v51  ;;  %v5901_v51 = vld [vmem:[#allocation9 + $0xa40] sm:$0xff] }
 0x43b   :  { %8948 = vmatpush1.bf16.msra.mxu1 %v14893_v52  ;;  %8777 = vmatprep.subr.bf16.mxu0 %v14900_v18  ;;  %v5905_v52 = vld [vmem:[#allocation9 + $0xa60] sm:$0xff]  ;;  %v5902_v18 = vld [vmem:[#allocation9 + $0xa48] sm:$0xff] }
 0x43c   :  { %8949 = vmatprep.subr.bf16.mxu1 %v14902_v53  ;;  %v5906_v53 = vld [vmem:[#allocation9 + $0xa68] sm:$0xff]  ;;  %v14956_v57 = vcombine.high %v5901_v51, %v5905_v52  ;;  %v14955_v0 = vcombine.low %v5901_v51, %v5905_v52 }
 0x43d   :  { %v14958_v59 = vcombine.high %v5902_v18, %v5906_v53  ;;  %v14957_v28 = vcombine.low %v5902_v18, %v5906_v53 }
 0x43e   :  { %8778 = vmatpush1.bf16.msra.mxu0 %v14899_v60  ;;  %v5909_v60 = vld [vmem:[#allocation9 + $0xa80] sm:$0xff] }
 0x43f   :  { %8950 = vmatpush1.bf16.msra.mxu1 %v14901_v61  ;;  %8779 = vmatprep.subr.bf16.mxu0 %v14908_v62  ;;  %v5913_v61 = vld [vmem:[#allocation9 + $0xaa0] sm:$0xff]  ;;  %v5910_v62 = vld [vmem:[#allocation9 + $0xa88] sm:$0xff] }
 0x440   :  { %8951 = vmatprep.subr.bf16.mxu1 %v14910_v63  ;;  %v5914_v63 = vld [vmem:[#allocation9 + $0xaa8] sm:$0xff]  ;;  %v14964_v31 = vcombine.high %v5909_v60, %v5913_v61  ;;  %v14963_v55 = vcombine.low %v5909_v60, %v5913_v61 }
 0x441   :  { %v14966_v1 = vcombine.high %v5910_v62, %v5914_v63  ;;  %v14965_v38 = vcombine.low %v5910_v62, %v5914_v63 }
 0x442   :  { %8780 = vmatpush1.bf16.msra.mxu0 %v14907_v6  ;;  %v5917_v6 = vld [vmem:[#allocation9 + $0xac0] sm:$0xff] }
 0x443   :  { %8952 = vmatpush1.bf16.msra.mxu1 %v14909_v8  ;;  %8781 = vmatprep.subr.bf16.mxu0 %v14916_v9  ;;  %v5921_v8 = vld [vmem:[#allocation9 + $0xae0] sm:$0xff]  ;;  %v5918_v9 = vld [vmem:[#allocation9 + $0xac8] sm:$0xff] }
 0x444   :  { %8953 = vmatprep.subr.bf16.mxu1 %v14918_v10  ;;  %v5922_v10 = vld [vmem:[#allocation9 + $0xae8] sm:$0xff]  ;;  %v14972_v11 = vcombine.high %v5917_v6, %v5921_v8  ;;  %v14971_v20 = vcombine.low %v5917_v6, %v5921_v8 }
 0x445   :  { %v14974_v12 = vcombine.high %v5918_v9, %v5922_v10  ;;  %v14973_v15 = vcombine.low %v5918_v9, %v5922_v10 }
 0x446   :  { %8782 = vmatpush1.bf16.msra.mxu0 %v14915_v14  ;;  %v5925_v14 = vld [vmem:[#allocation9 + $0xb00] sm:$0xff] }
 0x447   :  { %8954 = vmatpush1.bf16.msra.mxu1 %v14917_v17  ;;  %8783 = vmatprep.subr.bf16.mxu0 %v14924_v19  ;;  %v5929_v17 = vld [vmem:[#allocation9 + $0xb20] sm:$0xff]  ;;  %v5926_v19 = vld [vmem:[#allocation9 + $0xb08] sm:$0xff] }
 0x448   :  { %8955 = vmatprep.subr.bf16.mxu1 %v14926_v21  ;;  %v5930_v21 = vld [vmem:[#allocation9 + $0xb28] sm:$0xff]  ;;  %v14980_v27 = vcombine.high %v5925_v14, %v5929_v17  ;;  %v14979_v42 = vcombine.low %v5925_v14, %v5929_v17 }
 0x449   :  { %v14982_v33 = vcombine.high %v5926_v19, %v5930_v21  ;;  %v14981_v43 = vcombine.low %v5926_v19, %v5930_v21 }
 0x44a   :  { %8784 = vmatpush1.bf16.msra.mxu0 %v14923_v34  ;;  %v5933_v34 = vld [vmem:[#allocation9 + $0xb40] sm:$0xff] }
 0x44b   :  { %8956 = vmatpush1.bf16.msra.mxu1 %v14925_v37  ;;  %8785 = vmatprep.subr.bf16.mxu0 %v14932_v39  ;;  %v5937_v37 = vld [vmem:[#allocation9 + $0xb60] sm:$0xff]  ;;  %v5934_v39 = vld [vmem:[#allocation9 + $0xb48] sm:$0xff] }
 0x44c   :  { %8957 = vmatprep.subr.bf16.mxu1 %v14934_v40  ;;  %v5938_v40 = vld [vmem:[#allocation9 + $0xb68] sm:$0xff]  ;;  %v14988_v44 = vcombine.high %v5933_v34, %v5937_v37  ;;  %v14987_v58 = vcombine.low %v5933_v34, %v5937_v37 }
 0x44d   :  { %v14990_v45 = vcombine.high %v5934_v39, %v5938_v40  ;;  %v14989_v48 = vcombine.low %v5934_v39, %v5938_v40 }
 0x44e   :  { %8786 = vmatpush1.bf16.msra.mxu0 %v14931_v29  ;;  %v5941_v29 = vld [vmem:[#allocation9 + $0xb80] sm:$0xff] }
 0x44f   :  { %8958 = vmatpush1.bf16.msra.mxu1 %v14933_v46  ;;  %8787 = vmatprep.subr.bf16.mxu0 %v14940_v47  ;;  %v5945_v46 = vld [vmem:[#allocation9 + $0xba0] sm:$0xff]  ;;  %v5942_v47 = vld [vmem:[#allocation9 + $0xb88] sm:$0xff] }
 0x450   :  { %8959 = vmatprep.subr.bf16.mxu1 %v14942_v13  ;;  %v5946_v13 = vld [vmem:[#allocation9 + $0xba8] sm:$0xff]  ;;  %v14996_v4 = vcombine.high %v5941_v29, %v5945_v46  ;;  %v14995_v51 = vcombine.low %v5941_v29, %v5945_v46 }
 0x451   :  { %v14998_v49 = vcombine.high %v5942_v47, %v5946_v13  ;;  %v14997_v52 = vcombine.low %v5942_v47, %v5946_v13  ;;  %v5969_v13 = vld [vmem:[#allocation9 + $0xc60] sm:$0xff] }
 0x452   :  { %8788 = vmatpush1.bf16.msra.mxu0 %v14939_v50  ;;  %v5949_v50 = vld [vmem:[#allocation9 + $0xbc0] sm:$0xff] }
 0x453   :  { %8960 = vmatpush1.bf16.msra.mxu1 %v14941_v5  ;;  %8789 = vmatprep.subr.bf16.mxu0 %v14948_v2  ;;  %v5953_v5 = vld [vmem:[#allocation9 + $0xbe0] sm:$0xff]  ;;  %v5950_v2 = vld [vmem:[#allocation9 + $0xbc8] sm:$0xff] }
 0x454   :  { %8961 = vmatprep.subr.bf16.mxu1 %v14950_v41  ;;  %v5954_v41 = vld [vmem:[#allocation9 + $0xbe8] sm:$0xff]  ;;  %v15004_v18 = vcombine.high %v5949_v50, %v5953_v5  ;;  %v15003_v60 = vcombine.low %v5949_v50, %v5953_v5 }
 0x455   :  { %v15006_v53 = vcombine.high %v5950_v2, %v5954_v41  ;;  %v15005_v61 = vcombine.low %v5950_v2, %v5954_v41  ;;  %v5973_v41 = vld [vmem:[#allocation9 + $0xc80] sm:$0xff] }
 0x456   :  { %8790 = vmatpush1.bf16.msra.mxu0 %v14947_v54  ;;  %v16710_v54 = vld [vmem:[#allocation9 + $0xc00] sm:$0xff] }
 0x457   :  { %8962 = vmatpush1.bf16.msra.mxu1 %v14949_v56  ;;  %8791 = vmatprep.subr.bf16.mxu0 %v14956_v57  ;;  %v16712_v56 = vld [vmem:[#allocation9 + $0xc20] sm:$0xff]  ;;  %v16714_v57 = vld [vmem:[#allocation9 + $0xc08] sm:$0xff] }
 0x458   :  { %8963 = vmatprep.subr.bf16.mxu1 %v14958_v59  ;;  %v16716_v59 = vld [vmem:[#allocation9 + $0xc28] sm:$0xff]  ;;  %v15012_v62 = vcombine.high %v16710_v54, %v16712_v56  ;;  %v15011_v50 = vcombine.low %v16710_v54, %v16712_v56 }
 0x459   :  { %v15014_v63 = vcombine.high %v16714_v57, %v16716_v59  ;;  %v15013_v5 = vcombine.low %v16714_v57, %v16716_v59 }
 0x45a   :  { %8792 = vmatpush1.bf16.msra.mxu0 %v14955_v0  ;;  %v16111_v0 = vld [vmem:[#allocation7] sm:$0xff] }
 0x45b   :  { %8964 = vmatpush1.bf16.msra.mxu1 %v14957_v28  ;;  %8793 = vmatprep.subr.bf16.mxu0 %v14964_v31  ;;  %v2280_v28 = vrot.slane %v16111_v0, %v16639_v3  ;;  %v2288_v31 = vrot.slane %v16111_v0, %v16649_v23  ;;  %v2292_v6 = vrot.slane %v16111_v0, %v16652_v25 }
 0x45c   :  { %8965 = vmatprep.subr.bf16.mxu1 %v14966_v1  ;;  %v2284_v1 = vrot.slane %v16111_v0, %v16642_v7  ;;  %v5986_v0 = vld [vmem:[#allocation9 + $0xce8] sm:$0xff] }
 0x45e   :  { %8794 = vmatpush1.bf16.msra.mxu0 %v14963_v55 }
 0x45f   :  { %8966 = vmatpush1.bf16.msra.mxu1 %v14965_v38  ;;  %8795 = vmatprep.subr.bf16.mxu0 %v14972_v11 }
 0x460   :  { %8967 = vmatprep.subr.bf16.mxu1 %v14974_v12 }
 0x462   :  { %8796 = vmatpush1.bf16.msra.mxu0 %v14971_v20 }
 0x463   :  { %8968 = vmatpush1.bf16.msra.mxu1 %v14973_v15  ;;  %8797 = vmatprep.subr.bf16.mxu0 %v14980_v27 }
 0x464   :  { %8969 = vmatprep.subr.bf16.mxu1 %v14982_v33 }
 0x466   :  { %8798 = vmatpush1.bf16.msra.mxu0 %v14979_v42 }
 0x467   :  { %8970 = vmatpush1.bf16.msra.mxu1 %v14981_v43  ;;  %8799 = vmatprep.subr.bf16.mxu0 %v14988_v44 }
 0x468   :  { %8971 = vmatprep.subr.bf16.mxu1 %v14990_v45  ;;  %v5965_v45 = vld [vmem:[#allocation9 + $0xc40] sm:$0xff] }
 0x469   :  { %v15019_v54 = vcombine.low %v5965_v45, %v5969_v13 }
 0x46a   :  { %8800 = vmatpush1.bf16.msra.mxu0 %v14987_v58  ;;  %v5966_v58 = vld [vmem:[#allocation9 + $0xc48] sm:$0xff] }
 0x46b   :  { %8972 = vmatpush1.bf16.msra.mxu1 %v14989_v48  ;;  %8801 = vmatprep.subr.bf16.mxu0 %v14996_v4  ;;  %v5970_v48 = vld [vmem:[#allocation9 + $0xc68] sm:$0xff] }
 0x46c   :  { %8973 = vmatprep.subr.bf16.mxu1 %v14998_v49  ;;  %v15021_v56 = vcombine.low %v5966_v58, %v5970_v48 }
 0x46e   :  { %8802 = vmatpush1.bf16.msra.mxu0 %v14995_v51  ;;  %v15020_v51 = vcombine.high %v5965_v45, %v5969_v13  ;;  %v6017_v13 = vld [vmem:[#allocation9 + $0xde0] sm:$0xff] }
 0x46f   :  { %8974 = vmatpush1.bf16.msra.mxu1 %v14997_v52  ;;  %8803 = vmatprep.subr.bf16.mxu0 %v15004_v18  ;;  %v15022_v52 = vcombine.high %v5966_v58, %v5970_v48  ;;  %v5977_v18 = vld [vmem:[#allocation9 + $0xca0] sm:$0xff]  ;;  %v6014_v58 = vld [vmem:[#allocation9 + $0xdc8] sm:$0xff] }
 0x470   :  { %8975 = vmatprep.subr.bf16.mxu1 %v15006_v53  ;;  %v5974_v53 = vld [vmem:[#allocation9 + $0xc88] sm:$0xff]  ;;  %v15028_v57 = vcombine.high %v5973_v41, %v5977_v18 }
 0x471   :  { %v6018_v48 = vld [vmem:[#allocation9 + $0xde8] sm:$0xff] }
 0x472   :  { %8804 = vmatpush1.bf16.msra.mxu0 %v15003_v60  ;;  %v5978_v60 = vld [vmem:[#allocation9 + $0xca8] sm:$0xff] }
 0x473   :  { %8976 = vmatpush1.bf16.msra.mxu1 %v15005_v61  ;;  %8816 = vmatprep.subr.bf16.mxu0 %v15012_v62  ;;  %v15030_v59 = vcombine.high %v5974_v53, %v5978_v60  ;;  %v5981_v61 = vld [vmem:[#allocation9 + $0xcc0] sm:$0xff] }
 0x474   :  { %8988 = vmatprep.subr.bf16.mxu1 %v15014_v63  ;;  %v5985_v62 = vld [vmem:[#allocation9 + $0xce0] sm:$0xff]  ;;  %v5982_v63 = vld [vmem:[#allocation9 + $0xcc8] sm:$0xff] }
 0x488   :  { %v5368_v8 = vpop.f32.mrb[12].mxu0 }
 0x489   :  { %v15828_v9 = vadd.f32 %v5368_v8, %v2280_v28  ;;  %v5540_v10 = vpop.f32.mrb[12].mxu1  ;;  %v5370_v55 = vpop.f32.mrb[13].mxu0  ;;  %v5989_v8 = vld [vmem:[#allocation9 + $0xd00] sm:$0xff] }
 0x48a   :  { %v15832_v38 = vadd.f32 %v5540_v10, %v2288_v31  ;;  %v15829_v11 = vadd.f32 %v5370_v55, %v2284_v1  ;;  %v5542_v12 = vpop.f32.mrb[13].mxu1  ;;  %v5372_v14 = vpop.f32.mrb[14].mxu0  ;;  %v5990_v10 = vld [vmem:[#allocation9 + $0xd08] sm:$0xff] }
 0x48b   :  { %v15833_v17 = vadd.f32 %v5542_v12, %v2292_v6  ;;  %v15830_v19 = vadd.f32 %v5372_v14, %v2280_v28  ;;  %v5544_v21 = vpop.f32.mrb[14].mxu1  ;;  %v5374_v20 = vpop.f32.mrb[15].mxu0  ;;  %v5553_v34 = vmax.f32 %v15828_v9, 0.0  ;;  %v15027_v28 = vcombine.low %v5973_v41, %v5977_v18  ;;  %v5993_v9 = vld [vmem:[#allocation9 + $0xd20] sm:$0xff]  ;;  %v5994_v55 = vld [vmem:[#allocation9 + $0xd28] sm:$0xff] }
 0x48c   :  { %v15834_v15 = vadd.f32 %v5544_v21, %v2288_v31  ;;  %v15831_v27 = vadd.f32 %v5374_v20, %v2284_v1  ;;  %v5546_v33 = vpop.f32.mrb[15].mxu1  ;;  %v5555_v40 = vmax.f32 %v15832_v38, 0.0  ;;  %v5554_v42 = vmax.f32 %v15829_v11, 0.0  ;;  %v5998_v21 = vld [vmem:[#allocation9 + $0xd48] sm:$0xff]  ;;  %v6025_v18 = vld [vmem:[#allocation9 + $0xe20] sm:$0xff] }
 0x48d   :  { %v5561_v37 = vmax.f32 %v15830_v19, 0.0  ;;  %v15835_v39 = vadd.f32 %v5546_v33, %v2292_v6  ;;  %v5556_v29 = vmax.f32 %v15833_v17, 0.0  ;;  %v15029_v31 = vcombine.low %v5974_v53, %v5978_v60  ;;  %v5997_v17 = vld [vmem:[#allocation9 + $0xd40] sm:$0xff]  ;;  %v6002_v20 = vld [vmem:[#allocation9 + $0xd68] sm:$0xff] }
 0x48e   :  { %v5563_v43 = vmax.f32 %v15834_v15, 0.0  ;;  %v5562_v44 = vmax.f32 %v15831_v27, 0.0  ;;  %v15036_v1 = vcombine.high %v5981_v61, %v5985_v62  ;;  %v15038_v6 = vcombine.high %v5982_v63, %v5986_v0  ;;  %v6001_v19 = vld [vmem:[#allocation9 + $0xd60] sm:$0xff]  ;;  %v6022_v53 = vld [vmem:[#allocation9 + $0xe08] sm:$0xff] }
 0x48f   :  { %v16726_v46 = vpack.c.bf16 %v5561_v37, %v5553_v34  ;;  %v5564_v47 = vmax.f32 %v15835_v39, 0.0  ;;  %v15035_v38 = vcombine.low %v5981_v61, %v5985_v62  ;;  %v15037_v11 = vcombine.low %v5982_v63, %v5986_v0  ;;  %v6005_v37 = vld [vmem:[#allocation9 + $0xd80] sm:$0xff]  ;;  %v6026_v60 = vld [vmem:[#allocation9 + $0xe28] sm:$0xff] }
 0x490   :  { %v16728_v4 = vpack.c.bf16 %v5563_v43, %v5555_v40  ;;  %v16730_v49 = vpack.c.bf16 %v5562_v44, %v5554_v42  ;;  %v15044_v12 = vcombine.high %v5989_v8, %v5993_v9  ;;  %v15046_v14 = vcombine.high %v5990_v10, %v5994_v55  ;;  %v6009_v39 = vld [vmem:[#allocation9 + $0xda0] sm:$0xff]  ;;  %v6006_v40 = vld [vmem:[#allocation9 + $0xd88] sm:$0xff] }
 0x491   :  { %v16736_v2 = vpack.c.bf16 %v5564_v47, %v5556_v29  ;;  %v15043_v15 = vcombine.low %v5989_v8, %v5993_v9  ;;  %v15045_v27 = vcombine.low %v5990_v10, %v5994_v55  ;;  %v15052_v33 = vcombine.high %v5997_v17, %v6001_v19  ;;  %v6010_v42 = vld [vmem:[#allocation9 + $0xda8] sm:$0xff]  ;;  %v6013_v47 = vld [vmem:[#allocation9 + $0xdc0] sm:$0xff] }
 0x492   :  { %8805 = vmatprep.mubr.bf16.mxu0 %v16730_v49  ;;  %8977 = vmatprep.mubr.bf16.mxu1 %v16730_v49  ;;  %v15054_v34 = vcombine.high %v5998_v21, %v6002_v20  ;;  %v15051_v43 = vcombine.low %v5997_v17, %v6001_v19  ;;  %v15053_v44 = vcombine.low %v5998_v21, %v6002_v20  ;;  %v6029_v61 = vld [vmem:[#allocation9 + $0xe40] sm:$0xff]  ;;  %v6030_v63 = vld [vmem:[#allocation9 + $0xe48] sm:$0xff] }
 0x493   :  { %8806 = vmatmul.mubr.bf16.vlgmr.msra.gmra.mrb[16].mxu0 %v16726_v46  ;;  %8978 = vmatmul.mubr.bf16.vlgmr.msra.gmra.mrb[16].mxu1 %v16726_v46  ;;  %v15060_v45 = vcombine.high %v6005_v37, %v6009_v39  ;;  %v15062_v29 = vcombine.high %v6006_v40, %v6010_v42  ;;  %v15068_v41 = vcombine.high %v6013_v47, %v6017_v13  ;;  %v6033_v62 = vld [vmem:[#allocation9 + $0xe60] sm:$0xff]  ;;  %v6034_v0 = vld [vmem:[#allocation9 + $0xe68] sm:$0xff] }
 0x494   :  { %8817 = vmatpush1.bf16.msra.mxu0 %v15011_v50  ;;  %8989 = vmatpush1.bf16.msra.mxu1 %v15013_v5  ;;  %v15059_v50 = vcombine.low %v6005_v37, %v6009_v39  ;;  %v15061_v5 = vcombine.low %v6006_v40, %v6010_v42  ;;  %v6037_v8 = vld [vmem:[#allocation9 + $0xe80] sm:$0xff]  ;;  %v6038_v10 = vld [vmem:[#allocation9 + $0xe88] sm:$0xff] }
 0x495   :  { %8848 = vmatprep.mubr.bf16.mxu0 %v16736_v2  ;;  %9020 = vmatprep.mubr.bf16.mxu1 %v16736_v2  ;;  %v6041_v9 = vld [vmem:[#allocation9 + $0xea0] sm:$0xff]  ;;  %v6042_v55 = vld [vmem:[#allocation9 + $0xea8] sm:$0xff] }
 0x496   :  { %8818 = vmatprep.subr.bf16.mxu0 %v15020_v51  ;;  %8990 = vmatprep.subr.bf16.mxu1 %v15022_v52  ;;  %v15070_v51 = vcombine.high %v6014_v58, %v6018_v48  ;;  %v6021_v52 = vld [vmem:[#allocation9 + $0xe00] sm:$0xff]  ;;  %v6046_v21 = vld [vmem:[#allocation9 + $0xec8] sm:$0xff] }
 0x497   :  { %v6045_v17 = vld [vmem:[#allocation9 + $0xec0] sm:$0xff]  ;;  %v6050_v20 = vld [vmem:[#allocation9 + $0xee8] sm:$0xff] }
 0x498   :  { %8819 = vmatpush1.bf16.msra.mxu0 %v15019_v54  ;;  %8991 = vmatpush1.bf16.msra.mxu1 %v15021_v56  ;;  %v15067_v54 = vcombine.low %v6013_v47, %v6017_v13  ;;  %v15069_v56 = vcombine.low %v6014_v58, %v6018_v48  ;;  %v6049_v19 = vld [vmem:[#allocation9 + $0xee0] sm:$0xff]  ;;  %v6054_v40 = vld [vmem:[#allocation9 + $0xf08] sm:$0xff] }
 0x499   :  { %8820 = vmatprep.subr.bf16.mxu0 %v15028_v57  ;;  %8992 = vmatprep.subr.bf16.mxu1 %v15030_v59  ;;  %v15076_v57 = vcombine.high %v6021_v52, %v6025_v18  ;;  %v15078_v59 = vcombine.high %v6022_v53, %v6026_v60  ;;  %v6053_v37 = vld [vmem:[#allocation9 + $0xf00] sm:$0xff]  ;;  %v6058_v42 = vld [vmem:[#allocation9 + $0xf28] sm:$0xff] }
 0x49a   :  { %v6057_v39 = vld [vmem:[#allocation9 + $0xf20] sm:$0xff]  ;;  %v6062_v58 = vld [vmem:[#allocation9 + $0xf48] sm:$0xff] }
 0x49b   :  { %v6061_v47 = vld [vmem:[#allocation9 + $0xf40] sm:$0xff]  ;;  %v6066_v48 = vld [vmem:[#allocation9 + $0xf68] sm:$0xff] }
 0x49c   :  { %8821 = vmatpush1.bf16.msra.mxu0 %v15027_v28  ;;  %8993 = vmatpush1.bf16.msra.mxu1 %v15029_v31  ;;  %v15075_v28 = vcombine.low %v6021_v52, %v6025_v18  ;;  %v15077_v31 = vcombine.low %v6022_v53, %v6026_v60  ;;  %v6065_v13 = vld [vmem:[#allocation9 + $0xf60] sm:$0xff]  ;;  %v6070_v53 = vld [vmem:[#allocation9 + $0xf88] sm:$0xff] }
 0x49d   :  { %8822 = vmatprep.subr.bf16.mxu0 %v15036_v1  ;;  %8994 = vmatprep.subr.bf16.mxu1 %v15038_v6  ;;  %v15084_v1 = vcombine.high %v6029_v61, %v6033_v62  ;;  %v15086_v6 = vcombine.high %v6030_v63, %v6034_v0  ;;  %v6069_v52 = vld [vmem:[#allocation9 + $0xf80] sm:$0xff]  ;;  %v6074_v60 = vld [vmem:[#allocation9 + $0xfa8] sm:$0xff] }
 0x49e   :  { %v6073_v18 = vld [vmem:[#allocation9 + $0xfa0] sm:$0xff] }
 0x4a0   :  { %8823 = vmatpush1.bf16.msra.mxu0 %v15035_v38  ;;  %8995 = vmatpush1.bf16.msra.mxu1 %v15037_v11  ;;  %v15083_v38 = vcombine.low %v6029_v61, %v6033_v62  ;;  %v15085_v11 = vcombine.low %v6030_v63, %v6034_v0  ;;  %v6077_v61 = vld [vmem:[#allocation9 + $0xfc0] sm:$0xff]  ;;  %v6078_v63 = vld [vmem:[#allocation9 + $0xfc8] sm:$0xff] }
 0x4a1   :  { %8824 = vmatprep.subr.bf16.mxu0 %v15044_v12  ;;  %8996 = vmatprep.subr.bf16.mxu1 %v15046_v14  ;;  %v15092_v12 = vcombine.high %v6037_v8, %v6041_v9  ;;  %v15094_v14 = vcombine.high %v6038_v10, %v6042_v55  ;;  %v6081_v62 = vld [vmem:[#allocation9 + $0xfe0] sm:$0xff]  ;;  %v6082_v0 = vld [vmem:[#allocation9 + $0xfe8] sm:$0xff] }
 0x4a4   :  { %8825 = vmatpush1.bf16.msra.mxu0 %v15043_v15  ;;  %8997 = vmatpush1.bf16.msra.mxu1 %v15045_v27  ;;  %v15091_v15 = vcombine.low %v6037_v8, %v6041_v9  ;;  %v15093_v27 = vcombine.low %v6038_v10, %v6042_v55  ;;  %v5575_v8 = vld [vmem:[#allocation9 + $0x10] sm:$0xff]  ;;  %v5576_v10 = vld [vmem:[#allocation9 + $0x18] sm:$0xff] }
 0x4a5   :  { %8826 = vmatprep.subr.bf16.mxu0 %v15052_v33  ;;  %8998 = vmatprep.subr.bf16.mxu1 %v15054_v34  ;;  %v15100_v33 = vcombine.high %v6045_v17, %v6049_v19  ;;  %v15102_v34 = vcombine.high %v6046_v21, %v6050_v20  ;;  %v5579_v9 = vld [vmem:[#allocation9 + $0x30] sm:$0xff]  ;;  %v5580_v55 = vld [vmem:[#allocation9 + $0x38] sm:$0xff] }
 0x4a8   :  { %8827 = vmatpush1.bf16.msra.mxu0 %v15051_v43  ;;  %8999 = vmatpush1.bf16.msra.mxu1 %v15053_v44  ;;  %v15099_v43 = vcombine.low %v6045_v17, %v6049_v19  ;;  %v15101_v44 = vcombine.low %v6046_v21, %v6050_v20  ;;  %v5583_v17 = vld [vmem:[#allocation9 + $0x50] sm:$0xff]  ;;  %v5584_v21 = vld [vmem:[#allocation9 + $0x58] sm:$0xff] }
 0x4a9   :  { %8828 = vmatprep.subr.bf16.mxu0 %v15060_v45  ;;  %9000 = vmatprep.subr.bf16.mxu1 %v15062_v29  ;;  %v15108_v45 = vcombine.high %v6053_v37, %v6057_v39  ;;  %v15110_v29 = vcombine.high %v6054_v40, %v6058_v42  ;;  %v5587_v19 = vld [vmem:[#allocation9 + $0x70] sm:$0xff]  ;;  %v5588_v20 = vld [vmem:[#allocation9 + $0x78] sm:$0xff] }
 0x4ac   :  { %8829 = vmatpush1.bf16.msra.mxu0 %v15059_v50  ;;  %9001 = vmatpush1.bf16.msra.mxu1 %v15061_v5  ;;  %v15107_v50 = vcombine.low %v6053_v37, %v6057_v39  ;;  %v15109_v5 = vcombine.low %v6054_v40, %v6058_v42  ;;  %v5591_v37 = vld [vmem:[#allocation9 + $0x90] sm:$0xff]  ;;  %v5592_v40 = vld [vmem:[#allocation9 + $0x98] sm:$0xff] }
 0x4ad   :  { %8830 = vmatprep.subr.bf16.mxu0 %v15068_v41  ;;  %9002 = vmatprep.subr.bf16.mxu1 %v15070_v51  ;;  %v15116_v41 = vcombine.high %v6061_v47, %v6065_v13  ;;  %v15118_v51 = vcombine.high %v6062_v58, %v6066_v48  ;;  %v5595_v39 = vld [vmem:[#allocation9 + $0xb0] sm:$0xff]  ;;  %v5596_v42 = vld [vmem:[#allocation9 + $0xb8] sm:$0xff] }
 0x4b0   :  { %8831 = vmatpush1.bf16.msra.mxu0 %v15067_v54  ;;  %9003 = vmatpush1.bf16.msra.mxu1 %v15069_v56  ;;  %v15115_v54 = vcombine.low %v6061_v47, %v6065_v13  ;;  %v15117_v56 = vcombine.low %v6062_v58, %v6066_v48  ;;  %v5599_v47 = vld [vmem:[#allocation9 + $0xd0] sm:$0xff]  ;;  %v5600_v58 = vld [vmem:[#allocation9 + $0xd8] sm:$0xff] }
 0x4b1   :  { %8832 = vmatprep.subr.bf16.mxu0 %v15076_v57  ;;  %9004 = vmatprep.subr.bf16.mxu1 %v15078_v59  ;;  %v15124_v57 = vcombine.high %v6069_v52, %v6073_v18  ;;  %v15126_v59 = vcombine.high %v6070_v53, %v6074_v60  ;;  %v5603_v13 = vld [vmem:[#allocation9 + $0xf0] sm:$0xff]  ;;  %v5604_v48 = vld [vmem:[#allocation9 + $0xf8] sm:$0xff] }
 0x4b4   :  { %8833 = vmatpush1.bf16.msra.mxu0 %v15075_v28  ;;  %9005 = vmatpush1.bf16.msra.mxu1 %v15077_v31  ;;  %v15123_v28 = vcombine.low %v6069_v52, %v6073_v18  ;;  %v15125_v31 = vcombine.low %v6070_v53, %v6074_v60  ;;  %v5607_v52 = vld [vmem:[#allocation9 + $0x110] sm:$0xff]  ;;  %v5612_v53 = vld [vmem:[#allocation9 + $0x138] sm:$0xff]  ;;  %v14655_v60 = vcombine.low %v5599_v47, %v5603_v13 }
 0x4b5   :  { %8834 = vmatprep.subr.bf16.mxu0 %v15084_v1  ;;  %9006 = vmatprep.subr.bf16.mxu1 %v15086_v6  ;;  %v15132_v1 = vcombine.high %v6077_v61, %v6081_v62  ;;  %v15134_v6 = vcombine.high %v6078_v63, %v6082_v0  ;;  %v5611_v18 = vld [vmem:[#allocation9 + $0x130] sm:$0xff] }
 0x4b8   :  { %8835 = vmatpush1.bf16.msra.mxu0 %v15083_v38  ;;  %9007 = vmatpush1.bf16.msra.mxu1 %v15085_v11  ;;  %v15131_v38 = vcombine.low %v6077_v61, %v6081_v62  ;;  %v15133_v11 = vcombine.low %v6078_v63, %v6082_v0  ;;  %v5619_v61 = vld [vmem:[#allocation9 + $0x170] sm:$0xff]  ;;  %v5616_v62 = vld [vmem:[#allocation9 + $0x158] sm:$0xff]  ;;  %v14663_v0 = vcombine.low %v5607_v52, %v5611_v18 }
 0x4b9   :  { %8836 = vmatprep.subr.bf16.mxu0 %v15092_v12  ;;  %9008 = vmatprep.subr.bf16.mxu1 %v15094_v14  ;;  %v14632_v12 = vcombine.high %v5575_v8, %v5579_v9  ;;  %v14634_v14 = vcombine.high %v5576_v10, %v5580_v55  ;;  %v5620_v63 = vld [vmem:[#allocation9 + $0x178] sm:$0xff] }
 0x4bc   :  { %8837 = vmatpush1.bf16.msra.mxu0 %v15091_v15  ;;  %9009 = vmatpush1.bf16.msra.mxu1 %v15093_v27  ;;  %v14631_v15 = vcombine.low %v5575_v8, %v5579_v9  ;;  %v14633_v27 = vcombine.low %v5576_v10, %v5580_v55  ;;  %v5627_v8 = vld [vmem:[#allocation9 + $0x1b0] sm:$0xff]  ;;  %v5624_v9 = vld [vmem:[#allocation9 + $0x198] sm:$0xff] }
 0x4bd   :  { %8838 = vmatprep.subr.bf16.mxu0 %v15100_v33  ;;  %9010 = vmatprep.subr.bf16.mxu1 %v15102_v34  ;;  %v14640_v33 = vcombine.high %v5583_v17, %v5587_v19  ;;  %v14642_v34 = vcombine.high %v5584_v21, %v5588_v20  ;;  %v5628_v10 = vld [vmem:[#allocation9 + $0x1b8] sm:$0xff] }
 0x4c0   :  { %8839 = vmatpush1.bf16.msra.mxu0 %v15099_v43  ;;  %9011 = vmatpush1.bf16.msra.mxu1 %v15101_v44  ;;  %v14639_v43 = vcombine.low %v5583_v17, %v5587_v19  ;;  %v14641_v44 = vcombine.low %v5584_v21, %v5588_v20  ;;  %v5635_v17 = vld [vmem:[#allocation9 + $0x1f0] sm:$0xff]  ;;  %v5632_v19 = vld [vmem:[#allocation9 + $0x1d8] sm:$0xff] }
 0x4c1   :  { %8840 = vmatprep.subr.bf16.mxu0 %v15108_v45  ;;  %9012 = vmatprep.subr.bf16.mxu1 %v15110_v29  ;;  %v14648_v45 = vcombine.high %v5591_v37, %v5595_v39  ;;  %v14650_v29 = vcombine.high %v5592_v40, %v5596_v42  ;;  %v5636_v21 = vld [vmem:[#allocation9 + $0x1f8] sm:$0xff] }
 0x4c4   :  { %8841 = vmatpush1.bf16.msra.mxu0 %v15107_v50  ;;  %9013 = vmatpush1.bf16.msra.mxu1 %v15109_v5  ;;  %v14647_v50 = vcombine.low %v5591_v37, %v5595_v39  ;;  %v14649_v5 = vcombine.low %v5592_v40, %v5596_v42  ;;  %v5643_v37 = vld [vmem:[#allocation9 + $0x230] sm:$0xff]  ;;  %v5640_v39 = vld [vmem:[#allocation9 + $0x218] sm:$0xff] }
 0x4c5   :  { %8842 = vmatprep.subr.bf16.mxu0 %v15116_v41  ;;  %9014 = vmatprep.subr.bf16.mxu1 %v15118_v51  ;;  %v14656_v41 = vcombine.high %v5599_v47, %v5603_v13  ;;  %v14658_v51 = vcombine.high %v5600_v58, %v5604_v48  ;;  %v5644_v40 = vld [vmem:[#allocation9 + $0x238] sm:$0xff]  ;;  %v5651_v47 = vld [vmem:[#allocation9 + $0x270] sm:$0xff] }
 0x4c6   :  { %v5648_v13 = vld [vmem:[#allocation9 + $0x258] sm:$0xff] }
 0x4c8   :  { %8843 = vmatpush1.bf16.msra.mxu0 %v15115_v54  ;;  %9015 = vmatpush1.bf16.msra.mxu1 %v15117_v56  ;;  %v14657_v54 = vcombine.low %v5600_v58, %v5604_v48  ;;  %v14664_v56 = vcombine.high %v5607_v52, %v5611_v18  ;;  %v5652_v58 = vld [vmem:[#allocation9 + $0x278] sm:$0xff]  ;;  %v5659_v52 = vld [vmem:[#allocation9 + $0x2b0] sm:$0xff] }
 0x4c9   :  { %8844 = vmatprep.subr.bf16.mxu0 %v15124_v57  ;;  %9016 = vmatprep.subr.bf16.mxu1 %v15126_v59  ;;  %v5615_v59 = vld [vmem:[#allocation9 + $0x150] sm:$0xff]  ;;  %v5656_v18 = vld [vmem:[#allocation9 + $0x298] sm:$0xff] }
 0x4ca   :  { %v14671_v55 = vcombine.low %v5615_v59, %v5619_v61 }
 0x4cc   :  { %8845 = vmatpush1.bf16.msra.mxu0 %v15123_v28  ;;  %9017 = vmatpush1.bf16.msra.mxu1 %v15125_v31  ;;  %v14672_v31 = vcombine.high %v5615_v59, %v5619_v61  ;;  %v5667_v59 = vld [vmem:[#allocation9 + $0x2f0] sm:$0xff]  ;;  %v5664_v61 = vld [vmem:[#allocation9 + $0x2d8] sm:$0xff] }
 0x4cd   :  { %8846 = vmatprep.subr.bf16.mxu0 %v15132_v1  ;;  %9018 = vmatprep.subr.bf16.mxu1 %v15134_v6  ;;  %v14674_v1 = vcombine.high %v5616_v62, %v5620_v63  ;;  %v5623_v6 = vld [vmem:[#allocation9 + $0x190] sm:$0xff] }
 0x4ce   :  { %v14679_v20 = vcombine.low %v5623_v6, %v5627_v8 }
 0x4d0   :  { %8847 = vmatpush1.bf16.msra.mxu0 %v15131_v38  ;;  %9019 = vmatpush1.bf16.msra.mxu1 %v15133_v11  ;;  %v14673_v38 = vcombine.low %v5616_v62, %v5620_v63  ;;  %v14680_v11 = vcombine.high %v5623_v6, %v5627_v8  ;;  %v5668_v62 = vld [vmem:[#allocation9 + $0x2f8] sm:$0xff]  ;;  %v5675_v6 = vld [vmem:[#allocation9 + $0x330] sm:$0xff] }
 0x4d1   :  { %9031 = vmatprep.subr.bf16.mxu0 %v14632_v12  ;;  %9203 = vmatprep.subr.bf16.mxu1 %v14634_v14  ;;  %v14682_v12 = vcombine.high %v5624_v9, %v5628_v10  ;;  %v5631_v14 = vld [vmem:[#allocation9 + $0x1d0] sm:$0xff]  ;;  %v5672_v8 = vld [vmem:[#allocation9 + $0x318] sm:$0xff] }
 0x4d2   :  { %v14687_v42 = vcombine.low %v5631_v14, %v5635_v17 }
 0x4d3   :  { %8849 = vmatmul.mubr.bf16.vlgmr.msra.gmra.mrb[16].mxu0 %v16728_v4  ;;  %9021 = vmatmul.mubr.bf16.vlgmr.msra.gmra.mrb[16].mxu1 %v16728_v4 }
 0x4d4   :  { %9032 = vmatpush1.bf16.msra.mxu0 %v14631_v15  ;;  %9063 = vmatprep.mubr.bf16.mxu0 %v16696_v16  ;;  %v14681_v15 = vcombine.low %v5624_v9, %v5628_v10  ;;  %v5676_v9 = vld [vmem:[#allocation9 + $0x338] sm:$0xff] }
 0x4d5   :  { %9204 = vmatpush1.bf16.msra.mxu1 %v14633_v27  ;;  %9235 = vmatprep.mubr.bf16.mxu1 %v16696_v16  ;;  %v5608_v16 = vld [vmem:[#allocation9 + $0x118] sm:$0xff]  ;;  %v14688_v27 = vcombine.high %v5631_v14, %v5635_v17  ;;  %v5683_v14 = vld [vmem:[#allocation9 + $0x370] sm:$0xff] }
 0x4d6   :  { %9033 = vmatprep.subr.bf16.mxu0 %v14640_v33  ;;  %9205 = vmatprep.subr.bf16.mxu1 %v14642_v34  ;;  %v14666_v57 = vcombine.high %v5608_v16, %v5612_v53  ;;  %v14665_v28 = vcombine.low %v5608_v16, %v5612_v53  ;;  %v14690_v33 = vcombine.high %v5632_v19, %v5636_v21  ;;  %v5639_v34 = vld [vmem:[#allocation9 + $0x210] sm:$0xff]  ;;  %v5660_v16 = vld [vmem:[#allocation9 + $0x2b8] sm:$0xff] }
 0x4d7   :  { %v14695_v48 = vcombine.low %v5639_v34, %v5643_v37  ;;  %v5680_v17 = vld [vmem:[#allocation9 + $0x358] sm:$0xff] }
 0x4d8   :  { %9034 = vmatpush1.bf16.msra.mxu0 %v14639_v43  ;;  %v14689_v43 = vcombine.low %v5632_v19, %v5636_v21  ;;  %v5684_v19 = vld [vmem:[#allocation9 + $0x378] sm:$0xff] }
 0x4d9   :  { %9206 = vmatpush1.bf16.msra.mxu1 %v14641_v44  ;;  %9035 = vmatprep.subr.bf16.mxu0 %v14648_v45  ;;  %v14696_v44 = vcombine.high %v5639_v34, %v5643_v37  ;;  %v14698_v45 = vcombine.high %v5640_v39, %v5644_v40  ;;  %v5691_v34 = vld [vmem:[#allocation9 + $0x3b0] sm:$0xff]  ;;  %v5688_v37 = vld [vmem:[#allocation9 + $0x398] sm:$0xff] }
 0x4da   :  { %9207 = vmatprep.subr.bf16.mxu1 %v14650_v29  ;;  %v5647_v29 = vld [vmem:[#allocation9 + $0x250] sm:$0xff] }
 0x4db   :  { %v14703_v53 = vcombine.low %v5647_v29, %v5651_v47 }
 0x4dc   :  { %9036 = vmatpush1.bf16.msra.mxu0 %v14647_v50  ;;  %v14697_v50 = vcombine.low %v5640_v39, %v5644_v40  ;;  %v5692_v39 = vld [vmem:[#allocation9 + $0x3b8] sm:$0xff] }
 0x4dd   :  { %9208 = vmatpush1.bf16.msra.mxu1 %v14649_v5  ;;  %9037 = vmatprep.subr.bf16.mxu0 %v14656_v41  ;;  %v14704_v5 = vcombine.high %v5647_v29, %v5651_v47  ;;  %v14706_v41 = vcombine.high %v5648_v13, %v5652_v58  ;;  %v5699_v29 = vld [vmem:[#allocation9 + $0x3f0] sm:$0xff]  ;;  %v5696_v47 = vld [vmem:[#allocation9 + $0x3d8] sm:$0xff] }
 0x4de   :  { %9209 = vmatprep.subr.bf16.mxu1 %v14658_v51  ;;  %v5655_v51 = vld [vmem:[#allocation9 + $0x290] sm:$0xff] }
 0x4df   :  { %v14711_v63 = vcombine.low %v5655_v51, %v5659_v52 }
 0x4e0   :  { %9038 = vmatpush1.bf16.msra.mxu0 %v14655_v60  ;;  %v14705_v60 = vcombine.low %v5648_v13, %v5652_v58  ;;  %v5700_v13 = vld [vmem:[#allocation9 + $0x3f8] sm:$0xff] }
 0x4e1   :  { %9210 = vmatpush1.bf16.msra.mxu1 %v14657_v54  ;;  %9039 = vmatprep.subr.bf16.mxu0 %v14664_v56  ;;  %v14712_v54 = vcombine.high %v5655_v51, %v5659_v52  ;;  %v14714_v56 = vcombine.high %v5656_v18, %v5660_v16  ;;  %v5707_v51 = vld [vmem:[#allocation9 + $0x430] sm:$0xff]  ;;  %v5704_v52 = vld [vmem:[#allocation9 + $0x418] sm:$0xff] }
 0x4e2   :  { %9211 = vmatprep.subr.bf16.mxu1 %v14666_v57  ;;  %v5663_v57 = vld [vmem:[#allocation9 + $0x2d0] sm:$0xff] }
 0x4e3   :  { %v14719_v10 = vcombine.low %v5663_v57, %v5667_v59 }
 0x4e4   :  { %9040 = vmatpush1.bf16.msra.mxu0 %v14663_v0  ;;  %v14713_v0 = vcombine.low %v5656_v18, %v5660_v16  ;;  %v5708_v18 = vld [vmem:[#allocation9 + $0x438] sm:$0xff] }
 0x4e5   :  { %9212 = vmatpush1.bf16.msra.mxu1 %v14665_v28  ;;  %9041 = vmatprep.subr.bf16.mxu0 %v14672_v31  ;;  %v14720_v28 = vcombine.high %v5663_v57, %v5667_v59  ;;  %v14722_v31 = vcombine.high %v5664_v61, %v5668_v62  ;;  %v5715_v57 = vld [vmem:[#allocation9 + $0x470] sm:$0xff] }
 0x4e6   :  { %9213 = vmatprep.subr.bf16.mxu1 %v14674_v1  ;;  %v5671_v1 = vld [vmem:[#allocation9 + $0x310] sm:$0xff] }
 0x4e7   :  { %v14727_v21 = vcombine.low %v5671_v1, %v5675_v6 }
 0x4e8   :  { %9042 = vmatpush1.bf16.msra.mxu0 %v14671_v55  ;;  %v14721_v55 = vcombine.low %v5664_v61, %v5668_v62  ;;  %v5712_v61 = vld [vmem:[#allocation9 + $0x458] sm:$0xff] }
 0x4e9   :  { %9214 = vmatpush1.bf16.msra.mxu1 %v14673_v38  ;;  %9043 = vmatprep.subr.bf16.mxu0 %v14680_v11  ;;  %v14728_v38 = vcombine.high %v5671_v1, %v5675_v6  ;;  %v14730_v11 = vcombine.high %v5672_v8, %v5676_v9  ;;  %v5716_v62 = vld [vmem:[#allocation9 + $0x478] sm:$0xff] }
 0x4ea   :  { %9215 = vmatprep.subr.bf16.mxu1 %v14682_v12  ;;  %v5679_v12 = vld [vmem:[#allocation9 + $0x350] sm:$0xff]  ;;  %v14770_v1 = vcombine.high %v5712_v61, %v5716_v62  ;;  %v5720_v6 = vld [vmem:[#allocation9 + $0x498] sm:$0xff] }
 0x4eb   :  { %v14735_v40 = vcombine.low %v5679_v12, %v5683_v14 }
 0x4ec   :  { %9044 = vmatpush1.bf16.msra.mxu0 %v14679_v20  ;;  %v14729_v20 = vcombine.low %v5672_v8, %v5676_v9  ;;  %v5724_v8 = vld [vmem:[#allocation9 + $0x4b8] sm:$0xff] }
 0x4ed   :  { %9216 = vmatpush1.bf16.msra.mxu1 %v14681_v15  ;;  %9045 = vmatprep.subr.bf16.mxu0 %v14688_v27  ;;  %v14736_v15 = vcombine.high %v5679_v12, %v5683_v14  ;;  %v14738_v27 = vcombine.high %v5680_v17, %v5684_v19  ;;  %v5731_v12 = vld [vmem:[#allocation9 + $0x4f0] sm:$0xff]  ;;  %v5728_v14 = vld [vmem:[#allocation9 + $0x4d8] sm:$0xff] }
 0x4ee   :  { %9217 = vmatprep.subr.bf16.mxu1 %v14690_v33  ;;  %v5687_v33 = vld [vmem:[#allocation9 + $0x390] sm:$0xff] }
 0x4ef   :  { %v14743_v58 = vcombine.low %v5687_v33, %v5691_v34 }
 0x4f0   :  { %9046 = vmatpush1.bf16.msra.mxu0 %v14687_v42  ;;  %v14737_v42 = vcombine.low %v5680_v17, %v5684_v19  ;;  %v5732_v17 = vld [vmem:[#allocation9 + $0x4f8] sm:$0xff] }
 0x4f1   :  { %9218 = vmatpush1.bf16.msra.mxu1 %v14689_v43  ;;  %9047 = vmatprep.subr.bf16.mxu0 %v14696_v44  ;;  %v14744_v43 = vcombine.high %v5687_v33, %v5691_v34  ;;  %v14746_v44 = vcombine.high %v5688_v37, %v5692_v39  ;;  %v5736_v33 = vld [vmem:[#allocation9 + $0x518] sm:$0xff] }
 0x4f2   :  { %9219 = vmatprep.subr.bf16.mxu1 %v14698_v45  ;;  %v5695_v45 = vld [vmem:[#allocation9 + $0x3d0] sm:$0xff]  ;;  %v5740_v34 = vld [vmem:[#allocation9 + $0x538] sm:$0xff] }
 0x4f3   :  { %v14751_v16 = vcombine.low %v5695_v45, %v5699_v29 }
 0x4f4   :  { %9048 = vmatpush1.bf16.msra.mxu0 %v14695_v48  ;;  %v14745_v48 = vcombine.low %v5688_v37, %v5692_v39  ;;  %v14785_v37 = vcombine.low %v5728_v14, %v5732_v17 }
 0x4f5   :  { %9220 = vmatpush1.bf16.msra.mxu1 %v14697_v50  ;;  %9049 = vmatprep.subr.bf16.mxu0 %v14704_v5  ;;  %v14752_v50 = vcombine.high %v5695_v45, %v5699_v29  ;;  %v14754_v5 = vcombine.high %v5696_v47, %v5700_v13  ;;  %v5748_v45 = vld [vmem:[#allocation9 + $0x578] sm:$0xff] }
 0x4f6   :  { %9221 = vmatprep.subr.bf16.mxu1 %v14706_v41  ;;  %v5703_v41 = vld [vmem:[#allocation9 + $0x410] sm:$0xff] }
 0x4f7   :  { %v14759_v59 = vcombine.low %v5703_v41, %v5707_v51 }
 0x4f8   :  { %9050 = vmatpush1.bf16.msra.mxu0 %v14703_v53  ;;  %v14753_v53 = vcombine.low %v5696_v47, %v5700_v13  ;;  %v14793_v47 = vcombine.low %v5736_v33, %v5740_v34 }
 0x4f9   :  { %9222 = vmatpush1.bf16.msra.mxu1 %v14705_v60  ;;  %9051 = vmatprep.subr.bf16.mxu0 %v14712_v54  ;;  %v14760_v60 = vcombine.high %v5703_v41, %v5707_v51  ;;  %v14762_v54 = vcombine.high %v5704_v52, %v5708_v18  ;;  %v5756_v41 = vld [vmem:[#allocation9 + $0x5b8] sm:$0xff] }
 0x4fa   :  { %9223 = vmatprep.subr.bf16.mxu1 %v14714_v56  ;;  %v5711_v56 = vld [vmem:[#allocation9 + $0x450] sm:$0xff] }
 0x4fb   :  { %v14767_v9 = vcombine.low %v5711_v56, %v5715_v57 }
 0x4fc   :  { %9052 = vmatpush1.bf16.msra.mxu0 %v14711_v63  ;;  %v14761_v63 = vcombine.low %v5704_v52, %v5708_v18 }
 0x4fd   :  { %9224 = vmatpush1.bf16.msra.mxu1 %v14713_v0  ;;  %9053 = vmatprep.subr.bf16.mxu0 %v14720_v28  ;;  %v14768_v0 = vcombine.high %v5711_v56, %v5715_v57  ;;  %v5719_v28 = vld [vmem:[#allocation9 + $0x490] sm:$0xff]  ;;  %v5764_v56 = vld [vmem:[#allocation9 + $0x5f8] sm:$0xff] }
 0x4fe   :  { %9225 = vmatprep.subr.bf16.mxu1 %v14722_v31  ;;  %v5723_v31 = vld [vmem:[#allocation9 + $0x4b0] sm:$0xff] }
 0x4ff   :  { %v14775_v19 = vcombine.low %v5719_v28, %v5723_v31 }
 0x500   :  { %9054 = vmatpush1.bf16.msra.mxu0 %v14719_v10  ;;  %v14769_v10 = vcombine.low %v5712_v61, %v5716_v62 }
 0x501   :  { %9226 = vmatpush1.bf16.msra.mxu1 %v14721_v55  ;;  %9055 = vmatprep.subr.bf16.mxu0 %v14728_v38  ;;  %v14776_v55 = vcombine.high %v5719_v28, %v5723_v31  ;;  %v14778_v38 = vcombine.high %v5720_v6, %v5724_v8  ;;  %v5768_v28 = vld [vmem:[#allocation9 + $0x618] sm:$0xff] }
 0x502   :  { %9227 = vmatprep.subr.bf16.mxu1 %v14730_v11  ;;  %v5727_v11 = vld [vmem:[#allocation9 + $0x4d0] sm:$0xff]  ;;  %v5772_v31 = vld [vmem:[#allocation9 + $0x638] sm:$0xff] }
 0x504   :  { %9056 = vmatpush1.bf16.msra.mxu0 %v14727_v21  ;;  %v14784_v21 = vcombine.high %v5727_v11, %v5731_v12 }
 0x505   :  { %9228 = vmatpush1.bf16.msra.mxu1 %v14729_v20  ;;  %9057 = vmatprep.subr.bf16.mxu0 %v14736_v15  ;;  %v14786_v20 = vcombine.high %v5728_v14, %v5732_v17  ;;  %v5735_v15 = vld [vmem:[#allocation9 + $0x510] sm:$0xff]  ;;  %v14825_v14 = vcombine.low %v5768_v28, %v5772_v31 }
 0x506   :  { %9229 = vmatprep.subr.bf16.mxu1 %v14738_v27  ;;  %v5739_v27 = vld [vmem:[#allocation9 + $0x530] sm:$0xff] }
 0x507   :  { %v14792_v39 = vcombine.high %v5735_v15, %v5739_v27  ;;  %v14791_v29 = vcombine.low %v5735_v15, %v5739_v27  ;;  %v5788_v15 = vld [vmem:[#allocation9 + $0x6b8] sm:$0xff] }
 0x508   :  { %9058 = vmatpush1.bf16.msra.mxu0 %v14735_v40  ;;  %v14794_v40 = vcombine.high %v5736_v33, %v5740_v34 }
 0x509   :  { %9230 = vmatpush1.bf16.msra.mxu1 %v14737_v42  ;;  %9059 = vmatprep.subr.bf16.mxu0 %v14744_v43  ;;  %v5743_v42 = vld [vmem:[#allocation9 + $0x550] sm:$0xff] }
 0x50a   :  { %9231 = vmatprep.subr.bf16.mxu1 %v14746_v44  ;;  %v5747_v43 = vld [vmem:[#allocation9 + $0x570] sm:$0xff]  ;;  %v5744_v44 = vld [vmem:[#allocation9 + $0x558] sm:$0xff] }
 0x50b   :  { %v14800_v13 = vcombine.high %v5743_v42, %v5747_v43  ;;  %v14799_v51 = vcombine.low %v5743_v42, %v5747_v43  ;;  %v14801_v52 = vcombine.low %v5744_v44, %v5748_v45  ;;  %v5796_v42 = vld [vmem:[#allocation9 + $0x6f8] sm:$0xff] }
 0x50c   :  { %9060 = vmatpush1.bf16.msra.mxu0 %v14743_v58  ;;  %v14802_v58 = vcombine.high %v5744_v44, %v5748_v45 }
 0x50d   :  { %9232 = vmatpush1.bf16.msra.mxu1 %v14745_v48  ;;  %9061 = vmatprep.subr.bf16.mxu0 %v14752_v50  ;;  %v5751_v48 = vld [vmem:[#allocation9 + $0x590] sm:$0xff] }
 0x50e   :  { %9233 = vmatprep.subr.bf16.mxu1 %v14754_v5  ;;  %v5755_v50 = vld [vmem:[#allocation9 + $0x5b0] sm:$0xff]  ;;  %v5752_v5 = vld [vmem:[#allocation9 + $0x598] sm:$0xff] }
 0x50f   :  { %v14808_v18 = vcombine.high %v5751_v48, %v5755_v50  ;;  %v14807_v57 = vcombine.low %v5751_v48, %v5755_v50  ;;  %v5804_v48 = vld [vmem:[#allocation9 + $0x738] sm:$0xff] }
 0x510   :  { %9062 = vmatpush1.bf16.msra.mxu0 %v14751_v16  ;;  %v14810_v16 = vcombine.high %v5752_v5, %v5756_v41 }
 0x511   :  { %9234 = vmatpush1.bf16.msra.mxu1 %v14753_v53  ;;  %9074 = vmatprep.subr.bf16.mxu0 %v14760_v60  ;;  %v5759_v53 = vld [vmem:[#allocation9 + $0x5d0] sm:$0xff] }
 0x512   :  { %9246 = vmatprep.subr.bf16.mxu1 %v14762_v54  ;;  %v5763_v60 = vld [vmem:[#allocation9 + $0x5f0] sm:$0xff]  ;;  %v5760_v54 = vld [vmem:[#allocation9 + $0x5d8] sm:$0xff] }
 0x513   :  { %9064 = vmatmul.mubr.bf16.vlgmr.msra.gmra.mrb[20].mxu0 %v16692_v22  ;;  %v14816_v61 = vcombine.high %v5759_v53, %v5763_v60  ;;  %v14818_v62 = vcombine.high %v5760_v54, %v5764_v56 }
 0x514   :  { %9236 = vmatmul.mubr.bf16.vlgmr.msra.gmra.mrb[20].mxu1 %v16692_v22  ;;  %9075 = vmatpush1.bf16.msra.mxu0 %v14759_v59  ;;  %v14777_v22 = vcombine.low %v5720_v6, %v5724_v8  ;;  %v14809_v59 = vcombine.low %v5752_v5, %v5756_v41  ;;  %v14817_v6 = vcombine.low %v5760_v54, %v5764_v56 }
 0x515   :  { %9106 = vmatprep.mubr.bf16.mxu0 %v16698_v26  ;;  %9247 = vmatpush1.bf16.msra.mxu1 %v14761_v63  ;;  %v5767_v63 = vld [vmem:[#allocation9 + $0x610] sm:$0xff] }
 0x516   :  { %9278 = vmatprep.mubr.bf16.mxu1 %v16698_v26  ;;  %9076 = vmatprep.subr.bf16.mxu0 %v14768_v0  ;;  %v14783_v26 = vcombine.low %v5727_v11, %v5731_v12  ;;  %v5771_v0 = vld [vmem:[#allocation9 + $0x630] sm:$0xff]  ;;  %v5780_v11 = vld [vmem:[#allocation9 + $0x678] sm:$0xff] }
 0x517   :  { %9248 = vmatprep.subr.bf16.mxu1 %v14770_v1  ;;  %v14815_v1 = vcombine.low %v5759_v53, %v5763_v60  ;;  %v14824_v8 = vcombine.high %v5767_v63, %v5771_v0  ;;  %v14823_v12 = vcombine.low %v5767_v63, %v5771_v0  ;;  %v5812_v53 = vld [vmem:[#allocation9 + $0x778] sm:$0xff] }
 0x518   :  { %9077 = vmatpush1.bf16.msra.mxu0 %v14767_v9  ;;  %v14826_v9 = vcombine.high %v5768_v28, %v5772_v31  ;;  %v5820_v63 = vld [vmem:[#allocation9 + $0x7b8] sm:$0xff] }
 0x519   :  { %9249 = vmatpush1.bf16.msra.mxu1 %v14769_v10  ;;  %9078 = vmatprep.subr.bf16.mxu0 %v14776_v55  ;;  %v5775_v10 = vld [vmem:[#allocation9 + $0x650] sm:$0xff] }
 0x51a   :  { %9250 = vmatprep.subr.bf16.mxu1 %v14778_v38  ;;  %v5779_v55 = vld [vmem:[#allocation9 + $0x670] sm:$0xff]  ;;  %v5776_v38 = vld [vmem:[#allocation9 + $0x658] sm:$0xff] }
 0x51b   :  { %v14832_v17 = vcombine.high %v5775_v10, %v5779_v55  ;;  %v14831_v27 = vcombine.low %v5775_v10, %v5779_v55  ;;  %v14833_v33 = vcombine.low %v5776_v38, %v5780_v11  ;;  %v5828_v10 = vld [vmem:[#allocation9 + $0x7f8] sm:$0xff] }
 0x51c   :  { %9079 = vmatpush1.bf16.msra.mxu0 %v14775_v19  ;;  %v14834_v19 = vcombine.high %v5776_v38, %v5780_v11 }
 0x51d   :  { %9251 = vmatpush1.bf16.msra.mxu1 %v14777_v22  ;;  %9080 = vmatprep.subr.bf16.mxu0 %v14784_v21  ;;  %v5783_v22 = vld [vmem:[#allocation9 + $0x690] sm:$0xff] }
 0x51e   :  { %9252 = vmatprep.subr.bf16.mxu1 %v14786_v20  ;;  %v5787_v21 = vld [vmem:[#allocation9 + $0x6b0] sm:$0xff]  ;;  %v5784_v20 = vld [vmem:[#allocation9 + $0x698] sm:$0xff] }
 0x51f   :  { %v14840_v34 = vcombine.high %v5783_v22, %v5787_v21  ;;  %v14839_v43 = vcombine.low %v5783_v22, %v5787_v21  ;;  %v14841_v44 = vcombine.low %v5784_v20, %v5788_v15  ;;  %v5836_v22 = vld [vmem:[#allocation9 + $0x838] sm:$0xff] }
 0x520   :  { %9081 = vmatpush1.bf16.msra.mxu0 %v14783_v26  ;;  %v14842_v26 = vcombine.high %v5784_v20, %v5788_v15 }
 0x521   :  { %9253 = vmatpush1.bf16.msra.mxu1 %v14785_v37  ;;  %9082 = vmatprep.subr.bf16.mxu0 %v14792_v39  ;;  %v5791_v37 = vld [vmem:[#allocation9 + $0x6d0] sm:$0xff] }
 0x522   :  { %9254 = vmatprep.subr.bf16.mxu1 %v14794_v40  ;;  %v5795_v39 = vld [vmem:[#allocation9 + $0x6f0] sm:$0xff]  ;;  %v5792_v40 = vld [vmem:[#allocation9 + $0x6d8] sm:$0xff] }
 0x523   :  { %v14848_v45 = vcombine.high %v5791_v37, %v5795_v39  ;;  %v14847_v50 = vcombine.low %v5791_v37, %v5795_v39  ;;  %v14849_v5 = vcombine.low %v5792_v40, %v5796_v42  ;;  %v5840_v37 = vld [vmem:[#allocation9 + $0x858] sm:$0xff] }
 0x524   :  { %9083 = vmatpush1.bf16.msra.mxu0 %v14791_v29  ;;  %v14850_v29 = vcombine.high %v5792_v40, %v5796_v42  ;;  %v5844_v39 = vld [vmem:[#allocation9 + $0x878] sm:$0xff] }
 0x525   :  { %9255 = vmatpush1.bf16.msra.mxu1 %v14793_v47  ;;  %9084 = vmatprep.subr.bf16.mxu0 %v14800_v13  ;;  %v5799_v47 = vld [vmem:[#allocation9 + $0x710] sm:$0xff] }
 0x526   :  { %9256 = vmatprep.subr.bf16.mxu1 %v14802_v58  ;;  %v5803_v13 = vld [vmem:[#allocation9 + $0x730] sm:$0xff]  ;;  %v5800_v58 = vld [vmem:[#allocation9 + $0x718] sm:$0xff] }
 0x527   :  { %v14856_v41 = vcombine.high %v5799_v47, %v5803_v13  ;;  %v14855_v60 = vcombine.low %v5799_v47, %v5803_v13  ;;  %v14857_v54 = vcombine.low %v5800_v58, %v5804_v48  ;;  %v5852_v47 = vld [vmem:[#allocation9 + $0x8b8] sm:$0xff] }
 0x528   :  { %9085 = vmatpush1.bf16.msra.mxu0 %v14799_v51  ;;  %v14858_v51 = vcombine.high %v5800_v58, %v5804_v48  ;;  %v14897_v58 = vcombine.low %v5840_v37, %v5844_v39 }
 0x529   :  { %9257 = vmatpush1.bf16.msra.mxu1 %v14801_v52  ;;  %9086 = vmatprep.subr.bf16.mxu0 %v14808_v18  ;;  %v5807_v52 = vld [vmem:[#allocation9 + $0x750] sm:$0xff] }
 0x52a   :  { %9258 = vmatprep.subr.bf16.mxu1 %v14810_v16  ;;  %v5811_v18 = vld [vmem:[#allocation9 + $0x770] sm:$0xff]  ;;  %v5808_v16 = vld [vmem:[#allocation9 + $0x758] sm:$0xff] }
 0x52b   :  { %v14864_v56 = vcombine.high %v5807_v52, %v5811_v18  ;;  %v14863_v0 = vcombine.low %v5807_v52, %v5811_v18  ;;  %v14865_v28 = vcombine.low %v5808_v16, %v5812_v53  ;;  %v5860_v52 = vld [vmem:[#allocation9 + $0x8f8] sm:$0xff] }
 0x52c   :  { %9087 = vmatpush1.bf16.msra.mxu0 %v14807_v57  ;;  %v14866_v57 = vcombine.high %v5808_v16, %v5812_v53 }
 0x52d   :  { %9259 = vmatpush1.bf16.msra.mxu1 %v14809_v59  ;;  %9088 = vmatprep.subr.bf16.mxu0 %v14816_v61  ;;  %v5815_v59 = vld [vmem:[#allocation9 + $0x790] sm:$0xff] }
 0x52e   :  { %9260 = vmatprep.subr.bf16.mxu1 %v14818_v62  ;;  %v5819_v61 = vld [vmem:[#allocation9 + $0x7b0] sm:$0xff]  ;;  %v5816_v62 = vld [vmem:[#allocation9 + $0x798] sm:$0xff] }
 0x52f   :  { %v14872_v31 = vcombine.high %v5815_v59, %v5819_v61  ;;  %v14871_v55 = vcombine.low %v5815_v59, %v5819_v61  ;;  %v14873_v38 = vcombine.low %v5816_v62, %v5820_v63 }
 0x530   :  { %9089 = vmatpush1.bf16.msra.mxu0 %v14815_v1  ;;  %v14874_v1 = vcombine.high %v5816_v62, %v5820_v63  ;;  %v5871_v63 = vld [vmem:[#allocation9 + $0x950] sm:$0xff] }
 0x531   :  { %9261 = vmatpush1.bf16.msra.mxu1 %v14817_v6  ;;  %9090 = vmatprep.subr.bf16.mxu0 %v14824_v8  ;;  %v5823_v6 = vld [vmem:[#allocation9 + $0x7d0] sm:$0xff] }
 0x532   :  { %9262 = vmatprep.subr.bf16.mxu1 %v14826_v9  ;;  %v5827_v8 = vld [vmem:[#allocation9 + $0x7f0] sm:$0xff]  ;;  %v5824_v9 = vld [vmem:[#allocation9 + $0x7d8] sm:$0xff] }
 0x533   :  { %v14880_v11 = vcombine.high %v5823_v6, %v5827_v8  ;;  %v14879_v21 = vcombine.low %v5823_v6, %v5827_v8  ;;  %v14881_v20 = vcombine.low %v5824_v9, %v5828_v10 }
 0x534   :  { %9091 = vmatpush1.bf16.msra.mxu0 %v14823_v12  ;;  %v14882_v12 = vcombine.high %v5824_v9, %v5828_v10  ;;  %v5879_v10 = vld [vmem:[#allocation9 + $0x990] sm:$0xff] }
 0x535   :  { %9263 = vmatpush1.bf16.msra.mxu1 %v14825_v14  ;;  %9092 = vmatprep.subr.bf16.mxu0 %v14832_v17  ;;  %v5831_v14 = vld [vmem:[#allocation9 + $0x810] sm:$0xff] }
 0x536   :  { %9264 = vmatprep.subr.bf16.mxu1 %v14834_v19  ;;  %v5835_v17 = vld [vmem:[#allocation9 + $0x830] sm:$0xff]  ;;  %v5832_v19 = vld [vmem:[#allocation9 + $0x818] sm:$0xff] }
 0x537   :  { %v14888_v15 = vcombine.high %v5831_v14, %v5835_v17  ;;  %v14889_v40 = vcombine.low %v5832_v19, %v5836_v22 }
 0x538   :  { %9093 = vmatpush1.bf16.msra.mxu0 %v14831_v27  ;;  %v14890_v27 = vcombine.high %v5832_v19, %v5836_v22  ;;  %v5887_v22 = vld [vmem:[#allocation9 + $0x9d0] sm:$0xff] }
 0x539   :  { %9265 = vmatpush1.bf16.msra.mxu1 %v14833_v33  ;;  %9094 = vmatprep.subr.bf16.mxu0 %v14840_v34  ;;  %v5839_v33 = vld [vmem:[#allocation9 + $0x850] sm:$0xff] }
 0x53a   :  { %9266 = vmatprep.subr.bf16.mxu1 %v14842_v26  ;;  %v5843_v34 = vld [vmem:[#allocation9 + $0x870] sm:$0xff]  ;;  %v14887_v26 = vcombine.low %v5831_v14, %v5835_v17 }
 0x53b   :  { %v14896_v42 = vcombine.high %v5839_v33, %v5843_v34  ;;  %v14895_v13 = vcombine.low %v5839_v33, %v5843_v34 }
 0x53c   :  { %9095 = vmatpush1.bf16.msra.mxu0 %v14839_v43  ;;  %v5847_v43 = vld [vmem:[#allocation9 + $0x890] sm:$0xff] }
 0x53d   :  { %9267 = vmatpush1.bf16.msra.mxu1 %v14841_v44  ;;  %9096 = vmatprep.subr.bf16.mxu0 %v14848_v45  ;;  %v5851_v44 = vld [vmem:[#allocation9 + $0x8b0] sm:$0xff]  ;;  %v14898_v45 = vcombine.high %v5840_v37, %v5844_v39 }
 0x53e   :  { %9268 = vmatprep.subr.bf16.mxu1 %v14850_v29  ;;  %v5848_v29 = vld [vmem:[#allocation9 + $0x898] sm:$0xff]  ;;  %v14904_v48 = vcombine.high %v5847_v43, %v5851_v44  ;;  %v14903_v18 = vcombine.low %v5847_v43, %v5851_v44  ;;  %v5895_v37 = vld [vmem:[#allocation9 + $0xa10] sm:$0xff] }
 0x53f   :  { %v5899_v39 = vld [vmem:[#allocation9 + $0xa30] sm:$0xff] }
 0x540   :  { %9097 = vmatpush1.bf16.msra.mxu0 %v14847_v50  ;;  %v14906_v50 = vcombine.high %v5848_v29, %v5852_v47 }
 0x541   :  { %9269 = vmatpush1.bf16.msra.mxu1 %v14849_v5  ;;  %9098 = vmatprep.subr.bf16.mxu0 %v14856_v41  ;;  %v5855_v5 = vld [vmem:[#allocation9 + $0x8d0] sm:$0xff] }
 0x542   :  { %9270 = vmatprep.subr.bf16.mxu1 %v14858_v51  ;;  %v5859_v41 = vld [vmem:[#allocation9 + $0x8f0] sm:$0xff]  ;;  %v5856_v51 = vld [vmem:[#allocation9 + $0x8d8] sm:$0xff] }
 0x543   :  { %v14912_v16 = vcombine.high %v5855_v5, %v5859_v41  ;;  %v14914_v53 = vcombine.high %v5856_v51, %v5860_v52  ;;  %v14913_v59 = vcombine.low %v5856_v51, %v5860_v52  ;;  %v5911_v52 = vld [vmem:[#allocation9 + $0xa90] sm:$0xff] }
 0x544   :  { %9099 = vmatpush1.bf16.msra.mxu0 %v14855_v60  ;;  %v5863_v60 = vld [vmem:[#allocation9 + $0x910] sm:$0xff] }
 0x545   :  { %9271 = vmatpush1.bf16.msra.mxu1 %v14857_v54  ;;  %9100 = vmatprep.subr.bf16.mxu0 %v14864_v56  ;;  %v5867_v54 = vld [vmem:[#allocation9 + $0x930] sm:$0xff]  ;;  %v5864_v56 = vld [vmem:[#allocation9 + $0x918] sm:$0xff] }
 0x546   :  { %9272 = vmatprep.subr.bf16.mxu1 %v14866_v57  ;;  %v5868_v57 = vld [vmem:[#allocation9 + $0x938] sm:$0xff]  ;;  %v14920_v61 = vcombine.high %v5863_v60, %v5867_v54 }
 0x547   :  { %v14922_v62 = vcombine.high %v5864_v56, %v5868_v57  ;;  %v14921_v6 = vcombine.low %v5864_v56, %v5868_v57  ;;  %v5919_v57 = vld [vmem:[#allocation9 + $0xad0] sm:$0xff] }
 0x548   :  { %9101 = vmatpush1.bf16.msra.mxu0 %v14863_v0  ;;  %v5875_v0 = vld [vmem:[#allocation9 + $0x970] sm:$0xff] }
 0x549   :  { %9273 = vmatpush1.bf16.msra.mxu1 %v14865_v28  ;;  %9102 = vmatprep.subr.bf16.mxu0 %v14872_v31  ;;  %v5872_v28 = vld [vmem:[#allocation9 + $0x958] sm:$0xff]  ;;  %v14928_v8 = vcombine.high %v5871_v63, %v5875_v0 }
 0x54a   :  { %9274 = vmatprep.subr.bf16.mxu1 %v14874_v1  ;;  %v5876_v31 = vld [vmem:[#allocation9 + $0x978] sm:$0xff]  ;;  %v14919_v1 = vcombine.low %v5863_v60, %v5867_v54 }
 0x54b   :  { %v14930_v9 = vcombine.high %v5872_v28, %v5876_v31  ;;  %v14929_v14 = vcombine.low %v5872_v28, %v5876_v31  ;;  %v5927_v31 = vld [vmem:[#allocation9 + $0xb10] sm:$0xff] }
 0x54c   :  { %9103 = vmatpush1.bf16.msra.mxu0 %v14871_v55  ;;  %v5883_v55 = vld [vmem:[#allocation9 + $0x9b0] sm:$0xff] }
 0x54d   :  { %9275 = vmatpush1.bf16.msra.mxu1 %v14873_v38  ;;  %9104 = vmatprep.subr.bf16.mxu0 %v14880_v11  ;;  %v5880_v38 = vld [vmem:[#allocation9 + $0x998] sm:$0xff]  ;;  %v14936_v17 = vcombine.high %v5879_v10, %v5883_v55 }
 0x54e   :  { %9276 = vmatprep.subr.bf16.mxu1 %v14882_v12  ;;  %v5884_v11 = vld [vmem:[#allocation9 + $0x9b8] sm:$0xff]  ;;  %v14927_v12 = vcombine.low %v5871_v63, %v5875_v0 }
 0x54f   :  { %v14938_v19 = vcombine.high %v5880_v38, %v5884_v11  ;;  %v14937_v33 = vcombine.low %v5880_v38, %v5884_v11  ;;  %v5935_v11 = vld [vmem:[#allocation9 + $0xb50] sm:$0xff] }
 0x550   :  { %9105 = vmatpush1.bf16.msra.mxu0 %v14879_v21  ;;  %v5891_v21 = vld [vmem:[#allocation9 + $0x9f0] sm:$0xff] }
 0x551   :  { %9277 = vmatpush1.bf16.msra.mxu1 %v14881_v20  ;;  %9117 = vmatprep.subr.bf16.mxu0 %v14888_v15  ;;  %v5888_v20 = vld [vmem:[#allocation9 + $0x9d8] sm:$0xff]  ;;  %v14944_v34 = vcombine.high %v5887_v22, %v5891_v21  ;;  %v14943_v43 = vcombine.low %v5887_v22, %v5891_v21 }
 0x552   :  { %9289 = vmatprep.subr.bf16.mxu1 %v14890_v27  ;;  %v5892_v15 = vld [vmem:[#allocation9 + $0x9f8] sm:$0xff]  ;;  %v14935_v27 = vcombine.low %v5879_v10, %v5883_v55 }
 0x553   :  { %9107 = vmatmul.mubr.bf16.vlgmr.msra.gmra.mrb[20].mxu0 %v16694_v24  ;;  %v14945_v44 = vcombine.low %v5888_v20, %v5892_v15 }
 0x554   :  { %9279 = vmatmul.mubr.bf16.vlgmr.msra.gmra.mrb[20].mxu1 %v16694_v24  ;;  %9118 = vmatpush1.bf16.msra.mxu0 %v14887_v26  ;;  %v14905_v24 = vcombine.low %v5848_v29, %v5852_v47  ;;  %v14946_v26 = vcombine.high %v5888_v20, %v5892_v15  ;;  %v5903_v47 = vld [vmem:[#allocation9 + $0xa50] sm:$0xff] }
 0x555   :  { %9149 = vmatprep.mubr.bf16.mxu0 %v16730_v49  ;;  %9290 = vmatpush1.bf16.msra.mxu1 %v14889_v40  ;;  %v5896_v40 = vld [vmem:[#allocation9 + $0xa18] sm:$0xff]  ;;  %v5943_v15 = vld [vmem:[#allocation9 + $0xb90] sm:$0xff] }
 0x556   :  { %9321 = vmatprep.mubr.bf16.mxu1 %v16730_v49  ;;  %9119 = vmatprep.subr.bf16.mxu0 %v14896_v42  ;;  %v14911_v49 = vcombine.low %v5855_v5, %v5859_v41  ;;  %v5900_v42 = vld [vmem:[#allocation9 + $0xa38] sm:$0xff] }
 0x557   :  { %9291 = vmatprep.subr.bf16.mxu1 %v14898_v45  ;;  %v14952_v45 = vcombine.high %v5895_v37, %v5899_v39  ;;  %v14954_v29 = vcombine.high %v5896_v40, %v5900_v42  ;;  %v14953_v5 = vcombine.low %v5896_v40, %v5900_v42  ;;  %v5951_v42 = vld [vmem:[#allocation9 + $0xbd0] sm:$0xff] }
 0x558   :  { %9120 = vmatpush1.bf16.msra.mxu0 %v14895_v13  ;;  %v5907_v13 = vld [vmem:[#allocation9 + $0xa70] sm:$0xff] }
 0x559   :  { %9292 = vmatpush1.bf16.msra.mxu1 %v14897_v58  ;;  %9121 = vmatprep.subr.bf16.mxu0 %v14904_v48  ;;  %v5904_v58 = vld [vmem:[#allocation9 + $0xa58] sm:$0xff]  ;;  %v14960_v41 = vcombine.high %v5903_v47, %v5907_v13 }
 0x55a   :  { %9293 = vmatprep.subr.bf16.mxu1 %v14906_v50  ;;  %v5908_v48 = vld [vmem:[#allocation9 + $0xa78] sm:$0xff]  ;;  %v14951_v50 = vcombine.low %v5895_v37, %v5899_v39 }
 0x55b   :  { %v14962_v51 = vcombine.high %v5904_v58, %v5908_v48  ;;  %v14961_v60 = vcombine.low %v5904_v58, %v5908_v48  ;;  %v5959_v48 = vld [vmem:[#allocation9 + $0xc10] sm:$0xff] }
 0x55c   :  { %9122 = vmatpush1.bf16.msra.mxu0 %v14903_v18  ;;  %v5915_v18 = vld [vmem:[#allocation9 + $0xab0] sm:$0xff] }
 0x55d   :  { %9294 = vmatpush1.bf16.msra.mxu1 %v14905_v24  ;;  %9123 = vmatprep.subr.bf16.mxu0 %v14912_v16  ;;  %v5912_v24 = vld [vmem:[#allocation9 + $0xa98] sm:$0xff]  ;;  %v14968_v54 = vcombine.high %v5911_v52, %v5915_v18 }
 0x55e   :  { %9295 = vmatprep.subr.bf16.mxu1 %v14914_v53  ;;  %v5916_v16 = vld [vmem:[#allocation9 + $0xab8] sm:$0xff]  ;;  %v14959_v53 = vcombine.low %v5903_v47, %v5907_v13 }
 0x55f   :  { %v14970_v56 = vcombine.high %v5912_v24, %v5916_v16  ;;  %v14969_v63 = vcombine.low %v5912_v24, %v5916_v16  ;;  %v5967_v16 = vld [vmem:[#allocation9 + $0xc50] sm:$0xff] }
 0x560   :  { %9124 = vmatpush1.bf16.msra.mxu0 %v14911_v49  ;;  %v5923_v49 = vld [vmem:[#allocation9 + $0xaf0] sm:$0xff] }
 0x561   :  { %9296 = vmatpush1.bf16.msra.mxu1 %v14913_v59  ;;  %9125 = vmatprep.subr.bf16.mxu0 %v14920_v61  ;;  %v5920_v59 = vld [vmem:[#allocation9 + $0xad8] sm:$0xff]  ;;  %v14976_v0 = vcombine.high %v5919_v57, %v5923_v49 }
 0x562   :  { %9297 = vmatprep.subr.bf16.mxu1 %v14922_v62  ;;  %v5924_v61 = vld [vmem:[#allocation9 + $0xaf8] sm:$0xff]  ;;  %v14967_v62 = vcombine.low %v5911_v52, %v5915_v18 }
 0x563   :  { %v14978_v28 = vcombine.high %v5920_v59, %v5924_v61  ;;  %v14977_v10 = vcombine.low %v5920_v59, %v5924_v61  ;;  %v5975_v59 = vld [vmem:[#allocation9 + $0xc90] sm:$0xff] }
 0x564   :  { %9126 = vmatpush1.bf16.msra.mxu0 %v14919_v1  ;;  %v5931_v1 = vld [vmem:[#allocation9 + $0xb30] sm:$0xff] }
 0x565   :  { %9298 = vmatpush1.bf16.msra.mxu1 %v14921_v6  ;;  %9127 = vmatprep.subr.bf16.mxu0 %v14928_v8  ;;  %v5928_v6 = vld [vmem:[#allocation9 + $0xb18] sm:$0xff]  ;;  %v14984_v55 = vcombine.high %v5927_v31, %v5931_v1  ;;  %v5979_v61 = vld [vmem:[#allocation9 + $0xcb0] sm:$0xff] }
 0x566   :  { %9299 = vmatprep.subr.bf16.mxu1 %v14930_v9  ;;  %v5932_v8 = vld [vmem:[#allocation9 + $0xb38] sm:$0xff]  ;;  %v14975_v9 = vcombine.low %v5919_v57, %v5923_v49 }
 0x567   :  { %v14986_v38 = vcombine.high %v5928_v6, %v5932_v8  ;;  %v14985_v22 = vcombine.low %v5928_v6, %v5932_v8  ;;  %v5983_v8 = vld [vmem:[#allocation9 + $0xcd0] sm:$0xff] }
 0x568   :  { %9128 = vmatpush1.bf16.msra.mxu0 %v14927_v12  ;;  %v5939_v12 = vld [vmem:[#allocation9 + $0xb70] sm:$0xff] }
 0x569   :  { %9300 = vmatpush1.bf16.msra.mxu1 %v14929_v14  ;;  %9129 = vmatprep.subr.bf16.mxu0 %v14936_v17  ;;  %v5936_v14 = vld [vmem:[#allocation9 + $0xb58] sm:$0xff]  ;;  %v14992_v21 = vcombine.high %v5935_v11, %v5939_v12 }
 0x56a   :  { %9301 = vmatprep.subr.bf16.mxu1 %v14938_v19  ;;  %v5940_v17 = vld [vmem:[#allocation9 + $0xb78] sm:$0xff]  ;;  %v14983_v19 = vcombine.low %v5927_v31, %v5931_v1  ;;  %v15032_v1 = vcombine.high %v5975_v59, %v5979_v61 }
 0x56b   :  { %v14994_v20 = vcombine.high %v5936_v14, %v5940_v17  ;;  %v14993_v37 = vcombine.low %v5936_v14, %v5940_v17  ;;  %v5991_v14 = vld [vmem:[#allocation9 + $0xd10] sm:$0xff] }
 0x56c   :  { %9130 = vmatpush1.bf16.msra.mxu0 %v14935_v27  ;;  %v5947_v27 = vld [vmem:[#allocation9 + $0xbb0] sm:$0xff] }
 0x56d   :  { %9302 = vmatpush1.bf16.msra.mxu1 %v14937_v33  ;;  %9131 = vmatprep.subr.bf16.mxu0 %v14944_v34  ;;  %v5944_v33 = vld [vmem:[#allocation9 + $0xb98] sm:$0xff]  ;;  %v15000_v39 = vcombine.high %v5943_v15, %v5947_v27  ;;  %v5995_v17 = vld [vmem:[#allocation9 + $0xd30] sm:$0xff] }
 0x56e   :  { %9303 = vmatprep.subr.bf16.mxu1 %v14946_v26  ;;  %v5948_v34 = vld [vmem:[#allocation9 + $0xbb8] sm:$0xff]  ;;  %v14991_v26 = vcombine.low %v5935_v11, %v5939_v12 }
 0x56f   :  { %v15002_v40 = vcombine.high %v5944_v33, %v5948_v34  ;;  %v15001_v47 = vcombine.low %v5944_v33, %v5948_v34  ;;  %v6003_v33 = vld [vmem:[#allocation9 + $0xd70] sm:$0xff]  ;;  %v6000_v34 = vld [vmem:[#allocation9 + $0xd58] sm:$0xff] }
 0x570   :  { %9132 = vmatpush1.bf16.msra.mxu0 %v14943_v43  ;;  %v5955_v43 = vld [vmem:[#allocation9 + $0xbf0] sm:$0xff] }
 0x571   :  { %9304 = vmatpush1.bf16.msra.mxu1 %v14945_v44  ;;  %9133 = vmatprep.subr.bf16.mxu0 %v14952_v45  ;;  %v5952_v44 = vld [vmem:[#allocation9 + $0xbd8] sm:$0xff]  ;;  %v15008_v13 = vcombine.high %v5951_v42, %v5955_v43 }
 0x572   :  { %9305 = vmatprep.subr.bf16.mxu1 %v14954_v29  ;;  %v5956_v45 = vld [vmem:[#allocation9 + $0xbf8] sm:$0xff]  ;;  %v14999_v29 = vcombine.low %v5943_v15, %v5947_v27  ;;  %v5999_v27 = vld [vmem:[#allocation9 + $0xd50] sm:$0xff] }
 0x573   :  { %v15010_v58 = vcombine.high %v5952_v44, %v5956_v45  ;;  %v15009_v52 = vcombine.low %v5952_v44, %v5956_v45  ;;  %v6007_v44 = vld [vmem:[#allocation9 + $0xd90] sm:$0xff] }
 0x574   :  { %9134 = vmatpush1.bf16.msra.mxu0 %v14951_v50  ;;  %v5963_v50 = vld [vmem:[#allocation9 + $0xc30] sm:$0xff] }
 0x575   :  { %9306 = vmatpush1.bf16.msra.mxu1 %v14953_v5  ;;  %9135 = vmatprep.subr.bf16.mxu0 %v14960_v41  ;;  %v5960_v5 = vld [vmem:[#allocation9 + $0xc18] sm:$0xff]  ;;  %v15016_v18 = vcombine.high %v5959_v48, %v5963_v50  ;;  %v6011_v45 = vld [vmem:[#allocation9 + $0xdb0] sm:$0xff] }
 0x576   :  { %9307 = vmatprep.subr.bf16.mxu1 %v14962_v51  ;;  %v5964_v41 = vld [vmem:[#allocation9 + $0xc38] sm:$0xff]  ;;  %v15007_v51 = vcombine.low %v5951_v42, %v5955_v43  ;;  %v15056_v42 = vcombine.high %v5999_v27, %v6003_v33 }
 0x577   :  { %v15018_v24 = vcombine.high %v5960_v5, %v5964_v41  ;;  %v15017_v57 = vcombine.low %v5960_v5, %v5964_v41  ;;  %v15055_v5 = vcombine.low %v5999_v27, %v6003_v33 }
 0x578   :  { %9136 = vmatpush1.bf16.msra.mxu0 %v14959_v53  ;;  %v5971_v53 = vld [vmem:[#allocation9 + $0xc70] sm:$0xff] }
 0x579   :  { %9308 = vmatpush1.bf16.msra.mxu1 %v14961_v60  ;;  %9137 = vmatprep.subr.bf16.mxu0 %v14968_v54  ;;  %v15015_v60 = vcombine.low %v5959_v48, %v5963_v50  ;;  %v5968_v54 = vld [vmem:[#allocation9 + $0xc58] sm:$0xff]  ;;  %v15024_v49 = vcombine.high %v5967_v16, %v5971_v53 }
 0x57a   :  { %9309 = vmatprep.subr.bf16.mxu1 %v14970_v56  ;;  %v5972_v56 = vld [vmem:[#allocation9 + $0xc78] sm:$0xff] }
 0x57b   :  { %v15025_v31 = vcombine.low %v5968_v54, %v5972_v56 }
 0x57c   :  { %9138 = vmatpush1.bf16.msra.mxu0 %v14967_v62  ;;  %v15026_v62 = vcombine.high %v5968_v54, %v5972_v56 }
 0x57d   :  { %9310 = vmatpush1.bf16.msra.mxu1 %v14969_v63  ;;  %9139 = vmatprep.subr.bf16.mxu0 %v14976_v0  ;;  %v5976_v63 = vld [vmem:[#allocation9 + $0xc98] sm:$0xff] }
 0x57e   :  { %9311 = vmatprep.subr.bf16.mxu1 %v14978_v28  ;;  %v5980_v0 = vld [vmem:[#allocation9 + $0xcb8] sm:$0xff]  ;;  %v15023_v28 = vcombine.low %v5967_v16, %v5971_v53 }
 0x57f   :  { %v15034_v6 = vcombine.high %v5976_v63, %v5980_v0 }
 0x580   :  { %9140 = vmatpush1.bf16.msra.mxu0 %v14975_v9  ;;  %v5987_v9 = vld [vmem:[#allocation9 + $0xcf0] sm:$0xff] }
 0x581   :  { %9312 = vmatpush1.bf16.msra.mxu1 %v14977_v10  ;;  %9141 = vmatprep.subr.bf16.mxu0 %v14984_v55  ;;  %v5984_v10 = vld [vmem:[#allocation9 + $0xcd8] sm:$0xff]  ;;  %v15040_v11 = vcombine.high %v5983_v8, %v5987_v9 }
 0x582   :  { %9313 = vmatprep.subr.bf16.mxu1 %v14986_v38  ;;  %v5988_v55 = vld [vmem:[#allocation9 + $0xcf8] sm:$0xff]  ;;  %v15031_v38 = vcombine.low %v5975_v59, %v5979_v61 }
 0x583   :  { %v15042_v12 = vcombine.high %v5984_v10, %v5988_v55  ;;  %v6016_v59 = vld [vmem:[#allocation9 + $0xdd8] sm:$0xff] }
 0x584   :  { %9142 = vmatpush1.bf16.msra.mxu0 %v14983_v19  ;;  %v5992_v19 = vld [vmem:[#allocation9 + $0xd18] sm:$0xff] }
 0x585   :  { %9314 = vmatpush1.bf16.msra.mxu1 %v14985_v22  ;;  %9143 = vmatprep.subr.bf16.mxu0 %v14992_v21  ;;  %v5996_v22 = vld [vmem:[#allocation9 + $0xd38] sm:$0xff]  ;;  %v15041_v21 = vcombine.low %v5984_v10, %v5988_v55 }
 0x586   :  { %9315 = vmatprep.subr.bf16.mxu1 %v14994_v20  ;;  %v15048_v20 = vcombine.high %v5991_v14, %v5995_v17  ;;  %v15050_v15 = vcombine.high %v5992_v19, %v5996_v22  ;;  %v6020_v61 = vld [vmem:[#allocation9 + $0xdf8] sm:$0xff] }
 0x588   :  { %9144 = vmatpush1.bf16.msra.mxu0 %v14991_v26  ;;  %v6004_v26 = vld [vmem:[#allocation9 + $0xd78] sm:$0xff] }
 0x589   :  { %9316 = vmatpush1.bf16.msra.mxu1 %v14993_v37  ;;  %9145 = vmatprep.subr.bf16.mxu0 %v15000_v39  ;;  %v15047_v37 = vcombine.low %v5991_v14, %v5995_v17  ;;  %v6085_v39 = vld [vmem:[#allocation10] sm:$0xff]  ;;  %v15058_v43 = vcombine.high %v6000_v34, %v6004_v26  ;;  %v15057_v41 = vcombine.low %v6000_v34, %v6004_v26  ;;  %v6023_v14 = vld [vmem:[#allocation9 + $0xe10] sm:$0xff] }
 0x58a   :  { %9317 = vmatprep.subr.bf16.mxu1 %v15002_v40  ;;  %v15049_v40 = vcombine.low %v5992_v19, %v5996_v22  ;;  %v6094_v48 = vrot.slane %v6085_v39, %v16602_v32  ;;  %v6102_v50 = vrot.slane %v6085_v39, %v16612_v36  ;;  %v6027_v17 = vld [vmem:[#allocation9 + $0xe30] sm:$0xff] }
 0x58c   :  { %9146 = vmatpush1.bf16.msra.mxu0 %v14999_v29  ;;  %v6090_v29 = vrot.slane %v6085_v39, %v16597_v30 }
 0x58d   :  { %9318 = vmatpush1.bf16.msra.mxu1 %v15001_v47  ;;  %9147 = vmatprep.subr.bf16.mxu0 %v15008_v13  ;;  %v6098_v47 = vrot.slane %v6085_v39, %v16609_v35  ;;  %v6008_v13 = vld [vmem:[#allocation9 + $0xd98] sm:$0xff] }
 0x58e   :  { %9319 = vmatprep.subr.bf16.mxu1 %v15010_v58  ;;  %v6012_v58 = vld [vmem:[#allocation9 + $0xdb8] sm:$0xff] }
 0x58f   :  { %v15066_v53 = vcombine.high %v6008_v13, %v6012_v58 }
 0x590   :  { %9148 = vmatpush1.bf16.msra.mxu0 %v15007_v51  ;;  %v15064_v51 = vcombine.high %v6007_v44, %v6011_v45 }
 0x591   :  { %9320 = vmatpush1.bf16.msra.mxu1 %v15009_v52  ;;  %9160 = vmatprep.subr.bf16.mxu0 %v15016_v18  ;;  %v6015_v52 = vld [vmem:[#allocation9 + $0xdd0] sm:$0xff] }
 0x592   :  { %9332 = vmatprep.subr.bf16.mxu1 %v15018_v24  ;;  %v6019_v18 = vld [vmem:[#allocation9 + $0xdf0] sm:$0xff] }
 0x593   :  { %9150 = vmatmul.mubr.bf16.vlgmr.msra.gmra.mrb[20].mxu0 %v16726_v46  ;;  %v15072_v55 = vcombine.high %v6015_v52, %v6019_v18 }
 0x594   :  { %9322 = vmatmul.mubr.bf16.vlgmr.msra.gmra.mrb[20].mxu1 %v16726_v46  ;;  %9161 = vmatpush1.bf16.msra.mxu0 %v15015_v60  ;;  %v15033_v46 = vcombine.low %v5976_v63, %v5980_v0 }
 0x595   :  { %9192 = vmatprep.mubr.bf16.mxu0 %v16736_v2  ;;  %9333 = vmatpush1.bf16.msra.mxu1 %v15017_v57 }
 0x596   :  { %9364 = vmatprep.mubr.bf16.mxu1 %v16736_v2  ;;  %9162 = vmatprep.subr.bf16.mxu0 %v15024_v49  ;;  %v15039_v2 = vcombine.low %v5983_v8, %v5987_v9  ;;  %v15063_v49 = vcombine.low %v6007_v44, %v6011_v45  ;;  %v6031_v45 = vld [vmem:[#allocation9 + $0xe50] sm:$0xff] }
 0x597   :  { %9334 = vmatprep.subr.bf16.mxu1 %v15026_v62 }
 0x598   :  { %9163 = vmatpush1.bf16.msra.mxu0 %v15023_v28 }
 0x599   :  { %9335 = vmatpush1.bf16.msra.mxu1 %v15025_v31  ;;  %9164 = vmatprep.subr.bf16.mxu0 %v15032_v1  ;;  %v15065_v31 = vcombine.low %v6008_v13, %v6012_v58  ;;  %v15071_v1 = vcombine.low %v6015_v52, %v6019_v18  ;;  %v6036_v13 = vld [vmem:[#allocation9 + $0xe78] sm:$0xff]  ;;  %v15079_v58 = vcombine.low %v6023_v14, %v6027_v17 }
 0x59a   :  { %9336 = vmatprep.subr.bf16.mxu1 %v15034_v6  ;;  %v6040_v52 = vld [vmem:[#allocation9 + $0xe98] sm:$0xff] }
 0x59b   :  { %v6044_v18 = vld [vmem:[#allocation9 + $0xeb8] sm:$0xff] }
 0x59c   :  { %9165 = vmatpush1.bf16.msra.mxu0 %v15031_v38 }
 0x59d   :  { %9337 = vmatpush1.bf16.msra.mxu1 %v15033_v46  ;;  %9166 = vmatprep.subr.bf16.mxu0 %v15040_v11  ;;  %v15073_v11 = vcombine.low %v6016_v59, %v6020_v61 }
 0x59e   :  { %9338 = vmatprep.subr.bf16.mxu1 %v15042_v12  ;;  %v15074_v12 = vcombine.high %v6016_v59, %v6020_v61  ;;  %v15097_v61 = vcombine.low %v6040_v52, %v6044_v18 }
 0x5a0   :  { %9167 = vmatpush1.bf16.msra.mxu0 %v15039_v2 }
 0x5a1   :  { %9339 = vmatpush1.bf16.msra.mxu1 %v15041_v21  ;;  %9168 = vmatprep.subr.bf16.mxu0 %v15048_v20  ;;  %v6024_v20 = vld [vmem:[#allocation9 + $0xe18] sm:$0xff] }
 0x5a2   :  { %9340 = vmatprep.subr.bf16.mxu1 %v15050_v15  ;;  %v6028_v15 = vld [vmem:[#allocation9 + $0xe38] sm:$0xff] }
 0x5a3   :  { %v15082_v44 = vcombine.high %v6024_v20, %v6028_v15 }
 0x5a4   :  { %9169 = vmatpush1.bf16.msra.mxu0 %v15047_v37 }
 0x5a5   :  { %9341 = vmatpush1.bf16.msra.mxu1 %v15049_v40  ;;  %9170 = vmatprep.subr.bf16.mxu0 %v15056_v42  ;;  %v15080_v40 = vcombine.high %v6023_v14, %v6027_v17 }
 0x5a6   :  { %v8850_v24 = vpop.f32.mrb[16].mxu0  ;;  %v9022_v16 = vpop.f32.mrb[16].mxu1  ;;  %9342 = vmatprep.subr.bf16.mxu1 %v15058_v43 }
 0x5a7   :  { %v15836_v60 = vadd.f32 %v8850_v24, %v6090_v29  ;;  %v15840_v54 = vadd.f32 %v9022_v16, %v6098_v47  ;;  %v8852_v56 = vpop.f32.mrb[17].mxu0  ;;  %v9024_v57 = vpop.f32.mrb[17].mxu1 }
 0x5a8   :  { %v15837_v62 = vadd.f32 %v8852_v56, %v6094_v48  ;;  %v15841_v63 = vadd.f32 %v9024_v57, %v6102_v50  ;;  %v8854_v0 = vpop.f32.mrb[18].mxu0  ;;  %v9026_v28 = vpop.f32.mrb[18].mxu1  ;;  %9171 = vmatpush1.bf16.msra.mxu0 %v15055_v5  ;;  %v6051_v56 = vld [vmem:[#allocation9 + $0xef0] sm:$0xff]  ;;  %v6048_v57 = vld [vmem:[#allocation9 + $0xed8] sm:$0xff] }
 0x5a9   :  { %v15838_v6 = vadd.f32 %v8854_v0, %v6090_v29  ;;  %v15842_v8 = vadd.f32 %v9026_v28, %v6098_v47  ;;  %9343 = vmatpush1.bf16.msra.mxu1 %v15057_v41  ;;  %v8856_v9 = vpop.f32.mrb[19].mxu0  ;;  %v9028_v10 = vpop.f32.mrb[19].mxu1  ;;  %9172 = vmatprep.subr.bf16.mxu0 %v15064_v51  ;;  %v9375_v19 = vmax.f32 %v15836_v60, 0.0  ;;  %v9377_v22 = vmax.f32 %v15840_v54, 0.0  ;;  %v6035_v29 = vld [vmem:[#allocation9 + $0xe70] sm:$0xff]  ;;  %v6032_v47 = vld [vmem:[#allocation9 + $0xe58] sm:$0xff] }
 0x5aa   :  { %v15839_v38 = vadd.f32 %v8856_v9, %v6094_v48  ;;  %v15843_v46 = vadd.f32 %v9028_v10, %v6102_v50  ;;  %9344 = vmatprep.subr.bf16.mxu1 %v15066_v53  ;;  %v9376_v27 = vmax.f32 %v15837_v62, 0.0  ;;  %v9378_v33 = vmax.f32 %v15841_v63, 0.0  ;;  %v6039_v41 = vld [vmem:[#allocation9 + $0xe90] sm:$0xff] }
 0x5ab   :  { %v9383_v2 = vmax.f32 %v15838_v6, 0.0  ;;  %v9385_v21 = vmax.f32 %v15842_v8, 0.0  ;;  %v15081_v48 = vcombine.low %v6024_v20, %v6028_v15  ;;  %v15088_v50 = vcombine.high %v6031_v45, %v6035_v29  ;;  %v6043_v51 = vld [vmem:[#allocation9 + $0xeb0] sm:$0xff]  ;;  %v6076_v20 = vld [vmem:[#allocation9 + $0xfb8] sm:$0xff] }
 0x5ac   :  { %v9384_v34 = vmax.f32 %v15839_v38, 0.0  ;;  %v9386_v26 = vmax.f32 %v15843_v46, 0.0  ;;  %9173 = vmatpush1.bf16.msra.mxu0 %v15063_v49  ;;  %v15090_v5 = vcombine.high %v6032_v47, %v6036_v13  ;;  %v15087_v24 = vcombine.low %v6031_v45, %v6035_v29  ;;  %v6047_v54 = vld [vmem:[#allocation9 + $0xed0] sm:$0xff]  ;;  %v6052_v49 = vld [vmem:[#allocation9 + $0xef8] sm:$0xff] }
 0x5ad   :  { %v16764_v37 = vpack.c.bf16 %v9383_v2, %v9375_v19  ;;  %v16766_v39 = vpack.c.bf16 %v9385_v21, %v9377_v22  ;;  %9345 = vmatpush1.bf16.msra.mxu1 %v15065_v31  ;;  %9174 = vmatprep.subr.bf16.mxu0 %v15072_v55  ;;  %v15089_v16 = vcombine.low %v6032_v47, %v6036_v13  ;;  %v6055_v0 = vld [vmem:[#allocation9 + $0xf10] sm:$0xff]  ;;  %v6056_v31 = vld [vmem:[#allocation9 + $0xf18] sm:$0xff] }
 0x5ae   :  { %v16768_v42 = vpack.c.bf16 %v9384_v34, %v9376_v27  ;;  %v16770_v43 = vpack.c.bf16 %v9386_v26, %v9378_v33  ;;  %9346 = vmatprep.subr.bf16.mxu1 %v15074_v12  ;;  %v15096_v53 = vcombine.high %v6039_v41, %v6043_v51  ;;  %v15098_v60 = vcombine.high %v6040_v52, %v6044_v18  ;;  %v6059_v28 = vld [vmem:[#allocation9 + $0xf30] sm:$0xff]  ;;  %v6064_v46 = vld [vmem:[#allocation9 + $0xf58] sm:$0xff] }
 0x5af   :  { %v15095_v59 = vcombine.low %v6039_v41, %v6043_v51  ;;  %v15104_v62 = vcombine.high %v6047_v54, %v6051_v56  ;;  %v15106_v63 = vcombine.high %v6048_v57, %v6052_v49  ;;  %v15103_v6 = vcombine.low %v6047_v54, %v6051_v56  ;;  %v6063_v55 = vld [vmem:[#allocation9 + $0xf50] sm:$0xff]  ;;  %v6072_v21 = vld [vmem:[#allocation9 + $0xf98] sm:$0xff] }
 0x5b0   :  { %9175 = vmatpush1.bf16.msra.mxu0 %v15071_v1  ;;  %v6060_v1 = vld [vmem:[#allocation9 + $0xf38] sm:$0xff]  ;;  %v15105_v8 = vcombine.low %v6048_v57, %v6052_v49  ;;  %v15112_v9 = vcombine.high %v6055_v0, %v6059_v28  ;;  %v6067_v38 = vld [vmem:[#allocation9 + $0xf70] sm:$0xff]  ;;  %v15111_v12 = vcombine.low %v6055_v0, %v6059_v28  ;;  %v15130_v34 = vcombine.high %v6072_v21, %v6076_v20 }
 0x5b1   :  { %9347 = vmatpush1.bf16.msra.mxu1 %v15073_v11  ;;  %9176 = vmatprep.subr.bf16.mxu0 %v15080_v40  ;;  %v15114_v10 = vcombine.high %v6056_v31, %v6060_v1  ;;  %v6068_v11 = vld [vmem:[#allocation9 + $0xf78] sm:$0xff]  ;;  %v15113_v14 = vcombine.low %v6056_v31, %v6060_v1  ;;  %v15120_v17 = vcombine.high %v6063_v55, %v6067_v38  ;;  %v6071_v22 = vld [vmem:[#allocation9 + $0xf90] sm:$0xff] }
 0x5b2   :  { %9348 = vmatprep.subr.bf16.mxu1 %v15082_v44  ;;  %v15122_v19 = vcombine.high %v6064_v46, %v6068_v11  ;;  %v6075_v2 = vld [vmem:[#allocation9 + $0xfb0] sm:$0xff]  ;;  %v15119_v15 = vcombine.low %v6063_v55, %v6067_v38  ;;  %v15121_v27 = vcombine.low %v6064_v46, %v6068_v11  ;;  %v6080_v44 = vld [vmem:[#allocation9 + $0xfd8] sm:$0xff]  ;;  %v15129_v47 = vcombine.low %v6072_v21, %v6076_v20 }
 0x5b3   :  { %v15128_v33 = vcombine.high %v6071_v22, %v6075_v2  ;;  %v6079_v26 = vld [vmem:[#allocation9 + $0xfd0] sm:$0xff]  ;;  %v6084_v45 = vld [vmem:[#allocation9 + $0xff8] sm:$0xff]  ;;  %v15127_v29 = vcombine.low %v6071_v22, %v6075_v2 }
 0x5b4   :  { %9177 = vmatpush1.bf16.msra.mxu0 %v15079_v58  ;;  %v6083_v40 = vld [vmem:[#allocation9 + $0xff0] sm:$0xff]  ;;  %v15138_v58 = vcombine.high %v6080_v44, %v6084_v45  ;;  %v15137_v52 = vcombine.low %v6080_v44, %v6084_v45 }
 0x5b5   :  { %9349 = vmatpush1.bf16.msra.mxu1 %v15081_v48  ;;  %9178 = vmatprep.subr.bf16.mxu0 %v15088_v50  ;;  %v15136_v13 = vcombine.high %v6079_v26, %v6083_v40  ;;  %v9399_v48 = vld [vmem:[#allocation12] sm:$0xff]  ;;  %v9404_v41 = vld [vmem:[#allocation12 + $0x28] sm:$0xff]  ;;  %v15135_v51 = vcombine.low %v6079_v26, %v6083_v40 }
 0x5b6   :  { %9350 = vmatprep.subr.bf16.mxu1 %v15090_v5  ;;  %v9403_v50 = vld [vmem:[#allocation12 + $0x20] sm:$0xff]  ;;  %v9400_v5 = vld [vmem:[#allocation12 + $0x8] sm:$0xff] }
 0x5b7   :  { %v15140_v18 = vcombine.high %v9399_v48, %v9403_v50  ;;  %v9408_v54 = vld [vmem:[#allocation12 + $0x48] sm:$0xff]  ;;  %v15141_v57 = vcombine.low %v9400_v5, %v9404_v41 }
 0x5b8   :  { %9179 = vmatpush1.bf16.msra.mxu0 %v15087_v24  ;;  %v15142_v24 = vcombine.high %v9400_v5, %v9404_v41  ;;  %v9412_v56 = vld [vmem:[#allocation12 + $0x68] sm:$0xff] }
 0x5b9   :  { %9351 = vmatpush1.bf16.msra.mxu1 %v15089_v16  ;;  %9180 = vmatprep.subr.bf16.mxu0 %v15096_v53  ;;  %v9407_v16 = vld [vmem:[#allocation12 + $0x40] sm:$0xff]  ;;  %v9420_v0 = vld [vmem:[#allocation12 + $0xa8] sm:$0xff]  ;;  %v15149_v31 = vcombine.low %v9408_v54, %v9412_v56 }
 0x5ba   :  { %9352 = vmatprep.subr.bf16.mxu1 %v15098_v60  ;;  %v9411_v53 = vld [vmem:[#allocation12 + $0x60] sm:$0xff]  ;;  %v15139_v60 = vcombine.low %v9399_v48, %v9403_v50  ;;  %v9428_v55 = vld [vmem:[#allocation12 + $0xe8] sm:$0xff] }
 0x5bb   :  { %v15148_v49 = vcombine.high %v9407_v16, %v9411_v53  ;;  %v15147_v28 = vcombine.low %v9407_v16, %v9411_v53 }
 0x5bc   :  { %9181 = vmatpush1.bf16.msra.mxu0 %v15095_v59  ;;  %v9415_v59 = vld [vmem:[#allocation12 + $0x80] sm:$0xff] }
 0x5bd   :  { %9353 = vmatpush1.bf16.msra.mxu1 %v15097_v61  ;;  %9182 = vmatprep.subr.bf16.mxu0 %v15104_v62  ;;  %v9419_v61 = vld [vmem:[#allocation12 + $0xa0] sm:$0xff]  ;;  %v15150_v62 = vcombine.high %v9408_v54, %v9412_v56 }
 0x5be   :  { %9354 = vmatprep.subr.bf16.mxu1 %v15106_v63  ;;  %v9416_v63 = vld [vmem:[#allocation12 + $0x88] sm:$0xff]  ;;  %v15156_v1 = vcombine.high %v9415_v59, %v9419_v61  ;;  %v15155_v38 = vcombine.low %v9415_v59, %v9419_v61  ;;  %v9463_v56 = vld [vmem:[#allocation12 + $0x200] sm:$0xff] }
 0x5bf   :  { %v9468_v59 = vld [vmem:[#allocation12 + $0x228] sm:$0xff] }
 0x5c0   :  { %9183 = vmatpush1.bf16.msra.mxu0 %v15103_v6  ;;  %v15158_v6 = vcombine.high %v9416_v63, %v9420_v0 }
 0x5c1   :  { %9355 = vmatpush1.bf16.msra.mxu1 %v15105_v8  ;;  %9184 = vmatprep.subr.bf16.mxu0 %v15112_v9  ;;  %v9423_v8 = vld [vmem:[#allocation12 + $0xc0] sm:$0xff] }
 0x5c2   :  { %9356 = vmatprep.subr.bf16.mxu1 %v15114_v10  ;;  %v9427_v9 = vld [vmem:[#allocation12 + $0xe0] sm:$0xff]  ;;  %v9424_v10 = vld [vmem:[#allocation12 + $0xc8] sm:$0xff] }
 0x5c3   :  { %v15164_v46 = vcombine.high %v9423_v8, %v9427_v9  ;;  %v15166_v11 = vcombine.high %v9424_v10, %v9428_v55  ;;  %v15163_v22 = vcombine.low %v9423_v8, %v9427_v9  ;;  %v15165_v2 = vcombine.low %v9424_v10, %v9428_v55 }
 0x5c4   :  { %9185 = vmatpush1.bf16.msra.mxu0 %v15111_v12  ;;  %v9431_v12 = vld [vmem:[#allocation12 + $0x100] sm:$0xff] }
 0x5c5   :  { %9357 = vmatpush1.bf16.msra.mxu1 %v15113_v14  ;;  %9186 = vmatprep.subr.bf16.mxu0 %v15120_v17  ;;  %v9435_v14 = vld [vmem:[#allocation12 + $0x120] sm:$0xff]  ;;  %v9432_v17 = vld [vmem:[#allocation12 + $0x108] sm:$0xff] }
 0x5c6   :  { %9358 = vmatprep.subr.bf16.mxu1 %v15122_v19  ;;  %v9436_v19 = vld [vmem:[#allocation12 + $0x128] sm:$0xff]  ;;  %v15172_v21 = vcombine.high %v9431_v12, %v9435_v14  ;;  %v15171_v26 = vcombine.low %v9431_v12, %v9435_v14 }
 0x5c7   :  { %v15174_v20 = vcombine.high %v9432_v17, %v9436_v19  ;;  %v15173_v40 = vcombine.low %v9432_v17, %v9436_v19 }
 0x5c8   :  { %9187 = vmatpush1.bf16.msra.mxu0 %v15119_v15  ;;  %v9439_v15 = vld [vmem:[#allocation12 + $0x140] sm:$0xff] }
 0x5c9   :  { %9359 = vmatpush1.bf16.msra.mxu1 %v15121_v27  ;;  %9188 = vmatprep.subr.bf16.mxu0 %v15128_v33  ;;  %v9443_v27 = vld [vmem:[#allocation12 + $0x160] sm:$0xff]  ;;  %v9440_v33 = vld [vmem:[#allocation12 + $0x148] sm:$0xff] }
 0x5ca   :  { %9360 = vmatprep.subr.bf16.mxu1 %v15130_v34  ;;  %v9444_v34 = vld [vmem:[#allocation12 + $0x168] sm:$0xff]  ;;  %v15180_v44 = vcombine.high %v9439_v15, %v9443_v27  ;;  %v15179_v48 = vcombine.low %v9439_v15, %v9443_v27 }
 0x5cb   :  { %v15182_v45 = vcombine.high %v9440_v33, %v9444_v34  ;;  %v15181_v50 = vcombine.low %v9440_v33, %v9444_v34 }
 0x5cc   :  { %9189 = vmatpush1.bf16.msra.mxu0 %v15127_v29  ;;  %v9447_v29 = vld [vmem:[#allocation12 + $0x180] sm:$0xff] }
 0x5cd   :  { %9361 = vmatpush1.bf16.msra.mxu1 %v15129_v47  ;;  %9190 = vmatprep.subr.bf16.mxu0 %v15136_v13  ;;  %v9451_v47 = vld [vmem:[#allocation12 + $0x1a0] sm:$0xff]  ;;  %v9448_v13 = vld [vmem:[#allocation12 + $0x188] sm:$0xff] }
 0x5ce   :  { %9362 = vmatprep.subr.bf16.mxu1 %v15138_v58  ;;  %v9452_v58 = vld [vmem:[#allocation12 + $0x1a8] sm:$0xff]  ;;  %v15188_v5 = vcombine.high %v9447_v29, %v9451_v47  ;;  %v15187_v16 = vcombine.low %v9447_v29, %v9451_v47 }
 0x5cf   :  { %v15190_v41 = vcombine.high %v9448_v13, %v9452_v58  ;;  %v15189_v53 = vcombine.low %v9448_v13, %v9452_v58 }
 0x5d0   :  { %9191 = vmatpush1.bf16.msra.mxu0 %v15135_v51  ;;  %v9455_v51 = vld [vmem:[#allocation12 + $0x1c0] sm:$0xff] }
 0x5d1   :  { %9363 = vmatpush1.bf16.msra.mxu1 %v15137_v52  ;;  %12513 = vmatprep.subr.bf16.mxu0 %v15140_v18  ;;  %v9459_v52 = vld [vmem:[#allocation12 + $0x1e0] sm:$0xff]  ;;  %v9456_v18 = vld [vmem:[#allocation12 + $0x1c8] sm:$0xff] }
 0x5d2   :  { %12685 = vmatprep.subr.bf16.mxu1 %v15142_v24  ;;  %v9460_v24 = vld [vmem:[#allocation12 + $0x1e8] sm:$0xff]  ;;  %v15195_v61 = vcombine.low %v9455_v51, %v9459_v52 }
 0x5d3   :  { %9193 = vmatmul.mubr.bf16.vlgmr.msra.gmra.mrb[20].mxu0 %v16728_v4  ;;  %v15198_v54 = vcombine.high %v9456_v18, %v9460_v24 }
 0x5d4   :  { %9365 = vmatmul.mubr.bf16.vlgmr.msra.gmra.mrb[20].mxu1 %v16728_v4  ;;  %12514 = vmatpush1.bf16.msra.mxu0 %v15139_v60  ;;  %v15157_v4 = vcombine.low %v9416_v63, %v9420_v0  ;;  %v15196_v60 = vcombine.high %v9455_v51, %v9459_v52 }
 0x5d5   :  { %12545 = vmatprep.mubr.bf16.mxu0 %v16768_v42  ;;  %12686 = vmatpush1.bf16.msra.mxu1 %v15141_v57  ;;  %v9467_v57 = vld [vmem:[#allocation12 + $0x220] sm:$0xff] }
 0x5d6   :  { %12717 = vmatprep.mubr.bf16.mxu1 %v16768_v42  ;;  %12515 = vmatprep.subr.bf16.mxu0 %v15148_v49  ;;  %v9464_v49 = vld [vmem:[#allocation12 + $0x208] sm:$0xff]  ;;  %v15204_v63 = vcombine.high %v9463_v56, %v9467_v57  ;;  %v15203_v8 = vcombine.low %v9463_v56, %v9467_v57 }
 0x5d7   :  { %12687 = vmatprep.subr.bf16.mxu1 %v15150_v62  ;;  %v15197_v62 = vcombine.low %v9456_v18, %v9460_v24  ;;  %v15206_v0 = vcombine.high %v9464_v49, %v9468_v59  ;;  %v15205_v9 = vcombine.low %v9464_v49, %v9468_v59 }
 0x5d8   :  { %12516 = vmatpush1.bf16.msra.mxu0 %v15147_v28  ;;  %v9471_v28 = vld [vmem:[#allocation12 + $0x240] sm:$0xff] }
 0x5d9   :  { %12688 = vmatpush1.bf16.msra.mxu1 %v15149_v31  ;;  %12517 = vmatprep.subr.bf16.mxu0 %v15156_v1  ;;  %v9475_v31 = vld [vmem:[#allocation12 + $0x260] sm:$0xff]  ;;  %v9472_v1 = vld [vmem:[#allocation12 + $0x248] sm:$0xff] }
 0x5da   :  { %12689 = vmatprep.subr.bf16.mxu1 %v15158_v6  ;;  %v9476_v6 = vld [vmem:[#allocation12 + $0x268] sm:$0xff]  ;;  %v15212_v10 = vcombine.high %v9471_v28, %v9475_v31  ;;  %v15211_v12 = vcombine.low %v9471_v28, %v9475_v31 }
 0x5db   :  { %v15214_v55 = vcombine.high %v9472_v1, %v9476_v6  ;;  %v15213_v14 = vcombine.low %v9472_v1, %v9476_v6 }
 0x5dc   :  { %12518 = vmatpush1.bf16.msra.mxu0 %v15155_v38  ;;  %v9479_v38 = vld [vmem:[#allocation12 + $0x280] sm:$0xff] }
 0x5dd   :  { %12690 = vmatpush1.bf16.msra.mxu1 %v15157_v4  ;;  %12519 = vmatprep.subr.bf16.mxu0 %v15164_v46  ;;  %v9483_v4 = vld [vmem:[#allocation12 + $0x2a0] sm:$0xff]  ;;  %v9480_v46 = vld [vmem:[#allocation12 + $0x288] sm:$0xff] }
 0x5de   :  { %12691 = vmatprep.subr.bf16.mxu1 %v15166_v11  ;;  %v9484_v11 = vld [vmem:[#allocation12 + $0x2a8] sm:$0xff]  ;;  %v15220_v17 = vcombine.high %v9479_v38, %v9483_v4  ;;  %v15219_v15 = vcombine.low %v9479_v38, %v9483_v4 }
 0x5df   :  { %v15222_v19 = vcombine.high %v9480_v46, %v9484_v11  ;;  %v15221_v27 = vcombine.low %v9480_v46, %v9484_v11 }
 0x5e0   :  { %12520 = vmatpush1.bf16.msra.mxu0 %v15163_v22  ;;  %v9487_v22 = vld [vmem:[#allocation12 + $0x2c0] sm:$0xff] }
 0x5e1   :  { %12692 = vmatpush1.bf16.msra.mxu1 %v15165_v2  ;;  %12521 = vmatprep.subr.bf16.mxu0 %v15172_v21  ;;  %v9491_v2 = vld [vmem:[#allocation12 + $0x2e0] sm:$0xff]  ;;  %v9488_v21 = vld [vmem:[#allocation12 + $0x2c8] sm:$0xff] }
 0x5e2   :  { %12693 = vmatprep.subr.bf16.mxu1 %v15174_v20  ;;  %v9492_v20 = vld [vmem:[#allocation12 + $0x2e8] sm:$0xff]  ;;  %v15228_v33 = vcombine.high %v9487_v22, %v9491_v2  ;;  %v15227_v29 = vcombine.low %v9487_v22, %v9491_v2 }
 0x5e3   :  { %v15230_v34 = vcombine.high %v9488_v21, %v9492_v20  ;;  %v15229_v47 = vcombine.low %v9488_v21, %v9492_v20  ;;  %v9540_v22 = vld [vmem:[#allocation12 + $0x468] sm:$0xff]  ;;  %v9543_v20 = vld [vmem:[#allocation12 + $0x480] sm:$0xff] }
 0x5e4   :  { %12522 = vmatpush1.bf16.msra.mxu0 %v15171_v26  ;;  %v9495_v26 = vld [vmem:[#allocation12 + $0x300] sm:$0xff] }
 0x5e5   :  { %12694 = vmatpush1.bf16.msra.mxu1 %v15173_v40  ;;  %12523 = vmatprep.subr.bf16.mxu0 %v15180_v44  ;;  %v9499_v40 = vld [vmem:[#allocation12 + $0x320] sm:$0xff]  ;;  %v9496_v44 = vld [vmem:[#allocation12 + $0x308] sm:$0xff] }
 0x5e6   :  { %12695 = vmatprep.subr.bf16.mxu1 %v15182_v45  ;;  %v9500_v45 = vld [vmem:[#allocation12 + $0x328] sm:$0xff]  ;;  %v15236_v13 = vcombine.high %v9495_v26, %v9499_v40  ;;  %v15235_v51 = vcombine.low %v9495_v26, %v9499_v40 }
 0x5e7   :  { %v15238_v58 = vcombine.high %v9496_v44, %v9500_v45  ;;  %v15237_v52 = vcombine.low %v9496_v44, %v9500_v45 }
 0x5e8   :  { %12524 = vmatpush1.bf16.msra.mxu0 %v15179_v48  ;;  %v9503_v48 = vld [vmem:[#allocation12 + $0x340] sm:$0xff] }
 0x5e9   :  { %12696 = vmatpush1.bf16.msra.mxu1 %v15181_v50  ;;  %12525 = vmatprep.subr.bf16.mxu0 %v15188_v5  ;;  %v9507_v50 = vld [vmem:[#allocation12 + $0x360] sm:$0xff]  ;;  %v9504_v5 = vld [vmem:[#allocation12 + $0x348] sm:$0xff] }
 0x5ea   :  { %12697 = vmatprep.subr.bf16.mxu1 %v15190_v41  ;;  %v9508_v41 = vld [vmem:[#allocation12 + $0x368] sm:$0xff]  ;;  %v15244_v18 = vcombine.high %v9503_v48, %v9507_v50  ;;  %v15243_v56 = vcombine.low %v9503_v48, %v9507_v50 }
 0x5eb   :  { %v15246_v24 = vcombine.high %v9504_v5, %v9508_v41  ;;  %v15245_v57 = vcombine.low %v9504_v5, %v9508_v41 }
 0x5ec   :  { %12526 = vmatpush1.bf16.msra.mxu0 %v15187_v16  ;;  %v9511_v16 = vld [vmem:[#allocation12 + $0x380] sm:$0xff] }
 0x5ed   :  { %12698 = vmatpush1.bf16.msra.mxu1 %v15189_v53  ;;  %12527 = vmatprep.subr.bf16.mxu0 %v15196_v60  ;;  %v9515_v53 = vld [vmem:[#allocation12 + $0x3a0] sm:$0xff]  ;;  %v9512_v60 = vld [vmem:[#allocation12 + $0x388] sm:$0xff] }
 0x5ee   :  { %12699 = vmatprep.subr.bf16.mxu1 %v15198_v54  ;;  %v9516_v54 = vld [vmem:[#allocation12 + $0x3a8] sm:$0xff]  ;;  %v15252_v49 = vcombine.high %v9511_v16, %v9515_v53  ;;  %v15251_v28 = vcombine.low %v9511_v16, %v9515_v53 }
 0x5ef   :  { %v15254_v59 = vcombine.high %v9512_v60, %v9516_v54  ;;  %v15253_v31 = vcombine.low %v9512_v60, %v9516_v54 }
 0x5f0   :  { %12528 = vmatpush1.bf16.msra.mxu0 %v15195_v61  ;;  %v9519_v61 = vld [vmem:[#allocation12 + $0x3c0] sm:$0xff] }
 0x5f1   :  { %12700 = vmatpush1.bf16.msra.mxu1 %v15197_v62  ;;  %12529 = vmatprep.subr.bf16.mxu0 %v15204_v63  ;;  %v9523_v62 = vld [vmem:[#allocation12 + $0x3e0] sm:$0xff]  ;;  %v9520_v63 = vld [vmem:[#allocation12 + $0x3c8] sm:$0xff] }
 0x5f2   :  { %12701 = vmatprep.subr.bf16.mxu1 %v15206_v0  ;;  %v9524_v0 = vld [vmem:[#allocation12 + $0x3e8] sm:$0xff]  ;;  %v15260_v1 = vcombine.high %v9519_v61, %v9523_v62  ;;  %v15259_v38 = vcombine.low %v9519_v61, %v9523_v62 }
 0x5f3   :  { %v15262_v6 = vcombine.high %v9520_v63, %v9524_v0  ;;  %v15261_v4 = vcombine.low %v9520_v63, %v9524_v0 }
 0x5f4   :  { %12530 = vmatpush1.bf16.msra.mxu0 %v15203_v8  ;;  %v9527_v8 = vld [vmem:[#allocation12 + $0x400] sm:$0xff] }
 0x5f5   :  { %12702 = vmatpush1.bf16.msra.mxu1 %v15205_v9  ;;  %12531 = vmatprep.subr.bf16.mxu0 %v15212_v10  ;;  %v9531_v9 = vld [vmem:[#allocation12 + $0x420] sm:$0xff]  ;;  %v9528_v10 = vld [vmem:[#allocation12 + $0x408] sm:$0xff] }
 0x5f6   :  { %12703 = vmatprep.subr.bf16.mxu1 %v15214_v55  ;;  %v9532_v55 = vld [vmem:[#allocation12 + $0x428] sm:$0xff]  ;;  %v15268_v46 = vcombine.high %v9527_v8, %v9531_v9 }
 0x5f7   :  { %v15270_v11 = vcombine.high %v9528_v10, %v9532_v55  ;;  %v15269_v2 = vcombine.low %v9528_v10, %v9532_v55 }
 0x5f8   :  { %12532 = vmatpush1.bf16.msra.mxu0 %v15211_v12  ;;  %v9535_v12 = vld [vmem:[#allocation12 + $0x440] sm:$0xff] }
 0x5f9   :  { %12704 = vmatpush1.bf16.msra.mxu1 %v15213_v14  ;;  %12533 = vmatprep.subr.bf16.mxu0 %v15220_v17  ;;  %v9539_v14 = vld [vmem:[#allocation12 + $0x460] sm:$0xff]  ;;  %v15267_v17 = vcombine.low %v9527_v8, %v9531_v9 }
 0x5fa   :  { %12705 = vmatprep.subr.bf16.mxu1 %v15222_v19  ;;  %v9536_v19 = vld [vmem:[#allocation12 + $0x448] sm:$0xff]  ;;  %v15276_v21 = vcombine.high %v9535_v12, %v9539_v14  ;;  %v15275_v26 = vcombine.low %v9535_v12, %v9539_v14 }
 0x5fb   :  { %v15277_v40 = vcombine.low %v9536_v19, %v9540_v22 }
 0x5fc   :  { %12534 = vmatpush1.bf16.msra.mxu0 %v15219_v15  ;;  %v9547_v15 = vld [vmem:[#allocation12 + $0x4a0] sm:$0xff] }
 0x5fd   :  { %12706 = vmatpush1.bf16.msra.mxu1 %v15221_v27  ;;  %12535 = vmatprep.subr.bf16.mxu0 %v15228_v33  ;;  %v15278_v27 = vcombine.high %v9536_v19, %v9540_v22  ;;  %v9544_v33 = vld [vmem:[#allocation12 + $0x488] sm:$0xff]  ;;  %v15284_v44 = vcombine.high %v9543_v20, %v9547_v15  ;;  %v15283_v48 = vcombine.low %v9543_v20, %v9547_v15  ;;  %v9591_v22 = vld [vmem:[#allocation12 + $0x600] sm:$0xff] }
 0x5fe   :  { %12707 = vmatprep.subr.bf16.mxu1 %v15230_v34  ;;  %v9548_v34 = vld [vmem:[#allocation12 + $0x4a8] sm:$0xff] }
 0x5ff   :  { %v15286_v45 = vcombine.high %v9544_v33, %v9548_v34  ;;  %v15285_v50 = vcombine.low %v9544_v33, %v9548_v34  ;;  %v9596_v20 = vld [vmem:[#allocation12 + $0x628] sm:$0xff] }
 0x600   :  { %12536 = vmatpush1.bf16.msra.mxu0 %v15227_v29  ;;  %v9551_v29 = vld [vmem:[#allocation12 + $0x4c0] sm:$0xff] }
 0x601   :  { %12708 = vmatpush1.bf16.msra.mxu1 %v15229_v47  ;;  %12537 = vmatprep.subr.bf16.mxu0 %v15236_v13  ;;  %v9555_v47 = vld [vmem:[#allocation12 + $0x4e0] sm:$0xff]  ;;  %v9552_v13 = vld [vmem:[#allocation12 + $0x4c8] sm:$0xff] }
 0x602   :  { %12709 = vmatprep.subr.bf16.mxu1 %v15238_v58  ;;  %v9556_v58 = vld [vmem:[#allocation12 + $0x4e8] sm:$0xff]  ;;  %v15292_v5 = vcombine.high %v9551_v29, %v9555_v47  ;;  %v15291_v16 = vcombine.low %v9551_v29, %v9555_v47 }
 0x603   :  { %v15294_v41 = vcombine.high %v9552_v13, %v9556_v58  ;;  %v15293_v53 = vcombine.low %v9552_v13, %v9556_v58 }
 0x604   :  { %12538 = vmatpush1.bf16.msra.mxu0 %v15235_v51  ;;  %v9559_v51 = vld [vmem:[#allocation12 + $0x500] sm:$0xff] }
 0x605   :  { %12710 = vmatpush1.bf16.msra.mxu1 %v15237_v52  ;;  %12539 = vmatprep.subr.bf16.mxu0 %v15244_v18  ;;  %v9563_v52 = vld [vmem:[#allocation12 + $0x520] sm:$0xff]  ;;  %v9560_v18 = vld [vmem:[#allocation12 + $0x508] sm:$0xff] }
 0x606   :  { %12711 = vmatprep.subr.bf16.mxu1 %v15246_v24  ;;  %v9564_v24 = vld [vmem:[#allocation12 + $0x528] sm:$0xff]  ;;  %v15300_v60 = vcombine.high %v9559_v51, %v9563_v52  ;;  %v15299_v61 = vcombine.low %v9559_v51, %v9563_v52 }
 0x607   :  { %v15302_v54 = vcombine.high %v9560_v18, %v9564_v24  ;;  %v15301_v62 = vcombine.low %v9560_v18, %v9564_v24 }
 0x608   :  { %12540 = vmatpush1.bf16.msra.mxu0 %v15243_v56  ;;  %v9567_v56 = vld [vmem:[#allocation12 + $0x540] sm:$0xff] }
 0x609   :  { %12712 = vmatpush1.bf16.msra.mxu1 %v15245_v57  ;;  %12541 = vmatprep.subr.bf16.mxu0 %v15252_v49  ;;  %v9571_v57 = vld [vmem:[#allocation12 + $0x560] sm:$0xff]  ;;  %v9568_v49 = vld [vmem:[#allocation12 + $0x548] sm:$0xff] }
 0x60a   :  { %12713 = vmatprep.subr.bf16.mxu1 %v15254_v59  ;;  %v9572_v59 = vld [vmem:[#allocation12 + $0x568] sm:$0xff]  ;;  %v15308_v63 = vcombine.high %v9567_v56, %v9571_v57  ;;  %v15307_v8 = vcombine.low %v9567_v56, %v9571_v57 }
 0x60b   :  { %v15310_v0 = vcombine.high %v9568_v49, %v9572_v59  ;;  %v15309_v9 = vcombine.low %v9568_v49, %v9572_v59 }
 0x60c   :  { %12542 = vmatpush1.bf16.msra.mxu0 %v15251_v28  ;;  %v9575_v28 = vld [vmem:[#allocation12 + $0x580] sm:$0xff] }
 0x60d   :  { %12714 = vmatpush1.bf16.msra.mxu1 %v15253_v31  ;;  %12543 = vmatprep.subr.bf16.mxu0 %v15260_v1  ;;  %v9579_v31 = vld [vmem:[#allocation12 + $0x5a0] sm:$0xff]  ;;  %v9576_v1 = vld [vmem:[#allocation12 + $0x588] sm:$0xff] }
 0x60e   :  { %12715 = vmatprep.subr.bf16.mxu1 %v15262_v6  ;;  %v9580_v6 = vld [vmem:[#allocation12 + $0x5a8] sm:$0xff]  ;;  %v15316_v10 = vcombine.high %v9575_v28, %v9579_v31  ;;  %v15315_v12 = vcombine.low %v9575_v28, %v9579_v31 }
 0x60f   :  { %v15318_v55 = vcombine.high %v9576_v1, %v9580_v6  ;;  %v15317_v14 = vcombine.low %v9576_v1, %v9580_v6 }
 0x610   :  { %12544 = vmatpush1.bf16.msra.mxu0 %v15259_v38  ;;  %v9583_v38 = vld [vmem:[#allocation12 + $0x5c0] sm:$0xff] }
 0x611   :  { %12716 = vmatpush1.bf16.msra.mxu1 %v15261_v4  ;;  %12556 = vmatprep.subr.bf16.mxu0 %v15268_v46  ;;  %v9587_v4 = vld [vmem:[#allocation12 + $0x5e0] sm:$0xff]  ;;  %v9584_v46 = vld [vmem:[#allocation12 + $0x5c8] sm:$0xff] }
 0x612   :  { %12728 = vmatprep.subr.bf16.mxu1 %v15270_v11  ;;  %v9588_v11 = vld [vmem:[#allocation12 + $0x5e8] sm:$0xff]  ;;  %v15323_v15 = vcombine.low %v9583_v38, %v9587_v4 }
 0x613   :  { %12546 = vmatmul.mubr.bf16.vlgmr.msra.gmra.mrb[24].mxu0 %v16764_v37  ;;  %v15326_v19 = vcombine.high %v9584_v46, %v9588_v11 }
 0x614   :  { %12718 = vmatmul.mubr.bf16.vlgmr.msra.gmra.mrb[24].mxu1 %v16764_v37  ;;  %12557 = vmatpush1.bf16.msra.mxu0 %v15267_v17  ;;  %v15324_v17 = vcombine.high %v9583_v38, %v9587_v4 }
 0x615   :  { %12588 = vmatprep.mubr.bf16.mxu0 %v16770_v43  ;;  %12729 = vmatpush1.bf16.msra.mxu1 %v15269_v2  ;;  %v9595_v2 = vld [vmem:[#allocation12 + $0x620] sm:$0xff] }
 0x616   :  { %12760 = vmatprep.mubr.bf16.mxu1 %v16770_v43  ;;  %12558 = vmatprep.subr.bf16.mxu0 %v15276_v21  ;;  %v9592_v21 = vld [vmem:[#allocation12 + $0x608] sm:$0xff]  ;;  %v15332_v33 = vcombine.high %v9591_v22, %v9595_v2  ;;  %v15331_v29 = vcombine.low %v9591_v22, %v9595_v2 }
 0x617   :  { %12730 = vmatprep.subr.bf16.mxu1 %v15278_v27  ;;  %v15325_v27 = vcombine.low %v9584_v46, %v9588_v11  ;;  %v15334_v34 = vcombine.high %v9592_v21, %v9596_v20  ;;  %v15333_v47 = vcombine.low %v9592_v21, %v9596_v20 }
 0x618   :  { %12559 = vmatpush1.bf16.msra.mxu0 %v15275_v26  ;;  %v9599_v26 = vld [vmem:[#allocation12 + $0x640] sm:$0xff] }
 0x619   :  { %12731 = vmatpush1.bf16.msra.mxu1 %v15277_v40  ;;  %12560 = vmatprep.subr.bf16.mxu0 %v15284_v44  ;;  %v9603_v40 = vld [vmem:[#allocation12 + $0x660] sm:$0xff]  ;;  %v9600_v44 = vld [vmem:[#allocation12 + $0x648] sm:$0xff] }
 0x61a   :  { %12732 = vmatprep.subr.bf16.mxu1 %v15286_v45  ;;  %v9604_v45 = vld [vmem:[#allocation12 + $0x668] sm:$0xff]  ;;  %v15340_v13 = vcombine.high %v9599_v26, %v9603_v40  ;;  %v15339_v51 = vcombine.low %v9599_v26, %v9603_v40 }
 0x61b   :  { %v15342_v58 = vcombine.high %v9600_v44, %v9604_v45  ;;  %v15341_v52 = vcombine.low %v9600_v44, %v9604_v45 }
 0x61c   :  { %12561 = vmatpush1.bf16.msra.mxu0 %v15283_v48  ;;  %v9607_v48 = vld [vmem:[#allocation12 + $0x680] sm:$0xff] }
 0x61d   :  { %12733 = vmatpush1.bf16.msra.mxu1 %v15285_v50  ;;  %12562 = vmatprep.subr.bf16.mxu0 %v15292_v5  ;;  %v9611_v50 = vld [vmem:[#allocation12 + $0x6a0] sm:$0xff]  ;;  %v9608_v5 = vld [vmem:[#allocation12 + $0x688] sm:$0xff] }
 0x61e   :  { %12734 = vmatprep.subr.bf16.mxu1 %v15294_v41  ;;  %v9612_v41 = vld [vmem:[#allocation12 + $0x6a8] sm:$0xff]  ;;  %v15348_v18 = vcombine.high %v9607_v48, %v9611_v50  ;;  %v15347_v56 = vcombine.low %v9607_v48, %v9611_v50 }
 0x61f   :  { %v15350_v24 = vcombine.high %v9608_v5, %v9612_v41  ;;  %v15349_v57 = vcombine.low %v9608_v5, %v9612_v41 }
 0x620   :  { %12563 = vmatpush1.bf16.msra.mxu0 %v15291_v16  ;;  %v9615_v16 = vld [vmem:[#allocation12 + $0x6c0] sm:$0xff] }
 0x621   :  { %12735 = vmatpush1.bf16.msra.mxu1 %v15293_v53  ;;  %12564 = vmatprep.subr.bf16.mxu0 %v15300_v60  ;;  %v9619_v53 = vld [vmem:[#allocation12 + $0x6e0] sm:$0xff]  ;;  %v9616_v60 = vld [vmem:[#allocation12 + $0x6c8] sm:$0xff] }
 0x622   :  { %12736 = vmatprep.subr.bf16.mxu1 %v15302_v54  ;;  %v9620_v54 = vld [vmem:[#allocation12 + $0x6e8] sm:$0xff]  ;;  %v15356_v49 = vcombine.high %v9615_v16, %v9619_v53  ;;  %v15355_v28 = vcombine.low %v9615_v16, %v9619_v53 }
 0x623   :  { %v15358_v59 = vcombine.high %v9616_v60, %v9620_v54  ;;  %v15357_v31 = vcombine.low %v9616_v60, %v9620_v54 }
 0x624   :  { %12565 = vmatpush1.bf16.msra.mxu0 %v15299_v61  ;;  %v9623_v61 = vld [vmem:[#allocation12 + $0x700] sm:$0xff] }
 0x625   :  { %12737 = vmatpush1.bf16.msra.mxu1 %v15301_v62  ;;  %12566 = vmatprep.subr.bf16.mxu0 %v15308_v63  ;;  %v9627_v62 = vld [vmem:[#allocation12 + $0x720] sm:$0xff]  ;;  %v9624_v63 = vld [vmem:[#allocation12 + $0x708] sm:$0xff] }
 0x626   :  { %12738 = vmatprep.subr.bf16.mxu1 %v15310_v0  ;;  %v9628_v0 = vld [vmem:[#allocation12 + $0x728] sm:$0xff]  ;;  %v15364_v1 = vcombine.high %v9623_v61, %v9627_v62  ;;  %v15363_v38 = vcombine.low %v9623_v61, %v9627_v62 }
 0x627   :  { %v15366_v6 = vcombine.high %v9624_v63, %v9628_v0  ;;  %v15365_v4 = vcombine.low %v9624_v63, %v9628_v0 }
 0x628   :  { %12567 = vmatpush1.bf16.msra.mxu0 %v15307_v8  ;;  %v9631_v8 = vld [vmem:[#allocation12 + $0x740] sm:$0xff] }
 0x629   :  { %12739 = vmatpush1.bf16.msra.mxu1 %v15309_v9  ;;  %12568 = vmatprep.subr.bf16.mxu0 %v15316_v10  ;;  %v9635_v9 = vld [vmem:[#allocation12 + $0x760] sm:$0xff]  ;;  %v9632_v10 = vld [vmem:[#allocation12 + $0x748] sm:$0xff] }
 0x62a   :  { %12740 = vmatprep.subr.bf16.mxu1 %v15318_v55  ;;  %v9636_v55 = vld [vmem:[#allocation12 + $0x768] sm:$0xff]  ;;  %v15372_v46 = vcombine.high %v9631_v8, %v9635_v9  ;;  %v15371_v22 = vcombine.low %v9631_v8, %v9635_v9 }
 0x62b   :  { %v15374_v11 = vcombine.high %v9632_v10, %v9636_v55  ;;  %v15373_v2 = vcombine.low %v9632_v10, %v9636_v55 }
 0x62c   :  { %12569 = vmatpush1.bf16.msra.mxu0 %v15315_v12  ;;  %v9639_v12 = vld [vmem:[#allocation12 + $0x780] sm:$0xff] }
 0x62d   :  { %12741 = vmatpush1.bf16.msra.mxu1 %v15317_v14  ;;  %12570 = vmatprep.subr.bf16.mxu0 %v15324_v17  ;;  %v9643_v14 = vld [vmem:[#allocation12 + $0x7a0] sm:$0xff]  ;;  %v9640_v17 = vld [vmem:[#allocation12 + $0x788] sm:$0xff] }
 0x62e   :  { %12742 = vmatprep.subr.bf16.mxu1 %v15326_v19  ;;  %v9644_v19 = vld [vmem:[#allocation12 + $0x7a8] sm:$0xff]  ;;  %v15380_v21 = vcombine.high %v9639_v12, %v9643_v14  ;;  %v15379_v26 = vcombine.low %v9639_v12, %v9643_v14 }
 0x62f   :  { %v15382_v20 = vcombine.high %v9640_v17, %v9644_v19  ;;  %v15381_v40 = vcombine.low %v9640_v17, %v9644_v19 }
 0x630   :  { %12571 = vmatpush1.bf16.msra.mxu0 %v15323_v15  ;;  %v9647_v15 = vld [vmem:[#allocation12 + $0x7c0] sm:$0xff] }
 0x631   :  { %12743 = vmatpush1.bf16.msra.mxu1 %v15325_v27  ;;  %12572 = vmatprep.subr.bf16.mxu0 %v15332_v33  ;;  %v9651_v27 = vld [vmem:[#allocation12 + $0x7e0] sm:$0xff]  ;;  %v9648_v33 = vld [vmem:[#allocation12 + $0x7c8] sm:$0xff] }
 0x632   :  { %12744 = vmatprep.subr.bf16.mxu1 %v15334_v34  ;;  %v9652_v34 = vld [vmem:[#allocation12 + $0x7e8] sm:$0xff]  ;;  %v15388_v44 = vcombine.high %v9647_v15, %v9651_v27  ;;  %v15387_v48 = vcombine.low %v9647_v15, %v9651_v27 }
 0x633   :  { %v15390_v45 = vcombine.high %v9648_v33, %v9652_v34  ;;  %v15389_v50 = vcombine.low %v9648_v33, %v9652_v34 }
 0x634   :  { %12573 = vmatpush1.bf16.msra.mxu0 %v15331_v29  ;;  %v9655_v29 = vld [vmem:[#allocation12 + $0x800] sm:$0xff] }
 0x635   :  { %12745 = vmatpush1.bf16.msra.mxu1 %v15333_v47  ;;  %12574 = vmatprep.subr.bf16.mxu0 %v15340_v13  ;;  %v9659_v47 = vld [vmem:[#allocation12 + $0x820] sm:$0xff]  ;;  %v9656_v13 = vld [vmem:[#allocation12 + $0x808] sm:$0xff] }
 0x636   :  { %12746 = vmatprep.subr.bf16.mxu1 %v15342_v58  ;;  %v9660_v58 = vld [vmem:[#allocation12 + $0x828] sm:$0xff]  ;;  %v15396_v5 = vcombine.high %v9655_v29, %v9659_v47  ;;  %v15395_v16 = vcombine.low %v9655_v29, %v9659_v47 }
 0x637   :  { %v15398_v41 = vcombine.high %v9656_v13, %v9660_v58  ;;  %v15397_v53 = vcombine.low %v9656_v13, %v9660_v58 }
 0x638   :  { %12575 = vmatpush1.bf16.msra.mxu0 %v15339_v51  ;;  %v9663_v51 = vld [vmem:[#allocation12 + $0x840] sm:$0xff] }
 0x639   :  { %12747 = vmatpush1.bf16.msra.mxu1 %v15341_v52  ;;  %12576 = vmatprep.subr.bf16.mxu0 %v15348_v18  ;;  %v9667_v52 = vld [vmem:[#allocation12 + $0x860] sm:$0xff]  ;;  %v9664_v18 = vld [vmem:[#allocation12 + $0x848] sm:$0xff] }
 0x63a   :  { %12748 = vmatprep.subr.bf16.mxu1 %v15350_v24  ;;  %v9668_v24 = vld [vmem:[#allocation12 + $0x868] sm:$0xff]  ;;  %v15404_v60 = vcombine.high %v9663_v51, %v9667_v52  ;;  %v15403_v61 = vcombine.low %v9663_v51, %v9667_v52 }
 0x63b   :  { %v15406_v54 = vcombine.high %v9664_v18, %v9668_v24  ;;  %v15405_v62 = vcombine.low %v9664_v18, %v9668_v24 }
 0x63c   :  { %12577 = vmatpush1.bf16.msra.mxu0 %v15347_v56  ;;  %v9671_v56 = vld [vmem:[#allocation12 + $0x880] sm:$0xff] }
 0x63d   :  { %12749 = vmatpush1.bf16.msra.mxu1 %v15349_v57  ;;  %12578 = vmatprep.subr.bf16.mxu0 %v15356_v49  ;;  %v9675_v57 = vld [vmem:[#allocation12 + $0x8a0] sm:$0xff]  ;;  %v9672_v49 = vld [vmem:[#allocation12 + $0x888] sm:$0xff] }
 0x63e   :  { %12750 = vmatprep.subr.bf16.mxu1 %v15358_v59  ;;  %v9676_v59 = vld [vmem:[#allocation12 + $0x8a8] sm:$0xff]  ;;  %v15412_v63 = vcombine.high %v9671_v56, %v9675_v57  ;;  %v15411_v8 = vcombine.low %v9671_v56, %v9675_v57 }
 0x63f   :  { %v15414_v0 = vcombine.high %v9672_v49, %v9676_v59  ;;  %v15413_v9 = vcombine.low %v9672_v49, %v9676_v59 }
 0x640   :  { %12579 = vmatpush1.bf16.msra.mxu0 %v15355_v28  ;;  %v9679_v28 = vld [vmem:[#allocation12 + $0x8c0] sm:$0xff] }
 0x641   :  { %12751 = vmatpush1.bf16.msra.mxu1 %v15357_v31  ;;  %12580 = vmatprep.subr.bf16.mxu0 %v15364_v1  ;;  %v9683_v31 = vld [vmem:[#allocation12 + $0x8e0] sm:$0xff]  ;;  %v9680_v1 = vld [vmem:[#allocation12 + $0x8c8] sm:$0xff] }
 0x642   :  { %12752 = vmatprep.subr.bf16.mxu1 %v15366_v6  ;;  %v9684_v6 = vld [vmem:[#allocation12 + $0x8e8] sm:$0xff]  ;;  %v15420_v10 = vcombine.high %v9679_v28, %v9683_v31  ;;  %v15419_v12 = vcombine.low %v9679_v28, %v9683_v31 }
 0x643   :  { %v15422_v55 = vcombine.high %v9680_v1, %v9684_v6  ;;  %v15421_v14 = vcombine.low %v9680_v1, %v9684_v6 }
 0x644   :  { %12581 = vmatpush1.bf16.msra.mxu0 %v15363_v38  ;;  %v9687_v38 = vld [vmem:[#allocation12 + $0x900] sm:$0xff] }
 0x645   :  { %12753 = vmatpush1.bf16.msra.mxu1 %v15365_v4  ;;  %12582 = vmatprep.subr.bf16.mxu0 %v15372_v46  ;;  %v9691_v4 = vld [vmem:[#allocation12 + $0x920] sm:$0xff]  ;;  %v9688_v46 = vld [vmem:[#allocation12 + $0x908] sm:$0xff] }
 0x646   :  { %12754 = vmatprep.subr.bf16.mxu1 %v15374_v11  ;;  %v9692_v11 = vld [vmem:[#allocation12 + $0x928] sm:$0xff]  ;;  %v15428_v17 = vcombine.high %v9687_v38, %v9691_v4  ;;  %v15427_v15 = vcombine.low %v9687_v38, %v9691_v4 }
 0x647   :  { %v15430_v19 = vcombine.high %v9688_v46, %v9692_v11  ;;  %v15429_v27 = vcombine.low %v9688_v46, %v9692_v11 }
 0x648   :  { %12583 = vmatpush1.bf16.msra.mxu0 %v15371_v22  ;;  %v9695_v22 = vld [vmem:[#allocation12 + $0x940] sm:$0xff] }
 0x649   :  { %12755 = vmatpush1.bf16.msra.mxu1 %v15373_v2  ;;  %12584 = vmatprep.subr.bf16.mxu0 %v15380_v21  ;;  %v9699_v2 = vld [vmem:[#allocation12 + $0x960] sm:$0xff]  ;;  %v9696_v21 = vld [vmem:[#allocation12 + $0x948] sm:$0xff] }
 0x64a   :  { %12756 = vmatprep.subr.bf16.mxu1 %v15382_v20  ;;  %v9700_v20 = vld [vmem:[#allocation12 + $0x968] sm:$0xff]  ;;  %v15436_v33 = vcombine.high %v9695_v22, %v9699_v2  ;;  %v15435_v29 = vcombine.low %v9695_v22, %v9699_v2 }
 0x64b   :  { %v15438_v34 = vcombine.high %v9696_v21, %v9700_v20  ;;  %v15437_v47 = vcombine.low %v9696_v21, %v9700_v20 }
 0x64c   :  { %12585 = vmatpush1.bf16.msra.mxu0 %v15379_v26  ;;  %v9703_v26 = vld [vmem:[#allocation12 + $0x980] sm:$0xff] }
 0x64d   :  { %12757 = vmatpush1.bf16.msra.mxu1 %v15381_v40  ;;  %12586 = vmatprep.subr.bf16.mxu0 %v15388_v44  ;;  %v9707_v40 = vld [vmem:[#allocation12 + $0x9a0] sm:$0xff]  ;;  %v9704_v44 = vld [vmem:[#allocation12 + $0x988] sm:$0xff] }
 0x64e   :  { %12758 = vmatprep.subr.bf16.mxu1 %v15390_v45  ;;  %v9708_v45 = vld [vmem:[#allocation12 + $0x9a8] sm:$0xff]  ;;  %v15444_v13 = vcombine.high %v9703_v26, %v9707_v40  ;;  %v15443_v51 = vcombine.low %v9703_v26, %v9707_v40 }
 0x64f   :  { %v15446_v58 = vcombine.high %v9704_v44, %v9708_v45  ;;  %v15445_v52 = vcombine.low %v9704_v44, %v9708_v45 }
 0x650   :  { %12587 = vmatpush1.bf16.msra.mxu0 %v15387_v48  ;;  %v9711_v48 = vld [vmem:[#allocation12 + $0x9c0] sm:$0xff] }
 0x651   :  { %12759 = vmatpush1.bf16.msra.mxu1 %v15389_v50  ;;  %12599 = vmatprep.subr.bf16.mxu0 %v15396_v5  ;;  %v9715_v50 = vld [vmem:[#allocation12 + $0x9e0] sm:$0xff]  ;;  %v9712_v5 = vld [vmem:[#allocation12 + $0x9c8] sm:$0xff] }
 0x652   :  { %12771 = vmatprep.subr.bf16.mxu1 %v15398_v41  ;;  %v9716_v41 = vld [vmem:[#allocation12 + $0x9e8] sm:$0xff]  ;;  %v15452_v18 = vcombine.high %v9711_v48, %v9715_v50  ;;  %v15451_v56 = vcombine.low %v9711_v48, %v9715_v50 }
 0x653   :  { %12589 = vmatmul.mubr.bf16.vlgmr.msra.gmra.mrb[24].mxu0 %v16766_v39  ;;  %v15454_v24 = vcombine.high %v9712_v5, %v9716_v41  ;;  %v15453_v57 = vcombine.low %v9712_v5, %v9716_v41 }
 0x654   :  { %12761 = vmatmul.mubr.bf16.vlgmr.msra.gmra.mrb[24].mxu1 %v16766_v39  ;;  %12600 = vmatpush1.bf16.msra.mxu0 %v15395_v16  ;;  %v9719_v16 = vld [vmem:[#allocation12 + $0xa00] sm:$0xff] }
 0x655   :  { %12772 = vmatpush1.bf16.msra.mxu1 %v15397_v53  ;;  %12601 = vmatprep.subr.bf16.mxu0 %v15404_v60  ;;  %v9723_v53 = vld [vmem:[#allocation12 + $0xa20] sm:$0xff]  ;;  %v9720_v60 = vld [vmem:[#allocation12 + $0xa08] sm:$0xff] }
 0x656   :  { %12773 = vmatprep.subr.bf16.mxu1 %v15406_v54  ;;  %v9724_v54 = vld [vmem:[#allocation12 + $0xa28] sm:$0xff]  ;;  %v15460_v49 = vcombine.high %v9719_v16, %v9723_v53  ;;  %v15459_v28 = vcombine.low %v9719_v16, %v9723_v53 }
 0x657   :  { %v15462_v59 = vcombine.high %v9720_v60, %v9724_v54  ;;  %v15461_v31 = vcombine.low %v9720_v60, %v9724_v54 }
 0x658   :  { %12602 = vmatpush1.bf16.msra.mxu0 %v15403_v61  ;;  %v9727_v61 = vld [vmem:[#allocation12 + $0xa40] sm:$0xff] }
 0x659   :  { %12774 = vmatpush1.bf16.msra.mxu1 %v15405_v62  ;;  %12603 = vmatprep.subr.bf16.mxu0 %v15412_v63  ;;  %v9731_v62 = vld [vmem:[#allocation12 + $0xa60] sm:$0xff]  ;;  %v9728_v63 = vld [vmem:[#allocation12 + $0xa48] sm:$0xff] }
 0x65a   :  { %12775 = vmatprep.subr.bf16.mxu1 %v15414_v0  ;;  %v9732_v0 = vld [vmem:[#allocation12 + $0xa68] sm:$0xff]  ;;  %v15468_v1 = vcombine.high %v9727_v61, %v9731_v62  ;;  %v15467_v38 = vcombine.low %v9727_v61, %v9731_v62 }
 0x65b   :  { %v15470_v6 = vcombine.high %v9728_v63, %v9732_v0  ;;  %v15469_v4 = vcombine.low %v9728_v63, %v9732_v0 }
 0x65c   :  { %12604 = vmatpush1.bf16.msra.mxu0 %v15411_v8  ;;  %v9735_v8 = vld [vmem:[#allocation12 + $0xa80] sm:$0xff] }
 0x65d   :  { %12776 = vmatpush1.bf16.msra.mxu1 %v15413_v9  ;;  %12605 = vmatprep.subr.bf16.mxu0 %v15420_v10  ;;  %v9739_v9 = vld [vmem:[#allocation12 + $0xaa0] sm:$0xff]  ;;  %v9736_v10 = vld [vmem:[#allocation12 + $0xa88] sm:$0xff] }
 0x65e   :  { %12777 = vmatprep.subr.bf16.mxu1 %v15422_v55  ;;  %v9740_v55 = vld [vmem:[#allocation12 + $0xaa8] sm:$0xff]  ;;  %v15476_v46 = vcombine.high %v9735_v8, %v9739_v9  ;;  %v15475_v22 = vcombine.low %v9735_v8, %v9739_v9 }
 0x65f   :  { %v15478_v11 = vcombine.high %v9736_v10, %v9740_v55  ;;  %v15477_v2 = vcombine.low %v9736_v10, %v9740_v55 }
 0x660   :  { %12606 = vmatpush1.bf16.msra.mxu0 %v15419_v12  ;;  %v9743_v12 = vld [vmem:[#allocation12 + $0xac0] sm:$0xff] }
 0x661   :  { %12778 = vmatpush1.bf16.msra.mxu1 %v15421_v14  ;;  %12607 = vmatprep.subr.bf16.mxu0 %v15428_v17  ;;  %v9747_v14 = vld [vmem:[#allocation12 + $0xae0] sm:$0xff]  ;;  %v9744_v17 = vld [vmem:[#allocation12 + $0xac8] sm:$0xff] }
 0x662   :  { %12779 = vmatprep.subr.bf16.mxu1 %v15430_v19  ;;  %v9748_v19 = vld [vmem:[#allocation12 + $0xae8] sm:$0xff]  ;;  %v15484_v21 = vcombine.high %v9743_v12, %v9747_v14  ;;  %v15483_v26 = vcombine.low %v9743_v12, %v9747_v14 }
 0x663   :  { %v15486_v20 = vcombine.high %v9744_v17, %v9748_v19  ;;  %v15485_v40 = vcombine.low %v9744_v17, %v9748_v19 }
 0x664   :  { %12608 = vmatpush1.bf16.msra.mxu0 %v15427_v15  ;;  %v9751_v15 = vld [vmem:[#allocation12 + $0xb00] sm:$0xff] }
 0x665   :  { %12780 = vmatpush1.bf16.msra.mxu1 %v15429_v27  ;;  %12609 = vmatprep.subr.bf16.mxu0 %v15436_v33  ;;  %v9755_v27 = vld [vmem:[#allocation12 + $0xb20] sm:$0xff]  ;;  %v9752_v33 = vld [vmem:[#allocation12 + $0xb08] sm:$0xff] }
 0x666   :  { %12781 = vmatprep.subr.bf16.mxu1 %v15438_v34  ;;  %v9756_v34 = vld [vmem:[#allocation12 + $0xb28] sm:$0xff]  ;;  %v15492_v44 = vcombine.high %v9751_v15, %v9755_v27  ;;  %v15491_v48 = vcombine.low %v9751_v15, %v9755_v27 }
 0x667   :  { %v15494_v45 = vcombine.high %v9752_v33, %v9756_v34  ;;  %v15493_v50 = vcombine.low %v9752_v33, %v9756_v34 }
 0x668   :  { %12610 = vmatpush1.bf16.msra.mxu0 %v15435_v29  ;;  %v9759_v29 = vld [vmem:[#allocation12 + $0xb40] sm:$0xff] }
 0x669   :  { %12782 = vmatpush1.bf16.msra.mxu1 %v15437_v47  ;;  %12611 = vmatprep.subr.bf16.mxu0 %v15444_v13  ;;  %v9763_v47 = vld [vmem:[#allocation12 + $0xb60] sm:$0xff]  ;;  %v9760_v13 = vld [vmem:[#allocation12 + $0xb48] sm:$0xff] }
 0x66a   :  { %12783 = vmatprep.subr.bf16.mxu1 %v15446_v58  ;;  %v9764_v58 = vld [vmem:[#allocation12 + $0xb68] sm:$0xff]  ;;  %v15500_v5 = vcombine.high %v9759_v29, %v9763_v47  ;;  %v15499_v16 = vcombine.low %v9759_v29, %v9763_v47 }
 0x66b   :  { %v15502_v41 = vcombine.high %v9760_v13, %v9764_v58  ;;  %v15501_v53 = vcombine.low %v9760_v13, %v9764_v58 }
 0x66c   :  { %12612 = vmatpush1.bf16.msra.mxu0 %v15443_v51  ;;  %v9767_v51 = vld [vmem:[#allocation12 + $0xb80] sm:$0xff] }
 0x66d   :  { %12784 = vmatpush1.bf16.msra.mxu1 %v15445_v52  ;;  %12613 = vmatprep.subr.bf16.mxu0 %v15452_v18  ;;  %v9771_v52 = vld [vmem:[#allocation12 + $0xba0] sm:$0xff]  ;;  %v9768_v18 = vld [vmem:[#allocation12 + $0xb88] sm:$0xff] }
 0x66e   :  { %12785 = vmatprep.subr.bf16.mxu1 %v15454_v24  ;;  %v9772_v24 = vld [vmem:[#allocation12 + $0xba8] sm:$0xff]  ;;  %v15508_v60 = vcombine.high %v9767_v51, %v9771_v52  ;;  %v15507_v61 = vcombine.low %v9767_v51, %v9771_v52 }
 0x66f   :  { %v15510_v54 = vcombine.high %v9768_v18, %v9772_v24  ;;  %v15509_v62 = vcombine.low %v9768_v18, %v9772_v24  ;;  %v9795_v24 = vld [vmem:[#allocation12 + $0xc60] sm:$0xff] }
 0x670   :  { %12614 = vmatpush1.bf16.msra.mxu0 %v15451_v56  ;;  %v9775_v56 = vld [vmem:[#allocation12 + $0xbc0] sm:$0xff] }
 0x671   :  { %12786 = vmatpush1.bf16.msra.mxu1 %v15453_v57  ;;  %12615 = vmatprep.subr.bf16.mxu0 %v15460_v49  ;;  %v9779_v57 = vld [vmem:[#allocation12 + $0xbe0] sm:$0xff]  ;;  %v9776_v49 = vld [vmem:[#allocation12 + $0xbc8] sm:$0xff] }
 0x672   :  { %12787 = vmatprep.subr.bf16.mxu1 %v15462_v59  ;;  %v9780_v59 = vld [vmem:[#allocation12 + $0xbe8] sm:$0xff]  ;;  %v15516_v63 = vcombine.high %v9775_v56, %v9779_v57  ;;  %v15515_v8 = vcombine.low %v9775_v56, %v9779_v57 }
 0x673   :  { %v15518_v0 = vcombine.high %v9776_v49, %v9780_v59  ;;  %v15517_v9 = vcombine.low %v9776_v49, %v9780_v59  ;;  %v9799_v59 = vld [vmem:[#allocation12 + $0xc80] sm:$0xff] }
 0x674   :  { %12616 = vmatpush1.bf16.msra.mxu0 %v15459_v28  ;;  %v16782_v28 = vld [vmem:[#allocation12 + $0xc00] sm:$0xff] }
 0x675   :  { %12788 = vmatpush1.bf16.msra.mxu1 %v15461_v31  ;;  %12617 = vmatprep.subr.bf16.mxu0 %v15468_v1  ;;  %v16784_v31 = vld [vmem:[#allocation12 + $0xc20] sm:$0xff]  ;;  %v16786_v1 = vld [vmem:[#allocation12 + $0xc08] sm:$0xff] }
 0x676   :  { %12789 = vmatprep.subr.bf16.mxu1 %v15470_v6  ;;  %v16788_v6 = vld [vmem:[#allocation12 + $0xc28] sm:$0xff]  ;;  %v15524_v10 = vcombine.high %v16782_v28, %v16784_v31  ;;  %v15523_v56 = vcombine.low %v16782_v28, %v16784_v31 }
 0x677   :  { %v15526_v55 = vcombine.high %v16786_v1, %v16788_v6  ;;  %v15525_v57 = vcombine.low %v16786_v1, %v16788_v6 }
 0x678   :  { %12618 = vmatpush1.bf16.msra.mxu0 %v15467_v38  ;;  %v16112_v38 = vld [vmem:[#allocation10] sm:$0xff] }
 0x679   :  { %12790 = vmatpush1.bf16.msra.mxu1 %v15469_v4  ;;  %12619 = vmatprep.subr.bf16.mxu0 %v15476_v46  ;;  %v6106_v4 = vrot.slane %v16112_v38, %v16639_v3  ;;  %v6114_v46 = vrot.slane %v16112_v38, %v16649_v23  ;;  %v6118_v12 = vrot.slane %v16112_v38, %v16652_v25 }
 0x67a   :  { %12791 = vmatprep.subr.bf16.mxu1 %v15478_v11  ;;  %v6110_v11 = vrot.slane %v16112_v38, %v16642_v7  ;;  %v9812_v38 = vld [vmem:[#allocation12 + $0xce8] sm:$0xff] }
 0x67c   :  { %12620 = vmatpush1.bf16.msra.mxu0 %v15475_v22 }
 0x67d   :  { %12792 = vmatpush1.bf16.msra.mxu1 %v15477_v2  ;;  %12621 = vmatprep.subr.bf16.mxu0 %v15484_v21 }
 0x67e   :  { %12793 = vmatprep.subr.bf16.mxu1 %v15486_v20 }
 0x680   :  { %12622 = vmatpush1.bf16.msra.mxu0 %v15483_v26 }
 0x681   :  { %12794 = vmatpush1.bf16.msra.mxu1 %v15485_v40  ;;  %12623 = vmatprep.subr.bf16.mxu0 %v15492_v44 }
 0x682   :  { %12795 = vmatprep.subr.bf16.mxu1 %v15494_v45 }
 0x684   :  { %12624 = vmatpush1.bf16.msra.mxu0 %v15491_v48 }
 0x685   :  { %12796 = vmatpush1.bf16.msra.mxu1 %v15493_v50  ;;  %12625 = vmatprep.subr.bf16.mxu0 %v15500_v5 }
 0x686   :  { %12797 = vmatprep.subr.bf16.mxu1 %v15502_v41  ;;  %v9791_v41 = vld [vmem:[#allocation12 + $0xc40] sm:$0xff] }
 0x687   :  { %v15531_v28 = vcombine.low %v9791_v41, %v9795_v24 }
 0x688   :  { %12626 = vmatpush1.bf16.msra.mxu0 %v15499_v16  ;;  %v9792_v16 = vld [vmem:[#allocation12 + $0xc48] sm:$0xff] }
 0x689   :  { %12798 = vmatpush1.bf16.msra.mxu1 %v15501_v53  ;;  %12627 = vmatprep.subr.bf16.mxu0 %v15508_v60  ;;  %v9796_v53 = vld [vmem:[#allocation12 + $0xc68] sm:$0xff] }
 0x68a   :  { %12799 = vmatprep.subr.bf16.mxu1 %v15510_v54  ;;  %v15533_v31 = vcombine.low %v9792_v16, %v9796_v53 }
 0x68c   :  { %12628 = vmatpush1.bf16.msra.mxu0 %v15507_v61  ;;  %v15532_v61 = vcombine.high %v9791_v41, %v9795_v24  ;;  %v9843_v24 = vld [vmem:[#allocation12 + $0xde0] sm:$0xff] }
 0x68d   :  { %12800 = vmatpush1.bf16.msra.mxu1 %v15509_v62  ;;  %12629 = vmatprep.subr.bf16.mxu0 %v15516_v63  ;;  %v15534_v62 = vcombine.high %v9792_v16, %v9796_v53  ;;  %v9803_v63 = vld [vmem:[#allocation12 + $0xca0] sm:$0xff]  ;;  %v9840_v16 = vld [vmem:[#allocation12 + $0xdc8] sm:$0xff] }
 0x68e   :  { %12801 = vmatprep.subr.bf16.mxu1 %v15518_v0  ;;  %v9800_v0 = vld [vmem:[#allocation12 + $0xc88] sm:$0xff]  ;;  %v15540_v1 = vcombine.high %v9799_v59, %v9803_v63 }
 0x68f   :  { %v9844_v53 = vld [vmem:[#allocation12 + $0xde8] sm:$0xff] }
 0x690   :  { %12630 = vmatpush1.bf16.msra.mxu0 %v15515_v8  ;;  %v9804_v8 = vld [vmem:[#allocation12 + $0xca8] sm:$0xff] }
 0x691   :  { %12802 = vmatpush1.bf16.msra.mxu1 %v15517_v9  ;;  %12642 = vmatprep.subr.bf16.mxu0 %v15524_v10  ;;  %v15542_v6 = vcombine.high %v9800_v0, %v9804_v8  ;;  %v9807_v9 = vld [vmem:[#allocation12 + $0xcc0] sm:$0xff] }
 0x692   :  { %12814 = vmatprep.subr.bf16.mxu1 %v15526_v55  ;;  %v9811_v10 = vld [vmem:[#allocation12 + $0xce0] sm:$0xff]  ;;  %v9808_v55 = vld [vmem:[#allocation12 + $0xcc8] sm:$0xff] }
 0x6a6   :  { %v9194_v14 = vpop.f32.mrb[20].mxu0 }
 0x6a7   :  { %v15844_v17 = vadd.f32 %v9194_v14, %v6106_v4  ;;  %v9366_v19 = vpop.f32.mrb[20].mxu1  ;;  %v9196_v22 = vpop.f32.mrb[21].mxu0  ;;  %v9815_v14 = vld [vmem:[#allocation12 + $0xd00] sm:$0xff] }
 0x6a8   :  { %v15848_v2 = vadd.f32 %v9366_v19, %v6114_v46  ;;  %v15845_v21 = vadd.f32 %v9196_v22, %v6110_v11  ;;  %v9368_v20 = vpop.f32.mrb[21].mxu1  ;;  %v9198_v15 = vpop.f32.mrb[22].mxu0  ;;  %v9816_v19 = vld [vmem:[#allocation12 + $0xd08] sm:$0xff] }
 0x6a9   :  { %v15849_v27 = vadd.f32 %v9368_v20, %v6118_v12  ;;  %v15846_v33 = vadd.f32 %v9198_v15, %v6106_v4  ;;  %v9370_v34 = vpop.f32.mrb[22].mxu1  ;;  %v9200_v26 = vpop.f32.mrb[23].mxu0  ;;  %v9379_v29 = vmax.f32 %v15844_v17, 0.0  ;;  %v15539_v4 = vcombine.low %v9799_v59, %v9803_v63  ;;  %v9819_v17 = vld [vmem:[#allocation12 + $0xd20] sm:$0xff]  ;;  %v9820_v22 = vld [vmem:[#allocation12 + $0xd28] sm:$0xff] }
 0x6aa   :  { %v15850_v40 = vadd.f32 %v9370_v34, %v6114_v46  ;;  %v15847_v44 = vadd.f32 %v9200_v26, %v6110_v11  ;;  %v9372_v45 = vpop.f32.mrb[23].mxu1  ;;  %v9381_v58 = vmax.f32 %v15848_v2, 0.0  ;;  %v9380_v48 = vmax.f32 %v15845_v21, 0.0  ;;  %v9824_v34 = vld [vmem:[#allocation12 + $0xd48] sm:$0xff]  ;;  %v9851_v63 = vld [vmem:[#allocation12 + $0xe20] sm:$0xff] }
 0x6ab   :  { %v9387_v47 = vmax.f32 %v15846_v33, 0.0  ;;  %v15851_v13 = vadd.f32 %v9372_v45, %v6118_v12  ;;  %v9382_v51 = vmax.f32 %v15849_v27, 0.0  ;;  %v15541_v46 = vcombine.low %v9800_v0, %v9804_v8  ;;  %v9823_v27 = vld [vmem:[#allocation12 + $0xd40] sm:$0xff]  ;;  %v9828_v26 = vld [vmem:[#allocation12 + $0xd68] sm:$0xff] }
 0x6ac   :  { %v9389_v50 = vmax.f32 %v15850_v40, 0.0  ;;  %v9388_v5 = vmax.f32 %v15847_v44, 0.0  ;;  %v15548_v11 = vcombine.high %v9807_v9, %v9811_v10  ;;  %v15550_v12 = vcombine.high %v9808_v55, %v9812_v38  ;;  %v9827_v33 = vld [vmem:[#allocation12 + $0xd60] sm:$0xff]  ;;  %v9848_v0 = vld [vmem:[#allocation12 + $0xe08] sm:$0xff] }
 0x6ad   :  { %v16798_v52 = vpack.c.bf16 %v9387_v47, %v9379_v29  ;;  %v9390_v18 = vmax.f32 %v15851_v13, 0.0  ;;  %v15547_v2 = vcombine.low %v9807_v9, %v9811_v10  ;;  %v15549_v21 = vcombine.low %v9808_v55, %v9812_v38  ;;  %v9831_v47 = vld [vmem:[#allocation12 + $0xd80] sm:$0xff]  ;;  %v9852_v8 = vld [vmem:[#allocation12 + $0xe28] sm:$0xff] }
 0x6ae   :  { %v16800_v60 = vpack.c.bf16 %v9389_v50, %v9381_v58  ;;  %v16802_v54 = vpack.c.bf16 %v9388_v5, %v9380_v48  ;;  %v15556_v20 = vcombine.high %v9815_v14, %v9819_v17  ;;  %v15558_v15 = vcombine.high %v9816_v19, %v9820_v22  ;;  %v9835_v13 = vld [vmem:[#allocation12 + $0xda0] sm:$0xff]  ;;  %v9832_v58 = vld [vmem:[#allocation12 + $0xd88] sm:$0xff] }
 0x6af   :  { %v16808_v49 = vpack.c.bf16 %v9390_v18, %v9382_v51  ;;  %v15555_v40 = vcombine.low %v9815_v14, %v9819_v17  ;;  %v15557_v44 = vcombine.low %v9816_v19, %v9820_v22  ;;  %v15564_v45 = vcombine.high %v9823_v27, %v9827_v33  ;;  %v9836_v48 = vld [vmem:[#allocation12 + $0xda8] sm:$0xff]  ;;  %v9839_v18 = vld [vmem:[#allocation12 + $0xdc0] sm:$0xff] }
 0x6b0   :  { %12631 = vmatprep.mubr.bf16.mxu0 %v16802_v54  ;;  %12803 = vmatprep.mubr.bf16.mxu1 %v16802_v54  ;;  %v15566_v29 = vcombine.high %v9824_v34, %v9828_v26  ;;  %v15563_v50 = vcombine.low %v9823_v27, %v9827_v33  ;;  %v15565_v5 = vcombine.low %v9824_v34, %v9828_v26  ;;  %v9855_v9 = vld [vmem:[#allocation12 + $0xe40] sm:$0xff]  ;;  %v9856_v55 = vld [vmem:[#allocation12 + $0xe48] sm:$0xff] }
 0x6b1   :  { %12632 = vmatmul.mubr.bf16.vlgmr.msra.gmra.mrb[24].mxu0 %v16798_v52  ;;  %12804 = vmatmul.mubr.bf16.vlgmr.msra.gmra.mrb[24].mxu1 %v16798_v52  ;;  %v15572_v41 = vcombine.high %v9831_v47, %v9835_v13  ;;  %v15574_v51 = vcombine.high %v9832_v58, %v9836_v48  ;;  %v15580_v59 = vcombine.high %v9839_v18, %v9843_v24  ;;  %v9859_v10 = vld [vmem:[#allocation12 + $0xe60] sm:$0xff]  ;;  %v9860_v38 = vld [vmem:[#allocation12 + $0xe68] sm:$0xff] }
 0x6b2   :  { %12643 = vmatpush1.bf16.msra.mxu0 %v15523_v56  ;;  %12815 = vmatpush1.bf16.msra.mxu1 %v15525_v57  ;;  %v15571_v56 = vcombine.low %v9831_v47, %v9835_v13  ;;  %v15573_v57 = vcombine.low %v9832_v58, %v9836_v48  ;;  %v9863_v14 = vld [vmem:[#allocation12 + $0xe80] sm:$0xff]  ;;  %v9864_v19 = vld [vmem:[#allocation12 + $0xe88] sm:$0xff] }
 0x6b3   :  { %12674 = vmatprep.mubr.bf16.mxu0 %v16808_v49  ;;  %12846 = vmatprep.mubr.bf16.mxu1 %v16808_v49  ;;  %v9867_v17 = vld [vmem:[#allocation12 + $0xea0] sm:$0xff]  ;;  %v9868_v22 = vld [vmem:[#allocation12 + $0xea8] sm:$0xff] }
 0x6b4   :  { %12644 = vmatprep.subr.bf16.mxu0 %v15532_v61  ;;  %12816 = vmatprep.subr.bf16.mxu1 %v15534_v62  ;;  %v15582_v61 = vcombine.high %v9840_v16, %v9844_v53  ;;  %v9847_v62 = vld [vmem:[#allocation12 + $0xe00] sm:$0xff]  ;;  %v9872_v34 = vld [vmem:[#allocation12 + $0xec8] sm:$0xff] }
 0x6b5   :  { %v9871_v27 = vld [vmem:[#allocation12 + $0xec0] sm:$0xff]  ;;  %v9876_v26 = vld [vmem:[#allocation12 + $0xee8] sm:$0xff] }
 0x6b6   :  { %12645 = vmatpush1.bf16.msra.mxu0 %v15531_v28  ;;  %12817 = vmatpush1.bf16.msra.mxu1 %v15533_v31  ;;  %v15579_v28 = vcombine.low %v9839_v18, %v9843_v24  ;;  %v15581_v31 = vcombine.low %v9840_v16, %v9844_v53  ;;  %v9875_v33 = vld [vmem:[#allocation12 + $0xee0] sm:$0xff]  ;;  %v9880_v58 = vld [vmem:[#allocation12 + $0xf08] sm:$0xff] }
 0x6b7   :  { %12646 = vmatprep.subr.bf16.mxu0 %v15540_v1  ;;  %12818 = vmatprep.subr.bf16.mxu1 %v15542_v6  ;;  %v15588_v1 = vcombine.high %v9847_v62, %v9851_v63  ;;  %v15590_v6 = vcombine.high %v9848_v0, %v9852_v8  ;;  %v9879_v47 = vld [vmem:[#allocation12 + $0xf00] sm:$0xff]  ;;  %v9884_v48 = vld [vmem:[#allocation12 + $0xf28] sm:$0xff] }
 0x6b8   :  { %v9883_v13 = vld [vmem:[#allocation12 + $0xf20] sm:$0xff]  ;;  %v9888_v16 = vld [vmem:[#allocation12 + $0xf48] sm:$0xff] }
 0x6b9   :  { %v9887_v18 = vld [vmem:[#allocation12 + $0xf40] sm:$0xff]  ;;  %v9892_v53 = vld [vmem:[#allocation12 + $0xf68] sm:$0xff] }
 0x6ba   :  { %12647 = vmatpush1.bf16.msra.mxu0 %v15539_v4  ;;  %12819 = vmatpush1.bf16.msra.mxu1 %v15541_v46  ;;  %v15587_v4 = vcombine.low %v9847_v62, %v9851_v63  ;;  %v15589_v46 = vcombine.low %v9848_v0, %v9852_v8  ;;  %v9891_v24 = vld [vmem:[#allocation12 + $0xf60] sm:$0xff]  ;;  %v9896_v0 = vld [vmem:[#allocation12 + $0xf88] sm:$0xff] }
 0x6bb   :  { %12648 = vmatprep.subr.bf16.mxu0 %v15548_v11  ;;  %12820 = vmatprep.subr.bf16.mxu1 %v15550_v12  ;;  %v15596_v11 = vcombine.high %v9855_v9, %v9859_v10  ;;  %v15598_v12 = vcombine.high %v9856_v55, %v9860_v38  ;;  %v9895_v62 = vld [vmem:[#allocation12 + $0xf80] sm:$0xff]  ;;  %v9900_v8 = vld [vmem:[#allocation12 + $0xfa8] sm:$0xff] }
 0x6bc   :  { %v9899_v63 = vld [vmem:[#allocation12 + $0xfa0] sm:$0xff] }
 0x6be   :  { %12649 = vmatpush1.bf16.msra.mxu0 %v15547_v2  ;;  %12821 = vmatpush1.bf16.msra.mxu1 %v15549_v21  ;;  %v15595_v2 = vcombine.low %v9855_v9, %v9859_v10  ;;  %v15597_v21 = vcombine.low %v9856_v55, %v9860_v38  ;;  %v9903_v9 = vld [vmem:[#allocation12 + $0xfc0] sm:$0xff]  ;;  %v9904_v55 = vld [vmem:[#allocation12 + $0xfc8] sm:$0xff] }
 0x6bf   :  { %12650 = vmatprep.subr.bf16.mxu0 %v15556_v20  ;;  %12822 = vmatprep.subr.bf16.mxu1 %v15558_v15  ;;  %v15604_v20 = vcombine.high %v9863_v14, %v9867_v17  ;;  %v15606_v15 = vcombine.high %v9864_v19, %v9868_v22  ;;  %v9907_v10 = vld [vmem:[#allocation12 + $0xfe0] sm:$0xff]  ;;  %v9908_v38 = vld [vmem:[#allocation12 + $0xfe8] sm:$0xff] }
 0x6c2   :  { %12651 = vmatpush1.bf16.msra.mxu0 %v15555_v40  ;;  %12823 = vmatpush1.bf16.msra.mxu1 %v15557_v44  ;;  %v15603_v40 = vcombine.low %v9863_v14, %v9867_v17  ;;  %v15605_v44 = vcombine.low %v9864_v19, %v9868_v22  ;;  %v9401_v14 = vld [vmem:[#allocation12 + $0x10] sm:$0xff]  ;;  %v9402_v19 = vld [vmem:[#allocation12 + $0x18] sm:$0xff] }
 0x6c3   :  { %12652 = vmatprep.subr.bf16.mxu0 %v15564_v45  ;;  %12824 = vmatprep.subr.bf16.mxu1 %v15566_v29  ;;  %v15612_v45 = vcombine.high %v9871_v27, %v9875_v33  ;;  %v15614_v29 = vcombine.high %v9872_v34, %v9876_v26  ;;  %v9405_v17 = vld [vmem:[#allocation12 + $0x30] sm:$0xff]  ;;  %v9406_v22 = vld [vmem:[#allocation12 + $0x38] sm:$0xff] }
 0x6c6   :  { %12653 = vmatpush1.bf16.msra.mxu0 %v15563_v50  ;;  %12825 = vmatpush1.bf16.msra.mxu1 %v15565_v5  ;;  %v15611_v50 = vcombine.low %v9871_v27, %v9875_v33  ;;  %v15613_v5 = vcombine.low %v9872_v34, %v9876_v26  ;;  %v9409_v27 = vld [vmem:[#allocation12 + $0x50] sm:$0xff]  ;;  %v9410_v34 = vld [vmem:[#allocation12 + $0x58] sm:$0xff] }
 0x6c7   :  { %12654 = vmatprep.subr.bf16.mxu0 %v15572_v41  ;;  %12826 = vmatprep.subr.bf16.mxu1 %v15574_v51  ;;  %v15620_v41 = vcombine.high %v9879_v47, %v9883_v13  ;;  %v15622_v51 = vcombine.high %v9880_v58, %v9884_v48  ;;  %v9413_v33 = vld [vmem:[#allocation12 + $0x70] sm:$0xff]  ;;  %v9414_v26 = vld [vmem:[#allocation12 + $0x78] sm:$0xff] }
 0x6ca   :  { %12655 = vmatpush1.bf16.msra.mxu0 %v15571_v56  ;;  %12827 = vmatpush1.bf16.msra.mxu1 %v15573_v57  ;;  %v15619_v56 = vcombine.low %v9879_v47, %v9883_v13  ;;  %v15621_v57 = vcombine.low %v9880_v58, %v9884_v48  ;;  %v9417_v47 = vld [vmem:[#allocation12 + $0x90] sm:$0xff]  ;;  %v9418_v58 = vld [vmem:[#allocation12 + $0x98] sm:$0xff] }
 0x6cb   :  { %12656 = vmatprep.subr.bf16.mxu0 %v15580_v59  ;;  %12828 = vmatprep.subr.bf16.mxu1 %v15582_v61  ;;  %v15628_v59 = vcombine.high %v9887_v18, %v9891_v24  ;;  %v15630_v61 = vcombine.high %v9888_v16, %v9892_v53  ;;  %v9421_v13 = vld [vmem:[#allocation12 + $0xb0] sm:$0xff]  ;;  %v9422_v48 = vld [vmem:[#allocation12 + $0xb8] sm:$0xff] }
 0x6ce   :  { %12657 = vmatpush1.bf16.msra.mxu0 %v15579_v28  ;;  %12829 = vmatpush1.bf16.msra.mxu1 %v15581_v31  ;;  %v15627_v28 = vcombine.low %v9887_v18, %v9891_v24  ;;  %v15629_v31 = vcombine.low %v9888_v16, %v9892_v53  ;;  %v9425_v18 = vld [vmem:[#allocation12 + $0xd0] sm:$0xff]  ;;  %v9426_v16 = vld [vmem:[#allocation12 + $0xd8] sm:$0xff] }
 0x6cf   :  { %12658 = vmatprep.subr.bf16.mxu0 %v15588_v1  ;;  %12830 = vmatprep.subr.bf16.mxu1 %v15590_v6  ;;  %v15636_v1 = vcombine.high %v9895_v62, %v9899_v63  ;;  %v15638_v6 = vcombine.high %v9896_v0, %v9900_v8  ;;  %v9429_v24 = vld [vmem:[#allocation12 + $0xf0] sm:$0xff]  ;;  %v9430_v53 = vld [vmem:[#allocation12 + $0xf8] sm:$0xff] }
 0x6d2   :  { %12659 = vmatpush1.bf16.msra.mxu0 %v15587_v4  ;;  %12831 = vmatpush1.bf16.msra.mxu1 %v15589_v46  ;;  %v15635_v4 = vcombine.low %v9895_v62, %v9899_v63  ;;  %v15637_v46 = vcombine.low %v9896_v0, %v9900_v8  ;;  %v9433_v62 = vld [vmem:[#allocation12 + $0x110] sm:$0xff]  ;;  %v9438_v0 = vld [vmem:[#allocation12 + $0x138] sm:$0xff]  ;;  %v15167_v8 = vcombine.low %v9425_v18, %v9429_v24 }
 0x6d3   :  { %12660 = vmatprep.subr.bf16.mxu0 %v15596_v11  ;;  %12832 = vmatprep.subr.bf16.mxu1 %v15598_v12  ;;  %v15644_v11 = vcombine.high %v9903_v9, %v9907_v10  ;;  %v15646_v12 = vcombine.high %v9904_v55, %v9908_v38  ;;  %v9437_v63 = vld [vmem:[#allocation12 + $0x130] sm:$0xff] }
 0x6d6   :  { %12661 = vmatpush1.bf16.msra.mxu0 %v15595_v2  ;;  %12833 = vmatpush1.bf16.msra.mxu1 %v15597_v21  ;;  %v15643_v2 = vcombine.low %v9903_v9, %v9907_v10  ;;  %v15645_v21 = vcombine.low %v9904_v55, %v9908_v38  ;;  %v9445_v9 = vld [vmem:[#allocation12 + $0x170] sm:$0xff]  ;;  %v9442_v10 = vld [vmem:[#allocation12 + $0x158] sm:$0xff]  ;;  %v15175_v38 = vcombine.low %v9433_v62, %v9437_v63 }
 0x6d7   :  { %12662 = vmatprep.subr.bf16.mxu0 %v15604_v20  ;;  %12834 = vmatprep.subr.bf16.mxu1 %v15606_v15  ;;  %v15144_v20 = vcombine.high %v9401_v14, %v9405_v17  ;;  %v15146_v15 = vcombine.high %v9402_v19, %v9406_v22  ;;  %v9446_v55 = vld [vmem:[#allocation12 + $0x178] sm:$0xff] }
 0x6da   :  { %12663 = vmatpush1.bf16.msra.mxu0 %v15603_v40  ;;  %12835 = vmatpush1.bf16.msra.mxu1 %v15605_v44  ;;  %v15143_v40 = vcombine.low %v9401_v14, %v9405_v17  ;;  %v15145_v44 = vcombine.low %v9402_v19, %v9406_v22  ;;  %v9453_v14 = vld [vmem:[#allocation12 + $0x1b0] sm:$0xff]  ;;  %v9450_v17 = vld [vmem:[#allocation12 + $0x198] sm:$0xff] }
 0x6db   :  { %12664 = vmatprep.subr.bf16.mxu0 %v15612_v45  ;;  %12836 = vmatprep.subr.bf16.mxu1 %v15614_v29  ;;  %v15152_v45 = vcombine.high %v9409_v27, %v9413_v33  ;;  %v15154_v29 = vcombine.high %v9410_v34, %v9414_v26  ;;  %v9454_v19 = vld [vmem:[#allocation12 + $0x1b8] sm:$0xff] }
 0x6de   :  { %12665 = vmatpush1.bf16.msra.mxu0 %v15611_v50  ;;  %12837 = vmatpush1.bf16.msra.mxu1 %v15613_v5  ;;  %v15151_v50 = vcombine.low %v9409_v27, %v9413_v33  ;;  %v15153_v5 = vcombine.low %v9410_v34, %v9414_v26  ;;  %v9461_v27 = vld [vmem:[#allocation12 + $0x1f0] sm:$0xff]  ;;  %v9458_v33 = vld [vmem:[#allocation12 + $0x1d8] sm:$0xff] }
 0x6df   :  { %12666 = vmatprep.subr.bf16.mxu0 %v15620_v41  ;;  %12838 = vmatprep.subr.bf16.mxu1 %v15622_v51  ;;  %v15160_v41 = vcombine.high %v9417_v47, %v9421_v13  ;;  %v15162_v51 = vcombine.high %v9418_v58, %v9422_v48  ;;  %v9462_v34 = vld [vmem:[#allocation12 + $0x1f8] sm:$0xff] }
 0x6e2   :  { %12667 = vmatpush1.bf16.msra.mxu0 %v15619_v56  ;;  %12839 = vmatpush1.bf16.msra.mxu1 %v15621_v57  ;;  %v15159_v56 = vcombine.low %v9417_v47, %v9421_v13  ;;  %v15161_v57 = vcombine.low %v9418_v58, %v9422_v48  ;;  %v9469_v47 = vld [vmem:[#allocation12 + $0x230] sm:$0xff]  ;;  %v9466_v13 = vld [vmem:[#allocation12 + $0x218] sm:$0xff] }
 0x6e3   :  { %12668 = vmatprep.subr.bf16.mxu0 %v15628_v59  ;;  %12840 = vmatprep.subr.bf16.mxu1 %v15630_v61  ;;  %v15168_v59 = vcombine.high %v9425_v18, %v9429_v24  ;;  %v15170_v61 = vcombine.high %v9426_v16, %v9430_v53  ;;  %v9470_v58 = vld [vmem:[#allocation12 + $0x238] sm:$0xff]  ;;  %v9477_v18 = vld [vmem:[#allocation12 + $0x270] sm:$0xff] }
 0x6e4   :  { %v9474_v24 = vld [vmem:[#allocation12 + $0x258] sm:$0xff] }
 0x6e6   :  { %12669 = vmatpush1.bf16.msra.mxu0 %v15627_v28  ;;  %12841 = vmatpush1.bf16.msra.mxu1 %v15629_v31  ;;  %v15169_v28 = vcombine.low %v9426_v16, %v9430_v53  ;;  %v15176_v31 = vcombine.high %v9433_v62, %v9437_v63  ;;  %v9478_v16 = vld [vmem:[#allocation12 + $0x278] sm:$0xff]  ;;  %v9485_v62 = vld [vmem:[#allocation12 + $0x2b0] sm:$0xff] }
 0x6e7   :  { %12670 = vmatprep.subr.bf16.mxu0 %v15636_v1  ;;  %12842 = vmatprep.subr.bf16.mxu1 %v15638_v6  ;;  %v9441_v6 = vld [vmem:[#allocation12 + $0x150] sm:$0xff]  ;;  %v9482_v63 = vld [vmem:[#allocation12 + $0x298] sm:$0xff] }
 0x6e8   :  { %v15183_v22 = vcombine.low %v9441_v6, %v9445_v9 }
 0x6ea   :  { %12671 = vmatpush1.bf16.msra.mxu0 %v15635_v4  ;;  %12843 = vmatpush1.bf16.msra.mxu1 %v15637_v46  ;;  %v15184_v46 = vcombine.high %v9441_v6, %v9445_v9  ;;  %v9493_v6 = vld [vmem:[#allocation12 + $0x2f0] sm:$0xff]  ;;  %v9490_v9 = vld [vmem:[#allocation12 + $0x2d8] sm:$0xff] }
 0x6eb   :  { %12672 = vmatprep.subr.bf16.mxu0 %v15644_v11  ;;  %12844 = vmatprep.subr.bf16.mxu1 %v15646_v12  ;;  %v15186_v11 = vcombine.high %v9442_v10, %v9446_v55  ;;  %v9449_v12 = vld [vmem:[#allocation12 + $0x190] sm:$0xff] }
 0x6ec   :  { %v15191_v26 = vcombine.low %v9449_v12, %v9453_v14 }
 0x6ee   :  { %12673 = vmatpush1.bf16.msra.mxu0 %v15643_v2  ;;  %12845 = vmatpush1.bf16.msra.mxu1 %v15645_v21  ;;  %v15185_v2 = vcombine.low %v9442_v10, %v9446_v55  ;;  %v15192_v21 = vcombine.high %v9449_v12, %v9453_v14  ;;  %v9494_v10 = vld [vmem:[#allocation12 + $0x2f8] sm:$0xff]  ;;  %v9501_v12 = vld [vmem:[#allocation12 + $0x330] sm:$0xff] }
 0x6ef   :  { %12857 = vmatprep.subr.bf16.mxu0 %v15144_v20  ;;  %13029 = vmatprep.subr.bf16.mxu1 %v15146_v15  ;;  %v15194_v20 = vcombine.high %v9450_v17, %v9454_v19  ;;  %v9457_v15 = vld [vmem:[#allocation12 + $0x1d0] sm:$0xff]  ;;  %v9498_v14 = vld [vmem:[#allocation12 + $0x318] sm:$0xff] }
 0x6f0   :  { %v15199_v48 = vcombine.low %v9457_v15, %v9461_v27 }
 0x6f1   :  { %12675 = vmatmul.mubr.bf16.vlgmr.msra.gmra.mrb[24].mxu0 %v16800_v60  ;;  %12847 = vmatmul.mubr.bf16.vlgmr.msra.gmra.mrb[24].mxu1 %v16800_v60 }
 0x6f2   :  { %12858 = vmatpush1.bf16.msra.mxu0 %v15143_v40  ;;  %12889 = vmatprep.mubr.bf16.mxu0 %v16768_v42  ;;  %v15193_v40 = vcombine.low %v9450_v17, %v9454_v19  ;;  %v9502_v17 = vld [vmem:[#allocation12 + $0x338] sm:$0xff] }
 0x6f3   :  { %13030 = vmatpush1.bf16.msra.mxu1 %v15145_v44  ;;  %13061 = vmatprep.mubr.bf16.mxu1 %v16768_v42  ;;  %v9434_v42 = vld [vmem:[#allocation12 + $0x118] sm:$0xff]  ;;  %v15200_v44 = vcombine.high %v9457_v15, %v9461_v27  ;;  %v9509_v15 = vld [vmem:[#allocation12 + $0x370] sm:$0xff] }
 0x6f4   :  { %12859 = vmatprep.subr.bf16.mxu0 %v15152_v45  ;;  %13031 = vmatprep.subr.bf16.mxu1 %v15154_v29  ;;  %v15178_v1 = vcombine.high %v9434_v42, %v9438_v0  ;;  %v15177_v4 = vcombine.low %v9434_v42, %v9438_v0  ;;  %v15202_v45 = vcombine.high %v9458_v33, %v9462_v34  ;;  %v9465_v29 = vld [vmem:[#allocation12 + $0x210] sm:$0xff]  ;;  %v9486_v42 = vld [vmem:[#allocation12 + $0x2b8] sm:$0xff] }
 0x6f5   :  { %v15207_v53 = vcombine.low %v9465_v29, %v9469_v47  ;;  %v9506_v27 = vld [vmem:[#allocation12 + $0x358] sm:$0xff] }
 0x6f6   :  { %12860 = vmatpush1.bf16.msra.mxu0 %v15151_v50  ;;  %v15201_v50 = vcombine.low %v9458_v33, %v9462_v34  ;;  %v9510_v33 = vld [vmem:[#allocation12 + $0x378] sm:$0xff] }
 0x6f7   :  { %13032 = vmatpush1.bf16.msra.mxu1 %v15153_v5  ;;  %12861 = vmatprep.subr.bf16.mxu0 %v15160_v41  ;;  %v15208_v5 = vcombine.high %v9465_v29, %v9469_v47  ;;  %v15210_v41 = vcombine.high %v9466_v13, %v9470_v58  ;;  %v9517_v29 = vld [vmem:[#allocation12 + $0x3b0] sm:$0xff]  ;;  %v9514_v47 = vld [vmem:[#allocation12 + $0x398] sm:$0xff] }
 0x6f8   :  { %13033 = vmatprep.subr.bf16.mxu1 %v15162_v51  ;;  %v9473_v51 = vld [vmem:[#allocation12 + $0x250] sm:$0xff] }
 0x6f9   :  { %v15215_v0 = vcombine.low %v9473_v51, %v9477_v18 }
 0x6fa   :  { %12862 = vmatpush1.bf16.msra.mxu0 %v15159_v56  ;;  %v15209_v56 = vcombine.low %v9466_v13, %v9470_v58  ;;  %v9518_v13 = vld [vmem:[#allocation12 + $0x3b8] sm:$0xff] }
 0x6fb   :  { %13034 = vmatpush1.bf16.msra.mxu1 %v15161_v57  ;;  %12863 = vmatprep.subr.bf16.mxu0 %v15168_v59  ;;  %v15216_v57 = vcombine.high %v9473_v51, %v9477_v18  ;;  %v15218_v59 = vcombine.high %v9474_v24, %v9478_v16  ;;  %v9525_v51 = vld [vmem:[#allocation12 + $0x3f0] sm:$0xff]  ;;  %v9522_v18 = vld [vmem:[#allocation12 + $0x3d8] sm:$0xff] }
 0x6fc   :  { %13035 = vmatprep.subr.bf16.mxu1 %v15170_v61  ;;  %v9481_v61 = vld [vmem:[#allocation12 + $0x290] sm:$0xff] }
 0x6fd   :  { %v15223_v55 = vcombine.low %v9481_v61, %v9485_v62 }
 0x6fe   :  { %12864 = vmatpush1.bf16.msra.mxu0 %v15167_v8  ;;  %v15217_v8 = vcombine.low %v9474_v24, %v9478_v16  ;;  %v9526_v24 = vld [vmem:[#allocation12 + $0x3f8] sm:$0xff] }
 0x6ff   :  { %13036 = vmatpush1.bf16.msra.mxu1 %v15169_v28  ;;  %12865 = vmatprep.subr.bf16.mxu0 %v15176_v31  ;;  %v15224_v28 = vcombine.high %v9481_v61, %v9485_v62  ;;  %v15226_v31 = vcombine.high %v9482_v63, %v9486_v42  ;;  %v9533_v61 = vld [vmem:[#allocation12 + $0x430] sm:$0xff]  ;;  %v9530_v62 = vld [vmem:[#allocation12 + $0x418] sm:$0xff] }
 0x700   :  { %13037 = vmatprep.subr.bf16.mxu1 %v15178_v1  ;;  %v9489_v1 = vld [vmem:[#allocation12 + $0x2d0] sm:$0xff] }
 0x701   :  { %v15231_v19 = vcombine.low %v9489_v1, %v9493_v6 }
 0x702   :  { %12866 = vmatpush1.bf16.msra.mxu0 %v15175_v38  ;;  %v15225_v38 = vcombine.low %v9482_v63, %v9486_v42  ;;  %v9534_v63 = vld [vmem:[#allocation12 + $0x438] sm:$0xff] }
 0x703   :  { %13038 = vmatpush1.bf16.msra.mxu1 %v15177_v4  ;;  %12867 = vmatprep.subr.bf16.mxu0 %v15184_v46  ;;  %v15232_v4 = vcombine.high %v9489_v1, %v9493_v6  ;;  %v15234_v46 = vcombine.high %v9490_v9, %v9494_v10  ;;  %v9541_v1 = vld [vmem:[#allocation12 + $0x470] sm:$0xff] }
 0x704   :  { %13039 = vmatprep.subr.bf16.mxu1 %v15186_v11  ;;  %v9497_v11 = vld [vmem:[#allocation12 + $0x310] sm:$0xff] }
 0x705   :  { %v15239_v34 = vcombine.low %v9497_v11, %v9501_v12 }
 0x706   :  { %12868 = vmatpush1.bf16.msra.mxu0 %v15183_v22  ;;  %v15233_v22 = vcombine.low %v9490_v9, %v9494_v10  ;;  %v9538_v9 = vld [vmem:[#allocation12 + $0x458] sm:$0xff] }
 0x707   :  { %13040 = vmatpush1.bf16.msra.mxu1 %v15185_v2  ;;  %12869 = vmatprep.subr.bf16.mxu0 %v15192_v21  ;;  %v15240_v2 = vcombine.high %v9497_v11, %v9501_v12  ;;  %v15242_v21 = vcombine.high %v9498_v14, %v9502_v17  ;;  %v9542_v10 = vld [vmem:[#allocation12 + $0x478] sm:$0xff] }
 0x708   :  { %13041 = vmatprep.subr.bf16.mxu1 %v15194_v20  ;;  %v9505_v20 = vld [vmem:[#allocation12 + $0x350] sm:$0xff]  ;;  %v15282_v11 = vcombine.high %v9538_v9, %v9542_v10  ;;  %v9546_v12 = vld [vmem:[#allocation12 + $0x498] sm:$0xff] }
 0x709   :  { %v15247_v58 = vcombine.low %v9505_v20, %v9509_v15 }
 0x70a   :  { %12870 = vmatpush1.bf16.msra.mxu0 %v15191_v26  ;;  %v15241_v26 = vcombine.low %v9498_v14, %v9502_v17  ;;  %v9550_v14 = vld [vmem:[#allocation12 + $0x4b8] sm:$0xff] }
 0x70b   :  { %13042 = vmatpush1.bf16.msra.mxu1 %v15193_v40  ;;  %12871 = vmatprep.subr.bf16.mxu0 %v15200_v44  ;;  %v15248_v40 = vcombine.high %v9505_v20, %v9509_v15  ;;  %v15250_v44 = vcombine.high %v9506_v27, %v9510_v33  ;;  %v9557_v20 = vld [vmem:[#allocation12 + $0x4f0] sm:$0xff]  ;;  %v9554_v15 = vld [vmem:[#allocation12 + $0x4d8] sm:$0xff] }
 0x70c   :  { %13043 = vmatprep.subr.bf16.mxu1 %v15202_v45  ;;  %v9513_v45 = vld [vmem:[#allocation12 + $0x390] sm:$0xff] }
 0x70d   :  { %v15255_v16 = vcombine.low %v9513_v45, %v9517_v29 }
 0x70e   :  { %12872 = vmatpush1.bf16.msra.mxu0 %v15199_v48  ;;  %v15249_v48 = vcombine.low %v9506_v27, %v9510_v33  ;;  %v9558_v27 = vld [vmem:[#allocation12 + $0x4f8] sm:$0xff] }
 0x70f   :  { %13044 = vmatpush1.bf16.msra.mxu1 %v15201_v50  ;;  %12873 = vmatprep.subr.bf16.mxu0 %v15208_v5  ;;  %v15256_v50 = vcombine.high %v9513_v45, %v9517_v29  ;;  %v15258_v5 = vcombine.high %v9514_v47, %v9518_v13  ;;  %v9562_v45 = vld [vmem:[#allocation12 + $0x518] sm:$0xff] }
 0x710   :  { %13045 = vmatprep.subr.bf16.mxu1 %v15210_v41  ;;  %v9521_v41 = vld [vmem:[#allocation12 + $0x3d0] sm:$0xff]  ;;  %v9566_v29 = vld [vmem:[#allocation12 + $0x538] sm:$0xff] }
 0x711   :  { %v15263_v42 = vcombine.low %v9521_v41, %v9525_v51 }
 0x712   :  { %12874 = vmatpush1.bf16.msra.mxu0 %v15207_v53  ;;  %v15257_v53 = vcombine.low %v9514_v47, %v9518_v13  ;;  %v15297_v47 = vcombine.low %v9554_v15, %v9558_v27 }
 0x713   :  { %13046 = vmatpush1.bf16.msra.mxu1 %v15209_v56  ;;  %12875 = vmatprep.subr.bf16.mxu0 %v15216_v57  ;;  %v15264_v56 = vcombine.high %v9521_v41, %v9525_v51  ;;  %v15266_v57 = vcombine.high %v9522_v18, %v9526_v24  ;;  %v9574_v41 = vld [vmem:[#allocation12 + $0x578] sm:$0xff] }
 0x714   :  { %13047 = vmatprep.subr.bf16.mxu1 %v15218_v59  ;;  %v9529_v59 = vld [vmem:[#allocation12 + $0x410] sm:$0xff] }
 0x715   :  { %v15271_v6 = vcombine.low %v9529_v59, %v9533_v61 }
 0x716   :  { %12876 = vmatpush1.bf16.msra.mxu0 %v15215_v0  ;;  %v15265_v0 = vcombine.low %v9522_v18, %v9526_v24  ;;  %v15305_v18 = vcombine.low %v9562_v45, %v9566_v29 }
 0x717   :  { %13048 = vmatpush1.bf16.msra.mxu1 %v15217_v8  ;;  %12877 = vmatprep.subr.bf16.mxu0 %v15224_v28  ;;  %v15272_v8 = vcombine.high %v9529_v59, %v9533_v61  ;;  %v15274_v28 = vcombine.high %v9530_v62, %v9534_v63  ;;  %v9582_v59 = vld [vmem:[#allocation12 + $0x5b8] sm:$0xff] }
 0x718   :  { %13049 = vmatprep.subr.bf16.mxu1 %v15226_v31  ;;  %v9537_v31 = vld [vmem:[#allocation12 + $0x450] sm:$0xff] }
 0x719   :  { %v15279_v17 = vcombine.low %v9537_v31, %v9541_v1 }
 0x71a   :  { %12878 = vmatpush1.bf16.msra.mxu0 %v15223_v55  ;;  %v15273_v55 = vcombine.low %v9530_v62, %v9534_v63 }
 0x71b   :  { %13050 = vmatpush1.bf16.msra.mxu1 %v15225_v38  ;;  %12879 = vmatprep.subr.bf16.mxu0 %v15232_v4  ;;  %v15280_v38 = vcombine.high %v9537_v31, %v9541_v1  ;;  %v9545_v4 = vld [vmem:[#allocation12 + $0x490] sm:$0xff]  ;;  %v9590_v31 = vld [vmem:[#allocation12 + $0x5f8] sm:$0xff] }
 0x71c   :  { %13051 = vmatprep.subr.bf16.mxu1 %v15234_v46  ;;  %v9549_v46 = vld [vmem:[#allocation12 + $0x4b0] sm:$0xff] }
 0x71d   :  { %v15287_v33 = vcombine.low %v9545_v4, %v9549_v46 }
 0x71e   :  { %12880 = vmatpush1.bf16.msra.mxu0 %v15231_v19  ;;  %v15281_v19 = vcombine.low %v9538_v9, %v9542_v10 }
 0x71f   :  { %13052 = vmatpush1.bf16.msra.mxu1 %v15233_v22  ;;  %12881 = vmatprep.subr.bf16.mxu0 %v15240_v2  ;;  %v15288_v22 = vcombine.high %v9545_v4, %v9549_v46  ;;  %v15290_v2 = vcombine.high %v9546_v12, %v9550_v14  ;;  %v9594_v4 = vld [vmem:[#allocation12 + $0x618] sm:$0xff] }
 0x720   :  { %13053 = vmatprep.subr.bf16.mxu1 %v15242_v21  ;;  %v9553_v21 = vld [vmem:[#allocation12 + $0x4d0] sm:$0xff]  ;;  %v9598_v46 = vld [vmem:[#allocation12 + $0x638] sm:$0xff] }
 0x722   :  { %12882 = vmatpush1.bf16.msra.mxu0 %v15239_v34  ;;  %v15296_v34 = vcombine.high %v9553_v21, %v9557_v20 }
 0x723   :  { %13054 = vmatpush1.bf16.msra.mxu1 %v15241_v26  ;;  %12883 = vmatprep.subr.bf16.mxu0 %v15248_v40  ;;  %v15298_v26 = vcombine.high %v9554_v15, %v9558_v27  ;;  %v9561_v40 = vld [vmem:[#allocation12 + $0x510] sm:$0xff]  ;;  %v15337_v15 = vcombine.low %v9594_v4, %v9598_v46 }
 0x724   :  { %13055 = vmatprep.subr.bf16.mxu1 %v15250_v44  ;;  %v9565_v44 = vld [vmem:[#allocation12 + $0x530] sm:$0xff] }
 0x725   :  { %v15304_v13 = vcombine.high %v9561_v40, %v9565_v44  ;;  %v15303_v51 = vcombine.low %v9561_v40, %v9565_v44  ;;  %v9614_v40 = vld [vmem:[#allocation12 + $0x6b8] sm:$0xff] }
 0x726   :  { %12884 = vmatpush1.bf16.msra.mxu0 %v15247_v58  ;;  %v15306_v58 = vcombine.high %v9562_v45, %v9566_v29 }
 0x727   :  { %13056 = vmatpush1.bf16.msra.mxu1 %v15249_v48  ;;  %12885 = vmatprep.subr.bf16.mxu0 %v15256_v50  ;;  %v9569_v48 = vld [vmem:[#allocation12 + $0x550] sm:$0xff] }
 0x728   :  { %13057 = vmatprep.subr.bf16.mxu1 %v15258_v5  ;;  %v9573_v50 = vld [vmem:[#allocation12 + $0x570] sm:$0xff]  ;;  %v9570_v5 = vld [vmem:[#allocation12 + $0x558] sm:$0xff] }
 0x729   :  { %v15312_v24 = vcombine.high %v9569_v48, %v9573_v50  ;;  %v15311_v61 = vcombine.low %v9569_v48, %v9573_v50  ;;  %v15313_v62 = vcombine.low %v9570_v5, %v9574_v41  ;;  %v9622_v48 = vld [vmem:[#allocation12 + $0x6f8] sm:$0xff] }
 0x72a   :  { %12886 = vmatpush1.bf16.msra.mxu0 %v15255_v16  ;;  %v15314_v16 = vcombine.high %v9570_v5, %v9574_v41 }
 0x72b   :  { %13058 = vmatpush1.bf16.msra.mxu1 %v15257_v53  ;;  %12887 = vmatprep.subr.bf16.mxu0 %v15264_v56  ;;  %v9577_v53 = vld [vmem:[#allocation12 + $0x590] sm:$0xff] }
 0x72c   :  { %13059 = vmatprep.subr.bf16.mxu1 %v15266_v57  ;;  %v9581_v56 = vld [vmem:[#allocation12 + $0x5b0] sm:$0xff]  ;;  %v9578_v57 = vld [vmem:[#allocation12 + $0x598] sm:$0xff] }
 0x72d   :  { %v15320_v63 = vcombine.high %v9577_v53, %v9581_v56  ;;  %v15319_v1 = vcombine.low %v9577_v53, %v9581_v56  ;;  %v9630_v53 = vld [vmem:[#allocation12 + $0x738] sm:$0xff] }
 0x72e   :  { %12888 = vmatpush1.bf16.msra.mxu0 %v15263_v42  ;;  %v15322_v42 = vcombine.high %v9578_v57, %v9582_v59 }
 0x72f   :  { %13060 = vmatpush1.bf16.msra.mxu1 %v15265_v0  ;;  %12900 = vmatprep.subr.bf16.mxu0 %v15272_v8  ;;  %v9585_v0 = vld [vmem:[#allocation12 + $0x5d0] sm:$0xff] }
 0x730   :  { %13072 = vmatprep.subr.bf16.mxu1 %v15274_v28  ;;  %v9589_v8 = vld [vmem:[#allocation12 + $0x5f0] sm:$0xff]  ;;  %v9586_v28 = vld [vmem:[#allocation12 + $0x5d8] sm:$0xff] }
 0x731   :  { %12890 = vmatmul.mubr.bf16.vlgmr.msra.gmra.mrb[28].mxu0 %v16764_v37  ;;  %v15328_v9 = vcombine.high %v9585_v0, %v9589_v8  ;;  %v15330_v10 = vcombine.high %v9586_v28, %v9590_v31 }
 0x732   :  { %13062 = vmatmul.mubr.bf16.vlgmr.msra.gmra.mrb[28].mxu1 %v16764_v37  ;;  %12901 = vmatpush1.bf16.msra.mxu0 %v15271_v6  ;;  %v15289_v37 = vcombine.low %v9546_v12, %v9550_v14  ;;  %v15321_v6 = vcombine.low %v9578_v57, %v9582_v59  ;;  %v15329_v12 = vcombine.low %v9586_v28, %v9590_v31 }
 0x733   :  { %12932 = vmatprep.mubr.bf16.mxu0 %v16770_v43  ;;  %13073 = vmatpush1.bf16.msra.mxu1 %v15273_v55  ;;  %v9593_v55 = vld [vmem:[#allocation12 + $0x610] sm:$0xff] }
 0x734   :  { %13104 = vmatprep.mubr.bf16.mxu1 %v16770_v43  ;;  %12902 = vmatprep.subr.bf16.mxu0 %v15280_v38  ;;  %v15295_v43 = vcombine.low %v9553_v21, %v9557_v20  ;;  %v9597_v38 = vld [vmem:[#allocation12 + $0x630] sm:$0xff]  ;;  %v9606_v21 = vld [vmem:[#allocation12 + $0x678] sm:$0xff] }
 0x735   :  { %13074 = vmatprep.subr.bf16.mxu1 %v15282_v11  ;;  %v15327_v11 = vcombine.low %v9585_v0, %v9589_v8  ;;  %v15336_v14 = vcombine.high %v9593_v55, %v9597_v38  ;;  %v15335_v20 = vcombine.low %v9593_v55, %v9597_v38  ;;  %v9638_v0 = vld [vmem:[#allocation12 + $0x778] sm:$0xff] }
 0x736   :  { %12903 = vmatpush1.bf16.msra.mxu0 %v15279_v17  ;;  %v15338_v17 = vcombine.high %v9594_v4, %v9598_v46  ;;  %v9646_v55 = vld [vmem:[#allocation12 + $0x7b8] sm:$0xff] }
 0x737   :  { %13075 = vmatpush1.bf16.msra.mxu1 %v15281_v19  ;;  %12904 = vmatprep.subr.bf16.mxu0 %v15288_v22  ;;  %v9601_v19 = vld [vmem:[#allocation12 + $0x650] sm:$0xff] }
 0x738   :  { %13076 = vmatprep.subr.bf16.mxu1 %v15290_v2  ;;  %v9605_v22 = vld [vmem:[#allocation12 + $0x670] sm:$0xff]  ;;  %v9602_v2 = vld [vmem:[#allocation12 + $0x658] sm:$0xff] }
 0x739   :  { %v15344_v27 = vcombine.high %v9601_v19, %v9605_v22  ;;  %v15343_v44 = vcombine.low %v9601_v19, %v9605_v22  ;;  %v15345_v45 = vcombine.low %v9602_v2, %v9606_v21  ;;  %v9654_v19 = vld [vmem:[#allocation12 + $0x7f8] sm:$0xff] }
 0x73a   :  { %12905 = vmatpush1.bf16.msra.mxu0 %v15287_v33  ;;  %v15346_v33 = vcombine.high %v9602_v2, %v9606_v21 }
 0x73b   :  { %13077 = vmatpush1.bf16.msra.mxu1 %v15289_v37  ;;  %12906 = vmatprep.subr.bf16.mxu0 %v15296_v34  ;;  %v9609_v37 = vld [vmem:[#allocation12 + $0x690] sm:$0xff] }
 0x73c   :  { %13078 = vmatprep.subr.bf16.mxu1 %v15298_v26  ;;  %v9613_v34 = vld [vmem:[#allocation12 + $0x6b0] sm:$0xff]  ;;  %v9610_v26 = vld [vmem:[#allocation12 + $0x698] sm:$0xff] }
 0x73d   :  { %v15352_v29 = vcombine.high %v9609_v37, %v9613_v34  ;;  %v15351_v50 = vcombine.low %v9609_v37, %v9613_v34  ;;  %v15353_v5 = vcombine.low %v9610_v26, %v9614_v40  ;;  %v9662_v37 = vld [vmem:[#allocation12 + $0x838] sm:$0xff] }
 0x73e   :  { %12907 = vmatpush1.bf16.msra.mxu0 %v15295_v43  ;;  %v15354_v43 = vcombine.high %v9610_v26, %v9614_v40 }
 0x73f   :  { %13079 = vmatpush1.bf16.msra.mxu1 %v15297_v47  ;;  %12908 = vmatprep.subr.bf16.mxu0 %v15304_v13  ;;  %v9617_v47 = vld [vmem:[#allocation12 + $0x6d0] sm:$0xff] }
 0x740   :  { %13080 = vmatprep.subr.bf16.mxu1 %v15306_v58  ;;  %v9621_v13 = vld [vmem:[#allocation12 + $0x6f0] sm:$0xff]  ;;  %v9618_v58 = vld [vmem:[#allocation12 + $0x6d8] sm:$0xff] }
 0x741   :  { %v15360_v41 = vcombine.high %v9617_v47, %v9621_v13  ;;  %v15359_v56 = vcombine.low %v9617_v47, %v9621_v13  ;;  %v15361_v57 = vcombine.low %v9618_v58, %v9622_v48  ;;  %v9666_v47 = vld [vmem:[#allocation12 + $0x858] sm:$0xff] }
 0x742   :  { %12909 = vmatpush1.bf16.msra.mxu0 %v15303_v51  ;;  %v15362_v51 = vcombine.high %v9618_v58, %v9622_v48  ;;  %v9670_v13 = vld [vmem:[#allocation12 + $0x878] sm:$0xff] }
 0x743   :  { %13081 = vmatpush1.bf16.msra.mxu1 %v15305_v18  ;;  %12910 = vmatprep.subr.bf16.mxu0 %v15312_v24  ;;  %v9625_v18 = vld [vmem:[#allocation12 + $0x710] sm:$0xff] }
 0x744   :  { %13082 = vmatprep.subr.bf16.mxu1 %v15314_v16  ;;  %v9629_v24 = vld [vmem:[#allocation12 + $0x730] sm:$0xff]  ;;  %v9626_v16 = vld [vmem:[#allocation12 + $0x718] sm:$0xff] }
 0x745   :  { %v15368_v59 = vcombine.high %v9625_v18, %v9629_v24  ;;  %v15367_v8 = vcombine.low %v9625_v18, %v9629_v24  ;;  %v15369_v28 = vcombine.low %v9626_v16, %v9630_v53  ;;  %v9678_v18 = vld [vmem:[#allocation12 + $0x8b8] sm:$0xff] }
 0x746   :  { %12911 = vmatpush1.bf16.msra.mxu0 %v15311_v61  ;;  %v15370_v61 = vcombine.high %v9626_v16, %v9630_v53  ;;  %v15409_v16 = vcombine.low %v9666_v47, %v9670_v13 }
 0x747   :  { %13083 = vmatpush1.bf16.msra.mxu1 %v15313_v62  ;;  %12912 = vmatprep.subr.bf16.mxu0 %v15320_v63  ;;  %v9633_v62 = vld [vmem:[#allocation12 + $0x750] sm:$0xff] }
 0x748   :  { %13084 = vmatprep.subr.bf16.mxu1 %v15322_v42  ;;  %v9637_v63 = vld [vmem:[#allocation12 + $0x770] sm:$0xff]  ;;  %v9634_v42 = vld [vmem:[#allocation12 + $0x758] sm:$0xff] }
 0x749   :  { %v15376_v31 = vcombine.high %v9633_v62, %v9637_v63  ;;  %v15375_v38 = vcombine.low %v9633_v62, %v9637_v63  ;;  %v15377_v4 = vcombine.low %v9634_v42, %v9638_v0  ;;  %v9686_v62 = vld [vmem:[#allocation12 + $0x8f8] sm:$0xff] }
 0x74a   :  { %12913 = vmatpush1.bf16.msra.mxu0 %v15319_v1  ;;  %v15378_v1 = vcombine.high %v9634_v42, %v9638_v0 }
 0x74b   :  { %13085 = vmatpush1.bf16.msra.mxu1 %v15321_v6  ;;  %12914 = vmatprep.subr.bf16.mxu0 %v15328_v9  ;;  %v9641_v6 = vld [vmem:[#allocation12 + $0x790] sm:$0xff] }
 0x74c   :  { %13086 = vmatprep.subr.bf16.mxu1 %v15330_v10  ;;  %v9645_v9 = vld [vmem:[#allocation12 + $0x7b0] sm:$0xff]  ;;  %v9642_v10 = vld [vmem:[#allocation12 + $0x798] sm:$0xff] }
 0x74d   :  { %v15384_v46 = vcombine.high %v9641_v6, %v9645_v9  ;;  %v15383_v22 = vcombine.low %v9641_v6, %v9645_v9  ;;  %v15385_v2 = vcombine.low %v9642_v10, %v9646_v55 }
 0x74e   :  { %12915 = vmatpush1.bf16.msra.mxu0 %v15327_v11  ;;  %v15386_v11 = vcombine.high %v9642_v10, %v9646_v55  ;;  %v9697_v55 = vld [vmem:[#allocation12 + $0x950] sm:$0xff] }
 0x74f   :  { %13087 = vmatpush1.bf16.msra.mxu1 %v15329_v12  ;;  %12916 = vmatprep.subr.bf16.mxu0 %v15336_v14  ;;  %v9649_v12 = vld [vmem:[#allocation12 + $0x7d0] sm:$0xff] }
 0x750   :  { %13088 = vmatprep.subr.bf16.mxu1 %v15338_v17  ;;  %v9653_v14 = vld [vmem:[#allocation12 + $0x7f0] sm:$0xff]  ;;  %v9650_v17 = vld [vmem:[#allocation12 + $0x7d8] sm:$0xff] }
 0x751   :  { %v15392_v21 = vcombine.high %v9649_v12, %v9653_v14  ;;  %v15391_v34 = vcombine.low %v9649_v12, %v9653_v14  ;;  %v15393_v26 = vcombine.low %v9650_v17, %v9654_v19 }
 0x752   :  { %12917 = vmatpush1.bf16.msra.mxu0 %v15335_v20  ;;  %v15394_v20 = vcombine.high %v9650_v17, %v9654_v19  ;;  %v9705_v19 = vld [vmem:[#allocation12 + $0x990] sm:$0xff] }
 0x753   :  { %13089 = vmatpush1.bf16.msra.mxu1 %v15337_v15  ;;  %12918 = vmatprep.subr.bf16.mxu0 %v15344_v27  ;;  %v9657_v15 = vld [vmem:[#allocation12 + $0x810] sm:$0xff] }
 0x754   :  { %13090 = vmatprep.subr.bf16.mxu1 %v15346_v33  ;;  %v9661_v27 = vld [vmem:[#allocation12 + $0x830] sm:$0xff]  ;;  %v9658_v33 = vld [vmem:[#allocation12 + $0x818] sm:$0xff] }
 0x755   :  { %v15400_v40 = vcombine.high %v9657_v15, %v9661_v27  ;;  %v15401_v58 = vcombine.low %v9658_v33, %v9662_v37 }
 0x756   :  { %12919 = vmatpush1.bf16.msra.mxu0 %v15343_v44  ;;  %v15402_v44 = vcombine.high %v9658_v33, %v9662_v37  ;;  %v9713_v37 = vld [vmem:[#allocation12 + $0x9d0] sm:$0xff] }
 0x757   :  { %13091 = vmatpush1.bf16.msra.mxu1 %v15345_v45  ;;  %12920 = vmatprep.subr.bf16.mxu0 %v15352_v29  ;;  %v9665_v45 = vld [vmem:[#allocation12 + $0x850] sm:$0xff] }
 0x758   :  { %13092 = vmatprep.subr.bf16.mxu1 %v15354_v43  ;;  %v9669_v29 = vld [vmem:[#allocation12 + $0x870] sm:$0xff]  ;;  %v15399_v43 = vcombine.low %v9657_v15, %v9661_v27 }
 0x759   :  { %v15408_v48 = vcombine.high %v9665_v45, %v9669_v29  ;;  %v15407_v24 = vcombine.low %v9665_v45, %v9669_v29 }
 0x75a   :  { %12921 = vmatpush1.bf16.msra.mxu0 %v15351_v50  ;;  %v9673_v50 = vld [vmem:[#allocation12 + $0x890] sm:$0xff] }
 0x75b   :  { %13093 = vmatpush1.bf16.msra.mxu1 %v15353_v5  ;;  %12922 = vmatprep.subr.bf16.mxu0 %v15360_v41  ;;  %v9677_v5 = vld [vmem:[#allocation12 + $0x8b0] sm:$0xff]  ;;  %v15410_v41 = vcombine.high %v9666_v47, %v9670_v13 }
 0x75c   :  { %13094 = vmatprep.subr.bf16.mxu1 %v15362_v51  ;;  %v9674_v51 = vld [vmem:[#allocation12 + $0x898] sm:$0xff]  ;;  %v15416_v53 = vcombine.high %v9673_v50, %v9677_v5  ;;  %v15415_v63 = vcombine.low %v9673_v50, %v9677_v5  ;;  %v9721_v47 = vld [vmem:[#allocation12 + $0xa10] sm:$0xff] }
 0x75d   :  { %v9725_v13 = vld [vmem:[#allocation12 + $0xa30] sm:$0xff] }
 0x75e   :  { %12923 = vmatpush1.bf16.msra.mxu0 %v15359_v56  ;;  %v15418_v56 = vcombine.high %v9674_v51, %v9678_v18 }
 0x75f   :  { %13095 = vmatpush1.bf16.msra.mxu1 %v15361_v57  ;;  %12924 = vmatprep.subr.bf16.mxu0 %v15368_v59  ;;  %v9681_v57 = vld [vmem:[#allocation12 + $0x8d0] sm:$0xff] }
 0x760   :  { %13096 = vmatprep.subr.bf16.mxu1 %v15370_v61  ;;  %v9685_v59 = vld [vmem:[#allocation12 + $0x8f0] sm:$0xff]  ;;  %v9682_v61 = vld [vmem:[#allocation12 + $0x8d8] sm:$0xff] }
 0x761   :  { %v15424_v42 = vcombine.high %v9681_v57, %v9685_v59  ;;  %v15426_v0 = vcombine.high %v9682_v61, %v9686_v62  ;;  %v15425_v6 = vcombine.low %v9682_v61, %v9686_v62  ;;  %v9737_v62 = vld [vmem:[#allocation12 + $0xa90] sm:$0xff] }
 0x762   :  { %12925 = vmatpush1.bf16.msra.mxu0 %v15367_v8  ;;  %v9689_v8 = vld [vmem:[#allocation12 + $0x910] sm:$0xff] }
 0x763   :  { %13097 = vmatpush1.bf16.msra.mxu1 %v15369_v28  ;;  %12926 = vmatprep.subr.bf16.mxu0 %v15376_v31  ;;  %v9693_v28 = vld [vmem:[#allocation12 + $0x930] sm:$0xff]  ;;  %v9690_v31 = vld [vmem:[#allocation12 + $0x918] sm:$0xff] }
 0x764   :  { %13098 = vmatprep.subr.bf16.mxu1 %v15378_v1  ;;  %v9694_v1 = vld [vmem:[#allocation12 + $0x938] sm:$0xff]  ;;  %v15432_v9 = vcombine.high %v9689_v8, %v9693_v28 }
 0x765   :  { %v15434_v10 = vcombine.high %v9690_v31, %v9694_v1  ;;  %v15433_v12 = vcombine.low %v9690_v31, %v9694_v1  ;;  %v9745_v1 = vld [vmem:[#allocation12 + $0xad0] sm:$0xff] }
 0x766   :  { %12927 = vmatpush1.bf16.msra.mxu0 %v15375_v38  ;;  %v9701_v38 = vld [vmem:[#allocation12 + $0x970] sm:$0xff] }
 0x767   :  { %13099 = vmatpush1.bf16.msra.mxu1 %v15377_v4  ;;  %12928 = vmatprep.subr.bf16.mxu0 %v15384_v46  ;;  %v9698_v4 = vld [vmem:[#allocation12 + $0x958] sm:$0xff]  ;;  %v15440_v14 = vcombine.high %v9697_v55, %v9701_v38 }
 0x768   :  { %13100 = vmatprep.subr.bf16.mxu1 %v15386_v11  ;;  %v9702_v46 = vld [vmem:[#allocation12 + $0x978] sm:$0xff]  ;;  %v15431_v11 = vcombine.low %v9689_v8, %v9693_v28 }
 0x769   :  { %v15442_v17 = vcombine.high %v9698_v4, %v9702_v46  ;;  %v15441_v15 = vcombine.low %v9698_v4, %v9702_v46  ;;  %v9753_v46 = vld [vmem:[#allocation12 + $0xb10] sm:$0xff] }
 0x76a   :  { %12929 = vmatpush1.bf16.msra.mxu0 %v15383_v22  ;;  %v9709_v22 = vld [vmem:[#allocation12 + $0x9b0] sm:$0xff] }
 0x76b   :  { %13101 = vmatpush1.bf16.msra.mxu1 %v15385_v2  ;;  %12930 = vmatprep.subr.bf16.mxu0 %v15392_v21  ;;  %v9706_v2 = vld [vmem:[#allocation12 + $0x998] sm:$0xff]  ;;  %v15448_v27 = vcombine.high %v9705_v19, %v9709_v22 }
 0x76c   :  { %13102 = vmatprep.subr.bf16.mxu1 %v15394_v20  ;;  %v9710_v21 = vld [vmem:[#allocation12 + $0x9b8] sm:$0xff]  ;;  %v15439_v20 = vcombine.low %v9697_v55, %v9701_v38 }
 0x76d   :  { %v15450_v33 = vcombine.high %v9706_v2, %v9710_v21  ;;  %v15449_v45 = vcombine.low %v9706_v2, %v9710_v21  ;;  %v9761_v21 = vld [vmem:[#allocation12 + $0xb50] sm:$0xff] }
 0x76e   :  { %12931 = vmatpush1.bf16.msra.mxu0 %v15391_v34  ;;  %v9717_v34 = vld [vmem:[#allocation12 + $0x9f0] sm:$0xff] }
 0x76f   :  { %13103 = vmatpush1.bf16.msra.mxu1 %v15393_v26  ;;  %12943 = vmatprep.subr.bf16.mxu0 %v15400_v40  ;;  %v9714_v26 = vld [vmem:[#allocation12 + $0x9d8] sm:$0xff]  ;;  %v15456_v29 = vcombine.high %v9713_v37, %v9717_v34  ;;  %v15455_v50 = vcombine.low %v9713_v37, %v9717_v34 }
 0x770   :  { %13115 = vmatprep.subr.bf16.mxu1 %v15402_v44  ;;  %v9718_v40 = vld [vmem:[#allocation12 + $0x9f8] sm:$0xff]  ;;  %v15447_v44 = vcombine.low %v9705_v19, %v9709_v22 }
 0x771   :  { %12933 = vmatmul.mubr.bf16.vlgmr.msra.gmra.mrb[28].mxu0 %v16766_v39  ;;  %v15457_v5 = vcombine.low %v9714_v26, %v9718_v40 }
 0x772   :  { %13105 = vmatmul.mubr.bf16.vlgmr.msra.gmra.mrb[28].mxu1 %v16766_v39  ;;  %12944 = vmatpush1.bf16.msra.mxu0 %v15399_v43  ;;  %v15417_v39 = vcombine.low %v9674_v51, %v9678_v18  ;;  %v15458_v43 = vcombine.high %v9714_v26, %v9718_v40  ;;  %v9729_v18 = vld [vmem:[#allocation12 + $0xa50] sm:$0xff] }
 0x773   :  { %12975 = vmatprep.mubr.bf16.mxu0 %v16802_v54  ;;  %13116 = vmatpush1.bf16.msra.mxu1 %v15401_v58  ;;  %v9722_v58 = vld [vmem:[#allocation12 + $0xa18] sm:$0xff]  ;;  %v9769_v40 = vld [vmem:[#allocation12 + $0xb90] sm:$0xff] }
 0x774   :  { %13147 = vmatprep.mubr.bf16.mxu1 %v16802_v54  ;;  %12945 = vmatprep.subr.bf16.mxu0 %v15408_v48  ;;  %v15423_v54 = vcombine.low %v9681_v57, %v9685_v59  ;;  %v9726_v48 = vld [vmem:[#allocation12 + $0xa38] sm:$0xff] }
 0x775   :  { %13117 = vmatprep.subr.bf16.mxu1 %v15410_v41  ;;  %v15464_v41 = vcombine.high %v9721_v47, %v9725_v13  ;;  %v15466_v51 = vcombine.high %v9722_v58, %v9726_v48  ;;  %v15465_v57 = vcombine.low %v9722_v58, %v9726_v48  ;;  %v9777_v48 = vld [vmem:[#allocation12 + $0xbd0] sm:$0xff] }
 0x776   :  { %12946 = vmatpush1.bf16.msra.mxu0 %v15407_v24  ;;  %v9733_v24 = vld [vmem:[#allocation12 + $0xa70] sm:$0xff] }
 0x777   :  { %13118 = vmatpush1.bf16.msra.mxu1 %v15409_v16  ;;  %12947 = vmatprep.subr.bf16.mxu0 %v15416_v53  ;;  %v9730_v16 = vld [vmem:[#allocation12 + $0xa58] sm:$0xff]  ;;  %v15472_v59 = vcombine.high %v9729_v18, %v9733_v24 }
 0x778   :  { %13119 = vmatprep.subr.bf16.mxu1 %v15418_v56  ;;  %v9734_v53 = vld [vmem:[#allocation12 + $0xa78] sm:$0xff]  ;;  %v15463_v56 = vcombine.low %v9721_v47, %v9725_v13 }
 0x779   :  { %v15474_v61 = vcombine.high %v9730_v16, %v9734_v53  ;;  %v15473_v8 = vcombine.low %v9730_v16, %v9734_v53  ;;  %v9785_v53 = vld [vmem:[#allocation12 + $0xc10] sm:$0xff] }
 0x77a   :  { %12948 = vmatpush1.bf16.msra.mxu0 %v15415_v63  ;;  %v9741_v63 = vld [vmem:[#allocation12 + $0xab0] sm:$0xff] }
 0x77b   :  { %13120 = vmatpush1.bf16.msra.mxu1 %v15417_v39  ;;  %12949 = vmatprep.subr.bf16.mxu0 %v15424_v42  ;;  %v9738_v39 = vld [vmem:[#allocation12 + $0xa98] sm:$0xff]  ;;  %v15480_v28 = vcombine.high %v9737_v62, %v9741_v63 }
 0x77c   :  { %13121 = vmatprep.subr.bf16.mxu1 %v15426_v0  ;;  %v9742_v42 = vld [vmem:[#allocation12 + $0xab8] sm:$0xff]  ;;  %v15471_v0 = vcombine.low %v9729_v18, %v9733_v24 }
 0x77d   :  { %v15482_v31 = vcombine.high %v9738_v39, %v9742_v42  ;;  %v15481_v55 = vcombine.low %v9738_v39, %v9742_v42  ;;  %v9793_v42 = vld [vmem:[#allocation12 + $0xc50] sm:$0xff] }
 0x77e   :  { %12950 = vmatpush1.bf16.msra.mxu0 %v15423_v54  ;;  %v9749_v54 = vld [vmem:[#allocation12 + $0xaf0] sm:$0xff] }
 0x77f   :  { %13122 = vmatpush1.bf16.msra.mxu1 %v15425_v6  ;;  %12951 = vmatprep.subr.bf16.mxu0 %v15432_v9  ;;  %v9746_v6 = vld [vmem:[#allocation12 + $0xad8] sm:$0xff]  ;;  %v15488_v38 = vcombine.high %v9745_v1, %v9749_v54 }
 0x780   :  { %13123 = vmatprep.subr.bf16.mxu1 %v15434_v10  ;;  %v9750_v9 = vld [vmem:[#allocation12 + $0xaf8] sm:$0xff]  ;;  %v15479_v10 = vcombine.low %v9737_v62, %v9741_v63 }
 0x781   :  { %v15490_v4 = vcombine.high %v9746_v6, %v9750_v9  ;;  %v15489_v19 = vcombine.low %v9746_v6, %v9750_v9  ;;  %v9801_v6 = vld [vmem:[#allocation12 + $0xc90] sm:$0xff] }
 0x782   :  { %12952 = vmatpush1.bf16.msra.mxu0 %v15431_v11  ;;  %v9757_v11 = vld [vmem:[#allocation12 + $0xb30] sm:$0xff] }
 0x783   :  { %13124 = vmatpush1.bf16.msra.mxu1 %v15433_v12  ;;  %12953 = vmatprep.subr.bf16.mxu0 %v15440_v14  ;;  %v9754_v12 = vld [vmem:[#allocation12 + $0xb18] sm:$0xff]  ;;  %v15496_v22 = vcombine.high %v9753_v46, %v9757_v11  ;;  %v9805_v9 = vld [vmem:[#allocation12 + $0xcb0] sm:$0xff] }
 0x784   :  { %13125 = vmatprep.subr.bf16.mxu1 %v15442_v17  ;;  %v9758_v14 = vld [vmem:[#allocation12 + $0xb38] sm:$0xff]  ;;  %v15487_v17 = vcombine.low %v9745_v1, %v9749_v54 }
 0x785   :  { %v15498_v2 = vcombine.high %v9754_v12, %v9758_v14  ;;  %v15497_v37 = vcombine.low %v9754_v12, %v9758_v14  ;;  %v9809_v14 = vld [vmem:[#allocation12 + $0xcd0] sm:$0xff] }
 0x786   :  { %12954 = vmatpush1.bf16.msra.mxu0 %v15439_v20  ;;  %v9765_v20 = vld [vmem:[#allocation12 + $0xb70] sm:$0xff] }
 0x787   :  { %13126 = vmatpush1.bf16.msra.mxu1 %v15441_v15  ;;  %12955 = vmatprep.subr.bf16.mxu0 %v15448_v27  ;;  %v9762_v15 = vld [vmem:[#allocation12 + $0xb58] sm:$0xff]  ;;  %v15504_v34 = vcombine.high %v9761_v21, %v9765_v20 }
 0x788   :  { %13127 = vmatprep.subr.bf16.mxu1 %v15450_v33  ;;  %v9766_v27 = vld [vmem:[#allocation12 + $0xb78] sm:$0xff]  ;;  %v15495_v33 = vcombine.low %v9753_v46, %v9757_v11  ;;  %v15544_v11 = vcombine.high %v9801_v6, %v9805_v9 }
 0x789   :  { %v15506_v26 = vcombine.high %v9762_v15, %v9766_v27  ;;  %v15505_v47 = vcombine.low %v9762_v15, %v9766_v27  ;;  %v9817_v15 = vld [vmem:[#allocation12 + $0xd10] sm:$0xff] }
 0x78a   :  { %12956 = vmatpush1.bf16.msra.mxu0 %v15447_v44  ;;  %v9773_v44 = vld [vmem:[#allocation12 + $0xbb0] sm:$0xff] }
 0x78b   :  { %13128 = vmatpush1.bf16.msra.mxu1 %v15449_v45  ;;  %12957 = vmatprep.subr.bf16.mxu0 %v15456_v29  ;;  %v9770_v45 = vld [vmem:[#allocation12 + $0xb98] sm:$0xff]  ;;  %v15512_v13 = vcombine.high %v9769_v40, %v9773_v44  ;;  %v9821_v27 = vld [vmem:[#allocation12 + $0xd30] sm:$0xff] }
 0x78c   :  { %13129 = vmatprep.subr.bf16.mxu1 %v15458_v43  ;;  %v9774_v29 = vld [vmem:[#allocation12 + $0xbb8] sm:$0xff]  ;;  %v15503_v43 = vcombine.low %v9761_v21, %v9765_v20 }
 0x78d   :  { %v15514_v58 = vcombine.high %v9770_v45, %v9774_v29  ;;  %v15513_v18 = vcombine.low %v9770_v45, %v9774_v29  ;;  %v9829_v45 = vld [vmem:[#allocation12 + $0xd70] sm:$0xff]  ;;  %v9826_v29 = vld [vmem:[#allocation12 + $0xd58] sm:$0xff] }
 0x78e   :  { %12958 = vmatpush1.bf16.msra.mxu0 %v15455_v50  ;;  %v9781_v50 = vld [vmem:[#allocation12 + $0xbf0] sm:$0xff] }
 0x78f   :  { %13130 = vmatpush1.bf16.msra.mxu1 %v15457_v5  ;;  %12959 = vmatprep.subr.bf16.mxu0 %v15464_v41  ;;  %v9778_v5 = vld [vmem:[#allocation12 + $0xbd8] sm:$0xff]  ;;  %v15520_v24 = vcombine.high %v9777_v48, %v9781_v50 }
 0x790   :  { %13131 = vmatprep.subr.bf16.mxu1 %v15466_v51  ;;  %v9782_v41 = vld [vmem:[#allocation12 + $0xbf8] sm:$0xff]  ;;  %v15511_v51 = vcombine.low %v9769_v40, %v9773_v44  ;;  %v9825_v44 = vld [vmem:[#allocation12 + $0xd50] sm:$0xff] }
 0x791   :  { %v15522_v16 = vcombine.high %v9778_v5, %v9782_v41  ;;  %v15521_v62 = vcombine.low %v9778_v5, %v9782_v41  ;;  %v9833_v5 = vld [vmem:[#allocation12 + $0xd90] sm:$0xff] }
 0x792   :  { %12960 = vmatpush1.bf16.msra.mxu0 %v15463_v56  ;;  %v9789_v56 = vld [vmem:[#allocation12 + $0xc30] sm:$0xff] }
 0x793   :  { %13132 = vmatpush1.bf16.msra.mxu1 %v15465_v57  ;;  %12961 = vmatprep.subr.bf16.mxu0 %v15472_v59  ;;  %v9786_v57 = vld [vmem:[#allocation12 + $0xc18] sm:$0xff]  ;;  %v15528_v63 = vcombine.high %v9785_v53, %v9789_v56  ;;  %v9837_v41 = vld [vmem:[#allocation12 + $0xdb0] sm:$0xff] }
 0x794   :  { %13133 = vmatprep.subr.bf16.mxu1 %v15474_v61  ;;  %v9790_v59 = vld [vmem:[#allocation12 + $0xc38] sm:$0xff]  ;;  %v15519_v61 = vcombine.low %v9777_v48, %v9781_v50  ;;  %v15568_v48 = vcombine.high %v9825_v44, %v9829_v45 }
 0x795   :  { %v15530_v39 = vcombine.high %v9786_v57, %v9790_v59  ;;  %v15529_v1 = vcombine.low %v9786_v57, %v9790_v59  ;;  %v15567_v57 = vcombine.low %v9825_v44, %v9829_v45 }
 0x796   :  { %12962 = vmatpush1.bf16.msra.mxu0 %v15471_v0  ;;  %v9797_v0 = vld [vmem:[#allocation12 + $0xc70] sm:$0xff] }
 0x797   :  { %13134 = vmatpush1.bf16.msra.mxu1 %v15473_v8  ;;  %12963 = vmatprep.subr.bf16.mxu0 %v15480_v28  ;;  %v15527_v8 = vcombine.low %v9785_v53, %v9789_v56  ;;  %v9794_v28 = vld [vmem:[#allocation12 + $0xc58] sm:$0xff]  ;;  %v15536_v54 = vcombine.high %v9793_v42, %v9797_v0 }
 0x798   :  { %13135 = vmatprep.subr.bf16.mxu1 %v15482_v31  ;;  %v9798_v31 = vld [vmem:[#allocation12 + $0xc78] sm:$0xff] }
 0x799   :  { %v15537_v46 = vcombine.low %v9794_v28, %v9798_v31 }
 0x79a   :  { %12964 = vmatpush1.bf16.msra.mxu0 %v15479_v10  ;;  %v15538_v10 = vcombine.high %v9794_v28, %v9798_v31  ;;  %v15575_v31 = vcombine.low %v9833_v5, %v9837_v41 }
 0x79b   :  { %13136 = vmatpush1.bf16.msra.mxu1 %v15481_v55  ;;  %12965 = vmatprep.subr.bf16.mxu0 %v15488_v38  ;;  %v9802_v55 = vld [vmem:[#allocation12 + $0xc98] sm:$0xff] }
 0x79c   :  { %13137 = vmatprep.subr.bf16.mxu1 %v15490_v4  ;;  %v9806_v38 = vld [vmem:[#allocation12 + $0xcb8] sm:$0xff]  ;;  %v15535_v4 = vcombine.low %v9793_v42, %v9797_v0 }
 0x79d   :  { %v15546_v12 = vcombine.high %v9802_v55, %v9806_v38 }
 0x79e   :  { %12966 = vmatpush1.bf16.msra.mxu0 %v15487_v17  ;;  %v9813_v17 = vld [vmem:[#allocation12 + $0xcf0] sm:$0xff] }
 0x79f   :  { %13138 = vmatpush1.bf16.msra.mxu1 %v15489_v19  ;;  %12967 = vmatprep.subr.bf16.mxu0 %v15496_v22  ;;  %v9810_v19 = vld [vmem:[#allocation12 + $0xcd8] sm:$0xff]  ;;  %v15552_v21 = vcombine.high %v9809_v14, %v9813_v17 }
 0x7a0   :  { %13139 = vmatprep.subr.bf16.mxu1 %v15498_v2  ;;  %v9814_v22 = vld [vmem:[#allocation12 + $0xcf8] sm:$0xff]  ;;  %v15543_v2 = vcombine.low %v9801_v6, %v9805_v9 }
 0x7a1   :  { %v15554_v20 = vcombine.high %v9810_v19, %v9814_v22 }
 0x7a2   :  { %12968 = vmatpush1.bf16.msra.mxu0 %v15495_v33  ;;  %v9818_v33 = vld [vmem:[#allocation12 + $0xd18] sm:$0xff] }
 0x7a3   :  { %13140 = vmatpush1.bf16.msra.mxu1 %v15497_v37  ;;  %12969 = vmatprep.subr.bf16.mxu0 %v15504_v34  ;;  %v9822_v37 = vld [vmem:[#allocation12 + $0xd38] sm:$0xff]  ;;  %v15553_v34 = vcombine.low %v9810_v19, %v9814_v22 }
 0x7a4   :  { %13141 = vmatprep.subr.bf16.mxu1 %v15506_v26  ;;  %v15560_v26 = vcombine.high %v9817_v15, %v9821_v27  ;;  %v15562_v40 = vcombine.high %v9818_v33, %v9822_v37 }
 0x7a6   :  { %12970 = vmatpush1.bf16.msra.mxu0 %v15503_v43  ;;  %v9830_v43 = vld [vmem:[#allocation12 + $0xd78] sm:$0xff] }
 0x7a7   :  { %13142 = vmatpush1.bf16.msra.mxu1 %v15505_v47  ;;  %12971 = vmatprep.subr.bf16.mxu0 %v15512_v13  ;;  %v15559_v47 = vcombine.low %v9817_v15, %v9821_v27  ;;  %v16832_v13 = vld [vmem:[#allocation13] sm:$0xff]  ;;  %v15570_v50 = vcombine.high %v9826_v29, %v9830_v43  ;;  %v15569_v59 = vcombine.low %v9826_v29, %v9830_v43 }
 0x7a8   :  { %13143 = vmatprep.subr.bf16.mxu1 %v15514_v58  ;;  %v15561_v58 = vcombine.low %v9818_v33, %v9822_v37  ;;  %v9920_v53 = vrot.slane %v16832_v13, %v16602_v32  ;;  %v9928_v56 = vrot.slane %v16832_v13, %v16612_v36  ;;  %v9842_v32 = vld [vmem:[#allocation12 + $0xdd8] sm:$0xff] }
 0x7a9   :  { %v9850_v33 = vld [vmem:[#allocation12 + $0xe18] sm:$0xff] }
 0x7aa   :  { %12972 = vmatpush1.bf16.msra.mxu0 %v15511_v51  ;;  %v9916_v51 = vrot.slane %v16832_v13, %v16597_v30  ;;  %v9854_v37 = vld [vmem:[#allocation12 + $0xe38] sm:$0xff] }
 0x7ab   :  { %13144 = vmatpush1.bf16.msra.mxu1 %v15513_v18  ;;  %12973 = vmatprep.subr.bf16.mxu0 %v15520_v24  ;;  %v9924_v18 = vrot.slane %v16832_v13, %v16609_v35  ;;  %v9834_v24 = vld [vmem:[#allocation12 + $0xd98] sm:$0xff] }
 0x7ac   :  { %13145 = vmatprep.subr.bf16.mxu1 %v15522_v16  ;;  %v9838_v16 = vld [vmem:[#allocation12 + $0xdb8] sm:$0xff] }
 0x7ad   :  { %v15578_v35 = vcombine.high %v9834_v24, %v9838_v16 }
 0x7ae   :  { %12974 = vmatpush1.bf16.msra.mxu0 %v15519_v61  ;;  %v15576_v61 = vcombine.high %v9833_v5, %v9837_v41  ;;  %v9858_v5 = vld [vmem:[#allocation12 + $0xe58] sm:$0xff] }
 0x7af   :  { %13146 = vmatpush1.bf16.msra.mxu1 %v15521_v62  ;;  %12986 = vmatprep.subr.bf16.mxu0 %v15528_v63  ;;  %v9841_v62 = vld [vmem:[#allocation12 + $0xdd0] sm:$0xff]  ;;  %v9862_v41 = vld [vmem:[#allocation12 + $0xe78] sm:$0xff] }
 0x7b0   :  { %13158 = vmatprep.subr.bf16.mxu1 %v15530_v39  ;;  %v9845_v63 = vld [vmem:[#allocation12 + $0xdf0] sm:$0xff] }
 0x7b1   :  { %12976 = vmatmul.mubr.bf16.vlgmr.msra.gmra.mrb[28].mxu0 %v16798_v52 }
 0x7b2   :  { %13148 = vmatmul.mubr.bf16.vlgmr.msra.gmra.mrb[28].mxu1 %v16798_v52  ;;  %12987 = vmatpush1.bf16.msra.mxu0 %v15527_v8  ;;  %v15545_v52 = vcombine.low %v9802_v55, %v9806_v38  ;;  %v15583_v55 = vcombine.low %v9841_v62, %v9845_v63 }
 0x7b3   :  { %13018 = vmatprep.mubr.bf16.mxu0 %v16808_v49  ;;  %13159 = vmatpush1.bf16.msra.mxu1 %v15529_v1  ;;  %v9846_v1 = vld [vmem:[#allocation12 + $0xdf8] sm:$0xff] }
 0x7b4   :  { %13190 = vmatprep.mubr.bf16.mxu1 %v16808_v49  ;;  %12988 = vmatprep.subr.bf16.mxu0 %v15536_v54  ;;  %v15551_v49 = vcombine.low %v9809_v14, %v9813_v17  ;;  %v15585_v19 = vcombine.low %v9842_v32, %v9846_v1  ;;  %v15586_v22 = vcombine.high %v9842_v32, %v9846_v1  ;;  %v9881_v1 = vld [vmem:[#allocation12 + $0xf10] sm:$0xff] }
 0x7b5   :  { %13160 = vmatprep.subr.bf16.mxu1 %v15538_v10  ;;  %v15577_v10 = vcombine.low %v9834_v24, %v9838_v16  ;;  %v15602_v16 = vcombine.high %v9858_v5, %v9862_v41 }
 0x7b6   :  { %12989 = vmatpush1.bf16.msra.mxu0 %v15535_v4 }
 0x7b7   :  { %13161 = vmatpush1.bf16.msra.mxu1 %v15537_v46  ;;  %12990 = vmatprep.subr.bf16.mxu0 %v15544_v11 }
 0x7b8   :  { %13162 = vmatprep.subr.bf16.mxu1 %v15546_v12  ;;  %v15584_v12 = vcombine.high %v9841_v62, %v9845_v63  ;;  %v15601_v62 = vcombine.low %v9858_v5, %v9862_v41 }
 0x7ba   :  { %12991 = vmatpush1.bf16.msra.mxu0 %v15543_v2  ;;  %v9849_v2 = vld [vmem:[#allocation12 + $0xe10] sm:$0xff] }
 0x7bb   :  { %13163 = vmatpush1.bf16.msra.mxu1 %v15545_v52  ;;  %12992 = vmatprep.subr.bf16.mxu0 %v15552_v21  ;;  %v9853_v52 = vld [vmem:[#allocation12 + $0xe30] sm:$0xff] }
 0x7bc   :  { %13164 = vmatprep.subr.bf16.mxu1 %v15554_v20  ;;  %v15592_v29 = vcombine.high %v9849_v2, %v9853_v52 }
 0x7be   :  { %12993 = vmatpush1.bf16.msra.mxu0 %v15551_v49 }
 0x7bf   :  { %13165 = vmatpush1.bf16.msra.mxu1 %v15553_v34  ;;  %12994 = vmatprep.subr.bf16.mxu0 %v15560_v26 }
 0x7c0   :  { %13166 = vmatprep.subr.bf16.mxu1 %v15562_v40 }
 0x7c2   :  { %12995 = vmatpush1.bf16.msra.mxu0 %v15559_v47 }
 0x7c3   :  { %13167 = vmatpush1.bf16.msra.mxu1 %v15561_v58  ;;  %12996 = vmatprep.subr.bf16.mxu0 %v15568_v48  ;;  %v15594_v58 = vcombine.high %v9850_v33, %v9854_v37  ;;  %v9857_v48 = vld [vmem:[#allocation12 + $0xe50] sm:$0xff] }
 0x7c4   :  { %v12676_v30 = vpop.f32.mrb[24].mxu0  ;;  %v12848_v39 = vpop.f32.mrb[24].mxu1  ;;  %13168 = vmatprep.subr.bf16.mxu1 %v15570_v50  ;;  %v9861_v50 = vld [vmem:[#allocation12 + $0xe70] sm:$0xff] }
 0x7c5   :  { %v15852_v42 = vadd.f32 %v12676_v30, %v9916_v51  ;;  %v15856_v0 = vadd.f32 %v12848_v39, %v9924_v18  ;;  %v12678_v8 = vpop.f32.mrb[25].mxu0  ;;  %v12850_v28 = vpop.f32.mrb[25].mxu1  ;;  %v15600_v24 = vcombine.high %v9857_v48, %v9861_v50  ;;  %v9873_v39 = vld [vmem:[#allocation12 + $0xed0] sm:$0xff] }
 0x7c6   :  { %v15853_v54 = vadd.f32 %v12678_v8, %v9920_v53  ;;  %v15857_v36 = vadd.f32 %v12850_v28, %v9928_v56  ;;  %v12680_v6 = vpop.f32.mrb[26].mxu0  ;;  %v12852_v9 = vpop.f32.mrb[26].mxu1  ;;  %12997 = vmatpush1.bf16.msra.mxu0 %v15567_v57  ;;  %v9866_v57 = vld [vmem:[#allocation12 + $0xe98] sm:$0xff] }
 0x7c7   :  { %v15854_v38 = vadd.f32 %v12680_v6, %v9916_v51  ;;  %v15858_v4 = vadd.f32 %v12852_v9, %v9924_v18  ;;  %13169 = vmatpush1.bf16.msra.mxu1 %v15569_v59  ;;  %v12682_v46 = vpop.f32.mrb[27].mxu0  ;;  %v12854_v11 = vpop.f32.mrb[27].mxu1  ;;  %12998 = vmatprep.subr.bf16.mxu0 %v15576_v61  ;;  %v13201_v21 = vmax.f32 %v15852_v42, 0.0  ;;  %v13203_v20 = vmax.f32 %v15856_v0, 0.0  ;;  %v9870_v59 = vld [vmem:[#allocation12 + $0xeb8] sm:$0xff] }
 0x7c8   :  { %v15855_v14 = vadd.f32 %v12682_v46, %v9920_v53  ;;  %v15859_v17 = vadd.f32 %v12854_v11, %v9928_v56  ;;  %13170 = vmatprep.subr.bf16.mxu1 %v15578_v35  ;;  %v13202_v49 = vmax.f32 %v15853_v54, 0.0  ;;  %v13204_v34 = vmax.f32 %v15857_v36, 0.0  ;;  %v9865_v53 = vld [vmem:[#allocation12 + $0xe90] sm:$0xff]  ;;  %v9874_v42 = vld [vmem:[#allocation12 + $0xed8] sm:$0xff] }
 0x7c9   :  { %v13209_v15 = vmax.f32 %v15854_v38, 0.0  ;;  %v13211_v27 = vmax.f32 %v15858_v4, 0.0  ;;  %v15591_v51 = vcombine.low %v9849_v2, %v9853_v52  ;;  %v15593_v18 = vcombine.low %v9850_v33, %v9854_v37  ;;  %v9869_v56 = vld [vmem:[#allocation12 + $0xeb0] sm:$0xff]  ;;  %v9878_v0 = vld [vmem:[#allocation12 + $0xef8] sm:$0xff] }
 0x7ca   :  { %v13210_v26 = vmax.f32 %v15855_v14, 0.0  ;;  %v13212_v40 = vmax.f32 %v15859_v17, 0.0  ;;  %12999 = vmatpush1.bf16.msra.mxu0 %v15575_v31  ;;  %v15599_v61 = vcombine.low %v9857_v48, %v9861_v50  ;;  %v15608_v63 = vcombine.high %v9865_v53, %v9869_v56  ;;  %v9877_v35 = vld [vmem:[#allocation12 + $0xef0] sm:$0xff]  ;;  %v9882_v36 = vld [vmem:[#allocation12 + $0xf18] sm:$0xff] }
 0x7cb   :  { %v16842_v44 = vpack.c.bf16 %v13209_v15, %v13201_v21  ;;  %v16844_v45 = vpack.c.bf16 %v13211_v27, %v13203_v20  ;;  %13171 = vmatpush1.bf16.msra.mxu1 %v15577_v10  ;;  %13000 = vmatprep.subr.bf16.mxu0 %v15584_v12  ;;  %v15610_v30 = vcombine.high %v9866_v57, %v9870_v59  ;;  %v9885_v54 = vld [vmem:[#allocation12 + $0xf30] sm:$0xff]  ;;  %v9886_v6 = vld [vmem:[#allocation12 + $0xf38] sm:$0xff] }
 0x7cc   :  { %v16846_v43 = vpack.c.bf16 %v13210_v26, %v13202_v49  ;;  %v16848_v47 = vpack.c.bf16 %v13212_v40, %v13204_v34  ;;  %13172 = vmatprep.subr.bf16.mxu1 %v15586_v22  ;;  %v15607_v8 = vcombine.low %v9865_v53, %v9869_v56  ;;  %v15609_v28 = vcombine.low %v9866_v57, %v9870_v59  ;;  %v9889_v4 = vld [vmem:[#allocation12 + $0xf50] sm:$0xff]  ;;  %v9890_v11 = vld [vmem:[#allocation12 + $0xf58] sm:$0xff] }
 0x7cd   :  { %v15616_v31 = vcombine.high %v9873_v39, %v9877_v35  ;;  %v15618_v32 = vcombine.high %v9874_v42, %v9878_v0  ;;  %v15615_v9 = vcombine.low %v9873_v39, %v9877_v35  ;;  %v15617_v10 = vcombine.low %v9874_v42, %v9878_v0  ;;  %v9893_v46 = vld [vmem:[#allocation12 + $0xf70] sm:$0xff]  ;;  %v9894_v12 = vld [vmem:[#allocation12 + $0xf78] sm:$0xff]  ;;  %v16059_v39 = vld [vmem:[#allocation15 + $0x58] sm:$0xff]  }
 0x7ce   :  { %13001 = vmatpush1.bf16.msra.mxu0 %v15583_v55  ;;  %v15624_v55 = vcombine.high %v9881_v1, %v9885_v54  ;;  %v15626_v38 = vcombine.high %v9882_v36, %v9886_v6  ;;  %v15623_v14 = vcombine.low %v9881_v1, %v9885_v54  ;;  %v15625_v17 = vcombine.low %v9882_v36, %v9886_v6  ;;  %v9897_v2 = vld [vmem:[#allocation12 + $0xf90] sm:$0xff]  ;;  %v9898_v21 = vld [vmem:[#allocation12 + $0xf98] sm:$0xff]  ;;  %v16061_v35 = vld [vmem:[#allocation15 + $0x18] sm:$0xff]  }
 0x7cf   :  { %13173 = vmatpush1.bf16.msra.mxu1 %v15585_v19  ;;  %13002 = vmatprep.subr.bf16.mxu0 %v15592_v29  ;;  %v15632_v19 = vcombine.high %v9889_v4, %v9893_v46  ;;  %v15634_v22 = vcombine.high %v9890_v11, %v9894_v12  ;;  %v9901_v52 = vld [vmem:[#allocation12 + $0xfb0] sm:$0xff]  ;;  %v9902_v20 = vld [vmem:[#allocation12 + $0xfb8] sm:$0xff]  ;;  %v15631_v15 = vcombine.low %v9889_v4, %v9893_v46  ;;  %v16063_v42 = vld [vmem:[#allocation15 + $0x60] sm:$0xff]  }
 0x7d0   :  { %13174 = vmatprep.subr.bf16.mxu1 %v15594_v58  ;;  %v15633_v27 = vcombine.low %v9890_v11, %v9894_v12  ;;  %v15640_v33 = vcombine.high %v9897_v2, %v9901_v52  ;;  %v15642_v37 = vcombine.high %v9898_v21, %v9902_v20  ;;  %v9905_v49 = vld [vmem:[#allocation12 + $0xfd0] sm:$0xff]  ;;  %v9906_v26 = vld [vmem:[#allocation12 + $0xfd8] sm:$0xff]  ;;  %v15639_v29 = vcombine.low %v9897_v2, %v9901_v52  ;;  %v16064_v0 = vld [vmem:[#allocation15 + $0xe0] sm:$0xff]  }
 0x7d1   :  { %v9909_v34 = vld [vmem:[#allocation12 + $0xff0] sm:$0xff]  ;;  %v9910_v40 = vld [vmem:[#allocation12 + $0xff8] sm:$0xff]  ;;  %v15641_v58 = vcombine.low %v9898_v21, %v9902_v20  ;;  %v16078_v4 = vld [vmem:[#allocation15 + $0xb8] sm:$0xff]  }
 0x7d2   :  { %13003 = vmatpush1.bf16.msra.mxu0 %v15591_v51  ;;  %v15648_v48 = vcombine.high %v9905_v49, %v9909_v34  ;;  %v15650_v50 = vcombine.high %v9906_v26, %v9910_v40  ;;  %v15647_v5 = vcombine.low %v9905_v49, %v9909_v34  ;;  %v15649_v41 = vcombine.low %v9906_v26, %v9910_v40  ;;  %v16047_v51 = vld [vmem:[#allocation15 + $0x40] sm:$0xff]   ;;  %v16051_v53 = vld [vmem:[#allocation15 + $0x48] sm:$0xff]   ;;  %v16071_v54 = vld [vmem:[#allocation15 + $0x70] sm:$0xff]  }
 0x7d3   :  { %13175 = vmatpush1.bf16.msra.mxu1 %v15593_v18  ;;  %13004 = vmatprep.subr.bf16.mxu0 %v15600_v24  ;;  %v16048_v18 = vld [vmem:[#allocation15 + $0xc0] sm:$0xff]   ;;  %v16052_v56 = vld [vmem:[#allocation15 + $0xc8] sm:$0xff]   ;;  %v16072_v36 = vld [vmem:[#allocation15 + $0xf0] sm:$0xff]  }
 0x7d4   :  { %13176 = vmatprep.subr.bf16.mxu1 %v15602_v16  ;;  %v16049_v24 = vld [vmem:[#allocation15] sm:$0xff]   ;;  %v16053_v57 = vld [vmem:[#allocation15 + $0x8] sm:$0xff]   ;;  %v16073_v6 = vld [vmem:[#allocation15 + $0x30] sm:$0xff]  }
 0x7d5   :  { %v16050_v16 = vld [vmem:[#allocation15 + $0x80] sm:$0xff]   ;;  %v16054_v59 = vld [vmem:[#allocation15 + $0x88] sm:$0xff]   ;;  %v16087_v52 = vld [vmem:[#allocation15 + $0x150] sm:$0xff]  }
 0x7d6   :  { %13005 = vmatpush1.bf16.msra.mxu0 %v15599_v61  ;;  %v16055_v61 = vld [vmem:[#allocation15 + $0x50] sm:$0xff]   ;;  %v16070_v1 = vld [vmem:[#allocation15 + $0xa8] sm:$0xff]   ;;  %v16079_v46 = vld [vmem:[#allocation15 + $0x140] sm:$0xff]  }
 0x7d7   :  { %13177 = vmatpush1.bf16.msra.mxu1 %v15601_v62  ;;  %13006 = vmatprep.subr.bf16.mxu0 %v15608_v63  ;;  %v16056_v62 = vld [vmem:[#allocation15 + $0xd0] sm:$0xff]   ;;  %v16080_v11 = vld [vmem:[#allocation15 + $0x1c0] sm:$0xff]   ;;  %v16086_v2 = vld [vmem:[#allocation15 + $0x188] sm:$0xff]  }
 0x7d8   :  { %13178 = vmatprep.subr.bf16.mxu1 %v15610_v30  ;;  %v16057_v63 = vld [vmem:[#allocation15 + $0x10] sm:$0xff]   ;;  %v16081_v12 = vld [vmem:[#allocation15 + $0x100] sm:$0xff]   ;;  %v16099_v40 = vld [vmem:[#allocation15 + $0x168] sm:$0xff]  }
 0x7d9   :  { %v16058_v30 = vld [vmem:[#allocation15 + $0x90] sm:$0xff]   ;;  %v16096_v49 = vld [vmem:[#allocation15 + $0x1e0] sm:$0xff]  }
 0x7da   :  { %13007 = vmatpush1.bf16.msra.mxu0 %v15607_v8  ;;  %v16066_v8 = vld [vmem:[#allocation15 + $0xa0] sm:$0xff]   ;;  %v16088_v21 = vld [vmem:[#allocation15 + $0x1d0] sm:$0xff]  }
 0x7db   :  { %13179 = vmatpush1.bf16.msra.mxu1 %v15609_v28  ;;  %13008 = vmatprep.subr.bf16.mxu0 %v15616_v31  ;;  %v16067_v28 = vld [vmem:[#allocation15 + $0x68] sm:$0xff]   ;;  %v16089_v20 = vld [vmem:[#allocation15 + $0x110] sm:$0xff]   ;;  %v16097_v34 = vld [vmem:[#allocation15 + $0x120] sm:$0xff]  }
 0x7dc   :  { %13180 = vmatprep.subr.bf16.mxu1 %v15618_v32  ;;  %v16068_v31 = vld [vmem:[#allocation15 + $0xe8] sm:$0xff]   ;;  %v16098_v26 = vld [vmem:[#allocation15 + $0x1a0] sm:$0xff]  }
 0x7dd   :  { %v16069_v32 = vld [vmem:[#allocation15 + $0x28] sm:$0xff]  }
 0x7de   :  { %13009 = vmatpush1.bf16.msra.mxu0 %v15615_v9  ;;  %v16074_v9 = vld [vmem:[#allocation15 + $0xb0] sm:$0xff]  }
 0x7df   :  { %13181 = vmatpush1.bf16.msra.mxu1 %v15617_v10  ;;  %13010 = vmatprep.subr.bf16.mxu0 %v15624_v55  ;;  %v16075_v10 = vld [vmem:[#allocation15 + $0x78] sm:$0xff]  }
 0x7e0   :  { %13182 = vmatprep.subr.bf16.mxu1 %v15626_v38  ;;  %v16076_v55 = vld [vmem:[#allocation15 + $0xf8] sm:$0xff]  }
 0x7e1   :  { %v16077_v38 = vld [vmem:[#allocation15 + $0x38] sm:$0xff]  }
 0x7e2   :  { %13011 = vmatpush1.bf16.msra.mxu0 %v15623_v14  ;;  %v16082_v14 = vld [vmem:[#allocation15 + $0x180] sm:$0xff]  }
 0x7e3   :  { %13183 = vmatpush1.bf16.msra.mxu1 %v15625_v17  ;;  %13012 = vmatprep.subr.bf16.mxu0 %v15632_v19  ;;  %v16083_v17 = vld [vmem:[#allocation15 + $0x148] sm:$0xff]  }
 0x7e4   :  { %13184 = vmatprep.subr.bf16.mxu1 %v15634_v22  ;;  %v16084_v19 = vld [vmem:[#allocation15 + $0x1c8] sm:$0xff]  }
 0x7e5   :  { %v16085_v22 = vld [vmem:[#allocation15 + $0x108] sm:$0xff]  }
 0x7e6   :  { %13013 = vmatpush1.bf16.msra.mxu0 %v15631_v15  ;;  %v16090_v15 = vld [vmem:[#allocation15 + $0x190] sm:$0xff]  }
 0x7e7   :  { %13185 = vmatpush1.bf16.msra.mxu1 %v15633_v27  ;;  %13014 = vmatprep.subr.bf16.mxu0 %v15640_v33  ;;  %v16091_v27 = vld [vmem:[#allocation15 + $0x158] sm:$0xff]  }
 0x7e8   :  { %13186 = vmatprep.subr.bf16.mxu1 %v15642_v37  ;;  %v16092_v33 = vld [vmem:[#allocation15 + $0x1d8] sm:$0xff]   ;;  %v16095_v37 = vld [vmem:[#allocation15 + $0x160] sm:$0xff]  }
 0x7ea   :  { %13015 = vmatpush1.bf16.msra.mxu0 %v15639_v29  ;;  %v16100_v29 = vld [vmem:[#allocation15 + $0x1e8] sm:$0xff]  }
 0x7eb   :  { %13187 = vmatpush1.bf16.msra.mxu1 %v15641_v58  ;;  %13016 = vmatprep.subr.bf16.mxu0 %v15648_v48  ;;  %v16101_v58 = vld [vmem:[#allocation15 + $0x128] sm:$0xff]  }
 0x7ec   :  { %13188 = vmatprep.subr.bf16.mxu1 %v15650_v50  ;;  %v16102_v48 = vld [vmem:[#allocation15 + $0x1a8] sm:$0xff]   ;;  %v16103_v50 = vld [vmem:[#allocation15 + $0x170] sm:$0xff]  }
 0x7ee   :  { %13017 = vmatpush1.bf16.msra.mxu0 %v15647_v5  ;;  %v16104_v5 = vld [vmem:[#allocation15 + $0x1f0] sm:$0xff]  }
 0x7ef   :  { %13189 = vmatpush1.bf16.msra.mxu1 %v15649_v41  ;;  %15716 = vmatprep.subr.bf16.mxu0 %v16047_v51  ;;  %v16105_v41 = vld [vmem:[#allocation15 + $0x130] sm:$0xff]  }
 0x7f0   :  { %15738 = vmatprep.subr.bf16.mxu1 %v16048_v18  ;;  %v16106_v51 = vld [vmem:[#allocation15 + $0x1b0] sm:$0xff]   ;;  %v16107_v18 = vld [vmem:[#allocation15 + $0x178] sm:$0xff]  }
 0x7f1   :  { %13019 = vmatmul.mubr.bf16.vlgmr.msra.gmra.mrb[28].mxu0 %v16800_v60 }
 0x7f2   :  { %13191 = vmatmul.mubr.bf16.vlgmr.msra.gmra.mrb[28].mxu1 %v16800_v60  ;;  %15717 = vmatpush3.bf16.msra.mxu0 %v16049_v24  ;;  %v16060_v60 = vld [vmem:[#allocation15 + $0xd8] sm:$0xff]  }
 0x7f3   :  { %13776 = vmatprep.mubr.bf16.mxu0 %v16846_v43  ;;  %15739 = vmatpush3.bf16.msra.mxu1 %v16050_v16  ;;  %v16062_v43 = vld [vmem:[#allocation15 + $0x98] sm:$0xff]  }
 0x7f4   :  { %13817 = vmatprep.mubr.bf16.mxu1 %v16848_v47  ;;  %15718 = vmatprep.subr.bf16.mxu0 %v16051_v53  ;;  %v16065_v47 = vld [vmem:[#allocation15 + $0x20] sm:$0xff]   ;;  %v16108_v24 = vld [vmem:[#allocation15 + $0x1f8] sm:$0xff]  }
 0x7f5   :  { %15740 = vmatprep.subr.bf16.mxu1 %v16052_v56  ;;  %v16109_v16 = vld [vmem:[#allocation15 + $0x138] sm:$0xff]   ;;  %v9932_v56 = vrot.slane %v16832_v13, %v16639_v3 }
 0x7f6   :  { %15719 = vmatpush3.bf16.msra.mxu0 %v16053_v57  ;;  %v16110_v53 = vld [vmem:[#allocation15 + $0x1b8] sm:$0xff]   ;;  %v9940_v57 = vrot.slane %v16832_v13, %v16649_v23 }
 0x7f7   :  { %15741 = vmatpush3.bf16.msra.mxu1 %v16054_v59  ;;  %15720 = vmatprep.subr.bf16.mxu0 %v16055_v61  ;;  %v9936_v59 = vrot.slane %v16832_v13, %v16642_v7  ;;  %v9944_v61 = vrot.slane %v16832_v13, %v16652_v25 }
 0x7f8   :  { %15742 = vmatprep.subr.bf16.mxu1 %v16056_v62 }
 0x7fa   :  { %15721 = vmatpush3.bf16.msra.mxu0 %v16057_v63 }
 0x7fb   :  { %15743 = vmatpush3.bf16.msra.mxu1 %v16058_v30  ;;  %15722 = vmatprep.subr.bf16.mxu0 %v16059_v39 }
 0x7fc   :  { %15744 = vmatprep.subr.bf16.mxu1 %v16060_v60 }
 0x7fe   :  { %15723 = vmatpush3.bf16.msra.mxu0 %v16061_v35 }
 0x7ff   :  { %15745 = vmatpush3.bf16.msra.mxu1 %v16062_v43  ;;  %15724 = vmatprep.subr.bf16.mxu0 %v16063_v42 }
 0x800   :  { %15746 = vmatprep.subr.bf16.mxu1 %v16064_v0 }
 0x802   :  { %15725 = vmatpush3.bf16.msra.mxu0 %v16065_v47 }
 0x803   :  { %15747 = vmatpush3.bf16.msra.mxu1 %v16066_v8  ;;  %15726 = vmatprep.subr.bf16.mxu0 %v16067_v28 }
 0x804   :  { %15748 = vmatprep.subr.bf16.mxu1 %v16068_v31 }
 0x806   :  { %15727 = vmatpush3.bf16.msra.mxu0 %v16069_v32 }
 0x807   :  { %15749 = vmatpush3.bf16.msra.mxu1 %v16070_v1  ;;  %15728 = vmatprep.subr.bf16.mxu0 %v16071_v54 }
 0x808   :  { %15750 = vmatprep.subr.bf16.mxu1 %v16072_v36 }
 0x80a   :  { %15729 = vmatpush3.bf16.msra.mxu0 %v16073_v6 }
 0x80b   :  { %15751 = vmatpush3.bf16.msra.mxu1 %v16074_v9  ;;  %15730 = vmatprep.subr.bf16.mxu0 %v16075_v10 }
 0x80c   :  { %15752 = vmatprep.subr.bf16.mxu1 %v16076_v55 }
 0x80e   :  { %15731 = vmatpush3.bf16.msra.mxu0 %v16077_v38 }
 0x80f   :  { %15753 = vmatpush3.bf16.msra.mxu1 %v16078_v4  ;;  %15760 = vmatprep.subr.bf16.mxu0 %v16079_v46 }
 0x810   :  { %15782 = vmatprep.subr.bf16.mxu1 %v16080_v11 }
 0x811   :  { %13777 = vmatmul.mubr.bf16.vlgmr.msra.gmra.mrb[32].mxu0 %v16842_v44  ;;  %v16093_v44 = vld [vmem:[#allocation15 + $0x118] sm:$0xff]  }
 0x812   :  { %13818 = vmatmul.mubr.bf16.vlgmr.msra.gmra.mrb[32].mxu1 %v16844_v45  ;;  %15761 = vmatpush3.bf16.msra.mxu0 %v16081_v12  ;;  %v16094_v45 = vld [vmem:[#allocation15 + $0x198] sm:$0xff]   ;;  %v15651_v12 = vld [vmem:[#allocation16] ss:$0 sm:$0xff] }
 0x813   :  { %15783 = vmatpush3.bf16.msra.mxu1 %v16082_v14  ;;  %15762 = vmatprep.subr.bf16.mxu0 %v16083_v17 }
 0x814   :  { %15784 = vmatprep.subr.bf16.mxu1 %v16084_v19 }
 0x816   :  { %15763 = vmatpush3.bf16.msra.mxu0 %v16085_v22 }
 0x817   :  { %15785 = vmatpush3.bf16.msra.mxu1 %v16086_v2  ;;  %15764 = vmatprep.subr.bf16.mxu0 %v16087_v52 }
 0x818   :  { %15786 = vmatprep.subr.bf16.mxu1 %v16088_v21 }
 0x81a   :  { %15765 = vmatpush3.bf16.msra.mxu0 %v16089_v20 }
 0x81b   :  { %15787 = vmatpush3.bf16.msra.mxu1 %v16090_v15  ;;  %15766 = vmatprep.subr.bf16.mxu0 %v16091_v27 }
 0x81c   :  { %15788 = vmatprep.subr.bf16.mxu1 %v16092_v33 }
 0x81e   :  { %15767 = vmatpush3.bf16.msra.mxu0 %v16093_v44 }
 0x81f   :  { %15789 = vmatpush3.bf16.msra.mxu1 %v16094_v45  ;;  %15768 = vmatprep.subr.bf16.mxu0 %v16095_v37 }
 0x820   :  { %15790 = vmatprep.subr.bf16.mxu1 %v16096_v49 }
 0x822   :  { %15769 = vmatpush3.bf16.msra.mxu0 %v16097_v34 }
 0x823   :  { %15791 = vmatpush3.bf16.msra.mxu1 %v16098_v26  ;;  %15770 = vmatprep.subr.bf16.mxu0 %v16099_v40 }
 0x824   :  { %15792 = vmatprep.subr.bf16.mxu1 %v16100_v29 }
 0x826   :  { %15771 = vmatpush3.bf16.msra.mxu0 %v16101_v58 }
 0x827   :  { %15793 = vmatpush3.bf16.msra.mxu1 %v16102_v48  ;;  %15772 = vmatprep.subr.bf16.mxu0 %v16103_v50 }
 0x828   :  { %15794 = vmatprep.subr.bf16.mxu1 %v16104_v5 }
 0x82a   :  { %15773 = vmatpush3.bf16.msra.mxu0 %v16105_v41 }
 0x82b   :  { %15795 = vmatpush3.bf16.msra.mxu1 %v16106_v51  ;;  %15774 = vmatprep.subr.bf16.mxu0 %v16107_v18 }
 0x82c   :  { %15796 = vmatprep.subr.bf16.mxu1 %v16108_v24 }
 0x82e   :  { %15775 = vmatpush3.bf16.msra.mxu0 %v16109_v16 }
 0x82f   :  { %15797 = vmatpush3.bf16.msra.mxu1 %v16110_v53 }
 0x8c4   :  { %v13020_v62 = vpop.f32.mrb[28].mxu0 }
 0x8c5   :  { %v15860_v63 = vadd.f32 %v13020_v62, %v9932_v56  ;;  %v13192_v30 = vpop.f32.mrb[28].mxu1  ;;  %v13022_v39 = vpop.f32.mrb[29].mxu0 }
 0x8c6   :  { %v15864_v60 = vadd.f32 %v13192_v30, %v9940_v57  ;;  %v15861_v35 = vadd.f32 %v13022_v39, %v9936_v59  ;;  %v13194_v43 = vpop.f32.mrb[29].mxu1  ;;  %v13024_v42 = vpop.f32.mrb[30].mxu0 }
 0x8c7   :  { %v15865_v0 = vadd.f32 %v13194_v43, %v9944_v61  ;;  %v15862_v47 = vadd.f32 %v13024_v42, %v9932_v56  ;;  %v13196_v3 = vpop.f32.mrb[30].mxu1  ;;  %v13026_v8 = vpop.f32.mrb[31].mxu0  ;;  %v13205_v32 = vmax.f32 %v15860_v63, 0.0 }
 0x8c8   :  { %v15866_v28 = vadd.f32 %v13196_v3, %v9940_v57  ;;  %v15863_v23 = vadd.f32 %v13026_v8, %v9936_v59  ;;  %v13198_v31 = vpop.f32.mrb[31].mxu1  ;;  %v13207_v54 = vmax.f32 %v15864_v60, 0.0  ;;  %v13206_v25 = vmax.f32 %v15861_v35, 0.0 }
 0x8c9   :  { %v13213_v7 = vmax.f32 %v15862_v47, 0.0  ;;  %v15867_v1 = vadd.f32 %v13198_v31, %v9944_v61  ;;  %v13208_v6 = vmax.f32 %v15865_v0, 0.0 }
 0x8ca   :  { %v13215_v13 = vmax.f32 %v15866_v28, 0.0  ;;  %v13214_v36 = vmax.f32 %v15863_v23, 0.0 }
 0x8cb   :  { %v13221_v9 = vpack.c.bf16 %v13213_v7, %v13205_v32  ;;  %v13216_v10 = vmax.f32 %v15867_v1, 0.0 }
 0x8cc   :  { %v13223_v55 = vpack.c.bf16 %v13215_v13, %v13207_v54  ;;  %v13222_v38 = vpack.c.bf16 %v13214_v36, %v13206_v25 }
 0x8cd   :  { %v13224_v4 = vpack.c.bf16 %v13216_v10, %v13208_v6 }
 0x8ce   :  { %13858 = vmatprep.mubr.bf16.mxu0 %v13222_v38 }
 0x8cf   :  { %13899 = vmatprep.mubr.bf16.mxu1 %v13224_v4  ;;  %13859 = vmatmul.mubr.bf16.vlgmr.msra.gmra.mrb[36].mxu0 %v13221_v9 }
 0x8d0   :  { %13900 = vmatmul.mubr.bf16.vlgmr.msra.gmra.mrb[36].mxu1 %v13223_v55 }
 0x8e4   :  { %v15732_v46 = vpop.f32.mrb[32].mxu0 }
 0x8e5   :  { %v15754_v11 = vpop.f32.mrb[32].mxu1  ;;  %v15733_v14 = vpop.f32.mrb[33].mxu0 }
 0x8e6   :  { %v15734_v17 = vadd.f32 %v15733_v14, %v15732_v46  ;;  %v15755_v19 = vpop.f32.mrb[33].mxu1  ;;  %v15735_v22 = vpop.f32.mrb[34].mxu0 }
 0x8e7   :  { %v15756_v2 = vadd.f32 %v15755_v19, %v15754_v11  ;;  %v15757_v52 = vpop.f32.mrb[34].mxu1  ;;  %v15736_v21 = vpop.f32.mrb[35].mxu0 }
 0x8e8   :  { %v13779_v20 = vadd.f32 %v15734_v17, %v15651_v12  ;;  %v15737_v15 = vadd.f32 %v15736_v21, %v15735_v22  ;;  %v15758_v27 = vpop.f32.mrb[35].mxu1 }
 0x8e9   :  { %v15759_v33 = vadd.f32 %v15758_v27, %v15757_v52 }
 0x8ea   :  { %v13820_v44 = vadd.f32 %v15756_v2, %v13779_v20  ;;  %v13782_v45 = vadd.f32 %v15737_v15, %v15651_v12 }
 0x8ec   :  { %v13823_v37 = vadd.f32 %v15759_v33, %v13782_v45 }
 0x9a2   :  { %v15776_v49 = vpop.f32.mrb[36].mxu0 }
 0x9a3   :  { %v15798_v34 = vpop.f32.mrb[36].mxu1  ;;  %v15777_v26 = vpop.f32.mrb[37].mxu0 }
 0x9a4   :  { %v15778_v40 = vadd.f32 %v15777_v26, %v15776_v49  ;;  %v15799_v29 = vpop.f32.mrb[37].mxu1  ;;  %v15779_v58 = vpop.f32.mrb[38].mxu0 }
 0x9a5   :  { %v15800_v48 = vadd.f32 %v15799_v29, %v15798_v34  ;;  %v15801_v50 = vpop.f32.mrb[38].mxu1  ;;  %v15780_v5 = vpop.f32.mrb[39].mxu0 }
 0x9a6   :  { %v13861_v41 = vadd.f32 %v15778_v40, %v13820_v44  ;;  %v15781_v51 = vadd.f32 %v15780_v5, %v15779_v58  ;;  %v15802_v18 = vpop.f32.mrb[39].mxu1 }
 0x9a7   :  { %v15803_v24 = vadd.f32 %v15802_v18, %v15801_v50 }
 0x9a8   :  { %v13902_v16 = vadd.f32 %v15800_v48, %v13861_v41  ;;  %v13864_v53 = vadd.f32 %v15781_v51, %v13823_v37 }
 0x9aa   :  { %13908 = vst [vmem:[%s16881_s11] sm:$0xff] %v13902_v16  ;;  %v13905_v56 = vadd.f32 %v15803_v24, %v13864_v53 }
 0x9ac   :  { %13909 = vst [vmem:[%s16881_s11 + $0x8] sm:$0xff] %v13905_v56 }
 0x9ad   :  { %13914 = vsyncpa [#allocation3], 1 }
 0x9ae   :  { %13915 = vsyncpa [#allocation5], 1 }
 0x9af   :  { %13916 = vsyncpa [#allocation8], 1 }
 0x9b0   :  { %13917 = vsyncpa [#allocation11], 1 }
 0x9b1   :  { %13918 = vsyncpa [#allocation14], 1 }
 0x9b2   :  { %13919 = vsyncpa [#allocation17], 1 }

</bundles_post_ra>
